<compile_context>
chip_gen: v5e
topology: v5e:2x2
jax: 0.10.0
libtpu: 0.0.40
codegen_flags: <defaults>
</compile_context>

<pallas_src>
import functools

import jax
import jax.numpy as jnp
from jax import lax
from jax.experimental import pallas as pl
from jax.experimental.pallas import tpu as pltpu

NC = 4            # opt.label_nc (contain_dontcare_label = False)
POOL_TIMES = 7    # get_mask(times=7)
SCALE = 4         # get_mask scale


def _nbr(x, delta, axis, use_roll, valid=None):
    """Zero-padded neighbour: y[..., i, ...] = x[..., i+delta, ...] (0 outside).

    use_roll=True uses the XLU rotate (pltpu.roll) + a boundary select (keeps
    the shift off the VPU/load-store slots); otherwise slice+concat, which
    lowers for any shape/layout.  `valid` optionally supplies a precomputed
    boundary mask (hoisted out of loops).
    """
    n = x.shape[axis]
    if use_roll:
        rolled = pltpu.roll(x, (-delta) % n, axis)   # rolled[i] = x[(i+delta) % n]
        if valid is None:
            idx = lax.broadcasted_iota(jnp.int32, x.shape, axis)
            valid = (idx < n - delta) if delta > 0 else (idx >= -delta)
        return jnp.where(valid, rolled, jnp.zeros_like(x))
    pad_shape = list(x.shape)
    pad_shape[axis] = abs(delta)
    zeros = jnp.zeros(pad_shape, x.dtype)
    if delta > 0:
        return jnp.concatenate(
            [lax.slice_in_dim(x, delta, n, axis=axis), zeros], axis=axis)
    return jnp.concatenate(
        [zeros, lax.slice_in_dim(x, 0, n + delta, axis=axis)], axis=axis)


# ----------------------------------------------------------------------------
# Fused kernel: mask gen + upsample + one-hot + edges + mask apply
# ----------------------------------------------------------------------------
def _preprocess_kernel(label_ref, inst_ref, image_ref, rand_ref, uh_ref, uw_ref,
                       sem_ref, masked_ref, *, use_roll):
    H, W = label_ref.shape[2], label_ref.shape[3]
    h4, w4 = rand_ref.shape[2], rand_ref.shape[3]
    f32 = jnp.float32
    out_dt = sem_ref.dtype

    # ---- get_mask: threshold + 7x (3x3 zero-padded avg pool -> > 0.5) on the
    # /4 grid.  pooled > 0.5  <=>  3x3 window-sum > 4.5 (exact small-int f32),
    # computed as a separable shift-and-add.  Boundary masks hoisted.
    if use_roll:
        col4 = lax.broadcasted_iota(jnp.int32, (h4, w4), 1)
        row4 = lax.broadcasted_iota(jnp.int32, (h4, w4), 0)
        vmask = {(-1, 1): col4 >= 1, (1, 1): col4 < w4 - 1,
                 (-1, 0): row4 >= 1, (1, 0): row4 < h4 - 1}
    else:
        vmask = {}

    m = (rand_ref[0, 0] > 0.5).astype(f32)                       # (h4, w4)
    for _ in range(POOL_TIMES):
        sw = (m + _nbr(m, -1, 1, use_roll, vmask.get((-1, 1)))
                + _nbr(m, 1, 1, use_roll, vmask.get((1, 1))))
        s = (sw + _nbr(sw, -1, 0, use_roll, vmask.get((-1, 0)))
                + _nbr(sw, 1, 0, use_roll, vmask.get((1, 0))))
        m = (s > 4.5).astype(f32)
    mask_small = (1.0 - m).astype(jnp.bfloat16)                  # exact 0/1

    # nearest x4 upsample on the MXU with bf16 0/1 expansion matrices (exact:
    # every output element is a single-term sum): mask[i,j] = mask_small[i//4, j//4]
    row_up = jnp.dot(mask_small, uw_ref[...], preferred_element_type=f32)  # (h4, W)
    mask = jnp.dot(uh_ref[...], row_up.astype(jnp.bfloat16),
                   preferred_element_type=f32)                             # (H, W)

    # ---- get_semantics: one-hot of the label map, stored channel-by-channel
    label = label_ref[0, 0]                                      # (H, W) int
    for c in range(NC):
        sem_ref[0, c] = jnp.where(label == c, 1.0, 0.0).astype(out_dt)

    # ---- get_edges: integer diffs OR-ed into both shifted positions
    t = inst_ref[0, 0]                                           # (H, W) int32
    col = lax.broadcasted_iota(jnp.int32, (H, W), 1)
    row = lax.broadcasted_iota(jnp.int32, (H, W), 0)
    if use_roll:
        t_l = pltpu.roll(t, 1, 1)       # t[i, j-1] (wrap at j=0; masked below)
        t_u = pltpu.roll(t, 1, 0)       # t[i-1, j] (wrap at i=0; masked below)
    else:
        t_l = _nbr(t, -1, 1, False)
        t_u = _nbr(t, -1, 0, False)
    dh = jnp.where((col > 0) & (t != t_l), 1.0, 0.0)             # edge vs left
    dv = jnp.where((row > 0) & (t != t_u), 1.0, 0.0)             # edge vs up
    # Fold the diff into the other neighbour; dh/dv are already 0 in the first
    # column/row, so the value wrapped back by the second roll is 0 (no mask).
    if use_roll:
        dh_n = pltpu.roll(dh, W - 1, 1)                          # dh[i, j+1]
        dv_n = pltpu.roll(dv, H - 1, 0)                          # dv[i+1, j]
    else:
        dh_n = _nbr(dh, 1, 1, False)
        dv_n = _nbr(dv, 1, 0, False)
    edge = jnp.maximum(jnp.maximum(dh, dh_n), jnp.maximum(dv, dv_n))
    sem_ref[0, NC] = edge.astype(out_dt)

    # ---- inpaint-mask channel (1 - mask) + masked image
    sem_ref[0, NC + 1] = (1.0 - mask).astype(out_dt)
    masked_ref[0] = (image_ref[0] * mask[None]).astype(masked_ref.dtype)


def _tile_aligned(h, w):
    return (h % 8 == 0) and (w % 128 == 0)


def learneord_preprocess(label, inst, image, rand, *, sem_dtype=jnp.bfloat16):
    """Pallas implementation of LearningEordModel.preprocess_input
    (no_instance=False, no_inpaint=False, segmentation_mask=False, eord=False,
    bbox=False).  Returns (input_semantics (B, NC+2, H, W) in `sem_dtype`
    — every value is an exact 0/1, so bf16 is lossless and halves HBM write
    traffic of the largest output — and masked_image (B, 3, H, W) float32)."""
    B, _, H, W = label.shape
    _, _, h4, w4 = rand.shape
    assert h4 == H // SCALE and w4 == W // SCALE

    # Batch-invariant nearest-x4 expansion matrices, built once outside the
    # kernel and kept VMEM-resident via a constant (0, 0) block index.
    u_h = (jnp.arange(H, dtype=jnp.int32)[:, None] // SCALE
           == jnp.arange(h4, dtype=jnp.int32)[None, :]).astype(jnp.bfloat16)
    u_w = (jnp.arange(w4, dtype=jnp.int32)[:, None]
           == jnp.arange(W, dtype=jnp.int32)[None, :] // SCALE).astype(jnp.bfloat16)

    def build(use_roll):
        return pl.pallas_call(
            functools.partial(_preprocess_kernel, use_roll=use_roll),
            out_shape=(jax.ShapeDtypeStruct((B, NC + 2, H, W), sem_dtype),
                       jax.ShapeDtypeStruct((B, 3, H, W), image.dtype)),
            grid_spec=pltpu.PrefetchScalarGridSpec(
                num_scalar_prefetch=0,
                grid=(B,),
                in_specs=[
                    pl.BlockSpec((1, 1, H, W), lambda b: (b, 0, 0, 0)),    # label
                    pl.BlockSpec((1, 1, H, W), lambda b: (b, 0, 0, 0)),    # inst
                    pl.BlockSpec((1, 3, H, W), lambda b: (b, 0, 0, 0)),    # image
                    pl.BlockSpec((1, 1, h4, w4), lambda b: (b, 0, 0, 0)),  # rand
                    pl.BlockSpec((H, h4), lambda b: (0, 0)),               # u_h (resident)
                    pl.BlockSpec((w4, W), lambda b: (0, 0)),               # u_w (resident)
                ],
                out_specs=[
                    pl.BlockSpec((1, NC + 2, H, W), lambda b: (b, 0, 0, 0)),
                    pl.BlockSpec((1, 3, H, W), lambda b: (b, 0, 0, 0)),
                ]),
            compiler_params=pltpu.CompilerParams(
                dimension_semantics=("parallel",),
                vmem_limit_bytes=64 * 1024 * 1024),
        )

    # Use the XLU-rotate shift path only when both the full-res and /4 grids are
    # (8, 128)-tile aligned (what the Mosaic rotate lowering wants); otherwise
    # — and on any unexpected lowering failure — fall back to slice+concat.
    use_roll = _tile_aligned(H, W) and _tile_aligned(h4, w4)
    if use_roll:
        try:
            return build(True)(label, inst, image, rand, u_h, u_w)
        except Exception:   # lowering-support fallback; result path below is exact
            pass
    return build(False)(label, inst, image, rand, u_h, u_w)


# ----------------------------------------------------------------------------
# Pure-JAX reference for verification
# ----------------------------------------------------------------------------
def _reference(label, inst, image, rand):
    # mask
    m = (rand > 0.5).astype(jnp.float32)
    for _ in range(POOL_TIMES):
        s = lax.reduce_window(m, 0.0, lax.add, (1, 1, 3, 3), (1, 1, 1, 1),
                              [(0, 0), (0, 0), (1, 1), (1, 1)])
        m = (s / 9.0 > 0.5).astype(jnp.float32)
    m = 1.0 - m
    mask = jnp.repeat(jnp.repeat(m, SCALE, axis=2), SCALE, axis=3)
    # one-hot
    onehot = jax.nn.one_hot(label[:, 0], NC, axis=1, dtype=jnp.float32)
    # edges
    t = inst
    dh = (t[:, :, :, 1:] != t[:, :, :, :-1]).astype(jnp.float32)
    dv = (t[:, :, 1:, :] != t[:, :, :-1, :]).astype(jnp.float32)
    edge = jnp.zeros(t.shape, jnp.float32)
    edge = edge.at[:, :, :, 1:].max(dh)
    edge = edge.at[:, :, :, :-1].max(dh)
    edge = edge.at[:, :, 1:, :].max(dv)
    edge = edge.at[:, :, :-1, :].max(dv)
    sem = jnp.concatenate([onehot, edge, 1.0 - mask[:, 0:1]], axis=1)
    masked = image * mask
    return sem, masked


if __name__ == "__main__":
    key = jax.random.PRNGKey(0)
    k1, k2, k3, k4 = jax.random.split(key, 4)
    # W (and w4 = W // 4) chosen lane-aligned (multiple of 128) so stores are
    # unmasked vst and the XLU-roll fast path is exercised; still a small test.
    B, H, W = 2, 64, 512
    label = jax.random.randint(k1, (B, 1, H, W), 0, NC, dtype=jnp.int32)
    inst = jax.random.randint(k2, (B, 1, H, W), 0, 8, dtype=jnp.int32)
    image = jax.random.normal(k3, (B, 3, H, W), dtype=jnp.float32)
    rand = jax.random.uniform(k4, (B, 1, H // SCALE, W // SCALE),
                              dtype=jnp.float32)

    sem, masked = learneord_preprocess(label, inst, image, rand)
    jax.block_until_ready((sem, masked))

    sem_ref, masked_ref = _reference(label, inst, image, rand)
    assert sem.shape == (B, NC + 2, H, W) and masked.shape == (B, 3, H, W)
    assert jnp.allclose(sem.astype(jnp.float32), sem_ref, atol=1e-6), \
        "semantics mismatch"
    assert jnp.allclose(masked, masked_ref, atol=1e-6), "masked image mismatch"

    print("KERNEL_OK")
</pallas_src>

<mosaic_0001>
module attributes {stable_mosaic.version = 11 : i64} {
  func.func @_preprocess_kernel(%arg0: i32, %arg1: memref<1x1x64x512xi32, #tpu.memory_space<vmem>>, %arg2: memref<1x1x64x512xi32, #tpu.memory_space<vmem>>, %arg3: memref<1x3x64x512xf32, #tpu.memory_space<vmem>>, %arg4: memref<1x1x16x128xf32, #tpu.memory_space<vmem>>, %arg5: memref<64x16xbf16, #tpu.memory_space<vmem>>, %arg6: memref<128x512xbf16, #tpu.memory_space<vmem>>, %arg7: memref<1x6x64x512xbf16, #tpu.memory_space<vmem>>, %arg8: memref<1x3x64x512xf32, #tpu.memory_space<vmem>>) attributes {dimension_semantics = [#tpu.dimension_semantics<parallel>], iteration_bounds = array<i64: 2>, scalar_prefetch = 0 : i64, scratch_operands = 0 : i64, tpu.core_type = #tpu.core_type<tc>, window_params = [{transform_indices = @transform_0, window_bounds = array<i64: 1, 1, 64, 512>}, {transform_indices = @transform_1, window_bounds = array<i64: 1, 1, 64, 512>}, {transform_indices = @transform_2, window_bounds = array<i64: 1, 3, 64, 512>}, {transform_indices = @transform_3, window_bounds = array<i64: 1, 1, 16, 128>}, {pipeline_mode = #tpu.pipeline_mode<synchronous>, transform_indices = @transform_4, window_bounds = array<i64: 64, 16>}, {pipeline_mode = #tpu.pipeline_mode<synchronous>, transform_indices = @transform_5, window_bounds = array<i64: 128, 512>}, {transform_indices = @transform_6, window_bounds = array<i64: 1, 6, 64, 512>}, {transform_indices = @transform_7, window_bounds = array<i64: 1, 3, 64, 512>}]} {
    %0 = tpu.iota {dimensions = array<i32: 1>} : vector<16x128xi32>
    %1 = tpu.iota {dimensions = array<i32: 0>} : vector<16x128xi32>
    %c1_i32 = arith.constant 1 : i32
    %2 = vector.broadcast %c1_i32 : i32 to vector<16x128xi32>
    %3 = arith.cmpi sge, %0, %2 : vector<16x128xi32>
    %c127_i32 = arith.constant 127 : i32
    %4 = vector.broadcast %c127_i32 : i32 to vector<16x128xi32>
    %5 = arith.cmpi slt, %0, %4 : vector<16x128xi32>
    %c1_i32_0 = arith.constant 1 : i32
    %6 = vector.broadcast %c1_i32_0 : i32 to vector<16x128xi32>
    %7 = arith.cmpi sge, %1, %6 : vector<16x128xi32>
    %c15_i32 = arith.constant 15 : i32
    %8 = vector.broadcast %c15_i32 : i32 to vector<16x128xi32>
    %9 = arith.cmpi slt, %1, %8 : vector<16x128xi32>
    %c0 = arith.constant 0 : index
    %c0_1 = arith.constant 0 : index
    %c0_2 = arith.constant 0 : index
    %c0_3 = arith.constant 0 : index
    %10 = vector.load %arg4[%c0, %c0_1, %c0_2, %c0_3] : memref<1x1x16x128xf32, #tpu.memory_space<vmem>>, vector<1x1x16x128xf32>
    %11 = vector.shape_cast %10 : vector<1x1x16x128xf32> to vector<16x128xf32>
    %cst = arith.constant 5.000000e-01 : f32
    %12 = vector.broadcast %cst : f32 to vector<16x128xf32>
    %13 = arith.cmpf ogt, %11, %12 : vector<16x128xf32>
    %14 = arith.extui %13 : vector<16x128xi1> to vector<16x128xi32>
    %15 = arith.sitofp %14 : vector<16x128xi32> to vector<16x128xf32>
    %c1_i32_4 = arith.constant 1 : i32
    %16 = tpu.dynamic_rotate %15 by %c1_i32_4 dim 1 : vector<16x128xf32>, i32 -> vector<16x128xf32>
    %cst_5 = arith.constant 0.000000e+00 : f32
    %17 = vector.broadcast %cst_5 : f32 to vector<16x128xf32>
    %18 = arith.select %3, %16, %17 : vector<16x128xi1>, vector<16x128xf32>
    %19 = arith.addf %15, %18 : vector<16x128xf32>
    %c127_i32_6 = arith.constant 127 : i32
    %20 = tpu.dynamic_rotate %15 by %c127_i32_6 dim 1 : vector<16x128xf32>, i32 -> vector<16x128xf32>
    %cst_7 = arith.constant 0.000000e+00 : f32
    %21 = vector.broadcast %cst_7 : f32 to vector<16x128xf32>
    %22 = arith.select %5, %20, %21 : vector<16x128xi1>, vector<16x128xf32>
    %23 = arith.addf %19, %22 : vector<16x128xf32>
    %c1_i32_8 = arith.constant 1 : i32
    %24 = tpu.dynamic_rotate %23 by %c1_i32_8 dim 0 : vector<16x128xf32>, i32 -> vector<16x128xf32>
    %cst_9 = arith.constant 0.000000e+00 : f32
    %25 = vector.broadcast %cst_9 : f32 to vector<16x128xf32>
    %26 = arith.select %7, %24, %25 : vector<16x128xi1>, vector<16x128xf32>
    %27 = arith.addf %23, %26 : vector<16x128xf32>
    %c15_i32_10 = arith.constant 15 : i32
    %28 = tpu.dynamic_rotate %23 by %c15_i32_10 dim 0 : vector<16x128xf32>, i32 -> vector<16x128xf32>
    %cst_11 = arith.constant 0.000000e+00 : f32
    %29 = vector.broadcast %cst_11 : f32 to vector<16x128xf32>
    %30 = arith.select %9, %28, %29 : vector<16x128xi1>, vector<16x128xf32>
    %31 = arith.addf %27, %30 : vector<16x128xf32>
    %cst_12 = arith.constant 4.500000e+00 : f32
    %32 = vector.broadcast %cst_12 : f32 to vector<16x128xf32>
    %33 = arith.cmpf ogt, %31, %32 : vector<16x128xf32>
    %34 = arith.extui %33 : vector<16x128xi1> to vector<16x128xi32>
    %35 = arith.sitofp %34 : vector<16x128xi32> to vector<16x128xf32>
    %c1_i32_13 = arith.constant 1 : i32
    %36 = tpu.dynamic_rotate %35 by %c1_i32_13 dim 1 : vector<16x128xf32>, i32 -> vector<16x128xf32>
    %cst_14 = arith.constant 0.000000e+00 : f32
    %37 = vector.broadcast %cst_14 : f32 to vector<16x128xf32>
    %38 = arith.select %3, %36, %37 : vector<16x128xi1>, vector<16x128xf32>
    %39 = arith.addf %35, %38 : vector<16x128xf32>
    %c127_i32_15 = arith.constant 127 : i32
    %40 = tpu.dynamic_rotate %35 by %c127_i32_15 dim 1 : vector<16x128xf32>, i32 -> vector<16x128xf32>
    %cst_16 = arith.constant 0.000000e+00 : f32
    %41 = vector.broadcast %cst_16 : f32 to vector<16x128xf32>
    %42 = arith.select %5, %40, %41 : vector<16x128xi1>, vector<16x128xf32>
    %43 = arith.addf %39, %42 : vector<16x128xf32>
    %c1_i32_17 = arith.constant 1 : i32
    %44 = tpu.dynamic_rotate %43 by %c1_i32_17 dim 0 : vector<16x128xf32>, i32 -> vector<16x128xf32>
    %cst_18 = arith.constant 0.000000e+00 : f32
    %45 = vector.broadcast %cst_18 : f32 to vector<16x128xf32>
    %46 = arith.select %7, %44, %45 : vector<16x128xi1>, vector<16x128xf32>
    %47 = arith.addf %43, %46 : vector<16x128xf32>
    %c15_i32_19 = arith.constant 15 : i32
    %48 = tpu.dynamic_rotate %43 by %c15_i32_19 dim 0 : vector<16x128xf32>, i32 -> vector<16x128xf32>
    %cst_20 = arith.constant 0.000000e+00 : f32
    %49 = vector.broadcast %cst_20 : f32 to vector<16x128xf32>
    %50 = arith.select %9, %48, %49 : vector<16x128xi1>, vector<16x128xf32>
    %51 = arith.addf %47, %50 : vector<16x128xf32>
    %cst_21 = arith.constant 4.500000e+00 : f32
    %52 = vector.broadcast %cst_21 : f32 to vector<16x128xf32>
    %53 = arith.cmpf ogt, %51, %52 : vector<16x128xf32>
    %54 = arith.extui %53 : vector<16x128xi1> to vector<16x128xi32>
    %55 = arith.sitofp %54 : vector<16x128xi32> to vector<16x128xf32>
    %c1_i32_22 = arith.constant 1 : i32
    %56 = tpu.dynamic_rotate %55 by %c1_i32_22 dim 1 : vector<16x128xf32>, i32 -> vector<16x128xf32>
    %cst_23 = arith.constant 0.000000e+00 : f32
    %57 = vector.broadcast %cst_23 : f32 to vector<16x128xf32>
    %58 = arith.select %3, %56, %57 : vector<16x128xi1>, vector<16x128xf32>
    %59 = arith.addf %55, %58 : vector<16x128xf32>
    %c127_i32_24 = arith.constant 127 : i32
    %60 = tpu.dynamic_rotate %55 by %c127_i32_24 dim 1 : vector<16x128xf32>, i32 -> vector<16x128xf32>
    %cst_25 = arith.constant 0.000000e+00 : f32
    %61 = vector.broadcast %cst_25 : f32 to vector<16x128xf32>
    %62 = arith.select %5, %60, %61 : vector<16x128xi1>, vector<16x128xf32>
    %63 = arith.addf %59, %62 : vector<16x128xf32>
    %c1_i32_26 = arith.constant 1 : i32
    %64 = tpu.dynamic_rotate %63 by %c1_i32_26 dim 0 : vector<16x128xf32>, i32 -> vector<16x128xf32>
    %cst_27 = arith.constant 0.000000e+00 : f32
    %65 = vector.broadcast %cst_27 : f32 to vector<16x128xf32>
    %66 = arith.select %7, %64, %65 : vector<16x128xi1>, vector<16x128xf32>
    %67 = arith.addf %63, %66 : vector<16x128xf32>
    %c15_i32_28 = arith.constant 15 : i32
    %68 = tpu.dynamic_rotate %63 by %c15_i32_28 dim 0 : vector<16x128xf32>, i32 -> vector<16x128xf32>
    %cst_29 = arith.constant 0.000000e+00 : f32
    %69 = vector.broadcast %cst_29 : f32 to vector<16x128xf32>
    %70 = arith.select %9, %68, %69 : vector<16x128xi1>, vector<16x128xf32>
    %71 = arith.addf %67, %70 : vector<16x128xf32>
    %cst_30 = arith.constant 4.500000e+00 : f32
    %72 = vector.broadcast %cst_30 : f32 to vector<16x128xf32>
    %73 = arith.cmpf ogt, %71, %72 : vector<16x128xf32>
    %74 = arith.extui %73 : vector<16x128xi1> to vector<16x128xi32>
    %75 = arith.sitofp %74 : vector<16x128xi32> to vector<16x128xf32>
    %c1_i32_31 = arith.constant 1 : i32
    %76 = tpu.dynamic_rotate %75 by %c1_i32_31 dim 1 : vector<16x128xf32>, i32 -> vector<16x128xf32>
    %cst_32 = arith.constant 0.000000e+00 : f32
    %77 = vector.broadcast %cst_32 : f32 to vector<16x128xf32>
    %78 = arith.select %3, %76, %77 : vector<16x128xi1>, vector<16x128xf32>
    %79 = arith.addf %75, %78 : vector<16x128xf32>
    %c127_i32_33 = arith.constant 127 : i32
    %80 = tpu.dynamic_rotate %75 by %c127_i32_33 dim 1 : vector<16x128xf32>, i32 -> vector<16x128xf32>
    %cst_34 = arith.constant 0.000000e+00 : f32
    %81 = vector.broadcast %cst_34 : f32 to vector<16x128xf32>
    %82 = arith.select %5, %80, %81 : vector<16x128xi1>, vector<16x128xf32>
    %83 = arith.addf %79, %82 : vector<16x128xf32>
    %c1_i32_35 = arith.constant 1 : i32
    %84 = tpu.dynamic_rotate %83 by %c1_i32_35 dim 0 : vector<16x128xf32>, i32 -> vector<16x128xf32>
    %cst_36 = arith.constant 0.000000e+00 : f32
    %85 = vector.broadcast %cst_36 : f32 to vector<16x128xf32>
    %86 = arith.select %7, %84, %85 : vector<16x128xi1>, vector<16x128xf32>
    %87 = arith.addf %83, %86 : vector<16x128xf32>
    %c15_i32_37 = arith.constant 15 : i32
    %88 = tpu.dynamic_rotate %83 by %c15_i32_37 dim 0 : vector<16x128xf32>, i32 -> vector<16x128xf32>
    %cst_38 = arith.constant 0.000000e+00 : f32
    %89 = vector.broadcast %cst_38 : f32 to vector<16x128xf32>
    %90 = arith.select %9, %88, %89 : vector<16x128xi1>, vector<16x128xf32>
    %91 = arith.addf %87, %90 : vector<16x128xf32>
    %cst_39 = arith.constant 4.500000e+00 : f32
    %92 = vector.broadcast %cst_39 : f32 to vector<16x128xf32>
    %93 = arith.cmpf ogt, %91, %92 : vector<16x128xf32>
    %94 = arith.extui %93 : vector<16x128xi1> to vector<16x128xi32>
    %95 = arith.sitofp %94 : vector<16x128xi32> to vector<16x128xf32>
    %c1_i32_40 = arith.constant 1 : i32
    %96 = tpu.dynamic_rotate %95 by %c1_i32_40 dim 1 : vector<16x128xf32>, i32 -> vector<16x128xf32>
    %cst_41 = arith.constant 0.000000e+00 : f32
    %97 = vector.broadcast %cst_41 : f32 to vector<16x128xf32>
    %98 = arith.select %3, %96, %97 : vector<16x128xi1>, vector<16x128xf32>
    %99 = arith.addf %95, %98 : vector<16x128xf32>
    %c127_i32_42 = arith.constant 127 : i32
    %100 = tpu.dynamic_rotate %95 by %c127_i32_42 dim 1 : vector<16x128xf32>, i32 -> vector<16x128xf32>
    %cst_43 = arith.constant 0.000000e+00 : f32
    %101 = vector.broadcast %cst_43 : f32 to vector<16x128xf32>
    %102 = arith.select %5, %100, %101 : vector<16x128xi1>, vector<16x128xf32>
    %103 = arith.addf %99, %102 : vector<16x128xf32>
    %c1_i32_44 = arith.constant 1 : i32
    %104 = tpu.dynamic_rotate %103 by %c1_i32_44 dim 0 : vector<16x128xf32>, i32 -> vector<16x128xf32>
    %cst_45 = arith.constant 0.000000e+00 : f32
    %105 = vector.broadcast %cst_45 : f32 to vector<16x128xf32>
    %106 = arith.select %7, %104, %105 : vector<16x128xi1>, vector<16x128xf32>
    %107 = arith.addf %103, %106 : vector<16x128xf32>
    %c15_i32_46 = arith.constant 15 : i32
    %108 = tpu.dynamic_rotate %103 by %c15_i32_46 dim 0 : vector<16x128xf32>, i32 -> vector<16x128xf32>
    %cst_47 = arith.constant 0.000000e+00 : f32
    %109 = vector.broadcast %cst_47 : f32 to vector<16x128xf32>
    %110 = arith.select %9, %108, %109 : vector<16x128xi1>, vector<16x128xf32>
    %111 = arith.addf %107, %110 : vector<16x128xf32>
    %cst_48 = arith.constant 4.500000e+00 : f32
    %112 = vector.broadcast %cst_48 : f32 to vector<16x128xf32>
    %113 = arith.cmpf ogt, %111, %112 : vector<16x128xf32>
    %114 = arith.extui %113 : vector<16x128xi1> to vector<16x128xi32>
    %115 = arith.sitofp %114 : vector<16x128xi32> to vector<16x128xf32>
    %c1_i32_49 = arith.constant 1 : i32
    %116 = tpu.dynamic_rotate %115 by %c1_i32_49 dim 1 : vector<16x128xf32>, i32 -> vector<16x128xf32>
    %cst_50 = arith.constant 0.000000e+00 : f32
    %117 = vector.broadcast %cst_50 : f32 to vector<16x128xf32>
    %118 = arith.select %3, %116, %117 : vector<16x128xi1>, vector<16x128xf32>
    %119 = arith.addf %115, %118 : vector<16x128xf32>
    %c127_i32_51 = arith.constant 127 : i32
    %120 = tpu.dynamic_rotate %115 by %c127_i32_51 dim 1 : vector<16x128xf32>, i32 -> vector<16x128xf32>
    %cst_52 = arith.constant 0.000000e+00 : f32
    %121 = vector.broadcast %cst_52 : f32 to vector<16x128xf32>
    %122 = arith.select %5, %120, %121 : vector<16x128xi1>, vector<16x128xf32>
    %123 = arith.addf %119, %122 : vector<16x128xf32>
    %c1_i32_53 = arith.constant 1 : i32
    %124 = tpu.dynamic_rotate %123 by %c1_i32_53 dim 0 : vector<16x128xf32>, i32 -> vector<16x128xf32>
    %cst_54 = arith.constant 0.000000e+00 : f32
    %125 = vector.broadcast %cst_54 : f32 to vector<16x128xf32>
    %126 = arith.select %7, %124, %125 : vector<16x128xi1>, vector<16x128xf32>
    %127 = arith.addf %123, %126 : vector<16x128xf32>
    %c15_i32_55 = arith.constant 15 : i32
    %128 = tpu.dynamic_rotate %123 by %c15_i32_55 dim 0 : vector<16x128xf32>, i32 -> vector<16x128xf32>
    %cst_56 = arith.constant 0.000000e+00 : f32
    %129 = vector.broadcast %cst_56 : f32 to vector<16x128xf32>
    %130 = arith.select %9, %128, %129 : vector<16x128xi1>, vector<16x128xf32>
    %131 = arith.addf %127, %130 : vector<16x128xf32>
    %cst_57 = arith.constant 4.500000e+00 : f32
    %132 = vector.broadcast %cst_57 : f32 to vector<16x128xf32>
    %133 = arith.cmpf ogt, %131, %132 : vector<16x128xf32>
    %134 = arith.extui %133 : vector<16x128xi1> to vector<16x128xi32>
    %135 = arith.sitofp %134 : vector<16x128xi32> to vector<16x128xf32>
    %c1_i32_58 = arith.constant 1 : i32
    %136 = tpu.dynamic_rotate %135 by %c1_i32_58 dim 1 : vector<16x128xf32>, i32 -> vector<16x128xf32>
    %cst_59 = arith.constant 0.000000e+00 : f32
    %137 = vector.broadcast %cst_59 : f32 to vector<16x128xf32>
    %138 = arith.select %3, %136, %137 : vector<16x128xi1>, vector<16x128xf32>
    %139 = arith.addf %135, %138 : vector<16x128xf32>
    %c127_i32_60 = arith.constant 127 : i32
    %140 = tpu.dynamic_rotate %135 by %c127_i32_60 dim 1 : vector<16x128xf32>, i32 -> vector<16x128xf32>
    %cst_61 = arith.constant 0.000000e+00 : f32
    %141 = vector.broadcast %cst_61 : f32 to vector<16x128xf32>
    %142 = arith.select %5, %140, %141 : vector<16x128xi1>, vector<16x128xf32>
    %143 = arith.addf %139, %142 : vector<16x128xf32>
    %c1_i32_62 = arith.constant 1 : i32
    %144 = tpu.dynamic_rotate %143 by %c1_i32_62 dim 0 : vector<16x128xf32>, i32 -> vector<16x128xf32>
    %cst_63 = arith.constant 0.000000e+00 : f32
    %145 = vector.broadcast %cst_63 : f32 to vector<16x128xf32>
    %146 = arith.select %7, %144, %145 : vector<16x128xi1>, vector<16x128xf32>
    %147 = arith.addf %143, %146 : vector<16x128xf32>
    %c15_i32_64 = arith.constant 15 : i32
    %148 = tpu.dynamic_rotate %143 by %c15_i32_64 dim 0 : vector<16x128xf32>, i32 -> vector<16x128xf32>
    %cst_65 = arith.constant 0.000000e+00 : f32
    %149 = vector.broadcast %cst_65 : f32 to vector<16x128xf32>
    %150 = arith.select %9, %148, %149 : vector<16x128xi1>, vector<16x128xf32>
    %151 = arith.addf %147, %150 : vector<16x128xf32>
    %cst_66 = arith.constant 4.500000e+00 : f32
    %152 = vector.broadcast %cst_66 : f32 to vector<16x128xf32>
    %153 = arith.cmpf ogt, %151, %152 : vector<16x128xf32>
    %154 = arith.extui %153 : vector<16x128xi1> to vector<16x128xi32>
    %155 = arith.sitofp %154 : vector<16x128xi32> to vector<16x128xf32>
    %cst_67 = arith.constant 1.000000e+00 : f32
    %156 = vector.broadcast %cst_67 : f32 to vector<16x128xf32>
    %157 = arith.subf %156, %155 : vector<16x128xf32>
    %158 = arith.truncf %157 : vector<16x128xf32> to vector<16x128xbf16>
    %c0_68 = arith.constant 0 : index
    %c0_69 = arith.constant 0 : index
    %159 = vector.load %arg6[%c0_68, %c0_69] : memref<128x512xbf16, #tpu.memory_space<vmem>>, vector<128x512xbf16>
    %cst_70 = arith.constant dense<0.000000e+00> : vector<16x512xf32>
    %160 = tpu.matmul %158, %159, %cst_70 {dimension_numbers = #tpu.dot_dimension_numbers<[1], [0], [0], [1], [0, 0, 1, 1], [], []>} : vector<16x128xbf16>, vector<128x512xbf16>, vector<16x512xf32> -> vector<16x512xf32>
    %c0_71 = arith.constant 0 : index
    %c0_72 = arith.constant 0 : index
    %161 = vector.load %arg5[%c0_71, %c0_72] : memref<64x16xbf16, #tpu.memory_space<vmem>>, vector<64x16xbf16>
    %162 = arith.truncf %160 : vector<16x512xf32> to vector<16x512xbf16>
    %cst_73 = arith.constant dense<0.000000e+00> : vector<64x512xf32>
    %163 = tpu.matmul %161, %162, %cst_73 {dimension_numbers = #tpu.dot_dimension_numbers<[1], [0], [0], [1], [0, 0, 1, 1], [], []>} : vector<64x16xbf16>, vector<16x512xbf16>, vector<64x512xf32> -> vector<64x512xf32>
    %c0_74 = arith.constant 0 : index
    %c0_75 = arith.constant 0 : index
    %c0_76 = arith.constant 0 : index
    %c0_77 = arith.constant 0 : index
    %164 = vector.load %arg1[%c0_74, %c0_75, %c0_76, %c0_77] : memref<1x1x64x512xi32, #tpu.memory_space<vmem>>, vector<1x1x64x512xi32>
    %165 = vector.shape_cast %164 : vector<1x1x64x512xi32> to vector<64x512xi32>
    %c0_i32 = arith.constant 0 : i32
    %166 = vector.broadcast %c0_i32 : i32 to vector<64x512xi32>
    %167 = arith.cmpi eq, %165, %166 : vector<64x512xi32>
    %cst_78 = arith.constant 1.000000e+00 : f32
    %cst_79 = arith.constant 0.000000e+00 : f32
    %168 = vector.broadcast %cst_78 : f32 to vector<64x512xf32>
    %169 = vector.broadcast %cst_79 : f32 to vector<64x512xf32>
    %170 = arith.select %167, %168, %169 : vector<64x512xi1>, vector<64x512xf32>
    %171 = arith.truncf %170 : vector<64x512xf32> to vector<64x512xbf16>
    %c0_80 = arith.constant 0 : index
    %c0_81 = arith.constant 0 : index
    %c0_82 = arith.constant 0 : index
    %c0_83 = arith.constant 0 : index
    %172 = vector.load %arg7[%c0_80, %c0_81, %c0_82, %c0_83] : memref<1x6x64x512xbf16, #tpu.memory_space<vmem>>, vector<1x1x64x512xbf16>
    %173 = vector.shape_cast %172 : vector<1x1x64x512xbf16> to vector<64x512xbf16>
    %174 = vector.shape_cast %171 : vector<64x512xbf16> to vector<1x1x64x512xbf16>
    tpu.vector_store %arg7[%c0_80, %c0_81, %c0_82, %c0_83], %174 {strides = array<i32>} : memref<1x6x64x512xbf16, #tpu.memory_space<vmem>>, vector<1x1x64x512xbf16>,
    %c1_i32_84 = arith.constant 1 : i32
    %175 = vector.broadcast %c1_i32_84 : i32 to vector<64x512xi32>
    %176 = arith.cmpi eq, %165, %175 : vector<64x512xi32>
    %cst_85 = arith.constant 1.000000e+00 : f32
    %cst_86 = arith.constant 0.000000e+00 : f32
    %177 = vector.broadcast %cst_85 : f32 to vector<64x512xf32>
    %178 = vector.broadcast %cst_86 : f32 to vector<64x512xf32>
    %179 = arith.select %176, %177, %178 : vector<64x512xi1>, vector<64x512xf32>
    %180 = arith.truncf %179 : vector<64x512xf32> to vector<64x512xbf16>
    %c0_87 = arith.constant 0 : index
    %c1 = arith.constant 1 : index
    %c0_88 = arith.constant 0 : index
    %c0_89 = arith.constant 0 : index
    %181 = vector.load %arg7[%c0_87, %c1, %c0_88, %c0_89] : memref<1x6x64x512xbf16, #tpu.memory_space<vmem>>, vector<1x1x64x512xbf16>
    %182 = vector.shape_cast %181 : vector<1x1x64x512xbf16> to vector<64x512xbf16>
    %183 = vector.shape_cast %180 : vector<64x512xbf16> to vector<1x1x64x512xbf16>
    tpu.vector_store %arg7[%c0_87, %c1, %c0_88, %c0_89], %183 {strides = array<i32>} : memref<1x6x64x512xbf16, #tpu.memory_space<vmem>>, vector<1x1x64x512xbf16>,
    %c2_i32 = arith.constant 2 : i32
    %184 = vector.broadcast %c2_i32 : i32 to vector<64x512xi32>
    %185 = arith.cmpi eq, %165, %184 : vector<64x512xi32>
    %cst_90 = arith.constant 1.000000e+00 : f32
    %cst_91 = arith.constant 0.000000e+00 : f32
    %186 = vector.broadcast %cst_90 : f32 to vector<64x512xf32>
    %187 = vector.broadcast %cst_91 : f32 to vector<64x512xf32>
    %188 = arith.select %185, %186, %187 : vector<64x512xi1>, vector<64x512xf32>
    %189 = arith.truncf %188 : vector<64x512xf32> to vector<64x512xbf16>
    %c0_92 = arith.constant 0 : index
    %c2 = arith.constant 2 : index
    %c0_93 = arith.constant 0 : index
    %c0_94 = arith.constant 0 : index
    %190 = vector.load %arg7[%c0_92, %c2, %c0_93, %c0_94] : memref<1x6x64x512xbf16, #tpu.memory_space<vmem>>, vector<1x1x64x512xbf16>
    %191 = vector.shape_cast %190 : vector<1x1x64x512xbf16> to vector<64x512xbf16>
    %192 = vector.shape_cast %189 : vector<64x512xbf16> to vector<1x1x64x512xbf16>
    tpu.vector_store %arg7[%c0_92, %c2, %c0_93, %c0_94], %192 {strides = array<i32>} : memref<1x6x64x512xbf16, #tpu.memory_space<vmem>>, vector<1x1x64x512xbf16>,
    %c3_i32 = arith.constant 3 : i32
    %193 = vector.broadcast %c3_i32 : i32 to vector<64x512xi32>
    %194 = arith.cmpi eq, %165, %193 : vector<64x512xi32>
    %cst_95 = arith.constant 1.000000e+00 : f32
    %cst_96 = arith.constant 0.000000e+00 : f32
    %195 = vector.broadcast %cst_95 : f32 to vector<64x512xf32>
    %196 = vector.broadcast %cst_96 : f32 to vector<64x512xf32>
    %197 = arith.select %194, %195, %196 : vector<64x512xi1>, vector<64x512xf32>
    %198 = arith.truncf %197 : vector<64x512xf32> to vector<64x512xbf16>
    %c0_97 = arith.constant 0 : index
    %c3 = arith.constant 3 : index
    %c0_98 = arith.constant 0 : index
    %c0_99 = arith.constant 0 : index
    %199 = vector.load %arg7[%c0_97, %c3, %c0_98, %c0_99] : memref<1x6x64x512xbf16, #tpu.memory_space<vmem>>, vector<1x1x64x512xbf16>
    %200 = vector.shape_cast %199 : vector<1x1x64x512xbf16> to vector<64x512xbf16>
    %201 = vector.shape_cast %198 : vector<64x512xbf16> to vector<1x1x64x512xbf16>
    tpu.vector_store %arg7[%c0_97, %c3, %c0_98, %c0_99], %201 {strides = array<i32>} : memref<1x6x64x512xbf16, #tpu.memory_space<vmem>>, vector<1x1x64x512xbf16>,
    %c0_100 = arith.constant 0 : index
    %c0_101 = arith.constant 0 : index
    %c0_102 = arith.constant 0 : index
    %c0_103 = arith.constant 0 : index
    %202 = vector.load %arg2[%c0_100, %c0_101, %c0_102, %c0_103] : memref<1x1x64x512xi32, #tpu.memory_space<vmem>>, vector<1x1x64x512xi32>
    %203 = vector.shape_cast %202 : vector<1x1x64x512xi32> to vector<64x512xi32>
    %204 = tpu.iota {dimensions = array<i32: 1>} : vector<64x512xi32>
    %205 = tpu.iota {dimensions = array<i32: 0>} : vector<64x512xi32>
    %c1_i32_104 = arith.constant 1 : i32
    %206 = tpu.dynamic_rotate %203 by %c1_i32_104 dim 1 : vector<64x512xi32>, i32 -> vector<64x512xi32>
    %c1_i32_105 = arith.constant 1 : i32
    %207 = tpu.dynamic_rotate %203 by %c1_i32_105 dim 0 : vector<64x512xi32>, i32 -> vector<64x512xi32>
    %c0_i32_106 = arith.constant 0 : i32
    %208 = vector.broadcast %c0_i32_106 : i32 to vector<64x512xi32>
    %209 = arith.cmpi sgt, %204, %208 : vector<64x512xi32>
    %210 = arith.cmpi ne, %203, %206 : vector<64x512xi32>
    %211 = arith.andi %209, %210 : vector<64x512xi1>
    %cst_107 = arith.constant 1.000000e+00 : f32
    %cst_108 = arith.constant 0.000000e+00 : f32
    %212 = vector.broadcast %cst_107 : f32 to vector<64x512xf32>
    %213 = vector.broadcast %cst_108 : f32 to vector<64x512xf32>
    %214 = arith.select %211, %212, %213 : vector<64x512xi1>, vector<64x512xf32>
    %c0_i32_109 = arith.constant 0 : i32
    %215 = vector.broadcast %c0_i32_109 : i32 to vector<64x512xi32>
    %216 = arith.cmpi sgt, %205, %215 : vector<64x512xi32>
    %217 = arith.cmpi ne, %203, %207 : vector<64x512xi32>
    %218 = arith.andi %216, %217 : vector<64x512xi1>
    %cst_110 = arith.constant 1.000000e+00 : f32
    %cst_111 = arith.constant 0.000000e+00 : f32
    %219 = vector.broadcast %cst_110 : f32 to vector<64x512xf32>
    %220 = vector.broadcast %cst_111 : f32 to vector<64x512xf32>
    %221 = arith.select %218, %219, %220 : vector<64x512xi1>, vector<64x512xf32>
    %c511_i32 = arith.constant 511 : i32
    %222 = tpu.dynamic_rotate %214 by %c511_i32 dim 1 : vector<64x512xf32>, i32 -> vector<64x512xf32>
    %c63_i32 = arith.constant 63 : i32
    %223 = tpu.dynamic_rotate %221 by %c63_i32 dim 0 : vector<64x512xf32>, i32 -> vector<64x512xf32>
    %224 = arith.maximumf %214, %222 : vector<64x512xf32>
    %225 = arith.maximumf %221, %223 : vector<64x512xf32>
    %226 = arith.maximumf %224, %225 : vector<64x512xf32>
    %227 = arith.truncf %226 : vector<64x512xf32> to vector<64x512xbf16>
    %c0_112 = arith.constant 0 : index
    %c4 = arith.constant 4 : index
    %c0_113 = arith.constant 0 : index
    %c0_114 = arith.constant 0 : index
    %228 = vector.load %arg7[%c0_112, %c4, %c0_113, %c0_114] : memref<1x6x64x512xbf16, #tpu.memory_space<vmem>>, vector<1x1x64x512xbf16>
    %229 = vector.shape_cast %228 : vector<1x1x64x512xbf16> to vector<64x512xbf16>
    %230 = vector.shape_cast %227 : vector<64x512xbf16> to vector<1x1x64x512xbf16>
    tpu.vector_store %arg7[%c0_112, %c4, %c0_113, %c0_114], %230 {strides = array<i32>} : memref<1x6x64x512xbf16, #tpu.memory_space<vmem>>, vector<1x1x64x512xbf16>,
    %cst_115 = arith.constant 1.000000e+00 : f32
    %231 = vector.broadcast %cst_115 : f32 to vector<64x512xf32>
    %232 = arith.subf %231, %163 : vector<64x512xf32>
    %233 = arith.truncf %232 : vector<64x512xf32> to vector<64x512xbf16>
    %c0_116 = arith.constant 0 : index
    %c5 = arith.constant 5 : index
    %c0_117 = arith.constant 0 : index
    %c0_118 = arith.constant 0 : index
    %234 = vector.load %arg7[%c0_116, %c5, %c0_117, %c0_118] : memref<1x6x64x512xbf16, #tpu.memory_space<vmem>>, vector<1x1x64x512xbf16>
    %235 = vector.shape_cast %234 : vector<1x1x64x512xbf16> to vector<64x512xbf16>
    %236 = vector.shape_cast %233 : vector<64x512xbf16> to vector<1x1x64x512xbf16>
    tpu.vector_store %arg7[%c0_116, %c5, %c0_117, %c0_118], %236 {strides = array<i32>} : memref<1x6x64x512xbf16, #tpu.memory_space<vmem>>, vector<1x1x64x512xbf16>,
    %c0_119 = arith.constant 0 : index
    %c0_120 = arith.constant 0 : index
    %c0_121 = arith.constant 0 : index
    %c0_122 = arith.constant 0 : index
    %237 = vector.load %arg3[%c0_119, %c0_120, %c0_121, %c0_122] : memref<1x3x64x512xf32, #tpu.memory_space<vmem>>, vector<1x3x64x512xf32>
    %238 = vector.shape_cast %237 : vector<1x3x64x512xf32> to vector<3x64x512xf32>
    %239 = vector.shape_cast %163 : vector<64x512xf32> to vector<1x64x512xf32>
    %240 = vector.broadcast %239 : vector<1x64x512xf32> to vector<3x64x512xf32>
    %241 = arith.mulf %238, %240 : vector<3x64x512xf32>
    %c0_123 = arith.constant 0 : index
    %c0_124 = arith.constant 0 : index
    %c0_125 = arith.constant 0 : index
    %c0_126 = arith.constant 0 : index
    %242 = vector.load %arg8[%c0_123, %c0_124, %c0_125, %c0_126] : memref<1x3x64x512xf32, #tpu.memory_space<vmem>>, vector<1x3x64x512xf32>
    %243 = vector.shape_cast %242 : vector<1x3x64x512xf32> to vector<3x64x512xf32>
    %244 = vector.shape_cast %241 : vector<3x64x512xf32> to vector<1x3x64x512xf32>
    tpu.vector_store %arg8[%c0_123, %c0_124, %c0_125, %c0_126], %244 {strides = array<i32>} : memref<1x3x64x512xf32, #tpu.memory_space<vmem>>, vector<1x3x64x512xf32>,
    return
  }
  func.func @transform_0(%arg0: i32) -> (i32, i32, i32, i32) {
    %c0_i32 = arith.constant 0 : i32
    %c0_i32_0 = arith.constant 0 : i32
    %c0_i32_1 = arith.constant 0 : i32
    %c0_i32_2 = arith.constant 0 : i32
    return %arg0, %c0_i32, %c0_i32_0, %c0_i32_1 : i32, i32, i32, i32
  }
  func.func @transform_1(%arg0: i32) -> (i32, i32, i32, i32) {
    %c0_i32 = arith.constant 0 : i32
    %c0_i32_0 = arith.constant 0 : i32
    %c0_i32_1 = arith.constant 0 : i32
    %c0_i32_2 = arith.constant 0 : i32
    return %arg0, %c0_i32, %c0_i32_0, %c0_i32_1 : i32, i32, i32, i32
  }
  func.func @transform_2(%arg0: i32) -> (i32, i32, i32, i32) {
    %c0_i32 = arith.constant 0 : i32
    %c0_i32_0 = arith.constant 0 : i32
    %c0_i32_1 = arith.constant 0 : i32
    %c0_i32_2 = arith.constant 0 : i32
    return %arg0, %c0_i32, %c0_i32_0, %c0_i32_1 : i32, i32, i32, i32
  }
  func.func @transform_3(%arg0: i32) -> (i32, i32, i32, i32) {
    %c0_i32 = arith.constant 0 : i32
    %c0_i32_0 = arith.constant 0 : i32
    %c0_i32_1 = arith.constant 0 : i32
    %c0_i32_2 = arith.constant 0 : i32
    return %arg0, %c0_i32, %c0_i32_0, %c0_i32_1 : i32, i32, i32, i32
  }
  func.func @transform_4(%arg0: i32) -> (i32, i32) {
    %c0_i32 = arith.constant 0 : i32
    %c0_i32_0 = arith.constant 0 : i32
    %c0_i32_1 = arith.constant 0 : i32
    return %c0_i32, %c0_i32_0 : i32, i32
  }
  func.func @transform_5(%arg0: i32) -> (i32, i32) {
    %c0_i32 = arith.constant 0 : i32
    %c0_i32_0 = arith.constant 0 : i32
    %c0_i32_1 = arith.constant 0 : i32
    return %c0_i32, %c0_i32_0 : i32, i32
  }
  func.func @transform_6(%arg0: i32) -> (i32, i32, i32, i32) {
    %c0_i32 = arith.constant 0 : i32
    %c0_i32_0 = arith.constant 0 : i32
    %c0_i32_1 = arith.constant 0 : i32
    %c0_i32_2 = arith.constant 0 : i32
    return %arg0, %c0_i32, %c0_i32_0, %c0_i32_1 : i32, i32, i32, i32
  }
  func.func @transform_7(%arg0: i32) -> (i32, i32, i32, i32) {
    %c0_i32 = arith.constant 0 : i32
    %c0_i32_0 = arith.constant 0 : i32
    %c0_i32_1 = arith.constant 0 : i32
    %c0_i32_2 = arith.constant 0 : i32
    return %arg0, %c0_i32, %c0_i32_0, %c0_i32_1 : i32, i32, i32, i32
  }
}

module attributes {stable_mosaic.version = 11 : i64} {
  func.func @_preprocess_kernel(%arg0: i32, %arg1: memref<1x1x64x512xi32, #tpu.memory_space<vmem>>, %arg2: memref<1x1x64x512xi32, #tpu.memory_space<vmem>>, %arg3: memref<1x3x64x512xf32, #tpu.memory_space<vmem>>, %arg4: memref<1x1x16x128xf32, #tpu.memory_space<vmem>>, %arg5: memref<64x16xbf16, #tpu.memory_space<vmem>>, %arg6: memref<128x512xbf16, #tpu.memory_space<vmem>>, %arg7: memref<1x6x64x512xbf16, #tpu.memory_space<vmem>>, %arg8: memref<1x3x64x512xf32, #tpu.memory_space<vmem>>) attributes {dimension_semantics = [#tpu.dimension_semantics<parallel>], iteration_bounds = array<i64: 2>, scalar_prefetch = 0 : i64, scratch_operands = 0 : i64, tpu.core_type = #tpu.core_type<tc>, window_params = [{transform_indices = @transform_0, window_bounds = array<i64: 1, 1, 64, 512>}, {transform_indices = @transform_1, window_bounds = array<i64: 1, 1, 64, 512>}, {transform_indices = @transform_2, window_bounds = array<i64: 1, 3, 64, 512>}, {transform_indices = @transform_3, window_bounds = array<i64: 1, 1, 16, 128>}, {pipeline_mode = #tpu.pipeline_mode<synchronous>, transform_indices = @transform_4, window_bounds = array<i64: 64, 16>}, {pipeline_mode = #tpu.pipeline_mode<synchronous>, transform_indices = @transform_5, window_bounds = array<i64: 128, 512>}, {transform_indices = @transform_6, window_bounds = array<i64: 1, 6, 64, 512>}, {transform_indices = @transform_7, window_bounds = array<i64: 1, 3, 64, 512>}]} {
    %c0 = arith.constant 0 : index
    %c0_0 = arith.constant 0 : index
    %c0_1 = arith.constant 0 : index
    %c0_2 = arith.constant 0 : index
    %0 = vector.load %arg4[%c0, %c0_0, %c0_1, %c0_2] : memref<1x1x16x128xf32, #tpu.memory_space<vmem>>, vector<1x1x16x128xf32>
    %1 = vector.shape_cast %0 : vector<1x1x16x128xf32> to vector<16x128xf32>
    %cst = arith.constant 5.000000e-01 : f32
    %2 = vector.broadcast %cst : f32 to vector<16x128xf32>
    %3 = arith.cmpf ogt, %1, %2 : vector<16x128xf32>
    %4 = arith.extui %3 : vector<16x128xi1> to vector<16x128xi32>
    %5 = arith.sitofp %4 : vector<16x128xi32> to vector<16x128xf32>
    %cst_3 = arith.constant 0.000000e+00 : f32
    %6 = vector.broadcast %cst_3 : f32 to vector<16x1xf32>
    %7 = vector.extract_strided_slice %5 {offsets = [0, 0], sizes = [16, 127], strides = [1, 1]} : vector<16x128xf32> to vector<16x127xf32>
    %8 = tpu.concatenate %6, %7 in 1 : vector<16x1xf32>, vector<16x127xf32> -> vector<16x128xf32>
    %9 = arith.addf %5, %8 : vector<16x128xf32>
    %cst_4 = arith.constant 0.000000e+00 : f32
    %10 = vector.broadcast %cst_4 : f32 to vector<16x1xf32>
    %11 = vector.extract_strided_slice %5 {offsets = [0, 1], sizes = [16, 127], strides = [1, 1]} : vector<16x128xf32> to vector<16x127xf32>
    %12 = tpu.concatenate %11, %10 in 1 : vector<16x127xf32>, vector<16x1xf32> -> vector<16x128xf32>
    %13 = arith.addf %9, %12 : vector<16x128xf32>
    %cst_5 = arith.constant 0.000000e+00 : f32
    %14 = vector.broadcast %cst_5 : f32 to vector<1x128xf32>
    %15 = vector.extract_strided_slice %13 {offsets = [0, 0], sizes = [15, 128], strides = [1, 1]} : vector<16x128xf32> to vector<15x128xf32>
    %16 = tpu.concatenate %14, %15 in 0 : vector<1x128xf32>, vector<15x128xf32> -> vector<16x128xf32>
    %17 = arith.addf %13, %16 : vector<16x128xf32>
    %cst_6 = arith.constant 0.000000e+00 : f32
    %18 = vector.broadcast %cst_6 : f32 to vector<1x128xf32>
    %19 = vector.extract_strided_slice %13 {offsets = [1, 0], sizes = [15, 128], strides = [1, 1]} : vector<16x128xf32> to vector<15x128xf32>
    %20 = tpu.concatenate %19, %18 in 0 : vector<15x128xf32>, vector<1x128xf32> -> vector<16x128xf32>
    %21 = arith.addf %17, %20 : vector<16x128xf32>
    %cst_7 = arith.constant 4.500000e+00 : f32
    %22 = vector.broadcast %cst_7 : f32 to vector<16x128xf32>
    %23 = arith.cmpf ogt, %21, %22 : vector<16x128xf32>
    %24 = arith.extui %23 : vector<16x128xi1> to vector<16x128xi32>
    %25 = arith.sitofp %24 : vector<16x128xi32> to vector<16x128xf32>
    %cst_8 = arith.constant 0.000000e+00 : f32
    %26 = vector.broadcast %cst_8 : f32 to vector<16x1xf32>
    %27 = vector.extract_strided_slice %25 {offsets = [0, 0], sizes = [16, 127], strides = [1, 1]} : vector<16x128xf32> to vector<16x127xf32>
    %28 = tpu.concatenate %26, %27 in 1 : vector<16x1xf32>, vector<16x127xf32> -> vector<16x128xf32>
    %29 = arith.addf %25, %28 : vector<16x128xf32>
    %cst_9 = arith.constant 0.000000e+00 : f32
    %30 = vector.broadcast %cst_9 : f32 to vector<16x1xf32>
    %31 = vector.extract_strided_slice %25 {offsets = [0, 1], sizes = [16, 127], strides = [1, 1]} : vector<16x128xf32> to vector<16x127xf32>
    %32 = tpu.concatenate %31, %30 in 1 : vector<16x127xf32>, vector<16x1xf32> -> vector<16x128xf32>
    %33 = arith.addf %29, %32 : vector<16x128xf32>
    %cst_10 = arith.constant 0.000000e+00 : f32
    %34 = vector.broadcast %cst_10 : f32 to vector<1x128xf32>
    %35 = vector.extract_strided_slice %33 {offsets = [0, 0], sizes = [15, 128], strides = [1, 1]} : vector<16x128xf32> to vector<15x128xf32>
    %36 = tpu.concatenate %34, %35 in 0 : vector<1x128xf32>, vector<15x128xf32> -> vector<16x128xf32>
    %37 = arith.addf %33, %36 : vector<16x128xf32>
    %cst_11 = arith.constant 0.000000e+00 : f32
    %38 = vector.broadcast %cst_11 : f32 to vector<1x128xf32>
    %39 = vector.extract_strided_slice %33 {offsets = [1, 0], sizes = [15, 128], strides = [1, 1]} : vector<16x128xf32> to vector<15x128xf32>
    %40 = tpu.concatenate %39, %38 in 0 : vector<15x128xf32>, vector<1x128xf32> -> vector<16x128xf32>
    %41 = arith.addf %37, %40 : vector<16x128xf32>
    %cst_12 = arith.constant 4.500000e+00 : f32
    %42 = vector.broadcast %cst_12 : f32 to vector<16x128xf32>
    %43 = arith.cmpf ogt, %41, %42 : vector<16x128xf32>
    %44 = arith.extui %43 : vector<16x128xi1> to vector<16x128xi32>
    %45 = arith.sitofp %44 : vector<16x128xi32> to vector<16x128xf32>
    %cst_13 = arith.constant 0.000000e+00 : f32
    %46 = vector.broadcast %cst_13 : f32 to vector<16x1xf32>
    %47 = vector.extract_strided_slice %45 {offsets = [0, 0], sizes = [16, 127], strides = [1, 1]} : vector<16x128xf32> to vector<16x127xf32>
    %48 = tpu.concatenate %46, %47 in 1 : vector<16x1xf32>, vector<16x127xf32> -> vector<16x128xf32>
    %49 = arith.addf %45, %48 : vector<16x128xf32>
    %cst_14 = arith.constant 0.000000e+00 : f32
    %50 = vector.broadcast %cst_14 : f32 to vector<16x1xf32>
    %51 = vector.extract_strided_slice %45 {offsets = [0, 1], sizes = [16, 127], strides = [1, 1]} : vector<16x128xf32> to vector<16x127xf32>
    %52 = tpu.concatenate %51, %50 in 1 : vector<16x127xf32>, vector<16x1xf32> -> vector<16x128xf32>
    %53 = arith.addf %49, %52 : vector<16x128xf32>
    %cst_15 = arith.constant 0.000000e+00 : f32
    %54 = vector.broadcast %cst_15 : f32 to vector<1x128xf32>
    %55 = vector.extract_strided_slice %53 {offsets = [0, 0], sizes = [15, 128], strides = [1, 1]} : vector<16x128xf32> to vector<15x128xf32>
    %56 = tpu.concatenate %54, %55 in 0 : vector<1x128xf32>, vector<15x128xf32> -> vector<16x128xf32>
    %57 = arith.addf %53, %56 : vector<16x128xf32>
    %cst_16 = arith.constant 0.000000e+00 : f32
    %58 = vector.broadcast %cst_16 : f32 to vector<1x128xf32>
    %59 = vector.extract_strided_slice %53 {offsets = [1, 0], sizes = [15, 128], strides = [1, 1]} : vector<16x128xf32> to vector<15x128xf32>
    %60 = tpu.concatenate %59, %58 in 0 : vector<15x128xf32>, vector<1x128xf32> -> vector<16x128xf32>
    %61 = arith.addf %57, %60 : vector<16x128xf32>
    %cst_17 = arith.constant 4.500000e+00 : f32
    %62 = vector.broadcast %cst_17 : f32 to vector<16x128xf32>
    %63 = arith.cmpf ogt, %61, %62 : vector<16x128xf32>
    %64 = arith.extui %63 : vector<16x128xi1> to vector<16x128xi32>
    %65 = arith.sitofp %64 : vector<16x128xi32> to vector<16x128xf32>
    %cst_18 = arith.constant 0.000000e+00 : f32
    %66 = vector.broadcast %cst_18 : f32 to vector<16x1xf32>
    %67 = vector.extract_strided_slice %65 {offsets = [0, 0], sizes = [16, 127], strides = [1, 1]} : vector<16x128xf32> to vector<16x127xf32>
    %68 = tpu.concatenate %66, %67 in 1 : vector<16x1xf32>, vector<16x127xf32> -> vector<16x128xf32>
    %69 = arith.addf %65, %68 : vector<16x128xf32>
    %cst_19 = arith.constant 0.000000e+00 : f32
    %70 = vector.broadcast %cst_19 : f32 to vector<16x1xf32>
    %71 = vector.extract_strided_slice %65 {offsets = [0, 1], sizes = [16, 127], strides = [1, 1]} : vector<16x128xf32> to vector<16x127xf32>
    %72 = tpu.concatenate %71, %70 in 1 : vector<16x127xf32>, vector<16x1xf32> -> vector<16x128xf32>
    %73 = arith.addf %69, %72 : vector<16x128xf32>
    %cst_20 = arith.constant 0.000000e+00 : f32
    %74 = vector.broadcast %cst_20 : f32 to vector<1x128xf32>
    %75 = vector.extract_strided_slice %73 {offsets = [0, 0], sizes = [15, 128], strides = [1, 1]} : vector<16x128xf32> to vector<15x128xf32>
    %76 = tpu.concatenate %74, %75 in 0 : vector<1x128xf32>, vector<15x128xf32> -> vector<16x128xf32>
    %77 = arith.addf %73, %76 : vector<16x128xf32>
    %cst_21 = arith.constant 0.000000e+00 : f32
    %78 = vector.broadcast %cst_21 : f32 to vector<1x128xf32>
    %79 = vector.extract_strided_slice %73 {offsets = [1, 0], sizes = [15, 128], strides = [1, 1]} : vector<16x128xf32> to vector<15x128xf32>
    %80 = tpu.concatenate %79, %78 in 0 : vector<15x128xf32>, vector<1x128xf32> -> vector<16x128xf32>
    %81 = arith.addf %77, %80 : vector<16x128xf32>
    %cst_22 = arith.constant 4.500000e+00 : f32
    %82 = vector.broadcast %cst_22 : f32 to vector<16x128xf32>
    %83 = arith.cmpf ogt, %81, %82 : vector<16x128xf32>
    %84 = arith.extui %83 : vector<16x128xi1> to vector<16x128xi32>
    %85 = arith.sitofp %84 : vector<16x128xi32> to vector<16x128xf32>
    %cst_23 = arith.constant 0.000000e+00 : f32
    %86 = vector.broadcast %cst_23 : f32 to vector<16x1xf32>
    %87 = vector.extract_strided_slice %85 {offsets = [0, 0], sizes = [16, 127], strides = [1, 1]} : vector<16x128xf32> to vector<16x127xf32>
    %88 = tpu.concatenate %86, %87 in 1 : vector<16x1xf32>, vector<16x127xf32> -> vector<16x128xf32>
    %89 = arith.addf %85, %88 : vector<16x128xf32>
    %cst_24 = arith.constant 0.000000e+00 : f32
    %90 = vector.broadcast %cst_24 : f32 to vector<16x1xf32>
    %91 = vector.extract_strided_slice %85 {offsets = [0, 1], sizes = [16, 127], strides = [1, 1]} : vector<16x128xf32> to vector<16x127xf32>
    %92 = tpu.concatenate %91, %90 in 1 : vector<16x127xf32>, vector<16x1xf32> -> vector<16x128xf32>
    %93 = arith.addf %89, %92 : vector<16x128xf32>
    %cst_25 = arith.constant 0.000000e+00 : f32
    %94 = vector.broadcast %cst_25 : f32 to vector<1x128xf32>
    %95 = vector.extract_strided_slice %93 {offsets = [0, 0], sizes = [15, 128], strides = [1, 1]} : vector<16x128xf32> to vector<15x128xf32>
    %96 = tpu.concatenate %94, %95 in 0 : vector<1x128xf32>, vector<15x128xf32> -> vector<16x128xf32>
    %97 = arith.addf %93, %96 : vector<16x128xf32>
    %cst_26 = arith.constant 0.000000e+00 : f32
    %98 = vector.broadcast %cst_26 : f32 to vector<1x128xf32>
    %99 = vector.extract_strided_slice %93 {offsets = [1, 0], sizes = [15, 128], strides = [1, 1]} : vector<16x128xf32> to vector<15x128xf32>
    %100 = tpu.concatenate %99, %98 in 0 : vector<15x128xf32>, vector<1x128xf32> -> vector<16x128xf32>
    %101 = arith.addf %97, %100 : vector<16x128xf32>
    %cst_27 = arith.constant 4.500000e+00 : f32
    %102 = vector.broadcast %cst_27 : f32 to vector<16x128xf32>
    %103 = arith.cmpf ogt, %101, %102 : vector<16x128xf32>
    %104 = arith.extui %103 : vector<16x128xi1> to vector<16x128xi32>
    %105 = arith.sitofp %104 : vector<16x128xi32> to vector<16x128xf32>
    %cst_28 = arith.constant 0.000000e+00 : f32
    %106 = vector.broadcast %cst_28 : f32 to vector<16x1xf32>
    %107 = vector.extract_strided_slice %105 {offsets = [0, 0], sizes = [16, 127], strides = [1, 1]} : vector<16x128xf32> to vector<16x127xf32>
    %108 = tpu.concatenate %106, %107 in 1 : vector<16x1xf32>, vector<16x127xf32> -> vector<16x128xf32>
    %109 = arith.addf %105, %108 : vector<16x128xf32>
    %cst_29 = arith.constant 0.000000e+00 : f32
    %110 = vector.broadcast %cst_29 : f32 to vector<16x1xf32>
    %111 = vector.extract_strided_slice %105 {offsets = [0, 1], sizes = [16, 127], strides = [1, 1]} : vector<16x128xf32> to vector<16x127xf32>
    %112 = tpu.concatenate %111, %110 in 1 : vector<16x127xf32>, vector<16x1xf32> -> vector<16x128xf32>
    %113 = arith.addf %109, %112 : vector<16x128xf32>
    %cst_30 = arith.constant 0.000000e+00 : f32
    %114 = vector.broadcast %cst_30 : f32 to vector<1x128xf32>
    %115 = vector.extract_strided_slice %113 {offsets = [0, 0], sizes = [15, 128], strides = [1, 1]} : vector<16x128xf32> to vector<15x128xf32>
    %116 = tpu.concatenate %114, %115 in 0 : vector<1x128xf32>, vector<15x128xf32> -> vector<16x128xf32>
    %117 = arith.addf %113, %116 : vector<16x128xf32>
    %cst_31 = arith.constant 0.000000e+00 : f32
    %118 = vector.broadcast %cst_31 : f32 to vector<1x128xf32>
    %119 = vector.extract_strided_slice %113 {offsets = [1, 0], sizes = [15, 128], strides = [1, 1]} : vector<16x128xf32> to vector<15x128xf32>
    %120 = tpu.concatenate %119, %118 in 0 : vector<15x128xf32>, vector<1x128xf32> -> vector<16x128xf32>
    %121 = arith.addf %117, %120 : vector<16x128xf32>
    %cst_32 = arith.constant 4.500000e+00 : f32
    %122 = vector.broadcast %cst_32 : f32 to vector<16x128xf32>
    %123 = arith.cmpf ogt, %121, %122 : vector<16x128xf32>
    %124 = arith.extui %123 : vector<16x128xi1> to vector<16x128xi32>
    %125 = arith.sitofp %124 : vector<16x128xi32> to vector<16x128xf32>
    %cst_33 = arith.constant 0.000000e+00 : f32
    %126 = vector.broadcast %cst_33 : f32 to vector<16x1xf32>
    %127 = vector.extract_strided_slice %125 {offsets = [0, 0], sizes = [16, 127], strides = [1, 1]} : vector<16x128xf32> to vector<16x127xf32>
    %128 = tpu.concatenate %126, %127 in 1 : vector<16x1xf32>, vector<16x127xf32> -> vector<16x128xf32>
    %129 = arith.addf %125, %128 : vector<16x128xf32>
    %cst_34 = arith.constant 0.000000e+00 : f32
    %130 = vector.broadcast %cst_34 : f32 to vector<16x1xf32>
    %131 = vector.extract_strided_slice %125 {offsets = [0, 1], sizes = [16, 127], strides = [1, 1]} : vector<16x128xf32> to vector<16x127xf32>
    %132 = tpu.concatenate %131, %130 in 1 : vector<16x127xf32>, vector<16x1xf32> -> vector<16x128xf32>
    %133 = arith.addf %129, %132 : vector<16x128xf32>
    %cst_35 = arith.constant 0.000000e+00 : f32
    %134 = vector.broadcast %cst_35 : f32 to vector<1x128xf32>
    %135 = vector.extract_strided_slice %133 {offsets = [0, 0], sizes = [15, 128], strides = [1, 1]} : vector<16x128xf32> to vector<15x128xf32>
    %136 = tpu.concatenate %134, %135 in 0 : vector<1x128xf32>, vector<15x128xf32> -> vector<16x128xf32>
    %137 = arith.addf %133, %136 : vector<16x128xf32>
    %cst_36 = arith.constant 0.000000e+00 : f32
    %138 = vector.broadcast %cst_36 : f32 to vector<1x128xf32>
    %139 = vector.extract_strided_slice %133 {offsets = [1, 0], sizes = [15, 128], strides = [1, 1]} : vector<16x128xf32> to vector<15x128xf32>
    %140 = tpu.concatenate %139, %138 in 0 : vector<15x128xf32>, vector<1x128xf32> -> vector<16x128xf32>
    %141 = arith.addf %137, %140 : vector<16x128xf32>
    %cst_37 = arith.constant 4.500000e+00 : f32
    %142 = vector.broadcast %cst_37 : f32 to vector<16x128xf32>
    %143 = arith.cmpf ogt, %141, %142 : vector<16x128xf32>
    %144 = arith.extui %143 : vector<16x128xi1> to vector<16x128xi32>
    %145 = arith.sitofp %144 : vector<16x128xi32> to vector<16x128xf32>
    %cst_38 = arith.constant 1.000000e+00 : f32
    %146 = vector.broadcast %cst_38 : f32 to vector<16x128xf32>
    %147 = arith.subf %146, %145 : vector<16x128xf32>
    %148 = arith.truncf %147 : vector<16x128xf32> to vector<16x128xbf16>
    %c0_39 = arith.constant 0 : index
    %c0_40 = arith.constant 0 : index
    %149 = vector.load %arg6[%c0_39, %c0_40] : memref<128x512xbf16, #tpu.memory_space<vmem>>, vector<128x512xbf16>
    %cst_41 = arith.constant dense<0.000000e+00> : vector<16x512xf32>
    %150 = tpu.matmul %148, %149, %cst_41 {dimension_numbers = #tpu.dot_dimension_numbers<[1], [0], [0], [1], [0, 0, 1, 1], [], []>} : vector<16x128xbf16>, vector<128x512xbf16>, vector<16x512xf32> -> vector<16x512xf32>
    %c0_42 = arith.constant 0 : index
    %c0_43 = arith.constant 0 : index
    %151 = vector.load %arg5[%c0_42, %c0_43] : memref<64x16xbf16, #tpu.memory_space<vmem>>, vector<64x16xbf16>
    %152 = arith.truncf %150 : vector<16x512xf32> to vector<16x512xbf16>
    %cst_44 = arith.constant dense<0.000000e+00> : vector<64x512xf32>
    %153 = tpu.matmul %151, %152, %cst_44 {dimension_numbers = #tpu.dot_dimension_numbers<[1], [0], [0], [1], [0, 0, 1, 1], [], []>} : vector<64x16xbf16>, vector<16x512xbf16>, vector<64x512xf32> -> vector<64x512xf32>
    %c0_45 = arith.constant 0 : index
    %c0_46 = arith.constant 0 : index
    %c0_47 = arith.constant 0 : index
    %c0_48 = arith.constant 0 : index
    %154 = vector.load %arg1[%c0_45, %c0_46, %c0_47, %c0_48] : memref<1x1x64x512xi32, #tpu.memory_space<vmem>>, vector<1x1x64x512xi32>
    %155 = vector.shape_cast %154 : vector<1x1x64x512xi32> to vector<64x512xi32>
    %c0_i32 = arith.constant 0 : i32
    %156 = vector.broadcast %c0_i32 : i32 to vector<64x512xi32>
    %157 = arith.cmpi eq, %155, %156 : vector<64x512xi32>
    %cst_49 = arith.constant 1.000000e+00 : f32
    %cst_50 = arith.constant 0.000000e+00 : f32
    %158 = vector.broadcast %cst_49 : f32 to vector<64x512xf32>
    %159 = vector.broadcast %cst_50 : f32 to vector<64x512xf32>
    %160 = arith.select %157, %158, %159 : vector<64x512xi1>, vector<64x512xf32>
    %161 = arith.truncf %160 : vector<64x512xf32> to vector<64x512xbf16>
    %c0_51 = arith.constant 0 : index
    %c0_52 = arith.constant 0 : index
    %c0_53 = arith.constant 0 : index
    %c0_54 = arith.constant 0 : index
    %162 = vector.load %arg7[%c0_51, %c0_52, %c0_53, %c0_54] : memref<1x6x64x512xbf16, #tpu.memory_space<vmem>>, vector<1x1x64x512xbf16>
    %163 = vector.shape_cast %162 : vector<1x1x64x512xbf16> to vector<64x512xbf16>
    %164 = vector.shape_cast %161 : vector<64x512xbf16> to vector<1x1x64x512xbf16>
    tpu.vector_store %arg7[%c0_51, %c0_52, %c0_53, %c0_54], %164 {strides = array<i32>} : memref<1x6x64x512xbf16, #tpu.memory_space<vmem>>, vector<1x1x64x512xbf16>,
    %c1_i32 = arith.constant 1 : i32
    %165 = vector.broadcast %c1_i32 : i32 to vector<64x512xi32>
    %166 = arith.cmpi eq, %155, %165 : vector<64x512xi32>
    %cst_55 = arith.constant 1.000000e+00 : f32
    %cst_56 = arith.constant 0.000000e+00 : f32
    %167 = vector.broadcast %cst_55 : f32 to vector<64x512xf32>
    %168 = vector.broadcast %cst_56 : f32 to vector<64x512xf32>
    %169 = arith.select %166, %167, %168 : vector<64x512xi1>, vector<64x512xf32>
    %170 = arith.truncf %169 : vector<64x512xf32> to vector<64x512xbf16>
    %c0_57 = arith.constant 0 : index
    %c1 = arith.constant 1 : index
    %c0_58 = arith.constant 0 : index
    %c0_59 = arith.constant 0 : index
    %171 = vector.load %arg7[%c0_57, %c1, %c0_58, %c0_59] : memref<1x6x64x512xbf16, #tpu.memory_space<vmem>>, vector<1x1x64x512xbf16>
    %172 = vector.shape_cast %171 : vector<1x1x64x512xbf16> to vector<64x512xbf16>
    %173 = vector.shape_cast %170 : vector<64x512xbf16> to vector<1x1x64x512xbf16>
    tpu.vector_store %arg7[%c0_57, %c1, %c0_58, %c0_59], %173 {strides = array<i32>} : memref<1x6x64x512xbf16, #tpu.memory_space<vmem>>, vector<1x1x64x512xbf16>,
    %c2_i32 = arith.constant 2 : i32
    %174 = vector.broadcast %c2_i32 : i32 to vector<64x512xi32>
    %175 = arith.cmpi eq, %155, %174 : vector<64x512xi32>
    %cst_60 = arith.constant 1.000000e+00 : f32
    %cst_61 = arith.constant 0.000000e+00 : f32
    %176 = vector.broadcast %cst_60 : f32 to vector<64x512xf32>
    %177 = vector.broadcast %cst_61 : f32 to vector<64x512xf32>
    %178 = arith.select %175, %176, %177 : vector<64x512xi1>, vector<64x512xf32>
    %179 = arith.truncf %178 : vector<64x512xf32> to vector<64x512xbf16>
    %c0_62 = arith.constant 0 : index
    %c2 = arith.constant 2 : index
    %c0_63 = arith.constant 0 : index
    %c0_64 = arith.constant 0 : index
    %180 = vector.load %arg7[%c0_62, %c2, %c0_63, %c0_64] : memref<1x6x64x512xbf16, #tpu.memory_space<vmem>>, vector<1x1x64x512xbf16>
    %181 = vector.shape_cast %180 : vector<1x1x64x512xbf16> to vector<64x512xbf16>
    %182 = vector.shape_cast %179 : vector<64x512xbf16> to vector<1x1x64x512xbf16>
    tpu.vector_store %arg7[%c0_62, %c2, %c0_63, %c0_64], %182 {strides = array<i32>} : memref<1x6x64x512xbf16, #tpu.memory_space<vmem>>, vector<1x1x64x512xbf16>,
    %c3_i32 = arith.constant 3 : i32
    %183 = vector.broadcast %c3_i32 : i32 to vector<64x512xi32>
    %184 = arith.cmpi eq, %155, %183 : vector<64x512xi32>
    %cst_65 = arith.constant 1.000000e+00 : f32
    %cst_66 = arith.constant 0.000000e+00 : f32
    %185 = vector.broadcast %cst_65 : f32 to vector<64x512xf32>
    %186 = vector.broadcast %cst_66 : f32 to vector<64x512xf32>
    %187 = arith.select %184, %185, %186 : vector<64x512xi1>, vector<64x512xf32>
    %188 = arith.truncf %187 : vector<64x512xf32> to vector<64x512xbf16>
    %c0_67 = arith.constant 0 : index
    %c3 = arith.constant 3 : index
    %c0_68 = arith.constant 0 : index
    %c0_69 = arith.constant 0 : index
    %189 = vector.load %arg7[%c0_67, %c3, %c0_68, %c0_69] : memref<1x6x64x512xbf16, #tpu.memory_space<vmem>>, vector<1x1x64x512xbf16>
    %190 = vector.shape_cast %189 : vector<1x1x64x512xbf16> to vector<64x512xbf16>
    %191 = vector.shape_cast %188 : vector<64x512xbf16> to vector<1x1x64x512xbf16>
    tpu.vector_store %arg7[%c0_67, %c3, %c0_68, %c0_69], %191 {strides = array<i32>} : memref<1x6x64x512xbf16, #tpu.memory_space<vmem>>, vector<1x1x64x512xbf16>,
    %c0_70 = arith.constant 0 : index
    %c0_71 = arith.constant 0 : index
    %c0_72 = arith.constant 0 : index
    %c0_73 = arith.constant 0 : index
    %192 = vector.load %arg2[%c0_70, %c0_71, %c0_72, %c0_73] : memref<1x1x64x512xi32, #tpu.memory_space<vmem>>, vector<1x1x64x512xi32>
    %193 = vector.shape_cast %192 : vector<1x1x64x512xi32> to vector<64x512xi32>
    %194 = tpu.iota {dimensions = array<i32: 1>} : vector<64x512xi32>
    %195 = tpu.iota {dimensions = array<i32: 0>} : vector<64x512xi32>
    %c0_i32_74 = arith.constant 0 : i32
    %196 = vector.broadcast %c0_i32_74 : i32 to vector<64x1xi32>
    %197 = vector.extract_strided_slice %193 {offsets = [0, 0], sizes = [64, 511], strides = [1, 1]} : vector<64x512xi32> to vector<64x511xi32>
    %198 = tpu.concatenate %196, %197 in 1 : vector<64x1xi32>, vector<64x511xi32> -> vector<64x512xi32>
    %c0_i32_75 = arith.constant 0 : i32
    %199 = vector.broadcast %c0_i32_75 : i32 to vector<1x512xi32>
    %200 = vector.extract_strided_slice %193 {offsets = [0, 0], sizes = [63, 512], strides = [1, 1]} : vector<64x512xi32> to vector<63x512xi32>
    %201 = tpu.concatenate %199, %200 in 0 : vector<1x512xi32>, vector<63x512xi32> -> vector<64x512xi32>
    %c0_i32_76 = arith.constant 0 : i32
    %202 = vector.broadcast %c0_i32_76 : i32 to vector<64x512xi32>
    %203 = arith.cmpi sgt, %194, %202 : vector<64x512xi32>
    %204 = arith.cmpi ne, %193, %198 : vector<64x512xi32>
    %205 = arith.andi %203, %204 : vector<64x512xi1>
    %cst_77 = arith.constant 1.000000e+00 : f32
    %cst_78 = arith.constant 0.000000e+00 : f32
    %206 = vector.broadcast %cst_77 : f32 to vector<64x512xf32>
    %207 = vector.broadcast %cst_78 : f32 to vector<64x512xf32>
    %208 = arith.select %205, %206, %207 : vector<64x512xi1>, vector<64x512xf32>
    %c0_i32_79 = arith.constant 0 : i32
    %209 = vector.broadcast %c0_i32_79 : i32 to vector<64x512xi32>
    %210 = arith.cmpi sgt, %195, %209 : vector<64x512xi32>
    %211 = arith.cmpi ne, %193, %201 : vector<64x512xi32>
    %212 = arith.andi %210, %211 : vector<64x512xi1>
    %cst_80 = arith.constant 1.000000e+00 : f32
    %cst_81 = arith.constant 0.000000e+00 : f32
    %213 = vector.broadcast %cst_80 : f32 to vector<64x512xf32>
    %214 = vector.broadcast %cst_81 : f32 to vector<64x512xf32>
    %215 = arith.select %212, %213, %214 : vector<64x512xi1>, vector<64x512xf32>
    %cst_82 = arith.constant 0.000000e+00 : f32
    %216 = vector.broadcast %cst_82 : f32 to vector<64x1xf32>
    %217 = vector.extract_strided_slice %208 {offsets = [0, 1], sizes = [64, 511], strides = [1, 1]} : vector<64x512xf32> to vector<64x511xf32>
    %218 = tpu.concatenate %217, %216 in 1 : vector<64x511xf32>, vector<64x1xf32> -> vector<64x512xf32>
    %cst_83 = arith.constant 0.000000e+00 : f32
    %219 = vector.broadcast %cst_83 : f32 to vector<1x512xf32>
    %220 = vector.extract_strided_slice %215 {offsets = [1, 0], sizes = [63, 512], strides = [1, 1]} : vector<64x512xf32> to vector<63x512xf32>
    %221 = tpu.concatenate %220, %219 in 0 : vector<63x512xf32>, vector<1x512xf32> -> vector<64x512xf32>
    %222 = arith.maximumf %208, %218 : vector<64x512xf32>
    %223 = arith.maximumf %215, %221 : vector<64x512xf32>
    %224 = arith.maximumf %222, %223 : vector<64x512xf32>
    %225 = arith.truncf %224 : vector<64x512xf32> to vector<64x512xbf16>
    %c0_84 = arith.constant 0 : index
    %c4 = arith.constant 4 : index
    %c0_85 = arith.constant 0 : index
    %c0_86 = arith.constant 0 : index
    %226 = vector.load %arg7[%c0_84, %c4, %c0_85, %c0_86] : memref<1x6x64x512xbf16, #tpu.memory_space<vmem>>, vector<1x1x64x512xbf16>
    %227 = vector.shape_cast %226 : vector<1x1x64x512xbf16> to vector<64x512xbf16>
    %228 = vector.shape_cast %225 : vector<64x512xbf16> to vector<1x1x64x512xbf16>
    tpu.vector_store %arg7[%c0_84, %c4, %c0_85, %c0_86], %228 {strides = array<i32>} : memref<1x6x64x512xbf16, #tpu.memory_space<vmem>>, vector<1x1x64x512xbf16>,
    %cst_87 = arith.constant 1.000000e+00 : f32
    %229 = vector.broadcast %cst_87 : f32 to vector<64x512xf32>
    %230 = arith.subf %229, %153 : vector<64x512xf32>
    %231 = arith.truncf %230 : vector<64x512xf32> to vector<64x512xbf16>
    %c0_88 = arith.constant 0 : index
    %c5 = arith.constant 5 : index
    %c0_89 = arith.constant 0 : index
    %c0_90 = arith.constant 0 : index
    %232 = vector.load %arg7[%c0_88, %c5, %c0_89, %c0_90] : memref<1x6x64x512xbf16, #tpu.memory_space<vmem>>, vector<1x1x64x512xbf16>
    %233 = vector.shape_cast %232 : vector<1x1x64x512xbf16> to vector<64x512xbf16>
    %234 = vector.shape_cast %231 : vector<64x512xbf16> to vector<1x1x64x512xbf16>
    tpu.vector_store %arg7[%c0_88, %c5, %c0_89, %c0_90], %234 {strides = array<i32>} : memref<1x6x64x512xbf16, #tpu.memory_space<vmem>>, vector<1x1x64x512xbf16>,
    %c0_91 = arith.constant 0 : index
    %c0_92 = arith.constant 0 : index
    %c0_93 = arith.constant 0 : index
    %c0_94 = arith.constant 0 : index
    %235 = vector.load %arg3[%c0_91, %c0_92, %c0_93, %c0_94] : memref<1x3x64x512xf32, #tpu.memory_space<vmem>>, vector<1x3x64x512xf32>
    %236 = vector.shape_cast %235 : vector<1x3x64x512xf32> to vector<3x64x512xf32>
    %237 = vector.shape_cast %153 : vector<64x512xf32> to vector<1x64x512xf32>
    %238 = vector.broadcast %237 : vector<1x64x512xf32> to vector<3x64x512xf32>
    %239 = arith.mulf %236, %238 : vector<3x64x512xf32>
    %c0_95 = arith.constant 0 : index
    %c0_96 = arith.constant 0 : index
    %c0_97 = arith.constant 0 : index
    %c0_98 = arith.constant 0 : index
    %240 = vector.load %arg8[%c0_95, %c0_96, %c0_97, %c0_98] : memref<1x3x64x512xf32, #tpu.memory_space<vmem>>, vector<1x3x64x512xf32>
    %241 = vector.shape_cast %240 : vector<1x3x64x512xf32> to vector<3x64x512xf32>
    %242 = vector.shape_cast %239 : vector<3x64x512xf32> to vector<1x3x64x512xf32>
    tpu.vector_store %arg8[%c0_95, %c0_96, %c0_97, %c0_98], %242 {strides = array<i32>} : memref<1x3x64x512xf32, #tpu.memory_space<vmem>>, vector<1x3x64x512xf32>,
    return
  }
  func.func @transform_0(%arg0: i32) -> (i32, i32, i32, i32) {
    %c0_i32 = arith.constant 0 : i32
    %c0_i32_0 = arith.constant 0 : i32
    %c0_i32_1 = arith.constant 0 : i32
    %c0_i32_2 = arith.constant 0 : i32
    return %arg0, %c0_i32, %c0_i32_0, %c0_i32_1 : i32, i32, i32, i32
  }
  func.func @transform_1(%arg0: i32) -> (i32, i32, i32, i32) {
    %c0_i32 = arith.constant 0 : i32
    %c0_i32_0 = arith.constant 0 : i32
    %c0_i32_1 = arith.constant 0 : i32
    %c0_i32_2 = arith.constant 0 : i32
    return %arg0, %c0_i32, %c0_i32_0, %c0_i32_1 : i32, i32, i32, i32
  }
  func.func @transform_2(%arg0: i32) -> (i32, i32, i32, i32) {
    %c0_i32 = arith.constant 0 : i32
    %c0_i32_0 = arith.constant 0 : i32
    %c0_i32_1 = arith.constant 0 : i32
    %c0_i32_2 = arith.constant 0 : i32
    return %arg0, %c0_i32, %c0_i32_0, %c0_i32_1 : i32, i32, i32, i32
  }
  func.func @transform_3(%arg0: i32) -> (i32, i32, i32, i32) {
    %c0_i32 = arith.constant 0 : i32
    %c0_i32_0 = arith.constant 0 : i32
    %c0_i32_1 = arith.constant 0 : i32
    %c0_i32_2 = arith.constant 0 : i32
    return %arg0, %c0_i32, %c0_i32_0, %c0_i32_1 : i32, i32, i32, i32
  }
  func.func @transform_4(%arg0: i32) -> (i32, i32) {
    %c0_i32 = arith.constant 0 : i32
    %c0_i32_0 = arith.constant 0 : i32
    %c0_i32_1 = arith.constant 0 : i32
    return %c0_i32, %c0_i32_0 : i32, i32
  }
  func.func @transform_5(%arg0: i32) -> (i32, i32) {
    %c0_i32 = arith.constant 0 : i32
    %c0_i32_0 = arith.constant 0 : i32
    %c0_i32_1 = arith.constant 0 : i32
    return %c0_i32, %c0_i32_0 : i32, i32
  }
  func.func @transform_6(%arg0: i32) -> (i32, i32, i32, i32) {
    %c0_i32 = arith.constant 0 : i32
    %c0_i32_0 = arith.constant 0 : i32
    %c0_i32_1 = arith.constant 0 : i32
    %c0_i32_2 = arith.constant 0 : i32
    return %arg0, %c0_i32, %c0_i32_0, %c0_i32_1 : i32, i32, i32, i32
  }
  func.func @transform_7(%arg0: i32) -> (i32, i32, i32, i32) {
    %c0_i32 = arith.constant 0 : i32
    %c0_i32_0 = arith.constant 0 : i32
    %c0_i32_1 = arith.constant 0 : i32
    %c0_i32_2 = arith.constant 0 : i32
    return %arg0, %c0_i32, %c0_i32_0, %c0_i32_1 : i32, i32, i32, i32
  }
}

</mosaic_0001>

<bundles_post_ra>
// kernel: tpu_custom_call.1
= control target key start
LH: loop header
LB: loop body
LE: loop exit
PB: predicated region body
PF: predicated region fallthrough
CT: control target
= control target key end

     0   :  { %s6835_s0 = inlined_call_operand.hbm [shape: s32[2,1,64,512], index: 0, kind: input, shape index: {}]   ;;  %s6836_s1 = inlined_call_operand.hbm [shape: s32[2,1,64,512], index: 1, kind: input, shape index: {}]   ;;  %s6837_s2 = inlined_call_operand.hbm [shape: f32[2,3,64,512], index: 2, kind: input, shape index: {}]   ;;  %s6838_s3 = inlined_call_operand.vmem [shape: f32[2,1,16,128], index: 3, kind: input, shape index: {}]   ;;  %s6839_s4 = inlined_call_operand.vmem [shape: bf16[64,16], index: 4, kind: input, shape index: {}]   ;;  %s6840_s5 = inlined_call_operand.hbm [shape: bf16[128,512], index: 5, kind: input, shape index: {}]   ;;  %s6841_s6 = inlined_call_operand.hbm [shape: bf16[2,6,64,512], index: 6, kind: output, shape index: {0}]   ;;  %s6842_s7 = inlined_call_operand.hbm [shape: f32[2,3,64,512], index: 7, kind: output, shape index: {1}]  }
   0x1   :  { %6996 = sst [smem:[#allocation76_spill]] %s6836_s1 }
   0x2   :  { %6997 = sst [smem:[#allocation77_spill]] %s6840_s5 }
   0x3   :  { %13 = vsyncpa [#allocation3], 0 }
   0x4   :  { %15 = vsyncpa [#allocation3 + $0x1], 0 }
   0x5   :  { %16 = vsyncpa [#allocation6], 0 }
   0x6   :  { %18 = vsyncpa [#allocation6 + $0x1], 0 }
   0x7   :  { %19 = vsyncpa [#allocation9], 0 }
   0x8   :  { %20 = vsyncpa [#allocation4], 0 }
   0x9   :  { %22 = vsyncpa [#allocation4 + $0x1], 0 }
   0xa   :  { %23 = vsyncpa [#allocation12], 0 }
   0xb   :  { %25 = vsyncpa [#allocation12 + $0x1], 0  ;;  %s3644_s24 = smov 0   ;;  %s3646_s25 = smov 0  }
   0xc   :  { %s3648_s26 = smov 0   ;;  %s3650_s27 = smov 0  }
   0xd LB: > { %6998 = sst [smem:[#allocation18_spill]] %s3586_s26  ;;  %s3665_s28 = sadd.s32 1, %s3590_s27   ;;  %s3590_s27 = sphi %s3650_s27, %s7369_s27   ;;  %s3586_s26 = sphi %s3648_s26, %s7371_s26   ;;  %s3582_s25 = sphi %s3646_s25, %s7373_s25   ;;  %s3578_s24 = sphi %s3644_s24, %s7372_s24  }
   0xe   : > { %6999 = sst [smem:[#allocation19_spill]] %s3665_s28  ;;  %s38_s29 = sadd.s32 1, %s3586_s26 }
   0xf   : > { %s35_s30 = ssub.s32 %s3590_s27, %s3665_s28  ;;  %p45_p0 = scmp.ne.s32.totalorder %s3586_s26, %s3582_s25 }
  0x10   : > { %p36_p1 = scmp.eq.s32.totalorder %s35_s30, 0  ;;  %p46_p2 = scmp.eq.s32.totalorder %s3590_s27, 0 }
  0x11   : > { %p3161_p4 = scmp.lt.s32.totalorder %s3590_s27, 2  ;;  %s3682_s9 = sand.u32 1, %s3586_s26  }
  0x12   : > { %s3676_s8 = scalar_select %p36_p1, %s3586_s26, %s38_s29  }
  0x13   : > { %p47_p5 = por %p46_p2, %p45_p0  ;;  %s2808_s10 = sshll.u32 %s3682_s9, 8 }
  0x14   : > { %7000 = sst [smem:[#allocation20_spill]] %s3676_s8  ;;  %s3081_s11 = sshll.u32 %s3590_s27, 8 }
  0x15   : > { %p3686_p6 = pnand %p3161_p4, %p47_p5  ;;  %s286_s13 = sand.u32 1, %s3590_s27  }
  0x16   : > { %s7002_s1 = sld [smem:[#allocation76_spill]]  ;;  %s290_s18 = scalar_lea.vmem [#allocation5], %s2808_s10 }
  0x17   : > { %s298_s19 = sshll.u32 %s290_s18, 4  ;;  %s3698_s20 = scalar_lea.sflag [#allocation6], %s286_s13  ;;  %s299_s19 = int_to_ptr.vmem [resolvable:$true] %s298_s19 }
  0x18   : > { %p3368_p8 = pneg %p3686_p6 }
  0x1c   : > { %s295_s16 = scalar_lea.hbm %s7002_s1, %s3081_s11  ;;  %s3371_s30 = scalar_lea.hbm %s7002_s1, 512 }
  0x1d   : > { %s296_s17 = sshll.u32 %s295_s16, 4  ;;  %s297_s17 = int_to_ptr.hbm [resolvable:$true] %s296_s17 }
  0x1e   : > { %s3364_s21 = sshra.s32 %s297_s17, 4  ;;  %s3365_s21 = int_to_ptr.hbm [resolvable:$true] %s3364_s21 }
  0x1f   : > { %s3366_s22 = scalar_lea.hbm %s3365_s21, 256  ;;  %p3372_p11 = scmp.lt.s32.totalorder %s3365_s21, %s7002_s1 }
  0x20   : > { %p3367_p7 = scmp.ne.s32.totalorder %s3365_s21, %s3366_s22  ;;  %p3373_p12 = scmp.lt.s32.totalorder %s3371_s30, %s3366_s22 }
  0x22   : > { %p3369_p9 = pnand %p3368_p8, %p3367_p7  ;;  %p3374_p13 = por %p3373_p12, %p3372_p11 }
  0x24   : > { %p3370_p10 = pneg %p3369_p9 }
  0x26   : > { %p3375_p1 = pnand %p3374_p13, %p3370_p10 }
  0x28   : > { %3378 = shalt.err (!%p3375_p1)
}
  0x29   : > { %s6843_s13 = smov 512   ;;  %s6845_s16 = smov 32  }
  0x2a   : > { %3149 = dma.hbm_to_vmem [thread:$0]  (!%p3686_p6), %s297_s17, 4096, %s299_s19, %s3698_s20, %s6843_s13, %s6843_s13, %s6845_s16  }
  0x2b   : > { %s3718_s18 = sadd.s32 4294967295, %s3590_s27   ;;  %s2804_s21 = sadd.s32 4294967294, %s3590_s27  }
  0x2c   : > { %p51_p2 = scmp.ne.s32.totalorder %s3582_s25, %s3578_s24  ;;  %p52_p4 = scmp.eq.s32.totalorder %s3718_s18, 0 }
  0x2d   : > { %p195_p5 = scmp.eq.s32.totalorder %s3718_s18, 1  ;;  %p201_p7 = scmp.eq.s32.totalorder %s2804_s21, 1 }
  0x2e   : > { %p3727_p9 = por %p52_p4, %p51_p2  ;;  %p2805_p10 = scmp.ge.s32.totalorder %s3590_s27, 1 }
  0x2f   : > { %p3735_p11 = por %p195_p5, %p45_p0  ;;  %p3739_p12 = por %p201_p7, %p51_p2 }
  0x30   : > { %p234_p13 = scmp.lt.s32.totalorder %s3590_s27, 3  ;;  %s7007_s5 = sld [smem:[#allocation77_spill]] }
  0x31   : > { %s7005_s19 = scalar_select %p3739_p12, 1, 0 }
  0x32   : > { %p3747_p1 = pnand %p2805_p10, %p234_p13  ;;  %s3594_s15 = smov [#allocation8]  }
  0x33   : > { %7006 = sst [smem:[#allocation21_spill]] %s7005_s19  ;;  %s250_s21 = sshll.u32 %s3594_s15, 4  ;;  %s251_s21 = int_to_ptr.vmem [resolvable:$true] %s250_s21 }
  0x34   : > { %p3139_p0 = pneg %p3747_p1  ;;  %s273_s23 = scalar_lea.hbm %s6835_s0, %s3081_s11 }
  0x35   : > { %s268_s29 = scalar_lea.vmem [#allocation2], %s2808_s10  ;;  %s3595_s8 = smov 256  }
  0x36   : > { %s248_s30 = sshll.u32 %s7007_s5, 4  ;;  %p3140_p2 = pnand %p3139_p0, %p52_p4  ;;  %s249_s30 = int_to_ptr.hbm [resolvable:$true] %s248_s30 }
  0x37   : > { %s276_s1 = sshll.u32 %s268_s29, 4  ;;  %s274_s5 = sshll.u32 %s273_s23, 4  ;;  %s275_s5 = int_to_ptr.hbm [resolvable:$true] %s274_s5  ;;  %s277_s1 = int_to_ptr.vmem [resolvable:$true] %s276_s1 }
  0x38   : > { %s3596_s26 = smov 16   ;;  %s265_s15 = scalar_lea.sflag [#allocation3], %s3682_s9 }
  0x39   : > { %3142 = dma.hbm_to_vmem [thread:$0]  (!%p3140_p2), %s249_s30, 4096, %s251_s21, [#allocation9], %s3595_s8, %s3595_s8, %s3596_s26  }
  0x3a   : > { %s3424_s28 = sshra.s32 %s275_s5, 4  ;;  %s3431_s10 = scalar_lea.hbm %s6835_s0, 512  ;;  %s3425_s28 = int_to_ptr.hbm [resolvable:$true] %s3424_s28 }
  0x3b   : > { %s3426_s19 = scalar_lea.hbm %s3425_s28, 256  ;;  %p3432_p13 = scmp.lt.s32.totalorder %s3425_s28, %s6835_s0 }
  0x3c   : > { %p3427_p5 = scmp.ne.s32.totalorder %s3425_s28, %s3426_s19  ;;  %p3433_p0 = scmp.lt.s32.totalorder %s3431_s10, %s3426_s19 }
  0x3e   : > { %p3429_p7 = pnand %p3427_p5, %p3368_p8  ;;  %p3434_p2 = por %p3433_p0, %p3432_p13 }
  0x40   : > { %p3430_p10 = pneg %p3429_p7 }
  0x42   : > { %p3435_p3 = pnand %p3434_p2, %p3430_p10 }
  0x44   : > { %3438 = shalt.err (!%p3435_p3)
}
  0x45   : > { %s7009_s26 = smov 32   ;;  %s7010_s8 = smov 512  }
  0x46   : > { %3146 = dma.hbm_to_vmem [thread:$0]  (!%p3686_p6), %s275_s5, 4096, %s277_s1, %s265_s15, %s7010_s8, %s7010_s8, %s7009_s26  }
  0x47   : > { %s3120_s30 = smul.u32 768, %s3682_s9  ;;  %s3461_s9 = scalar_lea.hbm %s6837_s2, 1536 }
  0x48   : > { %s3121_s21 = smul.u32 768, %s3590_s27 }
  0x49   : > { %s312_s28 = scalar_lea.vmem [#allocation7], %s3120_s30 }
  0x4a   : > { %s317_s11 = scalar_lea.hbm %s6837_s2, %s3121_s21  ;;  %s320_s19 = sshll.u32 %s312_s28, 4  ;;  %s321_s19 = int_to_ptr.vmem [resolvable:$true] %s320_s19 }
  0x4b   : > { %s318_s10 = sshll.u32 %s317_s11, 4  ;;  %s319_s10 = int_to_ptr.hbm [resolvable:$true] %s318_s10 }
  0x4c   : > { %s3454_s16 = sshra.s32 %s319_s10, 4  ;;  %s3455_s16 = int_to_ptr.hbm [resolvable:$true] %s3454_s16 }
  0x4d   : > { %s3456_s23 = scalar_lea.hbm %s3455_s16, 768  ;;  %p3462_p10 = scmp.lt.s32.totalorder %s3455_s16, %s6837_s2 }
  0x4e   : > { %p3457_p3 = scmp.ne.s32.totalorder %s3455_s16, %s3456_s23  ;;  %p3463_p13 = scmp.lt.s32.totalorder %s3461_s9, %s3456_s23 }
  0x50   : > { %p3459_p5 = pnand %p3457_p3, %p3368_p8  ;;  %p3464_p0 = por %p3463_p13, %p3462_p10 }
  0x52   : > { %p3460_p7 = pneg %p3459_p5 }
  0x54   : > { %p3465_p2 = pnand %p3464_p0, %p3460_p7 }
  0x56   : > { %3468 = shalt.err (!%p3465_p2)
}
  0x57   : > { %3152 = dma.hbm_to_vmem [thread:$0]  (!%p3686_p6), %s319_s10, 12288, %s321_s19, %s3698_s20, %s7010_s8, %s7010_s8, %s7009_s26  }
  0x58   : > { %340 = sbr.rel (%p3747_p1) target bundleno = 1527 (0x5f7), region = 44 }
  0x5d   : > { %s3800_s30 = sand.u32 1, %s3582_s25  }
  0x5e   : > { %s2816_s21 = sshll.u32 %s3800_s30, 8  ;;  %s343_s13 = scalar_lea.sflag [#allocation3], %s3800_s30 }
  0x5f   : > { %s3804_s11 = scalar_lea.vmem [#allocation2], %s2816_s21 }
  0x60   : > { %3557 = dma.done.wait (%p3727_p9), %s343_s13, 4096  }
  0x61   : > { %3559 = vsyncadd (%p3727_p9), %s343_s13, 4294963200  ;;  %s352_s12 = sand.u32 1, %s3718_s18   ;;  %s3811_s14 = scalar_lea.vmem [#allocation5], %s2816_s21 }
  0x62   : > { %s353_s20 = scalar_lea.sflag [#allocation6], %s352_s12 }
  0x63   : > { %3561 = dma.done.wait (%p3727_p9), %s353_s20, 16384  }
  0x64   : > { %3563 = vsyncadd (%p3727_p9), %s353_s20, 4294950912  ;;  %s3818_s26 = smul.u32 768, %s3800_s30 }
  0x66   : > { %s3821_s8 = scalar_lea.vmem [#allocation7], %s3818_s26 }
  0x67   : > { %3565 = dma.done.wait (%p52_p4), [#allocation9], 4096  }
  0x68   : > { %3567 = vsyncadd (%p52_p4), [#allocation9], 4294963200  ;;  %p423_p6 = scmp.lt.s32.totalorder %s3718_s18, 1  ;;  %v6851_v2 = vmov 0.0   ;;  %s3598_s23 = smov 1   ;;  %v429_v6 = vlaneseq }
  0x69   : > { %s3599_s1 = smov 127   ;;  %s2596_s9 = scalar_lea.sflag [#allocation4], %s3800_s30 }
  0x6a   : > { %s424_s28 = scalar_select %p423_p6, %s3718_s18, 1  ;;  %v3836_v7 = vand.u32 127, %v429_v6  ;;  %v3839_v11 = vshrl.u32 %v429_v6, 7 }
  0x6b   : > { %s3504_s12 = scalar_lea.hbm %s6841_s6, 1536 }
  0x6c   : > { %s3083_s19 = sshll.u32 %s424_s28, 4  ;;  %vm434_vm2 = vcmp.ge.s32.totalorder %v3836_v7, 1  ;;  %7011 = vst [vmem:[#allocation22_spill] sm:$0xff] %v3839_v11  ;;  %vm435_vm3 = vcmp.lt.s32.totalorder %v3836_v7, 127  ;;  %v3847_v17 = vadd.s32 8, %v3839_v11  ;;  %vm436_vm4 = vcmp.ge.s32.totalorder %v3839_v11, 1 }
  0x6d   : > { %s427_s16 = scalar_lea.vmem %s6838_s3, %s3083_s19  ;;  %vm466_vm6 = vcmp.lt.s32.totalorder %v3839_v11, 1  ;;  %vm475_vm7 = vcmp.lt.s32.totalorder %v3839_v11, 7  ;;  %s5564_s28 = scalar_lea.vmem [#allocation11], %s3818_s26 }
  0x6e   : > { %v440_v0 = vld [vmem:[%s427_s16] sm:$0xff]  ;;  %v441_v1 = vld [vmem:[%s427_s16 + $0x8] sm:$0xff]  ;;  %vm439_vm5 = vcmp.lt.s32.totalorder %v3847_v17, 15 }
  0x6f   : > { %vm442_vm0 = vcmp.gt.f32.partialorder %v440_v0, 0.5  ;;  %vm443_vm1 = vcmp.gt.f32.partialorder %v441_v1, 0.5 }
  0x70   : > { %v2821_v3 = vsel %vm442_vm0, 1.0, %v6851_v2  ;;  %v2822_v4 = vsel %vm443_vm1, 1.0, %v6851_v2 }
  0x71   : > { %v3208_v5 = vpack.i.bf16 %v2822_v4, %v2821_v3 }
  0x73   : > { %3209 = vrot.lane.b32.xlu0 %v3208_v5, %s3598_s23 }
  0x7b   : > { %3214 = vrot.lane.b32.xlu0 %v3208_v5, %s3599_s1 }
  0xe5   : > { %v3210_v8 = vpop.permute.xlu0 %3209 }
  0xe6   : > { %v3212_v9 = vunpack.i.h.bf16 %v3210_v8  ;;  %v3211_v10 = vunpack.i.l.bf16 %v3210_v8 }
  0xe8   : > { %v453_v12 = vsel %vm434_vm2, %v3212_v9, 0.0  ;;  %v452_v13 = vsel %vm434_vm2, %v3211_v10, 0.0 }
  0xe9   : > { %v455_v18 = vadd.f32 %v2822_v4, %v453_v12  ;;  %v454_v19 = vadd.f32 %v2821_v3, %v452_v13 }
  0xed   : > { %v3215_v14 = vpop.permute.xlu0 %3214 }
  0xee   : > { %v3217_v15 = vunpack.i.h.bf16 %v3215_v14  ;;  %v3216_v16 = vunpack.i.l.bf16 %v3215_v14 }
  0xf0   : > { %v461_v20 = vsel %vm435_vm3, %v3217_v15, 0.0  ;;  %v460_v21 = vsel %vm435_vm3, %v3216_v16, 0.0 }
  0xf1   : > { %v462_v22 = vadd.f32 %v460_v21, %v454_v19  ;;  %v463_v23 = vadd.f32 %v461_v20, %v455_v18 }
  0xf3   : > { %v464_v24 = vrot.slane %v462_v22, 7  ;;  %v465_v25 = vrot.slane %v463_v23, 7  ;;  %v473_v26 = vrot.slane %v462_v22, 1  ;;  %v474_v27 = vrot.slane %v463_v23, 1 }
  0xf5   : > { %v467_v28 = vsel %vm466_vm6, %v464_v24, %v465_v25  ;;  %v468_v29 = vsel %vm466_vm6, %v465_v25, %v464_v24  ;;  %v477_v30 = vsel %vm475_vm7, %v474_v27, %v473_v26  ;;  %v476_v35 = vsel %vm475_vm7, %v473_v26, %v474_v27 }
  0xf6   : > { %v469_v31 = vsel %vm436_vm4, %v468_v29, 0.0  ;;  %v472_v32 = vadd.f32 %v467_v28, %v463_v23  ;;  %v479_v33 = vsel %vm439_vm5, %v477_v30, 0.0 }
  0xf7   : > { %v471_v34 = vadd.f32 %v469_v31, %v462_v22 }
  0xf8   : > { %v481_v36 = vadd.f32 %v479_v33, %v472_v32 }
  0xf9   : > { %v480_v37 = vadd.f32 %v476_v35, %v471_v34 }
  0xfa   : > { %vm483_vm8 = vcmp.gt.f32.partialorder %v481_v36, 4.5 }
  0xfb   : > { %vm482_vm9 = vcmp.gt.f32.partialorder %v480_v37, 4.5  ;;  %v2824_v38 = vsel %vm483_vm8, 1.0, %v6851_v2 }
  0xfc   : > { %v2823_v39 = vsel %vm482_vm9, 1.0, %v6851_v2 }
  0xfd   : > { %v3218_v40 = vpack.i.bf16 %v2824_v38, %v2823_v39 }
  0xff   : > { %3219 = vrot.lane.b32.xlu1 %v3218_v40, %s3598_s23 }
 0x107   : > { %3224 = vrot.lane.b32.xlu1 %v3218_v40, %s3599_s1 }
 0x171   : > { %v3220_v41 = vpop.permute.xlu1 %3219 }
 0x172   : > { %v3222_v42 = vunpack.i.h.bf16 %v3220_v41  ;;  %v3221_v43 = vunpack.i.l.bf16 %v3220_v41 }
 0x174   : > { %v493_v44 = vsel %vm434_vm2, %v3222_v42, 0.0  ;;  %v492_v45 = vsel %vm434_vm2, %v3221_v43, 0.0 }
 0x175   : > { %v495_v49 = vadd.f32 %v2824_v38, %v493_v44  ;;  %v494_v50 = vadd.f32 %v2823_v39, %v492_v45 }
 0x179   : > { %v3225_v46 = vpop.permute.xlu1 %3224 }
 0x17a   : > { %v3227_v47 = vunpack.i.h.bf16 %v3225_v46  ;;  %v3226_v48 = vunpack.i.l.bf16 %v3225_v46 }
 0x17c   : > { %v501_v51 = vsel %vm435_vm3, %v3227_v47, 0.0  ;;  %v500_v52 = vsel %vm435_vm3, %v3226_v48, 0.0 }
 0x17d   : > { %v502_v53 = vadd.f32 %v500_v52, %v494_v50  ;;  %v503_v54 = vadd.f32 %v501_v51, %v495_v49 }
 0x17f   : > { %v504_v55 = vrot.slane %v502_v53, 7  ;;  %v505_v56 = vrot.slane %v503_v54, 7  ;;  %v512_v57 = vrot.slane %v502_v53, 1  ;;  %v513_v58 = vrot.slane %v503_v54, 1 }
 0x181   : > { %v506_v59 = vsel %vm466_vm6, %v504_v55, %v505_v56  ;;  %v507_v60 = vsel %vm466_vm6, %v505_v56, %v504_v55  ;;  %v515_v61 = vsel %vm475_vm7, %v513_v58, %v512_v57  ;;  %v514_v3 = vsel %vm475_vm7, %v512_v57, %v513_v58 }
 0x182   : > { %v508_v62 = vsel %vm436_vm4, %v507_v60, 0.0  ;;  %v511_v63 = vadd.f32 %v506_v59, %v503_v54  ;;  %v517_v0 = vsel %vm439_vm5, %v515_v61, 0.0 }
 0x183   : > { %v510_v1 = vadd.f32 %v508_v62, %v502_v53 }
 0x184   : > { %v519_v4 = vadd.f32 %v517_v0, %v511_v63 }
 0x185   : > { %v518_v5 = vadd.f32 %v514_v3, %v510_v1 }
 0x186   : > { %vm521_vm10 = vcmp.gt.f32.partialorder %v519_v4, 4.5 }
 0x187   : > { %vm520_vm11 = vcmp.gt.f32.partialorder %v518_v5, 4.5  ;;  %v2826_v6 = vsel %vm521_vm10, 1.0, %v6851_v2  ;;  %vm1652_vm10 = vcmp.lt.s32.totalorder %v3836_v7, 1 }
 0x188   : > { %v2825_v8 = vsel %vm520_vm11, 1.0, %v6851_v2 }
 0x189   : > { %v3228_v9 = vpack.i.bf16 %v2826_v6, %v2825_v8 }
 0x18b   : > { %3229 = vrot.lane.b32.xlu2 %v3228_v9, %s3598_s23 }
 0x193   : > { %3234 = vrot.lane.b32.xlu2 %v3228_v9, %s3599_s1 }
 0x1e5   : > { %v3230_v10 = vpop.permute.xlu2 %3229 }
 0x1e6   : > { %v3232_v12 = vunpack.i.h.bf16 %v3230_v10  ;;  %v3231_v13 = vunpack.i.l.bf16 %v3230_v10 }
 0x1e8   : > { %v531_v14 = vsel %vm434_vm2, %v3232_v12, 0.0  ;;  %v530_v15 = vsel %vm434_vm2, %v3231_v13, 0.0 }
 0x1e9   : > { %v533_v20 = vadd.f32 %v2826_v6, %v531_v14  ;;  %v532_v21 = vadd.f32 %v2825_v8, %v530_v15 }
 0x1ed   : > { %v3235_v16 = vpop.permute.xlu2 %3234 }
 0x1ee   : > { %v3237_v18 = vunpack.i.h.bf16 %v3235_v16  ;;  %v3236_v19 = vunpack.i.l.bf16 %v3235_v16 }
 0x1f0   : > { %v539_v22 = vsel %vm435_vm3, %v3237_v18, 0.0  ;;  %v538_v23 = vsel %vm435_vm3, %v3236_v19, 0.0 }
 0x1f1   : > { %v540_v24 = vadd.f32 %v538_v23, %v532_v21  ;;  %v541_v25 = vadd.f32 %v539_v22, %v533_v20 }
 0x1f3   : > { %v542_v26 = vrot.slane %v540_v24, 7  ;;  %v543_v27 = vrot.slane %v541_v25, 7  ;;  %v550_v28 = vrot.slane %v540_v24, 1  ;;  %v551_v29 = vrot.slane %v541_v25, 1 }
 0x1f5   : > { %v544_v30 = vsel %vm466_vm6, %v542_v26, %v543_v27  ;;  %v545_v31 = vsel %vm466_vm6, %v543_v27, %v542_v26  ;;  %v553_v32 = vsel %vm475_vm7, %v551_v29, %v550_v28  ;;  %v552_v37 = vsel %vm475_vm7, %v550_v28, %v551_v29 }
 0x1f6   : > { %v546_v33 = vsel %vm436_vm4, %v545_v31, 0.0  ;;  %v549_v34 = vadd.f32 %v544_v30, %v541_v25  ;;  %v555_v35 = vsel %vm439_vm5, %v553_v32, 0.0 }
 0x1f7   : > { %v548_v36 = vadd.f32 %v546_v33, %v540_v24 }
 0x1f8   : > { %v557_v38 = vadd.f32 %v555_v35, %v549_v34 }
 0x1f9   : > { %v556_v39 = vadd.f32 %v552_v37, %v548_v36 }
 0x1fa   : > { %vm559_vm12 = vcmp.gt.f32.partialorder %v557_v38, 4.5 }
 0x1fb   : > { %vm558_vm13 = vcmp.gt.f32.partialorder %v556_v39, 4.5  ;;  %v2828_v40 = vsel %vm559_vm12, 1.0, %v6851_v2 }
 0x1fc   : > { %v2827_v41 = vsel %vm558_vm13, 1.0, %v6851_v2 }
 0x1fd   : > { %v3243_v42 = vpack.i.bf16 %v2828_v40, %v2827_v41 }
 0x1ff   : > { %3244 = vrot.lane.b32.xlu1 %v3243_v42, %s3599_s1  ;;  %3239 = vrot.lane.b32.xlu0 %v3243_v42, %s3598_s23 }
 0x271   : > { %v3245_v43 = vpop.permute.xlu1 %3244  ;;  %v3240_v44 = vpop.permute.xlu0 %3239 }
 0x272   : > { %v3247_v45 = vunpack.i.h.bf16 %v3245_v43  ;;  %v3246_v46 = vunpack.i.l.bf16 %v3245_v43  ;;  %v3242_v47 = vunpack.i.h.bf16 %v3240_v44  ;;  %v3241_v48 = vunpack.i.l.bf16 %v3240_v44 }
 0x274   : > { %v569_v49 = vsel %vm434_vm2, %v3242_v47, 0.0  ;;  %v568_v50 = vsel %vm434_vm2, %v3241_v48, 0.0  ;;  %v577_v53 = vsel %vm435_vm3, %v3247_v45, 0.0  ;;  %v576_v54 = vsel %vm435_vm3, %v3246_v46, 0.0 }
 0x275   : > { %v571_v51 = vadd.f32 %v2828_v40, %v569_v49  ;;  %v570_v52 = vadd.f32 %v2827_v41, %v568_v50 }
 0x277   : > { %v579_v55 = vadd.f32 %v577_v53, %v571_v51  ;;  %v578_v56 = vadd.f32 %v576_v54, %v570_v52 }
 0x279   : > { %v581_v57 = vrot.slane %v579_v55, 7  ;;  %v589_v58 = vrot.slane %v579_v55, 1  ;;  %v580_v59 = vrot.slane %v578_v56, 7  ;;  %v588_v60 = vrot.slane %v578_v56, 1 }
 0x27b   : > { %v582_v61 = vsel %vm466_vm6, %v580_v59, %v581_v57  ;;  %v583_v62 = vsel %vm466_vm6, %v581_v57, %v580_v59  ;;  %v591_v63 = vsel %vm475_vm7, %v589_v58, %v588_v60  ;;  %v590_v5 = vsel %vm475_vm7, %v588_v60, %v589_v58 }
 0x27c   : > { %v584_v0 = vsel %vm436_vm4, %v583_v62, 0.0  ;;  %v587_v1 = vadd.f32 %v582_v61, %v579_v55  ;;  %v593_v3 = vsel %vm439_vm5, %v591_v63, 0.0  ;;  %v3974_v55 = vld [vmem:[%s3811_s14] sm:$0xff] }
 0x27d   : > { %v586_v4 = vadd.f32 %v584_v0, %v578_v56  ;;  %7012 = vst [vmem:[#allocation23_spill] sm:$0xff] %v3974_v55 }
 0x27e   : > { %v595_v6 = vadd.f32 %v593_v3, %v587_v1 }
 0x27f   : > { %v594_v8 = vadd.f32 %v590_v5, %v586_v4 }
 0x280   : > { %vm597_vm14 = vcmp.gt.f32.partialorder %v595_v6, 4.5 }
 0x281   : > { %vm596_vm15 = vcmp.gt.f32.partialorder %v594_v8, 4.5  ;;  %v2830_v9 = vsel %vm597_vm14, 1.0, %v6851_v2 }
 0x282   : > { %v2829_v10 = vsel %vm596_vm15, 1.0, %v6851_v2 }
 0x283   : > { %v3253_v12 = vpack.i.bf16 %v2830_v9, %v2829_v10 }
 0x285   : > { %3254 = vrot.lane.b32.xlu0 %v3253_v12, %s3599_s1  ;;  %3249 = vrot.lane.b32.xlu2 %v3253_v12, %s3598_s23 }
 0x2df   : > { %v3250_v13 = vpop.permute.xlu2 %3249 }
 0x2e0   : > { %v3252_v14 = vunpack.i.h.bf16 %v3250_v13  ;;  %v3251_v15 = vunpack.i.l.bf16 %v3250_v13 }
 0x2e2   : > { %v607_v16 = vsel %vm434_vm2, %v3252_v14, 0.0  ;;  %v606_v18 = vsel %vm434_vm2, %v3251_v15, 0.0 }
 0x2e3   : > { %v609_v22 = vadd.f32 %v2830_v9, %v607_v16  ;;  %v608_v23 = vadd.f32 %v2829_v10, %v606_v18  ;;  %v3993_v9 = vld [vmem:[%s3811_s14 + $0x60] sm:$0xff] }
 0x2e4   : > { %7013 = vst [vmem:[#allocation24_spill] sm:$0xff] %v3993_v9  ;;  %v4010_v18 = vld [vmem:[%s3811_s14 + $0xc0] sm:$0xff] }
 0x2f7   : > { %v3255_v19 = vpop.permute.xlu0 %3254 }
 0x2f8   : > { %v3257_v20 = vunpack.i.h.bf16 %v3255_v19  ;;  %v3256_v21 = vunpack.i.l.bf16 %v3255_v19  ;;  %v4015_v19 = vld [vmem:[%s3811_s14 + $0x40] sm:$0xff] }
 0x2f9   : > { %7014 = vst [vmem:[#allocation25_spill] sm:$0xff] %v4015_v19 }
 0x2fa   : > { %v615_v24 = vsel %vm435_vm3, %v3257_v20, 0.0  ;;  %v614_v25 = vsel %vm435_vm3, %v3256_v21, 0.0  ;;  %v4018_v20 = vld [vmem:[%s3811_s14 + $0x20] sm:$0xff]  ;;  %v4025_v21 = vld [vmem:[%s3811_s14 + $0x28] sm:$0xff] }
 0x2fb   : > { %v616_v26 = vadd.f32 %v614_v25, %v608_v23  ;;  %v617_v27 = vadd.f32 %v615_v24, %v609_v22  ;;  %7015 = vst [vmem:[#allocation26_spill] sm:$0xff] %v4018_v20  ;;  %v4030_v22 = vld [vmem:[%s3811_s14 + $0xa0] sm:$0xff]  ;;  %v4040_v24 = vld [vmem:[%s3811_s14 + $0x88] sm:$0xff] }
 0x2fc   : > { %7016 = vst [vmem:[#allocation27_spill] sm:$0xff] %v4025_v21  ;;  %v4033_v23 = vld [vmem:[%s3811_s14 + $0x80] sm:$0xff]  ;;  %v4045_v25 = vld [vmem:[%s3811_s14 + $0x8] sm:$0xff] }
 0x2fd   : > { %v618_v28 = vrot.slane %v616_v26, 7  ;;  %v619_v29 = vrot.slane %v617_v27, 7  ;;  %v626_v30 = vrot.slane %v616_v26, 1  ;;  %v627_v31 = vrot.slane %v617_v27, 1 }
 0x2ff   : > { %v620_v32 = vsel %vm466_vm6, %v618_v28, %v619_v29  ;;  %v621_v33 = vsel %vm466_vm6, %v619_v29, %v618_v28  ;;  %v629_v34 = vsel %vm475_vm7, %v627_v31, %v626_v30  ;;  %v628_v39 = vsel %vm475_vm7, %v626_v30, %v627_v31  ;;  %v4060_v28 = vld [vmem:[%s3811_s14 + $0x68] sm:$0xff]  ;;  %v4070_v30 = vld [vmem:[%s3811_s14 + $0x50] sm:$0xff] }
 0x300   : > { %v622_v35 = vsel %vm436_vm4, %v621_v33, 0.0  ;;  %v625_v36 = vadd.f32 %v620_v32, %v617_v27  ;;  %v631_v37 = vsel %vm439_vm5, %v629_v34, 0.0  ;;  %v4055_v27 = vld [vmem:[%s3811_s14 + $0xe8] sm:$0xff]  ;;  %v4085_v33 = vld [vmem:[%s3811_s14 + $0xb0] sm:$0xff] }
 0x301   : > { %v624_v38 = vadd.f32 %v622_v35, %v616_v26  ;;  %v4048_v26 = vld [vmem:[%s3811_s14 + $0xe0] sm:$0xff]  ;;  %v4063_v29 = vld [vmem:[%s3811_s14 + $0x48] sm:$0xff]  ;;  %v4090_v34 = vld [vmem:[%s3811_s14 + $0x30] sm:$0xff] }
 0x302   : > { %v633_v40 = vadd.f32 %v631_v37, %v625_v36  ;;  %v4075_v31 = vld [vmem:[%s3811_s14 + $0xc8] sm:$0xff]  ;;  %v4093_v35 = vld [vmem:[%s3811_s14 + $0x10] sm:$0xff]  ;;  %v4100_v36 = vld [vmem:[%s3811_s14 + $0x18] sm:$0xff] }
 0x303   : > { %v632_v41 = vadd.f32 %v628_v39, %v624_v38  ;;  %v4078_v32 = vld [vmem:[%s3811_s14 + $0xa8] sm:$0xff]  ;;  %v4105_v37 = vld [vmem:[%s3811_s14 + $0x90] sm:$0xff]  ;;  %v4115_v39 = vld [vmem:[%s3811_s14 + $0x78] sm:$0xff] }
 0x304   : > { %vm635_vm0 = vcmp.gt.f32.partialorder %v633_v40, 4.5  ;;  %v4108_v38 = vld [vmem:[%s3811_s14 + $0x70] sm:$0xff]  ;;  %v2951_v40 = vld [vmem:[#allocation8 + $0xe0] sm:$0xf] }
 0x305   : > { %vm634_vm1 = vcmp.gt.f32.partialorder %v632_v41, 4.5  ;;  %v2832_v42 = vsel %vm635_vm0, 1.0, %v6851_v2  ;;  %v3114_v41 = vld [vmem:[#allocation8 + $0xec] sm:$0xf0] }
 0x306   : > { %v2831_v43 = vsel %vm634_vm1, 1.0, %v6851_v2 }
 0x307   : > { %v3263_v44 = vpack.i.bf16 %v2832_v42, %v2831_v43 }
 0x309   : > { %3264 = vrot.lane.b32.xlu2 %v3263_v44, %s3599_s1  ;;  %3259 = vrot.lane.b32.xlu1 %v3263_v44, %s3598_s23  ;;  %v2953_v44 = vld [vmem:[#allocation8 + $0xf0] sm:$0xf0] }
 0x311   : > { %1588 = vrot.lane.b32.xlu2 %v3974_v55, %s3598_s23 }
 0x319   : > { %1594 = vrot.lane.b32.xlu2 %v3993_v9, %s3598_s23 }
 0x321   : > { %1600 = vrot.lane.b32.xlu2 %v4010_v18, %s3598_s23 }
 0x329   : > { %1606 = vrot.lane.b32.xlu2 %v4025_v21, %s3598_s23 }
 0x331   : > { %1612 = vrot.lane.b32.xlu2 %v4040_v24, %s3598_s23 }
 0x339   : > { %1618 = vrot.lane.b32.xlu2 %v4055_v27, %s3598_s23 }
 0x341   : > { %1624 = vrot.lane.b32.xlu2 %v4070_v30, %s3598_s23 }
 0x349   : > { %1630 = vrot.lane.b32.xlu2 %v4085_v33, %s3598_s23 }
 0x351   : > { %1636 = vrot.lane.b32.xlu2 %v4100_v36, %s3598_s23 }
 0x359   : > { %1642 = vrot.lane.b32.xlu2 %v4115_v39, %s3598_s23 }
 0x363   : > { %v3265_v45 = vpop.permute.xlu2 %3264 }
 0x364   : > { %v3267_v47 = vunpack.i.h.bf16 %v3265_v45  ;;  %v3266_v48 = vunpack.i.l.bf16 %v3265_v45 }
 0x366   : > { %v653_v56 = vsel %vm435_vm3, %v3267_v47, 0.0  ;;  %v652_v57 = vsel %vm435_vm3, %v3266_v48, 0.0  ;;  %v3115_v47 = vld [vmem:[#allocation8 + $0xf4] sm:$0xf0]  ;;  %v3113_v48 = vld [vmem:[#allocation8 + $0xec] sm:$0xf] }
 0x37b   : > { %v3260_v46 = vpop.permute.xlu1 %3259 }
 0x37c   : > { %v3262_v49 = vunpack.i.h.bf16 %v3260_v46  ;;  %v3261_v50 = vunpack.i.l.bf16 %v3260_v46  ;;  %v2959_v46 = vld [vmem:[#allocation8 + $0xe8] sm:$0xf] }
 0x37e   : > { %v645_v51 = vsel %vm434_vm2, %v3262_v49, 0.0  ;;  %v644_v52 = vsel %vm434_vm2, %v3261_v50, 0.0  ;;  %v4120_v49 = vld [vmem:[%s3811_s14 + $0xf0] sm:$0xff]  ;;  %v2960_v50 = vor.u32 %v3115_v47, %v2959_v46  ;;  %v4138_v46 = vld [vmem:[%s3811_s14 + $0x38] sm:$0xff] }
 0x37f   : > { %v647_v53 = vadd.f32 %v2832_v42, %v645_v51  ;;  %v646_v54 = vadd.f32 %v2831_v43, %v644_v52  ;;  %v2952_v42 = vor.u32 %v3114_v41, %v2951_v40  ;;  %v3112_v43 = vld [vmem:[#allocation8 + $0xe4] sm:$0xf]  ;;  %v2961_v51 = vld [vmem:[#allocation8 + $0xf8] sm:$0xf0]  ;;  %v2935_v52 = vld [vmem:[#allocation8 + $0xc0] sm:$0xf] }
 0x380   : > { %v2956_v45 = vor.u32 %v3112_v43, %v2953_v44  ;;  %939 = vmatpush.bf16.msra.mxu2 %v2960_v50  ;;  %v2929_v40 = vld [vmem:[#allocation8 + $0xb8] sm:$0xf0]  ;;  %v2903_v50 = vld [vmem:[#allocation8 + $0x80] sm:$0xf] }
 0x381   : > { %v655_v58 = vadd.f32 %v653_v56, %v647_v53  ;;  %v654_v59 = vadd.f32 %v652_v57, %v646_v54  ;;  %911 = vmatpush.bf16.msra.mxu0 %v2952_v42  ;;  %v3110_v53 = vld [vmem:[#allocation8 + $0xcc] sm:$0xf0]  ;;  %v2964_v54 = vor.u32 %v3113_v48, %v2961_v51  ;;  %v3108_v57 = vld [vmem:[#allocation8 + $0xc4] sm:$0xf]  ;;  %v4145_v47 = vld [vmem:[%s3811_s14 + $0xb8] sm:$0xff] }
 0x382   : > { %925 = vmatpush.bf16.msra.mxu1 %v2956_v45  ;;  %v2936_v56 = vor.u32 %v3110_v53, %v2935_v52  ;;  %v4135_v45 = vld [vmem:[%s3811_s14 + $0x58] sm:$0xff]  ;;  %v3102_v51 = vld [vmem:[#allocation8 + $0x8c] sm:$0xf0]  ;;  %v3100_v52 = vld [vmem:[#allocation8 + $0x84] sm:$0xf] }
 0x383   : > { %v657_v60 = vrot.slane %v655_v58, 7  ;;  %v665_v61 = vrot.slane %v655_v58, 1  ;;  %v656_v62 = vrot.slane %v654_v59, 7  ;;  %v664_v63 = vrot.slane %v654_v59, 1  ;;  %953 = vmatpush.bf16.msra.mxu3 %v2964_v54  ;;  %v4148_v48 = vld [vmem:[%s3811_s14 + $0x98] sm:$0xff] }
 0x384   : > { %7018 = vst [vmem:[#allocation29_spill] sm:$0xff] %v4148_v48  ;;  %v2904_v53 = vor.u32 %v3102_v51, %v2903_v50  ;;  %v2905_v54 = vld [vmem:[#allocation8 + $0x90] sm:$0xf0]  ;;  %v3094_v50 = vld [vmem:[#allocation8 + $0x4c] sm:$0xf0] }
 0x385   : > { %v658_v0 = vsel %vm466_vm6, %v656_v62, %v657_v60  ;;  %v659_v1 = vsel %vm466_vm6, %v657_v60, %v656_v62  ;;  %v667_v3 = vsel %vm475_vm7, %v665_v61, %v664_v63  ;;  %v666_v10 = vsel %vm475_vm7, %v664_v63, %v665_v61  ;;  %v4123_v60 = vld [vmem:[%s3811_s14 + $0xd0] sm:$0xff]  ;;  %v3111_v62 = vld [vmem:[#allocation8 + $0xd4] sm:$0xf0]  ;;  %v3109_v63 = vld [vmem:[#allocation8 + $0xcc] sm:$0xf]  ;;  %912 = vmatpush.bf16.msra.mxu0 %v2936_v56 }
 0x386   : > { %v660_v4 = vsel %vm436_vm4, %v659_v1, 0.0  ;;  %v663_v5 = vadd.f32 %v658_v0, %v655_v58  ;;  %v669_v6 = vsel %vm439_vm5, %v667_v3, 0.0  ;;  %v2937_v58 = vld [vmem:[#allocation8 + $0xd0] sm:$0xf0]  ;;  %v2945_v1 = vld [vmem:[#allocation8 + $0xd8] sm:$0xf0] }
 0x387   : > { %v662_v8 = vadd.f32 %v660_v4, %v654_v59  ;;  %v2943_v59 = vld [vmem:[#allocation8 + $0xc8] sm:$0xf]  ;;  %v2940_v61 = vor.u32 %v3108_v57, %v2937_v58  ;;  %v4126_v3 = vld [vmem:[%s3811_s14 + $0xd8] sm:$0xff]  ;;  %v2948_v4 = vor.u32 %v3109_v63, %v2945_v1  ;;  %v2908_v58 = vor.u32 %v3100_v52, %v2905_v54  ;;  %v3092_v51 = vld [vmem:[#allocation8 + $0x44] sm:$0xf] }
 0x388   : > { %v671_v12 = vadd.f32 %v669_v6, %v663_v5  ;;  %v2944_v0 = vor.u32 %v3111_v62, %v2943_v59  ;;  %7017 = vst [vmem:[#allocation28_spill] sm:$0xff] %v4126_v3  ;;  %v2919_v5 = vld [vmem:[#allocation8 + $0xa0] sm:$0xf]  ;;  %v3106_v6 = vld [vmem:[#allocation8 + $0xac] sm:$0xf0]  ;;  %1648 = vrot.lane.b32.xlu2 %v4126_v3, %s3598_s23  ;;  %v4155_v63 = vld [vmem:[%s3811_s14 + $0xf8] sm:$0xff] }
 0x389   : > { %v670_v13 = vadd.f32 %v666_v10, %v662_v8  ;;  %v3104_v8 = vld [vmem:[#allocation8 + $0xa4] sm:$0xf]  ;;  %v2921_v10 = vld [vmem:[#allocation8 + $0xb0] sm:$0xf0]  ;;  %926 = vmatpush.bf16.msra.mxu1 %v2940_v61  ;;  %954 = vmatpush.bf16.msra.mxu3 %v2948_v4  ;;  %v2920_v41 = vor.u32 %v3106_v6, %v2919_v5  ;;  %v2911_v56 = vld [vmem:[#allocation8 + $0x88] sm:$0xf] }
 0x38a   : > { %vm673_vm8 = vcmp.gt.f32.partialorder %v671_v12, 4.5  ;;  %v2927_v12 = vld [vmem:[#allocation8 + $0xa8] sm:$0xf]  ;;  %940 = vmatpush.bf16.msra.mxu2 %v2944_v0  ;;  %v2924_v42 = vor.u32 %v3104_v8, %v2921_v10  ;;  %v3103_v57 = vld [vmem:[#allocation8 + $0x94] sm:$0xf0]  ;;  %7019 = vst [vmem:[#allocation30_spill] sm:$0xff] %v4155_v63  ;;  %v4157_v0 = vpop.permute.xlu2 %1588 }
 0x38b   : > { %vm672_vm9 = vcmp.gt.f32.partialorder %v670_v13, 4.5  ;;  %v4000_v14 = vsel %vm673_vm8, 1.0, %v6851_v2  ;;  %v3107_v13 = vld [vmem:[#allocation8 + $0xb4] sm:$0xf0]  ;;  %913 = vmatpush.bf16.msra.mxu0 %v2920_v41  ;;  %v2912_v59 = vor.u32 %v3103_v57, %v2911_v56  ;;  %v3101_v61 = vld [vmem:[#allocation8 + $0x8c] sm:$0xf] }
 0x38c   : > { %v4003_v15 = vsel %vm672_vm9, 1.0, %v6851_v2  ;;  %v2928_v43 = vor.u32 %v3107_v13, %v2927_v12  ;;  %v2913_v62 = vld [vmem:[#allocation8 + $0x98] sm:$0xf0]  ;;  %v2887_v4 = vld [vmem:[#allocation8 + $0x60] sm:$0xf] }
 0x38d   : > { %v3273_v16 = vpack.i.bf16 %v4000_v14, %v4003_v15  ;;  %927 = vmatpush.bf16.msra.mxu1 %v2924_v42  ;;  %v2916_v1 = vor.u32 %v3101_v61, %v2913_v62  ;;  %v3098_v5 = vld [vmem:[#allocation8 + $0x6c] sm:$0xf0]  ;;  %v3096_v6 = vld [vmem:[#allocation8 + $0x64] sm:$0xf]  ;;  %v2889_v10 = vld [vmem:[#allocation8 + $0x70] sm:$0xf0] }
 0x38e   : > { %941 = vmatpush.bf16.msra.mxu2 %v2928_v43  ;;  %v2888_v8 = vor.u32 %v3098_v5, %v2887_v4  ;;  %v2895_v12 = vld [vmem:[#allocation8 + $0x68] sm:$0xf]  ;;  %v3099_v13 = vld [vmem:[#allocation8 + $0x74] sm:$0xf0]  ;;  %v3097_v41 = vld [vmem:[#allocation8 + $0x6c] sm:$0xf] }
 0x38f   : > { %3274 = vrot.lane.b32.xlu1 %v3273_v16, %s3599_s1  ;;  %3269 = vrot.lane.b32.xlu0 %v3273_v16, %s3598_s23  ;;  %v3105_v16 = vld [vmem:[#allocation8 + $0xac] sm:$0xf]  ;;  %v2897_v42 = vld [vmem:[#allocation8 + $0x78] sm:$0xf0]  ;;  %v2879_v54 = vld [vmem:[#allocation8 + $0x48] sm:$0xf] }
 0x390   : > { %v2932_v44 = vor.u32 %v3105_v16, %v2929_v40  ;;  %914 = vmatpush.bf16.msra.mxu0 %v2904_v53  ;;  %v2892_v16 = vor.u32 %v3096_v6, %v2889_v10  ;;  %v2896_v40 = vor.u32 %v3099_v13, %v2895_v12  ;;  %v2900_v43 = vor.u32 %v3097_v41, %v2897_v42  ;;  %v2873_v53 = vld [vmem:[#allocation8 + $0x50] sm:$0xf0]  ;;  %v3095_v56 = vld [vmem:[#allocation8 + $0x54] sm:$0xf0]  ;;  %v2881_v61 = vld [vmem:[#allocation8 + $0x58] sm:$0xf0] }
 0x391   : > { %928 = vmatpush.bf16.msra.mxu1 %v2908_v58  ;;  %v2876_v57 = vor.u32 %v3092_v51, %v2873_v53  ;;  %v2880_v58 = vor.u32 %v3095_v56, %v2879_v54  ;;  %v3090_v4 = vld [vmem:[#allocation8 + $0x2c] sm:$0xf0]  ;;  %v3088_v5 = vld [vmem:[#allocation8 + $0x24] sm:$0xf]  ;;  %v2857_v10 = vld [vmem:[#allocation8 + $0x30] sm:$0xf0] }
 0x392   : > { %955 = vmatpush.bf16.msra.mxu3 %v2932_v44  ;;  %942 = vmatpush.bf16.msra.mxu2 %v2912_v59  ;;  %v2871_v44 = vld [vmem:[#allocation8 + $0x40] sm:$0xf]  ;;  %v3093_v59 = vld [vmem:[#allocation8 + $0x4c] sm:$0xf]  ;;  %v4161_v6 = vpop.permute.xlu2 %1594  ;;  %v2863_v12 = vld [vmem:[#allocation8 + $0x28] sm:$0xf] }
 0x393   : > { %v2872_v52 = vor.u32 %v3094_v50, %v2871_v44  ;;  %v2884_v62 = vor.u32 %v3093_v59, %v2881_v61  ;;  %v3091_v13 = vld [vmem:[#allocation8 + $0x34] sm:$0xf0]  ;;  %v3089_v41 = vld [vmem:[#allocation8 + $0x2c] sm:$0xf]  ;;  %v2865_v42 = vld [vmem:[#allocation8 + $0x38] sm:$0xf0] }
 0x394   : > { %915 = vmatpush.bf16.msra.mxu0 %v2888_v8  ;;  %v2839_v44 = vld [vmem:[#allocation8] sm:$0xf]  ;;  %v3086_v50 = vld [vmem:[#allocation8 + $0xc] sm:$0xf0]  ;;  %v3084_v51 = vld [vmem:[#allocation8 + $0x4] sm:$0xf] }
 0x395   : > { %929 = vmatpush.bf16.msra.mxu1 %v2892_v16  ;;  %v2860_v16 = vor.u32 %v3088_v5, %v2857_v10  ;;  %v2841_v53 = vld [vmem:[#allocation8 + $0x10] sm:$0xf0]  ;;  %v2847_v54 = vld [vmem:[#allocation8 + $0x8] sm:$0xf]  ;;  %v3087_v56 = vld [vmem:[#allocation8 + $0x14] sm:$0xf0] }
 0x396   : > { %956 = vmatpush.bf16.msra.mxu3 %v2916_v1  ;;  %943 = vmatpush.bf16.msra.mxu2 %v2896_v40  ;;  %v2855_v1 = vld [vmem:[#allocation8 + $0x20] sm:$0xf]  ;;  %v2864_v40 = vor.u32 %v3091_v13, %v2863_v12  ;;  %v3085_v59 = vld [vmem:[#allocation8 + $0xc] sm:$0xf]  ;;  %v2849_v61 = vld [vmem:[#allocation8 + $0x18] sm:$0xf0] }
 0x397   : > { %1592 = vrot.lane.b32.xlu1 %v4015_v19, %s3598_s23  ;;  %1590 = vrot.lane.b32.xlu0 %v4018_v20, %s3598_s23  ;;  %v2856_v8 = vor.u32 %v3090_v4, %v2855_v1 }
 0x398   : > { %916 = vmatpush.bf16.msra.mxu0 %v2872_v52  ;;  %v2840_v52 = vor.u32 %v3086_v50, %v2839_v44 }
 0x399   : > { %930 = vmatpush.bf16.msra.mxu1 %v2876_v57  ;;  %v2844_v57 = vor.u32 %v3084_v51, %v2841_v53 }
 0x39a   : > { %957 = vmatpush.bf16.msra.mxu3 %v2900_v43  ;;  %944 = vmatpush.bf16.msra.mxu2 %v2880_v58  ;;  %v2868_v43 = vor.u32 %v3089_v41, %v2865_v42  ;;  %v2848_v58 = vor.u32 %v3087_v56, %v2847_v54  ;;  %v4163_v1 = vpop.permute.xlu2 %1600 }
 0x39c   : > { %917 = vmatpush.bf16.msra.mxu0 %v2856_v8 }
 0x39d   : > { %931 = vmatpush.bf16.msra.mxu1 %v2860_v16 }
 0x39e   : > { %958 = vmatpush.bf16.msra.mxu3 %v2884_v62  ;;  %945 = vmatpush.bf16.msra.mxu2 %v2864_v40  ;;  %v2852_v62 = vor.u32 %v3085_v59, %v2849_v61 }
 0x39f   : > { %1598 = vrot.lane.b32.xlu1 %v4030_v22, %s3598_s23  ;;  %1596 = vrot.lane.b32.xlu0 %v4033_v23, %s3598_s23 }
 0x3a0   : > { %918 = vmatpush.bf16.msra.mxu0 %v2840_v52 }
 0x3a1   : > { %932 = vmatpush.bf16.msra.mxu1 %v2844_v57 }
 0x3a2   : > { %959 = vmatpush.bf16.msra.mxu3 %v2868_v43  ;;  %946 = vmatpush.bf16.msra.mxu2 %v2848_v58  ;;  %v4165_v16 = vpop.permute.xlu2 %1606 }
 0x3a6   : > { %960 = vmatpush.bf16.msra.mxu3 %v2852_v62 }
 0x3a7   : > { %1604 = vrot.lane.b32.xlu1 %v4045_v25, %s3598_s23  ;;  %1602 = vrot.lane.b32.xlu0 %v4048_v26, %s3598_s23 }
 0x3af   : > { %1610 = vrot.lane.b32.xlu1 %v4060_v28, %s3598_s23  ;;  %1608 = vrot.lane.b32.xlu0 %v4063_v29, %s3598_s23 }
 0x3b7   : > { %1616 = vrot.lane.b32.xlu1 %v4075_v31, %s3598_s23  ;;  %1614 = vrot.lane.b32.xlu0 %v4078_v32, %s3598_s23 }
 0x3bf   : > { %1622 = vrot.lane.b32.xlu1 %v4090_v34, %s3598_s23  ;;  %1620 = vrot.lane.b32.xlu0 %v4093_v35, %s3598_s23 }
 0x3c7   : > { %1628 = vrot.lane.b32.xlu1 %v4105_v37, %s3598_s23  ;;  %1626 = vrot.lane.b32.xlu0 %v4108_v38, %s3598_s23 }
 0x3cf   : > { %1634 = vrot.lane.b32.xlu1 %v4120_v49, %s3598_s23  ;;  %1632 = vrot.lane.b32.xlu0 %v4123_v60, %s3598_s23 }
 0x3d7   : > { %1640 = vrot.lane.b32.xlu1 %v4135_v45, %s3598_s23  ;;  %1638 = vrot.lane.b32.xlu0 %v4138_v46, %s3598_s23 }
 0x3df   : > { %1646 = vrot.lane.b32.xlu1 %v4145_v47, %s3598_s23  ;;  %1644 = vrot.lane.b32.xlu0 %v4148_v48, %s3598_s23 }
 0x3e7   : > { %1650 = vrot.lane.b32.xlu0 %v4155_v63, %s3598_s23 }
 0x401   : > { %v3275_v4 = vpop.permute.xlu1 %3274  ;;  %v3270_v5 = vpop.permute.xlu0 %3269 }
 0x402   : > { %v3277_v8 = vunpack.i.h.bf16 %v3275_v4  ;;  %v3276_v10 = vunpack.i.l.bf16 %v3275_v4  ;;  %v3272_v12 = vunpack.i.h.bf16 %v3270_v5  ;;  %v3271_v13 = vunpack.i.l.bf16 %v3270_v5 }
 0x404   : > { %v683_v40 = vsel %vm434_vm2, %v3272_v12, 0.0  ;;  %v682_v41 = vsel %vm434_vm2, %v3271_v13, 0.0  ;;  %v691_v44 = vsel %vm435_vm3, %v3277_v8, 0.0  ;;  %v690_v50 = vsel %vm435_vm3, %v3276_v10, 0.0  ;;  %v4189_v8 = vpop.permute.xlu2 %1612 }
 0x405   : > { %v685_v42 = vadd.f32 %v4000_v14, %v683_v40  ;;  %v684_v43 = vadd.f32 %v4003_v15, %v682_v41 }
 0x407   : > { %v693_v51 = vadd.f32 %v691_v44, %v685_v42  ;;  %v692_v52 = vadd.f32 %v690_v50, %v684_v43 }
 0x409   : > { %v695_v53 = vrot.slane %v693_v51, 7  ;;  %v703_v54 = vrot.slane %v693_v51, 1  ;;  %v694_v56 = vrot.slane %v692_v52, 7  ;;  %v702_v57 = vrot.slane %v692_v52, 1  ;;  %v4177_v58 = vpop.permute.xlu1 %1592  ;;  %v1591_v59 = vpop.permute.xlu0 %1590 }
 0x40a   : > { %v1670_v63 = vsel %vm1652_vm10, %v1591_v59, %v4165_v16 }
 0x40b   : > { %v696_v14 = vsel %vm466_vm6, %v694_v56, %v695_v53  ;;  %v697_v15 = vsel %vm466_vm6, %v695_v53, %v694_v56  ;;  %v705_v61 = vsel %vm475_vm7, %v703_v54, %v702_v57  ;;  %v704_v12 = vsel %vm475_vm7, %v702_v57, %v703_v54 }
 0x40c   : > { %v698_v62 = vsel %vm436_vm4, %v697_v15, 0.0  ;;  %v701_v4 = vadd.f32 %v696_v14, %v693_v51  ;;  %v707_v5 = vsel %vm439_vm5, %v705_v61, 0.0  ;;  %v4206_v53 = vpop.permute.xlu2 %1618  ;;  %vm1749_vm5 = vcmp.gt.s32.totalorder %v3836_v7, 0 }
 0x40d   : > { %v700_v10 = vadd.f32 %v698_v62, %v692_v52  ;;  %vm1758_vm9 = vcmp.ne.s32.totalorder %v4025_v21, %v1670_v63 }
 0x40e   : > { %v709_v13 = vadd.f32 %v707_v5, %v701_v4 }
 0x40f   : > { %v708_v40 = vadd.f32 %v704_v12, %v700_v10 }
 0x410   : > { %vm711_vm2 = vcmp.gt.f32.partialorder %v709_v13, 4.5 }
 0x411   : > { %v4194_v41 = vpop.permute.xlu1 %1598  ;;  %v4196_v42 = vpop.permute.xlu0 %1596  ;;  %vm710_vm4 = vcmp.gt.f32.partialorder %v708_v40, 4.5  ;;  %v2836_v43 = vsel %vm711_vm2, 1.0, %v6851_v2 }
 0x412   : > { %v2835_v17 = vsel %vm710_vm4, 1.0, %v6851_v2  ;;  %v717_v44 = vsub.f32 1.0, %v2836_v43  ;;  %v4204_v50 = vsel %vm1652_vm10, %v4196_v42, %v4189_v8 }
 0x413   : > { %v716_v51 = vsub.f32 1.0, %v2835_v17 }
 0x414   : > { %v4212_v57 = vpop.permute.xlu2 %1624 }
 0x415   : > { %v718_v52 = vpack.c.bf16 %v717_v44, %v716_v51 }
 0x417   : > { %919 = vmatmul.bf16.vlgmr.msra.gmra.mxu0 %v718_v52  ;;  %933 = vmatmul.bf16.vlgmr.msra.gmra.mxu1 %v718_v52 }
 0x418   : > { %947 = vmatmul.bf16.vlgmr.msra.gmra.mxu2 %v718_v52  ;;  %961 = vmatmul.bf16.vlgmr.msra.gmra.mxu3 %v718_v52 }
 0x419   : > { %v4208_v54 = vpop.permute.xlu1 %1604  ;;  %v4210_v56 = vpop.permute.xlu0 %1602 }
 0x41c   : > { %v4222_v4 = vpop.permute.xlu2 %1630 }
 0x421   : > { %v4214_v14 = vpop.permute.xlu1 %1610  ;;  %v4216_v15 = vpop.permute.xlu0 %1608 }
 0x424   : > { %v4228_v12 = vpop.permute.xlu2 %1636 }
 0x425   : > { %v1677_v52 = vsel %vm1652_vm10, %v4228_v12, %v4157_v0 }
 0x426   : > { %vm1753_vm12 = vcmp.ne.s32.totalorder %v3974_v55, %v1677_v52  ;;  %v1669_v55 = vsel %vm1652_vm10, %v4157_v0, %v4208_v54 }
 0x427   : > { %vm1785_vm14 = vmand %vm1749_vm5, %vm1753_vm12  ;;  %vm1754_vm2 = vcmp.ne.s32.totalorder %v4045_v25, %v1669_v55 }
 0x429   : > { %v4218_v61 = vpop.permute.xlu1 %1616  ;;  %v4220_v62 = vpop.permute.xlu0 %1614 }
 0x42c   : > { %v4234_v43 = vpop.permute.xlu2 %1642 }
 0x42d   : > { %v1680_v51 = vsel %vm1652_vm10, %v4234_v43, %v4161_v6 }
 0x42e   : > { %vm1765_vm11 = vcmp.ne.s32.totalorder %v3993_v9, %v1680_v51  ;;  %v7020_v9 = vmov 0.0  }
 0x42f   : > { %vm1797_vm13 = vmand %vm1749_vm5, %vm1765_vm11  ;;  %v4279_v48 = vsel %vm1785_vm14, 1.0, %v7020_v9  ;;  %v4304_v63 = vsel %vm1754_vm2, 1.0, %v7020_v9 }
 0x430   : > { %v4274_v3 = vsel %vm1797_vm13, 1.0, %v7020_v9  ;;  %7022 = vst [vmem:[#allocation32_spill] sm:$0xff] %v4279_v48 }
 0x431   : > { %v4224_v5 = vpop.permute.xlu1 %1622  ;;  %v4226_v10 = vpop.permute.xlu0 %1620  ;;  %7021 = vst [vmem:[#allocation31_spill] sm:$0xff] %v4274_v3 }
 0x432   : > { %7026 = vst [vmem:[#allocation36_spill] sm:$0xff] %v4304_v63 }
 0x439   : > { %v4230_v13 = vpop.permute.xlu1 %1628  ;;  %v4232_v40 = vpop.permute.xlu0 %1626 }
 0x441   : > { %v4236_v17 = vpop.permute.xlu1 %1634  ;;  %v4238_v44 = vpop.permute.xlu0 %1632 }
 0x449   : > { %v4255_v2 = vpop.permute.xlu1 %1640  ;;  %v4257_v11 = vpop.permute.xlu0 %1638 }
 0x44a   : > { %v1679_v51 = vsel %vm1652_vm10, %v4255_v2, %v4177_v58  ;;  %v1678_v52 = vsel %vm1652_vm10, %v4257_v11, %v1591_v59 }
 0x44b   : > { %vm1761_vm15 = vcmp.ne.s32.totalorder %v4015_v19, %v1679_v51  ;;  %vm1757_vm0 = vcmp.ne.s32.totalorder %v4018_v20, %v1678_v52  ;;  %v4297_v20 = vpop.permute.xlu2 %1648  ;;  %v4301_v19 = vsel %vm1758_vm9, 1.0, %v7020_v9 }
 0x44c   : > { %vm1793_vm1 = vmand %vm1749_vm5, %vm1761_vm15  ;;  %7025 = vst [vmem:[#allocation35_spill] sm:$0xff] %v4301_v19 }
 0x44d   : > { %v4284_v59 = vsel %vm1793_vm1, 1.0, %v7020_v9  ;;  %vm1789_vm8 = vmand %vm1749_vm5, %vm1757_vm0 }
 0x44e   : > { %7023 = vst [vmem:[#allocation33_spill] sm:$0xff] %v4284_v59  ;;  %v4291_v0 = vsel %vm1789_vm8, 1.0, %v7020_v9  ;;  %v3283_v51 = vpack.i.bf16 %v4274_v3, %v4284_v59  ;;  %v1683_v3 = vsel %vm1652_vm10, %v4297_v20, %v4163_v1 }
 0x44f   : > { %7024 = vst [vmem:[#allocation34_spill] sm:$0xff] %v4291_v0  ;;  %v3278_v52 = vpack.i.bf16 %v4291_v0, %v4279_v48  ;;  %v1675_v48 = vsel %vm1652_vm10, %v4163_v1, %v4218_v61  ;;  %v1671_v0 = vsel %vm1652_vm10, %v4177_v58, %v4216_v15  ;;  %v3298_v1 = vpack.i.bf16 %v4301_v19, %v4304_v63 }
 0x450   : > { %3284 = vrot.lane.b32.xlu2 %v3283_v51, %s3599_s1  ;;  %vm1777_vm14 = vcmp.ne.s32.totalorder %v4010_v18, %v1683_v3  ;;  %vm1778_vm0 = vcmp.ne.s32.totalorder %v4075_v31, %v1675_v48  ;;  %vm1762_vm8 = vcmp.ne.s32.totalorder %v4063_v29, %v1671_v0  ;;  %v1665_v63 = vsel %vm1652_vm10, %v4189_v8, %v4230_v13 }
 0x451   : > { %3279 = vrot.lane.b32.xlu1 %v3278_v52, %s3599_s1  ;;  %v4307_v55 = vpop.permute.xlu1 %1646  ;;  %v4309_v21 = vpop.permute.xlu0 %1644  ;;  %v1676_v52 = vsel %vm1652_vm10, %v4210_v56, %v4206_v53  ;;  %vm1809_vm9 = vmand %vm1749_vm5, %vm1777_vm14  ;;  %v4367_v48 = vsel %vm1778_vm0, 1.0, %v7020_v9  ;;  %vm1771_vm14 = vcmp.ne.s32.totalorder %v4105_v37, %v1665_v63 }
 0x452   : > { %v1682_v59 = vsel %vm1652_vm10, %v4307_v55, %v4194_v41  ;;  %v1681_v51 = vsel %vm1652_vm10, %v4309_v21, %v4196_v42  ;;  %v1672_v42 = vsel %vm1652_vm10, %v4161_v6, %v4214_v14  ;;  %vm1782_vm15 = vcmp.ne.s32.totalorder %v4055_v27, %v1676_v52  ;;  %7030 = vst [vmem:[#allocation40_spill] sm:$0xff] %v4367_v48 }
 0x453   : > { %vm1773_vm4 = vcmp.ne.s32.totalorder %v4030_v22, %v1682_v59  ;;  %vm1769_vm11 = vcmp.ne.s32.totalorder %v4033_v23, %v1681_v51  ;;  %vm1766_vm1 = vcmp.ne.s32.totalorder %v4060_v28, %v1672_v42  ;;  %v4364_v3 = vsel %vm1782_vm15, 1.0, %v7020_v9 }
 0x454   : > { %vm1805_vm12 = vmand %vm1749_vm5, %vm1773_vm4  ;;  %7029 = vst [vmem:[#allocation39_spill] sm:$0xff] %v4364_v3  ;;  %v4373_v0 = vsel %vm1766_vm1, 1.0, %v7020_v9  ;;  %v4376_v52 = vsel %vm1762_vm8, 1.0, %v7020_v9  ;;  %v1674_v42 = vsel %vm1652_vm10, %v4194_v41, %v4220_v62  ;;  %v4395_v19 = vsel %vm1809_vm9, 1.0, %v7020_v9 }
 0x455   : > { %v4346_v59 = vsel %vm1805_vm12, 1.0, %v7020_v9  ;;  %vm1801_vm13 = vmand %vm1749_vm5, %vm1769_vm11  ;;  %7031 = vst [vmem:[#allocation41_spill] sm:$0xff] %v4373_v0  ;;  %v1662_v41 = vsel %vm1652_vm10, %v4165_v16, %v4224_v5  ;;  %v3313_v8 = vpack.i.bf16 %v4364_v3, %v4367_v48  ;;  %vm1770_vm11 = vcmp.ne.s32.totalorder %v4040_v24, %v4204_v50 }
 0x456   : > { %7027 = vst [vmem:[#allocation37_spill] sm:$0xff] %v4346_v59  ;;  %v4354_v6 = vsel %vm1801_vm13, 1.0, %v7020_v9  ;;  %v3303_v16 = vpack.i.bf16 %v4373_v0, %v4376_v52  ;;  %vm1774_vm12 = vcmp.ne.s32.totalorder %v4078_v32, %v1674_v42  ;;  %v4427_v50 = vsel %vm1770_vm11, 1.0, %v7020_v9 }
 0x457   : > { %7028 = vst [vmem:[#allocation38_spill] sm:$0xff] %v4354_v6  ;;  %v3288_v58 = vpack.i.bf16 %v4346_v59, %v4354_v6  ;;  %v4430_v42 = vsel %vm1774_vm12, 1.0, %v7020_v9  ;;  %v4436_v63 = vsel %vm1771_vm14, 1.0, %v7020_v9  ;;  %v1686_v0 = vrot.slane %v4045_v25, 7 }
 0x458   : > { %3299 = vrot.lane.b32.xlu2 %v3298_v1, %s3599_s1  ;;  %7032 = vst [vmem:[#allocation42_spill] sm:$0xff] %v4376_v52  ;;  %v7056_v52 = vld [vmem:[#allocation27_spill] sm:$0xff] }
 0x459   : > { %3289 = vrot.lane.b32.xlu0 %v3288_v58, %s3599_s1  ;;  %v4370_v51 = vpop.permute.xlu0 %1650  ;;  %v1666_v58 = vsel %vm1652_vm10, %v4220_v62, %v4222_v4  ;;  %7033 = vst [vmem:[#allocation43_spill] sm:$0xff] %v4427_v50 }
 0x45a   : > { %v1684_v1 = vsel %vm1652_vm10, %v4370_v51, %v4210_v56  ;;  %v1661_v56 = vsel %vm1652_vm10, %v4208_v54, %v4226_v10  ;;  %vm1775_vm13 = vcmp.ne.s32.totalorder %v4085_v33, %v1666_v58  ;;  %7035 = vst [vmem:[#allocation45_spill] sm:$0xff] %v4436_v63 }
 0x45b   : > { %vm1781_vm2 = vcmp.ne.s32.totalorder %v4048_v26, %v1684_v1  ;;  %vm1755_vm15 = vcmp.ne.s32.totalorder %v4093_v35, %v1661_v56  ;;  %v4433_v1 = vsel %vm1775_vm13, 1.0, %v7020_v9  ;;  %v1663_v56 = vsel %vm1652_vm10, %v4216_v15, %v4212_v57 }
 0x45c   : > { %vm1813_vm4 = vmand %vm1749_vm5, %vm1781_vm2  ;;  %vm1759_vm5 = vcmp.ne.s32.totalorder %v4090_v34, %v1662_v41  ;;  %7034 = vst [vmem:[#allocation44_spill] sm:$0xff] %v4433_v1  ;;  %v4443_v41 = vsel %vm1755_vm15, 1.0, %v7020_v9  ;;  %v1668_v15 = vsel %vm1652_vm10, %v4206_v53, %v4236_v17  ;;  %v3328_v48 = vpack.i.bf16 %v4433_v1, %v4436_v63 }
 0x45d   : > { %v4413_v62 = vsel %vm1813_vm4, 1.0, %v7020_v9  ;;  %v4440_v58 = vsel %vm1759_vm5, 1.0, %v7020_v9  ;;  %7037 = vst [vmem:[#allocation47_spill] sm:$0xff] %v4443_v41  ;;  %vm1763_vm0 = vcmp.ne.s32.totalorder %v4070_v30, %v1663_v56  ;;  %vm1783_vm2 = vcmp.ne.s32.totalorder %v4120_v49, %v1668_v15 }
 0x45e   : > { %v3293_v54 = vpack.i.bf16 %v4413_v62, %v4395_v19  ;;  %7036 = vst [vmem:[#allocation46_spill] sm:$0xff] %v4440_v58  ;;  %v4497_v56 = vsel %vm1783_vm2, 1.0, %v7020_v9  ;;  %v1657_v15 = vsel %vm1652_vm10, %v4230_v13, %v4309_v21 }
 0x45f   : > { %7040 = vst [vmem:[#allocation50_spill] sm:$0xff] %v4497_v56 }
 0x460   : > { %3314 = vrot.lane.b32.xlu2 %v3313_v8, %s3599_s1  ;;  %3294 = vrot.lane.b32.xlu1 %v3293_v54, %s3599_s1  ;;  %v1664_v8 = vsel %vm1652_vm10, %v4214_v14, %v4232_v40  ;;  %v1655_v54 = vsel %vm1652_vm10, %v4212_v57, %v4255_v2  ;;  %v1667_v14 = vsel %vm1652_vm10, %v4218_v61, %v4238_v44  ;;  %v4484_v2 = vsel %vm1763_vm0, 1.0, %v7020_v9 }
 0x461   : > { %3304 = vrot.lane.b32.xlu0 %v3303_v16, %s3599_s1  ;;  %v1656_v16 = vsel %vm1652_vm10, %v4232_v40, %v4234_v43  ;;  %v3308_v40 = vpack.i.bf16 %v4430_v42, %v4427_v50  ;;  %v3318_v43 = vpack.i.bf16 %v4440_v58, %v4443_v41  ;;  %vm1767_vm1 = vcmp.ne.s32.totalorder %v4108_v38, %v1664_v8 }
 0x462   : > { %vm1768_vm8 = vcmp.ne.s32.totalorder %v4115_v39, %v1656_v16  ;;  %vm1764_vm9 = vcmp.ne.s32.totalorder %v4135_v45, %v1655_v54  ;;  %vm1779_vm4 = vcmp.ne.s32.totalorder %v4123_v60, %v1667_v14  ;;  %7038 = vst [vmem:[#allocation48_spill] sm:$0xff] %v4484_v2  ;;  %v4487_v53 = vsel %vm1767_vm1, 1.0, %v7020_v9 }
 0x463   : > { %7039 = vst [vmem:[#allocation49_spill] sm:$0xff] %v4487_v53  ;;  %v4490_v57 = vsel %vm1768_vm8, 1.0, %v7020_v9  ;;  %v4493_v61 = vsel %vm1764_vm9, 1.0, %v7020_v9  ;;  %v1653_v8 = vsel %vm1652_vm10, %v4226_v10, %v4228_v12  ;;  %v1654_v16 = vsel %vm1652_vm10, %v4224_v5, %v4257_v11  ;;  %v7042_v11 = vld [vmem:[#allocation29_spill] sm:$0xff] }
 0x464   : > { %v1658_v54 = vsel %vm1652_vm10, %v4222_v4, %v4307_v55  ;;  %v3343_v14 = vpack.i.bf16 %v4490_v57, %v4493_v61  ;;  %v3323_v10 = vpack.i.bf16 %v4487_v53, %v4484_v2  ;;  %vm1756_vm11 = vcmp.ne.s32.totalorder %v4100_v36, %v1653_v8 }
 0x465   : > { %vm1760_vm12 = vcmp.ne.s32.totalorder %v4138_v46, %v1654_v16  ;;  %vm1776_vm13 = vcmp.ne.s32.totalorder %v4145_v47, %v1658_v54  ;;  %vm1772_vm14 = vcmp.ne.s32.totalorder %v7042_v11, %v1657_v15  ;;  %v4531_v21 = vsel %vm1756_vm11, 1.0, %v7020_v9  ;;  %v7047_v16 = vld [vmem:[#allocation28_spill] sm:$0xff]  ;;  %v7048_v54 = vld [vmem:[#allocation30_spill] sm:$0xff] }
 0x466   : > { %7043 = vst [vmem:[#allocation29_spill] sm:$0xff] %v4531_v21  ;;  %v4534_v4 = vsel %vm1760_vm12, 1.0, %v7020_v9  ;;  %v4538_v5 = vsel %vm1776_vm13, 1.0, %v7020_v9  ;;  %v4541_v13 = vsel %vm1772_vm14, 1.0, %v7020_v9  ;;  %v1659_v55 = vsel %vm1652_vm10, %v4238_v44, %v4297_v20 }
 0x467   : > { %7044 = vst [vmem:[#allocation52_spill] sm:$0xff] %v4534_v4  ;;  %v3348_v8 = vpack.i.bf16 %v4538_v5, %v4541_v13  ;;  %vm1780_vm5 = vcmp.ne.s32.totalorder %v7047_v16, %v1659_v55  ;;  %v1690_v41 = vrot.slane %v7056_v52, 7  ;;  %vm999_vm8 = vcmask 130048  }
 0x468   : > { %3329 = vrot.lane.b32.xlu2 %v3328_v48, %s3599_s1  ;;  %3309 = vrot.lane.b32.xlu1 %v3308_v40, %s3599_s1  ;;  %v4500_v48 = vsel %vm1779_vm4, 1.0, %v7020_v9  ;;  %7045 = vst [vmem:[#allocation53_spill] sm:$0xff] %v4538_v5  ;;  %v1660_v40 = vsel %vm1652_vm10, %v4236_v17, %v4370_v51  ;;  %v4559_v15 = vsel %vm1780_vm5, 1.0, %v7020_v9  ;;  %v1710_v53 = vrot.slane %v4075_v31, 7 }
 0x469   : > { %3319 = vrot.lane.b32.xlu0 %v3318_v43, %s3599_s1  ;;  %7041 = vst [vmem:[#allocation51_spill] sm:$0xff] %v4500_v48  ;;  %v3333_v12 = vpack.i.bf16 %v4497_v56, %v4500_v48  ;;  %v3338_v43 = vpack.i.bf16 %v4534_v4, %v4531_v21  ;;  %vm1784_vm15 = vcmp.ne.s32.totalorder %v7048_v54, %v1660_v40  ;;  %v7053_v40 = vld [vmem:[#allocation24_spill] sm:$0xff]  ;;  %v1701_v56 = vrot.slane %v4033_v23, 7  ;;  %v7054_v48 = vld [vmem:[#allocation22_spill] sm:$0xff]  ;;  %v7055_v21 = vld [vmem:[#allocation23_spill] sm:$0xff] }
 0x46a   : > { %7046 = vst [vmem:[#allocation54_spill] sm:$0xff] %v4541_v13  ;;  %v4562_v20 = vsel %vm1784_vm15, 1.0, %v7020_v9 }
 0x46b   : > { %7049 = vst [vmem:[#allocation28_spill] sm:$0xff] %v4559_v15  ;;  %v3353_v17 = vpack.i.bf16 %v4562_v20, %v4559_v15 }
 0x46c   : > { %7050 = vst [vmem:[#allocation30_spill] sm:$0xff] %v4562_v20 }
 0x470   : > { %3344 = vrot.lane.b32.xlu2 %v3343_v14, %s3599_s1  ;;  %3324 = vrot.lane.b32.xlu1 %v3323_v10, %s3599_s1  ;;  %v7051_v14 = vld [vmem:[#allocation25_spill] sm:$0xff] }
 0x471   : > { %3334 = vrot.lane.b32.xlu0 %v3333_v12, %s3599_s1  ;;  %v1693_v10 = vrot.slane %v7051_v14, 7  ;;  %v7052_v12 = vld [vmem:[#allocation26_spill] sm:$0xff] }
 0x472   : > { %v1689_v55 = vrot.slane %v7052_v12, 7 }
 0x474   : > { %v1737_v5 = vsel %vm466_vm6, %v1689_v55, %v1693_v10 }
 0x475   : > { %vm1865_vm10 = vcmp.ne.s32.totalorder %v7051_v14, %v1737_v5 }
 0x478   : > { %3339 = vrot.lane.b32.xlu1 %v3338_v43, %s3599_s1  ;;  %v1697_v43 = vrot.slane %v7053_v40, 7 }
 0x479   : > { %3349 = vrot.lane.b32.xlu0 %v3348_v8, %s3599_s1  ;;  %v1705_v8 = vrot.slane %v4030_v22, 7 }
 0x47a   : > { %v1733_v15 = vsel %vm466_vm6, %v1693_v10, %v1697_v43  ;;  %v1729_v13 = vsel %vm466_vm6, %v1697_v43, %v1701_v56  ;;  %v1709_v10 = vrot.slane %v4010_v18, 7  ;;  %v3116_v43 = vld [vmem:[%s6839_s4] sm:$0xff] }
 0x47b   : > { %v1725_v58 = vsel %vm466_vm6, %v1701_v56, %v1705_v8  ;;  %vm1869_vm0 = vcmp.ne.s32.totalorder %v7053_v40, %v1733_v15  ;;  %vm1873_vm1 = vcmp.ne.s32.totalorder %v4033_v23, %v1729_v13  ;;  %v1694_v56 = vrot.slane %v4063_v29, 7 }
 0x47c   : > { %vm1877_vm9 = vcmp.ne.s32.totalorder %v4030_v22, %v1725_v58  ;;  %v1713_v15 = vrot.slane %v4048_v26, 7  ;;  %v4602_v23 = vsel %vm1869_vm0, 1.0, %v7020_v9  ;;  %v4605_v13 = vsel %vm1873_vm1, 1.0, %v7020_v9 }
 0x47d   : > { %7059 = vst [vmem:[#allocation26_spill] sm:$0xff] %v4602_v23  ;;  %v1721_v22 = vsel %vm466_vm6, %v1705_v8, %v1709_v10  ;;  %v4613_v58 = vsel %vm1877_vm9, 1.0, %v7020_v9  ;;  %v6896_v2 = vrot.slane %v4602_v23, 1 }
 0x47e   : > { %vm1881_vm4 = vcmp.ne.s32.totalorder %v4010_v18, %v1721_v22 }
 0x480   : > { %3354 = vrot.lane.b32.xlu1 %v3353_v17, %s3599_s1 }
 0x494   : > { %v920_v44 = vpop.f32.mrf.mxu0  ;;  %v934_v51 = vpop.f32.mrf.mxu1 }
 0x49b   : > { %v948_v20 = vpop.f32.mrf.mxu2  ;;  %v962_v17 = vpop.f32.mrf.mxu3 }
 0x49c   : > { %v922_v63 = vpop.f32.mrf.mxu0  ;;  %v936_v1 = vpop.f32.mrf.mxu1 }
 0x49d   : > { %v975_v4 = vpack.c.bf16 %v922_v63, %v920_v44  ;;  %v976_v3 = vpack.c.bf16 %v936_v1, %v934_v51  ;;  %v4594_v1 = vsel %vm1865_vm10, 1.0, %v7020_v9  ;;  %v7058_v63 = vrot.slane %v7055_v21, 7 }
 0x49e   : > { %7057 = vst [vmem:[#allocation25_spill] sm:$0xff] %v4594_v1  ;;  %v1738_v44 = vsel %vm466_vm6, %v1690_v41, %v1694_v56  ;;  %v1742_v51 = vsel %vm466_vm6, %v1686_v0, %v1690_v41  ;;  %v1706_v41 = vrot.slane %v4078_v32, 7 }
 0x49f   : > { %1019 = vmatpush.bf16.msrb.mxu0 %v975_v4  ;;  %1048 = vmatpush.bf16.msrb.mxu1 %v976_v3  ;;  %v1741_v5 = vsel %vm466_vm6, %v7058_v63, %v1689_v55  ;;  %v1698_v3 = vrot.slane %v4060_v28, 7  ;;  %v1717_v4 = vsel %vm466_vm6, %v1709_v10, %v1713_v15  ;;  %v6895_v10 = vrot.slane %v4605_v13, 1 }
 0x4a0   : > { %vm1861_vm2 = vcmp.ne.s32.totalorder %v7052_v12, %v1741_v5  ;;  %vm1885_vm11 = vcmp.ne.s32.totalorder %v4048_v26, %v1717_v4  ;;  %vm1862_vm12 = vcmp.ne.s32.totalorder %v7056_v52, %v1742_v51  ;;  %vm1866_vm13 = vcmp.ne.s32.totalorder %v4063_v29, %v1738_v44 }
 0x4a1   : > { %v1734_v40 = vsel %vm466_vm6, %v1694_v56, %v1698_v3  ;;  %v4639_v56 = vsel %vm1881_vm4, 1.0, %v7020_v9  ;;  %v4644_v26 = vsel %vm1861_vm2, 1.0, %v7020_v9  ;;  %v4647_v29 = vsel %vm1885_vm11, 1.0, %v7020_v9 }
 0x4a2   : > { %2981 = vmatmul.msk.bf16.vlgmr.msrb.gmra.mxu0 %vm999_vm8, %v3116_v43  ;;  %2985 = vmatmul.msk.bf16.vlgmr.msrb.gmra.mxu1 %vm999_vm8, %v3116_v43  ;;  %vm1870_vm14 = vcmp.ne.s32.totalorder %v4060_v28, %v1734_v40  ;;  %7060 = vst [vmem:[#allocation24_spill] sm:$0xff] %v4639_v56  ;;  %v4650_v52 = vsel %vm1862_vm12, 1.0, %v7020_v9  ;;  %v4653_v28 = vsel %vm1866_vm13, 1.0, %v7020_v9  ;;  %v4663_v12 = vsel %vm475_vm7, %v6896_v2, %v6895_v10 }
 0x4a3   : > { %v950_v14 = vpop.f32.mrf.mxu2  ;;  %v964_v55 = vpop.f32.mrf.mxu3  ;;  %7061 = vst [vmem:[#allocation22_spill] sm:$0xff] %v4663_v12  ;;  %v4666_v5 = vsel %vm1870_vm14, 1.0, %v7020_v9  ;;  %v1722_v22 = vsel %vm466_vm6, %v1706_v41, %v1710_v53  ;;  %v6901_v4 = vrot.slane %v4093_v35, 7  ;;  %v6898_v40 = vrot.slane %v4647_v29, 1 }
 0x4a4   : > { %v977_v8 = vpack.c.bf16 %v950_v14, %v948_v20  ;;  %v978_v63 = vpack.c.bf16 %v964_v55, %v962_v17  ;;  %v1702_v20 = vrot.slane %v4040_v24, 7  ;;  %7062 = vst [vmem:[#allocation23_spill] sm:$0xff] %v4666_v5  ;;  %v1714_v55 = vrot.slane %v4055_v27, 7 }
 0x4a5   : > { %v1691_v10 = vrot.slane %v4090_v34, 7  ;;  %v7063_v2 = vrot.slane %v7055_v21, 7  ;;  %vm1882_vm5 = vcmp.ne.s32.totalorder %v4075_v31, %v1722_v22  ;;  %v1695_v21 = vrot.slane %v4070_v30, 7 }
 0x4a6   : > { %1077 = vmatpush.bf16.msrb.mxu2 %v977_v8  ;;  %1106 = vmatpush.bf16.msrb.mxu3 %v978_v63  ;;  %v1726_v51 = vsel %vm466_vm6, %v1702_v20, %v1706_v41  ;;  %v1730_v14 = vsel %vm466_vm6, %v1698_v3, %v1702_v20  ;;  %v6900_v8 = vrot.slane %v4650_v52, 1  ;;  %v6899_v63 = vrot.slane %v4653_v28, 1 }
 0x4a7   : > { %v4688_v41 = vsel %vm466_vm6, %v1713_v15, %v7063_v2  ;;  %v1743_v20 = vsel %vm466_vm6, %v6901_v4, %v1691_v10  ;;  %vm1874_vm15 = vcmp.ne.s32.totalorder %v4040_v24, %v1730_v14  ;;  %vm1878_vm10 = vcmp.ne.s32.totalorder %v4078_v32, %v1726_v51  ;;  %v3117_v2 = vld [vmem:[%s6839_s4 + $0x8] sm:$0xff]  ;;  %v3358_v24 = vld [vmem:[%s3811_s14] sm:$0xff] }
 0x4a8   : > { %v1699_v3 = vrot.slane %v4108_v38, 7  ;;  %v1746_v31 = vsel %vm466_vm6, %v1714_v55, %v1686_v0  ;;  %v1707_v22 = vrot.slane %v4085_v33, 7  ;;  %vm1857_vm0 = vcmp.ne.s32.totalorder %v3358_v24, %v4688_v41 }
 0x4a9   : > { %2989 = vmatmul.msk.bf16.vlgmr.msrb.gmra.mxu2 %vm999_vm8, %v3116_v43  ;;  %2993 = vmatmul.msk.bf16.vlgmr.msrb.gmra.mxu3 %vm999_vm8, %v3116_v43  ;;  %v6897_v43 = vrot.slane %v4639_v56, 1  ;;  %v4721_v51 = vsel %vm1882_vm5, 1.0, %v7020_v9  ;;  %v4729_v0 = vsel %vm475_vm7, %v6900_v8, %v6899_v63  ;;  %vm1863_vm1 = vcmp.ne.s32.totalorder %v4090_v34, %v1743_v20 }
 0x4aa   : > { %v4671_v44 = vpop.permute.xlu2 %3284  ;;  %7065 = vst [vmem:[#allocation55_spill] sm:$0xff] %v4721_v51  ;;  %v4734_v15 = vsel %vm1874_vm15, 1.0, %v7020_v9  ;;  %v1718_v18 = vsel %vm466_vm6, %v1710_v53, %v1714_v55  ;;  %vm1858_vm9 = vcmp.ne.s32.totalorder %v4045_v25, %v1746_v31  ;;  %v1739_v63 = vsel %vm466_vm6, %v1691_v10, %v1695_v21 }
 0x4ab   : > { %v4718_v32 = vsel %vm475_vm7, %v6897_v43, %v6898_v40  ;;  %7066 = vst [vmem:[#allocation56_spill] sm:$0xff] %v4729_v0  ;;  %v4737_v43 = vsel %vm1878_vm10, 1.0, %v7020_v9  ;;  %v1703_v40 = vrot.slane %v4105_v37, 7  ;;  %v1696_v8 = vrot.slane %v4135_v45, 7 }
 0x4ac   : > { %7064 = vst [vmem:[#allocation27_spill] sm:$0xff] %v4718_v32  ;;  %v1735_v4 = vsel %vm466_vm6, %v1695_v21, %v1699_v3  ;;  %v6906_v53 = vrot.slane %v7042_v11, 7  ;;  %v1700_v55 = vrot.slane %v4115_v39, 7  ;;  %v6905_v14 = vrot.slane %v4737_v43, 1 }
 0x4ad   : > { %v1727_v37 = vsel %vm466_vm6, %v1703_v40, %v1707_v22  ;;  %vm1849_vm2 = vcmp.gt.s32.totalorder %v7054_v48, 0  ;;  %v7067_v12 = vrot.slane %v4123_v60, 7  ;;  %vm1886_vm4 = vcmp.ne.s32.totalorder %v4055_v27, %v1718_v18 }
 0x4ae   : > { %vm1890_vm11 = vmand %vm1849_vm2, %vm1858_vm9  ;;  %vm1867_vm12 = vcmp.ne.s32.totalorder %v4070_v30, %v1739_v63  ;;  %vm1871_vm13 = vcmp.ne.s32.totalorder %v4108_v38, %v1735_v4  ;;  %vm1879_vm14 = vcmp.ne.s32.totalorder %v4085_v33, %v1727_v37  ;;  %v1692_v27 = vrot.slane %v4138_v46, 7 }
 0x4af   : > { %v1723_v59 = vsel %vm466_vm6, %v1707_v22, %v7067_v12  ;;  %v4777_v12 = vsel %vm1863_vm1, 1.0, %v7020_v9  ;;  %v1732_v25 = vsel %vm466_vm6, %v1700_v55, %v6906_v53  ;;  %v1736_v30 = vsel %vm466_vm6, %v1696_v8, %v1700_v55  ;;  %vm1889_vm1 = vmand %vm1849_vm2, %vm1857_vm0  ;;  %v3359_v53 = vld [vmem:[%s3811_s14 + $0x90] sm:$0xff] }
 0x4b0   : > { %7068 = vst [vmem:[#allocation57_spill] sm:$0xff] %v4777_v12  ;;  %vm1883_vm5 = vcmp.ne.s32.totalorder %v4123_v60, %v1723_v59  ;;  %v7069_v34 = vrot.slane %v4734_v15, 1  ;;  %v4798_v33 = vsel %vm1890_vm11, 1.0, %v7020_v9  ;;  %v4801_v59 = vsel %vm1886_vm4, 1.0, %v7020_v9 }
 0x4b1   : > { %7071 = vst [vmem:[#allocation59_spill] sm:$0xff] %v4801_v59  ;;  %v4804_v18 = vsel %vm1867_vm12, 1.0, %v7020_v9  ;;  %v4807_v4 = vsel %vm1871_vm13, 1.0, %v7020_v9  ;;  %v4810_v63 = vsel %vm1879_vm14, 1.0, %v7020_v9  ;;  %v1708_v20 = vrot.slane %v4145_v47, 7 }
 0x4b2   : > { %v4746_v17 = vpop.permute.xlu2 %3299  ;;  %2982 = vmatmul.msk.bf16.gmra.mxu0 %vm999_vm8, %v3117_v2  ;;  %2986 = vmatmul.msk.bf16.gmra.mxu1 %vm999_vm8, %v3117_v2  ;;  %v4795_v38 = vsel %vm475_vm7, %v7069_v34, %v6905_v14  ;;  %7072 = vst [vmem:[#allocation60_spill] sm:$0xff] %v4810_v63  ;;  %v1688_v31 = vrot.slane %v4100_v36, 7  ;;  %v4817_v22 = vsel %vm1883_vm5, 1.0, %v7020_v9  ;;  %vm1872_vm15 = vcmp.ne.s32.totalorder %v4115_v39, %v1736_v30 }
 0x4b3   : > { %7070 = vst [vmem:[#allocation58_spill] sm:$0xff] %v4795_v38  ;;  %vm1876_vm10 = vcmp.ne.s32.totalorder %v7042_v11, %v1732_v25  ;;  %v1712_v37 = vrot.slane %v7047_v16, 7  ;;  %v4826_v34 = vsel %vm466_vm6, %v1699_v3, %v1703_v40  ;;  %v6908_v36 = vrot.slane %v4801_v59, 1 }
 0x4b4   : > { %7073 = vst [vmem:[#allocation61_spill] sm:$0xff] %v4817_v22  ;;  %v1715_v10 = vrot.slane %v4120_v49, 7  ;;  %v6909_v39 = vrot.slane %v4798_v33, 1  ;;  %v6911_v25 = vrot.slane %v4804_v18, 1  ;;  %v6912_v40 = vrot.slane %v4807_v4, 1 }
 0x4b5   : > { %v1744_v49 = vsel %vm466_vm6, %v1688_v31, %v1692_v27  ;;  %v4847_v41 = vsel %vm1876_vm10, 1.0, %v7020_v9  ;;  %v1716_v24 = vrot.slane %v7048_v54, 7  ;;  %v1724_v21 = vsel %vm466_vm6, %v1708_v20, %v1712_v37 }
 0x4b6   : > { %v4854_v14 = vsel %vm1889_vm1, 1.0, %v7020_v9  ;;  %vm1875_vm9 = vcmp.ne.s32.totalorder %v3359_v53, %v4826_v34  ;;  %v4869_v54 = vsel %vm475_vm7, %v6908_v36, %v6909_v39  ;;  %v7075_v3 = vrot.slane %v4093_v35, 7  ;;  %v3360_v36 = vld [vmem:[%s3811_s14 + $0x10] sm:$0xff] }
 0x4b7   : > { %7074 = vst [vmem:[#allocation62_spill] sm:$0xff] %v4869_v54  ;;  %v4883_v50 = vsel %vm475_vm7, %v6911_v25, %v6912_v40  ;;  %vm1864_vm4 = vcmp.ne.s32.totalorder %v4138_v46, %v1744_v49  ;;  %v7077_v35 = vrot.slane %v4817_v22, 1  ;;  %v7078_v39 = vrot.slane %v4810_v63, 1  ;;  %v3361_v49 = vld [vmem:[%s3811_s14 + $0x18] sm:$0xff] }
 0x4b8   : > { %v4875_v30 = vsel %vm466_vm6, %v1715_v10, %v7075_v3  ;;  %7076 = vst [vmem:[#allocation63_spill] sm:$0xff] %v4883_v50  ;;  %vm1884_vm11 = vcmp.ne.s32.totalorder %v7047_v16, %v1724_v21  ;;  %v2049_v32 = vrot.slane %v4854_v14, 1  ;;  %v7080_v22 = vrot.slane %v7042_v11, 7 }
 0x4b9   : > { %2990 = vmatmul.msk.bf16.gmra.mxu2 %vm999_vm8, %v3117_v2  ;;  %2994 = vmatmul.msk.bf16.gmra.mxu3 %vm999_vm8, %v3117_v2  ;;  %v1740_v2 = vsel %vm466_vm6, %v1692_v27, %v1696_v8  ;;  %v4844_v8 = vsel %vm1872_vm15, 1.0, %v7020_v9  ;;  %v3118_v27 = vld [vmem:[%s6839_s4 + $0x10] sm:$0xff]  ;;  %v4894_v3 = vsel %vm475_vm7, %v7078_v39, %v7077_v35  ;;  %vm1859_vm12 = vcmp.ne.s32.totalorder %v3360_v36, %v4875_v30 }
 0x4ba   : > { %v4822_v55 = vpop.permute.xlu2 %3314  ;;  %vm1868_vm0 = vcmp.ne.s32.totalorder %v4135_v45, %v1740_v2  ;;  %v2064_v0 = vrot.slane %v4844_v8, 1  ;;  %7079 = vst [vmem:[#allocation64_spill] sm:$0xff] %v4894_v3  ;;  %v4910_v39 = vsel %vm466_vm6, %v7080_v22, %v1708_v20  ;;  %v1748_v35 = vsel %vm466_vm6, %v1716_v24, %v1688_v31 }
 0x4bb   : > { %v4901_v25 = vsel %vm1868_vm0, 1.0, %v7020_v9  ;;  %v7081_v2 = vrot.slane %v4123_v60, 7  ;;  %v4931_v31 = vsel %vm1864_vm4, 1.0, %v7020_v9  ;;  %v7083_v45 = vrot.slane %v4847_v41, 1 }
 0x4bc   : > { %vm1880_vm13 = vcmp.ne.s32.totalorder %v4145_v47, %v4910_v39  ;;  %vm1860_vm14 = vcmp.ne.s32.totalorder %v3361_v49, %v1748_v35  ;;  %v7085_v40 = vrot.slane %v4644_v26, 1  ;;  %v4965_v46 = vsel %vm466_vm6, %v1712_v37, %v1716_v24 }
 0x4bd   : > { %v4924_v11 = vsel %vm466_vm6, %v7081_v2, %v1715_v10  ;;  %v4941_v60 = vsel %vm475_vm7, %v2064_v0, %v7083_v45  ;;  %v4946_v10 = vsel %vm1884_vm11, 1.0, %v7020_v9  ;;  %v7084_v2 = vrot.slane %v4594_v1, 1  ;;  %vm1891_vm6 = vmand %vm1849_vm2, %vm1859_vm12 }
 0x4be   : > { %v7086_v20 = vmov %v7085_v40  ;;  %v6920_v3 = vunpack.i.h.bf16 %v4746_v17  ;;  %v7087_v24 = vrot.slane %v4901_v25, 1  ;;  %vm1892_vm5 = vmand %vm1849_vm2, %vm1860_vm14  ;;  %v5083_v36 = vsel %vm1891_vm6, 1.0, %v7020_v9 }
 0x4bf   : > { %v2101_v45 = vsel %vm475_vm7, %v7085_v40, %v7084_v2  ;;  %v2105_v16 = vsel %vm475_vm7, %v2049_v32, %v7086_v20  ;;  %v6924_v2 = vunpack.i.l.bf16 %v4746_v17  ;;  %v7088_v40 = vrot.slane %v4647_v29, 1 }
 0x4c0   : > { %v2145_v21 = vmax.f32 %v4854_v14, %v2105_v16  ;;  %v2149_v37 = vmax.f32 %v4644_v26, %v2101_v45  ;;  %v4981_v54 = vsel %vm475_vm7, %v7087_v24, %v2064_v0  ;;  %v7089_v26 = vrot.slane %v4602_v23, 1 }
 0x4c1   : > { %v4990_v20 = vsel %vm475_vm7, %v7088_v40, %v2049_v32  ;;  %v7090_v14 = vrot.slane %v4594_v1, 1  ;;  %v7092_v45 = vrot.slane %v4613_v58, 1  ;;  %v7093_v16 = vrot.slane %v4605_v13, 1 }
 0x4c2   : > { %v4914_v38 = vpop.permute.xlu2 %3329  ;;  %2983 = vmatmul.msk.bf16.gmra.mxu0 %vm999_vm8, %v3118_v27  ;;  %2987 = vmatmul.msk.bf16.gmra.mxu1 %vm999_vm8, %v3118_v27  ;;  %v7110_v30 = vrot.slane %v4666_v5, 1  ;;  %v7119_v1 = vrot.slane %v4807_v4, 1 }
 0x4c3   : > { %v4933_v22 = vpop.permute.xlu1 %3279  ;;  %v4998_v0 = vsel %vm475_vm7, %v7090_v14, %v7089_v26  ;;  %v7096_v26 = vrot.slane %v4639_v56, 1  ;;  %v7097_v14 = vmov %v7092_v45 }
 0x4c4   : > { %7082 = vst [vmem:[#allocation65_spill] sm:$0xff] %v4933_v22  ;;  %v7094_v32 = vunpack.i.h.bf16 %v4933_v22 }
 0x4c5   : > { %7091 = vst [vmem:[#allocation66_spill] sm:$0xff] %v4998_v0  ;;  %v5022_v50 = vsel %vm475_vm7, %v7097_v14, %v7096_v26  ;;  %v2156_v14 = vmax.f32 %v4901_v25, %v4981_v54 }
 0x4c6   : > { %v2034_v40 = vsel %vm435_vm3, %v7094_v32, %v6920_v3  ;;  %v5035_v32 = vsel %vm1875_vm9, 1.0, %v7020_v9  ;;  %v7100_v3 = vunpack.i.l.bf16 %v4933_v22 }
 0x4c7   : > { %v2067_v34 = vrot.slane %v5035_v32, 1 }
 0x4c8   : > { %v2033_v26 = vsel %vm435_vm3, %v7100_v3, %v6924_v2  ;;  %v7101_v3 = vrot.slane %v4650_v52, 1  ;;  %v7102_v2 = vrot.slane %v4798_v33, 1 }
 0x4c9   : > { %2991 = vmatmul.msk.bf16.gmra.mxu2 %vm999_vm8, %v3118_v27  ;;  %2995 = vmatmul.msk.bf16.gmra.mxu3 %vm999_vm8, %v3118_v27  ;;  %v5006_v27 = vsel %vm475_vm7, %v7093_v16, %v7092_v45  ;;  %v7098_v45 = vrot.slane %v4721_v51, 1  ;;  %v7099_v16 = vrot.slane %v4737_v43, 1  ;;  %v5140_v47 = vsel %vm475_vm7, %v7119_v1, %v2067_v34 }
 0x4ca   : > { %v5014_v24 = vpop.permute.xlu2 %3344  ;;  %v5061_v54 = vsel %vm475_vm7, %v7102_v2, %v7101_v3  ;;  %v7104_v3 = vld [vmem:[#allocation32_spill] sm:$0xff]  ;;  %v7109_v2 = vrot.slane %v4734_v15, 1 }
 0x4cb   : > { %7095 = vst [vmem:[#allocation67_spill] sm:$0xff] %v5014_v24  ;;  %v5030_v6 = vsel %vm475_vm7, %v7099_v16, %v7098_v45  ;;  %v5047_v16 = vpop.permute.xlu0 %3289  ;;  %v7103_v45 = vld [vmem:[#allocation34_spill] sm:$0xff]  ;;  %v2113_v0 = vmax.f32 %v7104_v3, %v2033_v26  ;;  %v7106_v56 = vunpack.i.h.bf16 %v5014_v24  ;;  %v7107_v3 = vunpack.i.l.bf16 %v4671_v44 }
 0x4cc   : > { %v2117_v23 = vmax.f32 %v7103_v45, %v2034_v40  ;;  %v3119_v40 = vld [vmem:[%s6839_s4 + $0x18] sm:$0xff]  ;;  %v7105_v45 = vunpack.i.h.bf16 %v4671_v44  ;;  %v7108_v53 = vunpack.i.l.bf16 %v5014_v24  ;;  %v5106_v22 = vsel %vm475_vm7, %v7110_v30, %v7109_v2 }
 0x4cd   : > { %7111 = vst [vmem:[#allocation34_spill] sm:$0xff] %v5106_v22  ;;  %v7116_v2 = vrot.slane %v4801_v59, 1  ;;  %v5143_v39 = vmax.f32 %v2113_v0, %v2145_v21  ;;  %v3362_v0 = vld [vmem:[%s3811_s14 + $0xf0] sm:$0xff]  ;;  %v7122_v22 = vrot.slane %v4777_v12, 1 }
 0x4ce   : > { %v2044_v26 = vsel %vm435_vm3, %v7106_v56, %v7105_v45  ;;  %v2043_v35 = vsel %vm435_vm3, %v7108_v53, %v7107_v3  ;;  %v7112_v56 = vmov %v7110_v30  ;;  %v7113_v45 = vrot.slane %v4653_v28, 1 }
 0x4cf   : > { %v5117_v53 = vsel %vm1892_vm5, 1.0, %v7020_v9  ;;  %v5123_v3 = vsel %vm1880_vm13, 1.0, %v7020_v9  ;;  %v5125_v49 = vmax.f32 %v2117_v23, %v2149_v37  ;;  %v7117_v30 = vrot.slane %v4721_v51, 1 }
 0x4d0   : > { %v5114_v24 = vsel %vm475_vm7, %v7113_v45, %v7112_v56  ;;  %7114 = vst [vmem:[#allocation32_spill] sm:$0xff] %v5123_v3  ;;  %v2128_v37 = vmax.f32 %v4490_v57, %v2044_v26  ;;  %v2124_v59 = vmax.f32 %v4493_v61, %v2043_v35  ;;  %v2072_v57 = vrot.slane %v5123_v3, 1  ;;  %v3363_v61 = vld [vmem:[%s3811_s14 + $0xf8] sm:$0xff]  ;;  %s5361_s14 = scalar_lea.vmem [#allocation10], %s3818_s26 }
 0x4d1   : > { %7115 = vst [vmem:[#allocation68_spill] sm:$0xff] %v5125_v49  ;;  %v5133_v56 = vsel %vm475_vm7, %v7117_v30, %v7116_v2  ;;  %vm1887_vm2 = vcmp.ne.s32.totalorder %v3362_v0, %v4924_v11  ;;  %vm1888_vm15 = vcmp.ne.s32.totalorder %v3363_v61, %v4965_v46  ;;  %v7121_v45 = vrot.slane %v4804_v18, 1  ;;  %s2613_s10 = sshll.u32 %s5361_s14, 4  ;;  %s6778_s10 = int_to_ptr.vmem [resolvable:$true] %s2613_s10 }
 0x4d2   : > { %7118 = vst [vmem:[#allocation69_spill] sm:$0xff] %v5133_v56  ;;  %v5147_v49 = vpop.permute.xlu1 %3294  ;;  %2984 = vmatmul.msk.bf16.gmra.mxu0 %vm999_vm8, %v3119_v40  ;;  %2988 = vmatmul.msk.bf16.gmra.mxu1 %vm999_vm8, %v3119_v40  ;;  %v7124_v35 = vmov %v7122_v22  ;;  %v7125_v26 = vrot.slane %v5083_v36, 1  ;;  %v7126_v30 = vmax.f32 %v4844_v8, %v4941_v60  ;;  %v5192_v23 = vmax.f32 %v2124_v59, %v2156_v14 }
 0x4d3   : > { %7120 = vst [vmem:[#allocation70_spill] sm:$0xff] %v5147_v49  ;;  %v5151_v2 = vpop.permute.xlu0 %3304  ;;  %v5177_v5 = vsel %vm475_vm7, %v7122_v22, %v7121_v45  ;;  %v7127_v22 = vrot.slane %v4901_v25, 1  ;;  %v7128_v45 = vrot.slane %v4931_v31, 1  ;;  %v7132_v59 = vrot.slane %v4946_v10, 1 }
 0x4d4   : > { %7123 = vst [vmem:[#allocation71_spill] sm:$0xff] %v5177_v5  ;;  %v5185_v1 = vsel %vm475_vm7, %v7125_v26, %v7124_v35  ;;  %v5190_v21 = vmax.f32 %v2128_v37, %v7126_v30  ;;  %v7130_v35 = vrot.slane %v5117_v53, 1  ;;  %v7134_v25 = vrot.slane %v4810_v63, 1  ;;  %v7146_v5 = vld [vmem:[#allocation31_spill] sm:$0xff] }
 0x4d5   : > { %v5201_v51 = vsel %vm475_vm7, %v7128_v45, %v7127_v22  ;;  %v7129_v26 = vmov %v7128_v45  ;;  %v5215_v60 = vsel %vm475_vm7, %v2072_v57, %v7132_v59  ;;  %v7136_v37 = vrot.slane %v4847_v41, 1 }
 0x4d6   : > { %v5209_v8 = vsel %vm475_vm7, %v7130_v35, %v7129_v26  ;;  %7133 = vst [vmem:[#allocation73_spill] sm:$0xff] %v5215_v60  ;;  %v5221_v14 = vsel %vm475_vm7, %v2067_v34, %v7134_v25  ;;  %v7138_v22 = vunpack.i.h.bf16 %v4822_v55  ;;  %v7139_v45 = vunpack.i.h.bf16 %v5147_v49  ;;  %v7147_v25 = vld [vmem:[#allocation33_spill] sm:$0xff] }
 0x4d7   : > { %7131 = vst [vmem:[#allocation72_spill] sm:$0xff] %v5209_v8  ;;  %v5227_v30 = vsel %vm475_vm7, %v7136_v37, %v2072_v57  ;;  %v7140_v35 = vunpack.i.l.bf16 %v4822_v55  ;;  %v7141_v59 = vunpack.i.l.bf16 %v5147_v49  ;;  %v7142_v56 = vunpack.i.h.bf16 %v5151_v2 }
 0x4d8   : > { %7135 = vst [vmem:[#allocation74_spill] sm:$0xff] %v5221_v14  ;;  %v2040_v26 = vsel %vm435_vm3, %v7139_v45, %v7138_v22  ;;  %v7143_v63 = vunpack.i.h.bf16 %v4671_v44  ;;  %v7144_v45 = vunpack.i.l.bf16 %v5151_v2  ;;  %v7145_v49 = vunpack.i.l.bf16 %v4671_v44 }
 0x4d9   : > { %7137 = vst [vmem:[#allocation75_spill] sm:$0xff] %v5227_v30  ;;  %v2039_v34 = vsel %vm435_vm3, %v7141_v59, %v7140_v35  ;;  %2992 = vmatmul.msk.bf16.gmra.mxu2 %vm999_vm8, %v3119_v40  ;;  %2996 = vmatmul.msk.bf16.gmra.mxu3 %vm999_vm8, %v3119_v40  ;;  %v7148_v44 = vunpack.i.h.bf16 %v4914_v38  ;;  %v7156_v3 = vunpack.i.h.bf16 %v4746_v17  ;;  %v7158_v30 = vunpack.i.l.bf16 %v4746_v17 }
 0x4da   : > { %v2036_v22 = vsel %vm435_vm3, %v7143_v63, %v7142_v56  ;;  %v2035_v35 = vsel %vm435_vm3, %v7145_v49, %v7144_v45  ;;  %v3310_v57 = vpop.permute.xlu1 %3309  ;;  %v2141_v56 = vmax.f32 %v4413_v62, %v2040_v26  ;;  %v2137_v40 = vmax.f32 %v4395_v19, %v2039_v34  ;;  %v7154_v63 = vld [vmem:[#allocation37_spill] sm:$0xff] }
 0x4db   : > { %v3312_v45 = vunpack.i.h.bf16 %v3310_v57  ;;  %v3311_v37 = vunpack.i.l.bf16 %v3310_v57  ;;  %v5272_v59 = vpop.permute.xlu0 %3319  ;;  %v2125_v12 = vmax.f32 %v7146_v5, %v2036_v22  ;;  %v2121_v8 = vmax.f32 %v7147_v25, %v2035_v35  ;;  %v7152_v22 = vld [vmem:[#allocation38_spill] sm:$0xff] }
 0x4dc   : > { %v7149_v62 = vunpack.i.l.bf16 %v4914_v38  ;;  %v7150_v26 = vunpack.i.l.bf16 %v5047_v16  ;;  %v7151_v34 = vunpack.i.h.bf16 %v5047_v16  ;;  %v7160_v17 = vmax.f32 %v4605_v13, %v5006_v27  ;;  %v7168_v13 = vld [vmem:[#allocation35_spill] sm:$0xff] }
 0x4dd   : > { %v2030_v49 = vsel %vm435_vm3, %v3312_v45, %v7148_v44  ;;  %v7153_v44 = vld [vmem:[#allocation43_spill] sm:$0xff]  ;;  %v7163_v11 = vmax.f32 %v4613_v58, %v5022_v50  ;;  %v7164_v46 = vmax.f32 %v4647_v29, %v4990_v20  ;;  %v7170_v29 = vld [vmem:[#allocation56_spill] sm:$0xff] }
 0x4de   : > { %v2029_v19 = vsel %vm435_vm3, %v3311_v37, %v7149_v62  ;;  %v2037_v5 = vsel %vm435_vm3, %v7150_v26, %v3311_v37  ;;  %v2038_v25 = vsel %vm435_vm3, %v7151_v34, %v3312_v45  ;;  %v2134_v57 = vmax.f32 %v4430_v42, %v2030_v49 }
 0x4df   : > { %v2129_v35 = vmax.f32 %v7152_v22, %v2037_v5  ;;  %v2130_v14 = vmax.f32 %v7153_v44, %v2029_v19  ;;  %v2133_v60 = vmax.f32 %v7154_v63, %v2038_v25  ;;  %v7155_v62 = vunpack.i.h.bf16 %v5272_v59  ;;  %v7165_v25 = vld [vmem:[#allocation24_spill] sm:$0xff] }
 0x4e0   : > { %v7157_v26 = vunpack.i.l.bf16 %v5272_v59  ;;  %v5313_v49 = vsel %vm1887_vm2, 1.0, %v7020_v9  ;;  %v5318_v63 = vsel %vm1888_vm15, 1.0, %v7020_v9  ;;  %v5335_v61 = vmax.f32 %v2141_v56, %v7164_v46  ;;  %v7169_v22 = vld [vmem:[#allocation36_spill] sm:$0xff] }
 0x4e1   : > { %v2026_v37 = vsel %vm435_vm3, %v7156_v3, %v7155_v62  ;;  %v7159_v3 = vmax.f32 %v4737_v43, %v5030_v6  ;;  %v2193_v19 = vmax.f32 %v2129_v35, %v7160_v17  ;;  %v2197_v0 = vmax.f32 %v2133_v60, %v7163_v11  ;;  %v7166_v6 = vld [vmem:[#allocation27_spill] sm:$0xff] }
 0x4e2   : > { %v2025_v42 = vsel %vm435_vm3, %v7158_v30, %v7157_v26  ;;  %v7161_v30 = vld [vmem:[#allocation58_spill] sm:$0xff]  ;;  %v7167_v43 = vmax.f32 %v7165_v25, %v7166_v6  ;;  %v2118_v27 = vmax.f32 %v7168_v13, %v2026_v37  ;;  %v3325_v44 = vpop.permute.xlu1 %3324  ;;  %v2079_v50 = vrot.slane %v5313_v49, 1 }
 0x4e3   : > { %v2198_v45 = vmax.f32 %v2134_v57, %v7159_v3  ;;  %v7162_v5 = vmax.f32 %v4734_v15, %v7161_v30  ;;  %v2114_v15 = vmax.f32 %v7169_v22, %v2025_v42  ;;  %v2080_v58 = vrot.slane %v5318_v63, 1  ;;  %v5352_v37 = vpop.permute.xlu0 %3334  ;;  %v7173_v42 = vld [vmem:[#allocation26_spill] sm:$0xff] }
 0x4e4   : > { %v5340_v57 = vmax.f32 %v2137_v40, %v7167_v43  ;;  %v7171_v20 = vmax.f32 %v4650_v52, %v7170_v29  ;;  %v7172_v56 = vmax.f32 %v4798_v33, %v5061_v54  ;;  %v3327_v62 = vunpack.i.h.bf16 %v3325_v44  ;;  %v7174_v3 = vld [vmem:[#allocation22_spill] sm:$0xff]  ;;  %v7179_v54 = vld [vmem:[#allocation68_spill] sm:$0xff]  ;;  %v7183_v43 = vld [vmem:[#allocation49_spill] sm:$0xff] }
 0x4e5   : > { %v2194_v34 = vmax.f32 %v2130_v14, %v7162_v5  ;;  %v2219_v35 = vpack.c.bf16 %v2198_v45, %v2197_v0  ;;  %v3326_v26 = vunpack.i.l.bf16 %v3325_v44  ;;  %v7175_v45 = vmax.f32 %v7173_v42, %v7174_v3  ;;  %v7177_v30 = vld [vmem:[#allocation66_spill] sm:$0xff]  ;;  %v7180_v0 = vld [vmem:[#allocation67_spill] sm:$0xff] }
 0x4e6   : > { %v2182_v60 = vmax.f32 %v2118_v27, %v7171_v20  ;;  %v2178_v40 = vmax.f32 %v2114_v15, %v7172_v56  ;;  %v3337_v52 = vunpack.i.h.bf16 %v5352_v37  ;;  %v3336_v33 = vunpack.i.l.bf16 %v5352_v37  ;;  %v7187_v44 = vld [vmem:[#allocation42_spill] sm:$0xff]  ;;  %v7188_v20 = vld [vmem:[#allocation41_spill] sm:$0xff] }
 0x4e7   : > { %v2217_v14 = vpack.c.bf16 %v2194_v34, %v2193_v19  ;;  %v2189_v17 = vmax.f32 %v2125_v12, %v7175_v45  ;;  %v7176_v19 = vld [vmem:[#allocation25_spill] sm:$0xff]  ;;  %3055 = vst [vmem:[%s5361_s14 + $0x250] sm:$0xff] %v2219_v35  ;;  %v7181_v46 = vunpack.i.h.bf16 %v7180_v0  ;;  %v7182_v25 = vunpack.i.l.bf16 %v7180_v0  ;;  %v7193_v45 = vld [vmem:[#allocation39_spill] sm:$0xff]  ;;  %v7251_v37 = vld [vmem:[#allocation50_spill] sm:$0xff] }
 0x4e8   : > { %v7178_v5 = vmax.f32 %v7176_v19, %v7177_v30  ;;  %v2211_v11 = vpack.c.bf16 %v2182_v60, %v7179_v54  ;;  %v2209_v12 = vpack.c.bf16 %v2178_v40, %v5143_v39  ;;  %v7184_v27 = vunpack.i.l.bf16 %v5151_v2  ;;  %v7194_v30 = vld [vmem:[#allocation40_spill] sm:$0xff] }
 0x4e9   : > { %3053 = vst [vmem:[%s5361_s14 + $0x240] sm:$0xff] %v2217_v14  ;;  %v2019_v6 = vsel %vm435_vm3, %v3326_v26, %v7182_v25  ;;  %v7185_v15 = vunpack.i.h.bf16 %v5151_v2  ;;  %v7186_v14 = vld [vmem:[#allocation48_spill] sm:$0xff]  ;;  %v7189_v56 = vunpack.i.h.bf16 %v4822_v55  ;;  %v7190_v2 = vunpack.i.l.bf16 %v4822_v55 }
 0x4ea   : > { %v2185_v34 = vmax.f32 %v2121_v8, %v7178_v5  ;;  %v2020_v8 = vsel %vm435_vm3, %v3327_v62, %v7181_v46  ;;  %v2027_v22 = vsel %vm435_vm3, %v7184_v27, %v3326_v26  ;;  %v2123_v35 = vmax.f32 %v7186_v14, %v2019_v6  ;;  %3047 = vst [vmem:[%s5361_s14 + $0x210] sm:$0xff] %v2211_v11  ;;  %v7191_v26 = vld [vmem:[#allocation63_spill] sm:$0xff] }
 0x4eb   : > { %v2127_v13 = vmax.f32 %v7183_v43, %v2020_v8  ;;  %v2028_v39 = vsel %vm435_vm3, %v7185_v15, %v3327_v62  ;;  %v2122_v29 = vmax.f32 %v7187_v44, %v2027_v22  ;;  %v2032_v40 = vsel %vm435_vm3, %v7189_v56, %v3337_v52  ;;  %3045 = vst [vmem:[%s5361_s14 + $0x200] sm:$0xff] %v2209_v12  ;;  %v7197_v46 = vld [vmem:[#allocation23_spill] sm:$0xff]  ;;  %v7198_v8 = vld [vmem:[#allocation34_spill] sm:$0xff]  ;;  %v3340_v44 = vpop.permute.xlu1 %3339 }
 0x4ec   : > { %v2126_v60 = vmax.f32 %v7188_v20, %v2028_v39  ;;  %v2031_v62 = vsel %vm435_vm3, %v7190_v2, %v3336_v33  ;;  %v7192_v42 = vmax.f32 %v4804_v18, %v7191_v26  ;;  %v2142_v19 = vmax.f32 %v7193_v45, %v2032_v40  ;;  %v7200_v18 = vld [vmem:[#allocation61_spill] sm:$0xff]  ;;  %v7206_v15 = vld [vmem:[#allocation55_spill] sm:$0xff]  ;;  %v3350_v2 = vpop.permute.xlu0 %3349 }
 0x4ed   : > { %v2138_v5 = vmax.f32 %v7194_v30, %v2031_v62  ;;  %v7195_v54 = vmax.f32 %v4807_v4, %v5140_v47  ;;  %v7196_v55 = vmax.f32 %v4653_v28, %v5114_v24  ;;  %v7199_v12 = vmax.f32 %v7197_v46, %v7198_v8  ;;  %v7203_v47 = vld [vmem:[#allocation59_spill] sm:$0xff]  ;;  %v7207_v39 = vld [vmem:[#allocation69_spill] sm:$0xff]  ;;  %v7217_v8 = vld [vmem:[#allocation46_spill] sm:$0xff] }
 0x4ee   : > { %v2187_v3 = vmax.f32 %v2123_v35, %v7192_v42  ;;  %v7201_v6 = vrot.slane %v7200_v18, 1  ;;  %v7202_v4 = vrot.slane %v4946_v10, 1  ;;  %v7208_v14 = vmax.f32 %v7206_v15, %v7207_v39 }
 0x4ef   : > { %v2191_v11 = vmax.f32 %v2127_v13, %v7195_v54  ;;  %v2186_v0 = vmax.f32 %v2122_v29, %v7196_v55  ;;  %v2190_v25 = vmax.f32 %v2126_v60, %v7199_v12  ;;  %v7204_v13 = vld [vmem:[#allocation62_spill] sm:$0xff]  ;;  %v3342_v56 = vunpack.i.h.bf16 %v3340_v44 }
 0x4f0   : > { %v5423_v43 = vsel %vm475_vm7, %v7201_v6, %v2079_v50  ;;  %v5431_v28 = vsel %vm475_vm7, %v7202_v4, %v2080_v58  ;;  %v2214_v24 = vpack.c.bf16 %v5192_v23, %v2187_v3  ;;  %v7205_v27 = vmax.f32 %v7203_v47, %v7204_v13  ;;  %v7209_v3 = vld [vmem:[#allocation65_spill] sm:$0xff] }
 0x4f1   : > { %v2202_v35 = vmax.f32 %v2138_v5, %v7208_v14  ;;  %v2216_v29 = vpack.c.bf16 %v5190_v21, %v2191_v11  ;;  %v2213_v20 = vpack.c.bf16 %v2186_v0, %v2185_v34  ;;  %v2215_v60 = vpack.c.bf16 %v2190_v25, %v2189_v17  ;;  %v7214_v5 = vld [vmem:[#allocation52_spill] sm:$0xff]  ;;  %v7215_v11 = vld [vmem:[#allocation47_spill] sm:$0xff]  ;;  %v7216_v0 = vld [vmem:[#allocation29_spill] sm:$0xff] }
 0x4f2   : > { %v2206_v22 = vmax.f32 %v2142_v19, %v7205_v27  ;;  %v3341_v40 = vunpack.i.l.bf16 %v3340_v44  ;;  %3050 = vst [vmem:[%s5361_s14 + $0x228] sm:$0xff] %v2214_v24  ;;  %v3352_v26 = vunpack.i.h.bf16 %v3350_v2  ;;  %v3351_v42 = vunpack.i.l.bf16 %v3350_v2  ;;  %v7224_v14 = vld [vmem:[#allocation72_spill] sm:$0xff] }
 0x4f3   : > { %v2221_v62 = vpack.c.bf16 %v2202_v35, %v5340_v57  ;;  %3049 = vst [vmem:[%s5361_s14 + $0x220] sm:$0xff] %v2213_v20  ;;  %v7210_v45 = vunpack.i.h.bf16 %v7209_v3  ;;  %v7211_v17 = vunpack.i.l.bf16 %v5272_v59  ;;  %v7212_v19 = vunpack.i.h.bf16 %v5272_v59  ;;  %v7226_v20 = vld [vmem:[#allocation57_spill] sm:$0xff] }
 0x4f4   : > { %v2223_v23 = vpack.c.bf16 %v2206_v22, %v5335_v61  ;;  %v7213_v57 = vunpack.i.l.bf16 %v7209_v3  ;;  %3051 = vst [vmem:[%s5361_s14 + $0x230] sm:$0xff] %v2215_v60  ;;  %v7218_v59 = vunpack.i.h.bf16 %v4914_v38  ;;  %v7219_v6 = vunpack.i.l.bf16 %v4914_v38  ;;  %v7227_v60 = vld [vmem:[#allocation71_spill] sm:$0xff] }
 0x4f5   : > { %v2042_v21 = vsel %vm435_vm3, %v3342_v56, %v7210_v45  ;;  %v2017_v34 = vsel %vm435_vm3, %v7211_v17, %v3341_v40  ;;  %v2018_v61 = vsel %vm435_vm3, %v7212_v19, %v3342_v56  ;;  %v7220_v24 = vunpack.i.l.bf16 %v5047_v16  ;;  %3057 = vst [vmem:[%s5361_s14 + $0x260] sm:$0xff] %v2221_v62  ;;  %v7235_v19 = vld [vmem:[#allocation60_spill] sm:$0xff] }
 0x4f6   : > { %v2041_v30 = vsel %vm435_vm3, %v3341_v40, %v7213_v57  ;;  %v2120_v54 = vmax.f32 %v7214_v5, %v2042_v21  ;;  %v2115_v55 = vmax.f32 %v7215_v11, %v2017_v34  ;;  %v2119_v12 = vmax.f32 %v7217_v8, %v2018_v61  ;;  %3059 = vst [vmem:[%s5361_s14 + $0x270] sm:$0xff] %v2223_v23  ;;  %v7229_v40 = vld [vmem:[#allocation44_spill] sm:$0xff]  ;;  %v7230_v23 = vld [vmem:[#allocation45_spill] sm:$0xff]  ;;  %v3355_v34 = vpop.permute.xlu1 %3354  ;;  %v7238_v5 = vld [vmem:[#allocation74_spill] sm:$0xff] }
 0x4f7   : > { %v2116_v46 = vmax.f32 %v7216_v0, %v2041_v30  ;;  %v2022_v25 = vsel %vm435_vm3, %v7218_v59, %v3352_v26  ;;  %v2021_v4 = vsel %vm435_vm3, %v7219_v6, %v3351_v42  ;;  %v2045_v47 = vsel %vm435_vm3, %v3351_v42, %v7220_v24  ;;  %3052 = vst [vmem:[%s5361_s14 + $0x238] sm:$0xff] %v2216_v29  ;;  %v7236_v61 = vld [vmem:[#allocation64_spill] sm:$0xff]  ;;  %v7240_v11 = vld [vmem:[#allocation75_spill] sm:$0xff] }
 0x4f8   : > { %v7221_v13 = vunpack.i.h.bf16 %v5047_v16  ;;  %v7222_v22 = vmax.f32 %v4931_v31, %v5201_v51  ;;  %v7223_v38 = vmax.f32 %v5083_v36, %v5185_v1  ;;  %v7225_v35 = vmax.f32 %v5117_v53, %v7224_v14  ;;  %v7231_v51 = vld [vmem:[#allocation54_spill] sm:$0xff]  ;;  %v7242_v0 = vld [vmem:[#allocation32_spill] sm:$0xff] }
 0x4f9   : > { %v7228_v56 = vmax.f32 %v7226_v20, %v7227_v60  ;;  %v2135_v2 = vmax.f32 %v7229_v40, %v2022_v25  ;;  %v2131_v62 = vmax.f32 %v7230_v23, %v2021_v4  ;;  %v2132_v31 = vmax.f32 %v7231_v51, %v2045_v47  ;;  %v7245_v4 = vld [vmem:[#allocation70_spill] sm:$0xff]  ;;  %v2308_v40 = vld [vmem:[%s3821_s8 + $0x8] sm:$0xff] }
 0x4fa   : > { %v2046_v27 = vsel %vm435_vm3, %v3352_v26, %v7221_v13  ;;  %v2184_v15 = vmax.f32 %v2120_v54, %v7222_v22  ;;  %v2179_v39 = vmax.f32 %v2115_v55, %v7223_v38  ;;  %v2180_v44 = vmax.f32 %v2116_v46, %v7225_v35  ;;  %v7232_v26 = vld [vmem:[#allocation53_spill] sm:$0xff]  ;;  %v7249_v13 = vld [vmem:[#allocation51_spill] sm:$0xff]  ;;  %v2339_v20 = vld [vmem:[%s3821_s8 + $0x100] sm:$0xff] }
 0x4fb   : > { %v2183_v16 = vmax.f32 %v2119_v12, %v7228_v56  ;;  %v2136_v1 = vmax.f32 %v7232_v26, %v2046_v27  ;;  %v7233_v45 = vrot.slane %v5083_v36, 1  ;;  %v7234_v29 = vrot.slane %v5117_v53, 1  ;;  %v7243_v53 = vld [vmem:[#allocation73_spill] sm:$0xff]  ;;  %v2371_v60 = vld [vmem:[%s3821_s8 + $0x200] sm:$0xff] }
 0x4fc   : > { %v2210_v42 = vpack.c.bf16 %v2180_v44, %v2179_v39  ;;  %v7237_v57 = vmax.f32 %v7235_v19, %v7236_v61  ;;  %v7239_v36 = vmax.f32 %v5035_v32, %v7238_v5  ;;  %v7241_v55 = vmax.f32 %v4847_v41, %v7240_v11  ;;  %v2307_v44 = vld [vmem:[%s3821_s8] sm:$0xff] }
 0x4fd   : > { %v2212_v3 = vpack.c.bf16 %v2184_v15, %v2183_v16  ;;  %v2111_v21 = vsel %vm475_vm7, %v2079_v50, %v7233_v45  ;;  %v2112_v17 = vsel %vm475_vm7, %v2080_v58, %v7234_v29  ;;  %v7244_v46 = vmax.f32 %v7242_v0, %v7243_v53  ;;  %v2311_v29 = vld [vmem:[%s3821_s8 + $0x20] sm:$0xff]  ;;  %v2373_v0 = vld [vmem:[%s3821_s8 + $0x210] sm:$0xff] }
 0x4fe   : > { %v2199_v30 = vmax.f32 %v2135_v2, %v7237_v57  ;;  %v2195_v54 = vmax.f32 %v2131_v62, %v7239_v36  ;;  %v2196_v50 = vmax.f32 %v2132_v31, %v7241_v55  ;;  %3046 = vst [vmem:[%s5361_s14 + $0x208] sm:$0xff] %v2210_v42  ;;  %v2171_v48 = vmax.f32 %v7200_v18, %v5423_v43  ;;  %v7248_v43 = vld [vmem:[#allocation30_spill] sm:$0xff]  ;;  %v2340_v31 = vld [vmem:[%s3821_s8 + $0x108] sm:$0xff]  ;;  %v2309_v55 = vld [vmem:[%s3821_s8 + $0x10] sm:$0xff] }
 0x4ff   : > { %v2200_v8 = vmax.f32 %v2136_v1, %v7244_v46  ;;  %v2172_v58 = vmax.f32 %v4946_v10, %v5431_v28  ;;  %v3357_v12 = vunpack.i.h.bf16 %v3355_v34  ;;  %v3356_v32 = vunpack.i.l.bf16 %v3355_v34  ;;  %3048 = vst [vmem:[%s5361_s14 + $0x218] sm:$0xff] %v2212_v3  ;;  %v2372_v1 = vld [vmem:[%s3821_s8 + $0x208] sm:$0xff]  ;;  %v2375_v34 = vld [vmem:[%s3821_s8 + $0x220] sm:$0xff] }
 0x500   : > { %v2218_v59 = vpack.c.bf16 %v2196_v50, %v2195_v54  ;;  %v2175_v41 = vmax.f32 %v5313_v49, %v2111_v21  ;;  %v2176_v6 = vmax.f32 %v5318_v63, %v2112_v17  ;;  %v7246_v24 = vunpack.i.h.bf16 %v7245_v4  ;;  %v2343_v17 = vld [vmem:[%s3821_s8 + $0x120] sm:$0xff]  ;;  %v2312_v57 = vld [vmem:[%s3821_s8 + $0x28] sm:$0xff]  ;;  %v2341_v50 = vld [vmem:[%s3821_s8 + $0x110] sm:$0xff] }
 0x501   : > { %v2220_v25 = vpack.c.bf16 %v2200_v8, %v2199_v30  ;;  %v2023_v10 = vsel %vm435_vm3, %v3336_v33, %v3356_v32  ;;  %v2024_v18 = vsel %vm435_vm3, %v3337_v52, %v3357_v12  ;;  %v7247_v49 = vunpack.i.l.bf16 %v7245_v4  ;;  %v7250_v33 = vld [vmem:[#allocation28_spill] sm:$0xff]  ;;  %v2374_v4 = vld [vmem:[%s3821_s8 + $0x218] sm:$0xff] }
 0x502   : > { %v2048_v47 = vsel %vm435_vm3, %v3357_v12, %v7246_v24  ;;  %3054 = vst [vmem:[%s5361_s14 + $0x248] sm:$0xff] %v2218_v59  ;;  %v2139_v27 = vmax.f32 %v7249_v13, %v2023_v10  ;;  %v2143_v15 = vmax.f32 %v7251_v37, %v2024_v18  ;;  %v2345_v13 = vld [vmem:[%s3821_s8 + $0x130] sm:$0xff] }
 0x503   : > { %v2047_v63 = vsel %vm435_vm3, %v3356_v32, %v7247_v49  ;;  %v2144_v28 = vmax.f32 %v7248_v43, %v2048_v47  ;;  %3056 = vst [vmem:[%s5361_s14 + $0x258] sm:$0xff] %v2220_v25  ;;  %v2344_v47 = vld [vmem:[%s3821_s8 + $0x128] sm:$0xff] }
 0x504   : > { %v2140_v22 = vmax.f32 %v7250_v33, %v2047_v63  ;;  %v2203_v38 = vmax.f32 %v2139_v27, %v2171_v48  ;;  %v2207_v7 = vmax.f32 %v2143_v15, %v2175_v41  ;;  %v2342_v41 = vld [vmem:[%s3821_s8 + $0x118] sm:$0xff]  ;;  %v2376_v49 = vld [vmem:[%s3821_s8 + $0x228] sm:$0xff]  ;;  %v2377_v33 = vld [vmem:[%s3821_s8 + $0x230] sm:$0xff] }
 0x505   : > { %v2208_v52 = vmax.f32 %v2144_v28, %v2176_v6  ;;  %v2313_v28 = vld [vmem:[%s3821_s8 + $0x30] sm:$0xff] }
 0x506   : > { %v2204_v39 = vmax.f32 %v2140_v22, %v2172_v58  ;;  %v2310_v58 = vld [vmem:[%s3821_s8 + $0x18] sm:$0xff] }
 0x507   : > { %v2224_v35 = vpack.c.bf16 %v2208_v52, %v2207_v7 }
 0x508   : > { %v2222_v14 = vpack.c.bf16 %v2204_v39, %v2203_v38  ;;  %v2314_v39 = vld [vmem:[%s3821_s8 + $0x38] sm:$0xff] }
 0x509   : > { %3060 = vst [vmem:[%s5361_s14 + $0x278] sm:$0xff] %v2224_v35  ;;  %v2346_v35 = vld [vmem:[%s3821_s8 + $0x138] sm:$0xff] }
 0x50a   : > { %3058 = vst [vmem:[%s5361_s14 + $0x268] sm:$0xff] %v2222_v14 }
 0x51f   : > { %v1021_v56 = vpop.f32.mrf.mxu0  ;;  %v1050_v16 = vpop.f32.mrf.mxu1 }
 0x520   : > { %v2242_v2 = vsub.f32 1.0, %v1021_v56  ;;  %v2403_v23 = vmul.f32 %v2307_v44, %v1021_v56  ;;  %v2435_v62 = vmul.f32 %v2339_v20, %v1021_v56  ;;  %v2467_v51 = vmul.f32 %v2371_v60, %v1021_v56  ;;  %v2378_v44 = vld [vmem:[%s3821_s8 + $0x238] sm:$0xff]  ;;  %v2315_v56 = vld [vmem:[%s3821_s8 + $0x40] sm:$0xff] }
 0x521   : > { %v2243_v26 = vsub.f32 1.0, %v1050_v16  ;;  %v2404_v42 = vmul.f32 %v2308_v40, %v1050_v16  ;;  %v2436_v45 = vmul.f32 %v2340_v31, %v1050_v16  ;;  %v2468_v21 = vmul.f32 %v2372_v1, %v1050_v16  ;;  %v2379_v31 = vld [vmem:[%s3821_s8 + $0x240] sm:$0xff] }
 0x522   : > { %2499 = vst [vmem:[%s5564_s28] sm:$0xff] %v2403_v23 }
 0x523   : > { %2531 = vst [vmem:[%s5564_s28 + $0x100] sm:$0xff] %v2435_v62  ;;  %v2274_v3 = vpack.c.bf16 %v2243_v26, %v2242_v2  ;;  %v2347_v2 = vld [vmem:[%s3821_s8 + $0x140] sm:$0xff] }
 0x524   : > { %2563 = vst [vmem:[%s5564_s28 + $0x200] sm:$0xff] %v2467_v51 }
 0x525   : > { %3061 = vst [vmem:[%s5361_s14 + $0x280] sm:$0xff] %v2274_v3  ;;  %v2316_v3 = vld [vmem:[%s3821_s8 + $0x48] sm:$0xff] }
 0x526   : > { %2500 = vst [vmem:[%s5564_s28 + $0x8] sm:$0xff] %v2404_v42 }
 0x527   : > { %2532 = vst [vmem:[%s5564_s28 + $0x108] sm:$0xff] %v2436_v45  ;;  %v1023_v19 = vpop.f32.mrf.mxu0  ;;  %v1052_v61 = vpop.f32.mrf.mxu1 }
 0x528   : > { %2564 = vst [vmem:[%s5564_s28 + $0x208] sm:$0xff] %v2468_v21  ;;  %v2246_v30 = vsub.f32 1.0, %v1023_v19  ;;  %v2407_v5 = vmul.f32 %v2311_v29, %v1023_v19  ;;  %v2439_v36 = vmul.f32 %v2343_v17, %v1023_v19  ;;  %v2471_v54 = vmul.f32 %v2375_v34, %v1023_v19  ;;  %v2348_v21 = vld [vmem:[%s3821_s8 + $0x148] sm:$0xff] }
 0x529   : > { %v2247_v11 = vsub.f32 1.0, %v1052_v61  ;;  %v2408_v53 = vmul.f32 %v2312_v57, %v1052_v61  ;;  %v2440_v43 = vmul.f32 %v2344_v47, %v1052_v61  ;;  %v2472_v27 = vmul.f32 %v2376_v49, %v1052_v61  ;;  %v2380_v17 = vld [vmem:[%s3821_s8 + $0x248] sm:$0xff]  ;;  %v2317_v57 = vld [vmem:[%s3821_s8 + $0x50] sm:$0xff]  ;;  %v2383_v47 = vld [vmem:[%s3821_s8 + $0x260] sm:$0xff] }
 0x52a   : > { %2503 = vst [vmem:[%s5564_s28 + $0x20] sm:$0xff] %v2407_v5  ;;  %v2349_v5 = vld [vmem:[%s3821_s8 + $0x150] sm:$0xff] }
 0x52b   : > { %2535 = vst [vmem:[%s5564_s28 + $0x120] sm:$0xff] %v2439_v36  ;;  %v2276_v46 = vpack.c.bf16 %v2247_v11, %v2246_v30  ;;  %v2381_v11 = vld [vmem:[%s3821_s8 + $0x250] sm:$0xff] }
 0x52c   : > { %v1079_v8 = vpop.f32.mrf.mxu2  ;;  %v1108_v48 = vpop.f32.mrf.mxu3  ;;  %2567 = vst [vmem:[%s5564_s28 + $0x220] sm:$0xff] %v2471_v54 }
 0x52d   : > { %v2244_v12 = vsub.f32 1.0, %v1079_v8  ;;  %v2405_v32 = vmul.f32 %v2309_v55, %v1079_v8  ;;  %v2437_v59 = vmul.f32 %v2341_v50, %v1079_v8  ;;  %v2469_v25 = vmul.f32 %v2373_v0, %v1079_v8  ;;  %3063 = vst [vmem:[%s5361_s14 + $0x290] sm:$0xff] %v2276_v46  ;;  %v2350_v8 = vld [vmem:[%s3821_s8 + $0x158] sm:$0xff] }
 0x52e   : > { %v2245_v6 = vsub.f32 1.0, %v1108_v48  ;;  %2504 = vst [vmem:[%s5564_s28 + $0x28] sm:$0xff] %v2408_v53  ;;  %v2406_v24 = vmul.f32 %v2310_v58, %v1108_v48  ;;  %v2438_v18 = vmul.f32 %v2342_v41, %v1108_v48  ;;  %v2470_v63 = vmul.f32 %v2374_v4, %v1108_v48  ;;  %v2318_v53 = vld [vmem:[%s3821_s8 + $0x58] sm:$0xff] }
 0x52f   : > { %2501 = vst [vmem:[%s5564_s28 + $0x10] sm:$0xff] %v2405_v32  ;;  %v1026_v40 = vpop.f32.mrf.mxu0  ;;  %v1055_v23 = vpop.f32.mrf.mxu1  ;;  %v2382_v58 = vld [vmem:[%s3821_s8 + $0x258] sm:$0xff] }
 0x530   : > { %2533 = vst [vmem:[%s5564_s28 + $0x110] sm:$0xff] %v2437_v59  ;;  %v2275_v10 = vpack.c.bf16 %v2245_v6, %v2244_v12  ;;  %v2250_v51 = vsub.f32 1.0, %v1026_v40  ;;  %v2251_v26 = vsub.f32 1.0, %v1055_v23  ;;  %v2411_v1 = vmul.f32 %v2315_v56, %v1026_v40  ;;  %v2351_v6 = vld [vmem:[%s3821_s8 + $0x160] sm:$0xff] }
 0x531   : > { %2565 = vst [vmem:[%s5564_s28 + $0x210] sm:$0xff] %v2469_v25  ;;  %v2443_v42 = vmul.f32 %v2347_v2, %v1026_v40  ;;  %v2475_v45 = vmul.f32 %v2379_v31, %v1026_v40  ;;  %v2412_v61 = vmul.f32 %v2316_v3, %v1055_v23  ;;  %v2444_v30 = vmul.f32 %v2348_v21, %v1055_v23  ;;  %v2319_v25 = vld [vmem:[%s3821_s8 + $0x60] sm:$0xff]  ;;  %v2386_v2 = vld [vmem:[%s3821_s8 + $0x278] sm:$0xff] }
 0x532   : > { %3062 = vst [vmem:[%s5361_s14 + $0x288] sm:$0xff] %v2275_v10  ;;  %v2278_v29 = vpack.c.bf16 %v2251_v26, %v2250_v51  ;;  %v2476_v36 = vmul.f32 %v2380_v17, %v1055_v23  ;;  %v2355_v26 = vld [vmem:[%s3821_s8 + $0x180] sm:$0xff] }
 0x533   : > { %2502 = vst [vmem:[%s5564_s28 + $0x18] sm:$0xff] %v2406_v24 }
 0x534   : > { %2534 = vst [vmem:[%s5564_s28 + $0x118] sm:$0xff] %v2438_v18  ;;  %v1081_v22 = vpop.f32.mrf.mxu2  ;;  %v1110_v37 = vpop.f32.mrf.mxu3 }
 0x535   : > { %2566 = vst [vmem:[%s5564_s28 + $0x218] sm:$0xff] %v2470_v63  ;;  %v2248_v15 = vsub.f32 1.0, %v1081_v22  ;;  %v2409_v52 = vmul.f32 %v2313_v28, %v1081_v22  ;;  %v2441_v38 = vmul.f32 %v2345_v13, %v1081_v22  ;;  %v2473_v7 = vmul.f32 %v2377_v33, %v1081_v22  ;;  %v2320_v63 = vld [vmem:[%s3821_s8 + $0x68] sm:$0xff] }
 0x536   : > { %2536 = vst [vmem:[%s5564_s28 + $0x128] sm:$0xff] %v2440_v43  ;;  %v2249_v14 = vsub.f32 1.0, %v1110_v37  ;;  %v2410_v60 = vmul.f32 %v2314_v39, %v1110_v37  ;;  %v2442_v16 = vmul.f32 %v2346_v35, %v1110_v37  ;;  %v2474_v62 = vmul.f32 %v2378_v44, %v1110_v37  ;;  %v2352_v28 = vld [vmem:[%s3821_s8 + $0x168] sm:$0xff] }
 0x537   : > { %2568 = vst [vmem:[%s5564_s28 + $0x228] sm:$0xff] %v2472_v27  ;;  %v1028_v12 = vpop.f32.mrf.mxu0  ;;  %v1057_v32 = vpop.f32.mrf.mxu1  ;;  %v2384_v27 = vld [vmem:[%s3821_s8 + $0x268] sm:$0xff] }
 0x538   : > { %2505 = vst [vmem:[%s5564_s28 + $0x30] sm:$0xff] %v2409_v52  ;;  %v2277_v20 = vpack.c.bf16 %v2249_v14, %v2248_v15  ;;  %v2254_v24 = vsub.f32 1.0, %v1028_v12  ;;  %v2255_v10 = vsub.f32 1.0, %v1057_v32  ;;  %v2415_v18 = vmul.f32 %v2319_v25, %v1028_v12  ;;  %v2321_v15 = vld [vmem:[%s3821_s8 + $0x70] sm:$0xff]  ;;  %v2358_v25 = vld [vmem:[%s3821_s8 + $0x198] sm:$0xff] }
 0x539   : > { %2537 = vst [vmem:[%s5564_s28 + $0x130] sm:$0xff] %v2441_v38  ;;  %v2447_v49 = vmul.f32 %v2351_v6, %v1028_v12  ;;  %v2479_v43 = vmul.f32 %v2383_v47, %v1028_v12  ;;  %v2416_v37 = vmul.f32 %v2320_v63, %v1057_v32  ;;  %v2448_v52 = vmul.f32 %v2352_v28, %v1057_v32  ;;  %v2353_v38 = vld [vmem:[%s3821_s8 + $0x170] sm:$0xff]  ;;  %v2326_v12 = vld [vmem:[%s3821_s8 + $0x98] sm:$0xff]  ;;  %v2359_v63 = vld [vmem:[%s3821_s8 + $0x1a0] sm:$0xff] }
 0x53a   : > { %2569 = vst [vmem:[%s5564_s28 + $0x230] sm:$0xff] %v2473_v7  ;;  %v2280_v13 = vpack.c.bf16 %v2255_v10, %v2254_v24  ;;  %v2480_v39 = vmul.f32 %v2384_v27, %v1057_v32  ;;  %v2385_v14 = vld [vmem:[%s3821_s8 + $0x270] sm:$0xff]  ;;  %v2390_v24 = vld [vmem:[%s3821_s8 + $0x298] sm:$0xff] }
 0x53b   : > { %3064 = vst [vmem:[%s5361_s14 + $0x298] sm:$0xff] %v2277_v20 }
 0x53c   : > { %2506 = vst [vmem:[%s5564_s28 + $0x38] sm:$0xff] %v2410_v60  ;;  %v1084_v34 = vpop.f32.mrf.mxu2  ;;  %v1113_v19 = vpop.f32.mrf.mxu3  ;;  %v2322_v60 = vld [vmem:[%s3821_s8 + $0x78] sm:$0xff] }
 0x53d   : > { %2538 = vst [vmem:[%s5564_s28 + $0x138] sm:$0xff] %v2442_v16  ;;  %v2252_v54 = vsub.f32 1.0, %v1084_v34  ;;  %v2253_v55 = vsub.f32 1.0, %v1113_v19  ;;  %v2413_v50 = vmul.f32 %v2317_v57, %v1084_v34  ;;  %v2445_v0 = vmul.f32 %v2349_v5, %v1084_v34  ;;  %v2354_v16 = vld [vmem:[%s3821_s8 + $0x178] sm:$0xff] }
 0x53e   : > { %2570 = vst [vmem:[%s5564_s28 + $0x238] sm:$0xff] %v2474_v62  ;;  %v2477_v46 = vmul.f32 %v2381_v11, %v1084_v34  ;;  %v2414_v59 = vmul.f32 %v2318_v53, %v1113_v19  ;;  %v2446_v41 = vmul.f32 %v2350_v8, %v1113_v19  ;;  %v2478_v4 = vmul.f32 %v2382_v58, %v1113_v19  ;;  %v2323_v62 = vld [vmem:[%s3821_s8 + $0x80] sm:$0xff]  ;;  %v2325_v11 = vld [vmem:[%s3821_s8 + $0x90] sm:$0xff] }
 0x53f   : > { %2507 = vst [vmem:[%s5564_s28 + $0x40] sm:$0xff] %v2411_v1  ;;  %v2279_v48 = vpack.c.bf16 %v2253_v55, %v2252_v54  ;;  %v1031_v31 = vpop.f32.mrf.mxu0  ;;  %v1060_v1 = vpop.f32.mrf.mxu1 }
 0x540   : > { %2539 = vst [vmem:[%s5564_s28 + $0x140] sm:$0xff] %v2443_v42  ;;  %v2258_v3 = vsub.f32 1.0, %v1031_v31  ;;  %v2259_v21 = vsub.f32 1.0, %v1060_v1  ;;  %v2419_v17 = vmul.f32 %v2323_v62, %v1031_v31  ;;  %v2451_v19 = vmul.f32 %v2355_v26, %v1031_v31  ;;  %v2330_v26 = vld [vmem:[%s3821_s8 + $0xb8] sm:$0xff] }
 0x541   : > { %2571 = vst [vmem:[%s5564_s28 + $0x240] sm:$0xff] %v2475_v45  ;;  %v2387_v45 = vld [vmem:[%s3821_s8 + $0x280] sm:$0xff] }
 0x542   : > { %3065 = vst [vmem:[%s5361_s14 + $0x2a0] sm:$0xff] %v2278_v29  ;;  %v2483_v57 = vmul.f32 %v2387_v45, %v1031_v31  ;;  %v2282_v5 = vpack.c.bf16 %v2259_v21, %v2258_v3  ;;  %v2394_v45 = vld [vmem:[%s3821_s8 + $0x2b8] sm:$0xff] }
 0x543   : > { %2508 = vst [vmem:[%s5564_s28 + $0x48] sm:$0xff] %v2412_v61  ;;  %v2324_v61 = vld [vmem:[%s3821_s8 + $0x88] sm:$0xff] }
 0x544   : > { %2540 = vst [vmem:[%s5564_s28 + $0x148] sm:$0xff] %v2444_v30  ;;  %v1086_v33 = vpop.f32.mrf.mxu2  ;;  %v1115_v22 = vpop.f32.mrf.mxu3  ;;  %v2356_v30 = vld [vmem:[%s3821_s8 + $0x188] sm:$0xff]  ;;  %v2420_v54 = vmul.f32 %v2324_v61, %v1060_v1 }
 0x545   : > { %2572 = vst [vmem:[%s5564_s28 + $0x248] sm:$0xff] %v2476_v36  ;;  %v2256_v7 = vsub.f32 1.0, %v1086_v33  ;;  %v2257_v35 = vsub.f32 1.0, %v1115_v22  ;;  %v2417_v44 = vmul.f32 %v2321_v15, %v1086_v33  ;;  %v2449_v20 = vmul.f32 %v2353_v38, %v1086_v33  ;;  %v2388_v36 = vld [vmem:[%s3821_s8 + $0x288] sm:$0xff] }
 0x546   : > { %2509 = vst [vmem:[%s5564_s28 + $0x50] sm:$0xff] %v2413_v50  ;;  %v2481_v56 = vmul.f32 %v2385_v14, %v1086_v33  ;;  %v2418_v23 = vmul.f32 %v2322_v60, %v1115_v22  ;;  %v2450_v51 = vmul.f32 %v2354_v16, %v1115_v22  ;;  %v2482_v42 = vmul.f32 %v2386_v2, %v1115_v22  ;;  %v2357_v50 = vld [vmem:[%s3821_s8 + $0x190] sm:$0xff] }
 0x547   : > { %2541 = vst [vmem:[%s5564_s28 + $0x150] sm:$0xff] %v2445_v0  ;;  %v2281_v40 = vpack.c.bf16 %v2257_v35, %v2256_v7  ;;  %v2452_v55 = vmul.f32 %v2356_v30, %v1060_v1  ;;  %v2484_v0 = vmul.f32 %v2388_v36, %v1060_v1  ;;  %v1033_v32 = vpop.f32.mrf.mxu0  ;;  %v2329_v14 = vld [vmem:[%s3821_s8 + $0xb0] sm:$0xff]  ;;  %v2332_v30 = vld [vmem:[%s3821_s8 + $0xc8] sm:$0xff] }
 0x548   : > { %2573 = vst [vmem:[%s5564_s28 + $0x250] sm:$0xff] %v2477_v46  ;;  %v2389_v46 = vld [vmem:[%s3821_s8 + $0x290] sm:$0xff]  ;;  %v2262_v28 = vsub.f32 1.0, %v1033_v32  ;;  %v2455_v22 = vmul.f32 %v2359_v63, %v1033_v32  ;;  %v2399_v63 = vld [vmem:[%s3821_s8 + $0x2e0] sm:$0xff] }
 0x549   : > { %3066 = vst [vmem:[%s5361_s14 + $0x2a8] sm:$0xff] %v2279_v48  ;;  %v2393_v2 = vld [vmem:[%s3821_s8 + $0x2b0] sm:$0xff] }
 0x54a   : > { %2510 = vst [vmem:[%s5564_s28 + $0x58] sm:$0xff] %v2414_v59 }
 0x54b   : > { %2542 = vst [vmem:[%s5564_s28 + $0x158] sm:$0xff] %v2446_v41  ;;  %v1062_v41 = vpop.f32.mrf.mxu1 }
 0x54c   : > { %2574 = vst [vmem:[%s5564_s28 + $0x258] sm:$0xff] %v2478_v4  ;;  %v1089_v29 = vpop.f32.mrf.mxu2  ;;  %v1118_v34 = vpop.f32.mrf.mxu3  ;;  %v2263_v27 = vsub.f32 1.0, %v1062_v41 }
 0x54d   : > { %2511 = vst [vmem:[%s5564_s28 + $0x60] sm:$0xff] %v2415_v18  ;;  %v2260_v53 = vsub.f32 1.0, %v1089_v29  ;;  %v2261_v8 = vsub.f32 1.0, %v1118_v34  ;;  %v2421_v48 = vmul.f32 %v2325_v11, %v1089_v29  ;;  %v2453_v58 = vmul.f32 %v2357_v50, %v1089_v29  ;;  %v2327_v18 = vld [vmem:[%s3821_s8 + $0xa0] sm:$0xff]  ;;  %v2333_v11 = vld [vmem:[%s3821_s8 + $0xd0] sm:$0xff] }
 0x54e   : > { %2543 = vst [vmem:[%s5564_s28 + $0x160] sm:$0xff] %v2447_v49  ;;  %v2485_v59 = vmul.f32 %v2389_v46, %v1089_v29  ;;  %v2422_v10 = vmul.f32 %v2326_v12, %v1118_v34  ;;  %v2454_v49 = vmul.f32 %v2358_v25, %v1118_v34  ;;  %v2423_v33 = vmul.f32 %v2327_v18, %v1033_v32  ;;  %v2334_v46 = vld [vmem:[%s3821_s8 + $0xd8] sm:$0xff] }
 0x54f   : > { %2575 = vst [vmem:[%s5564_s28 + $0x260] sm:$0xff] %v2479_v43  ;;  %v2283_v4 = vpack.c.bf16 %v2261_v8, %v2260_v53  ;;  %v2486_v43 = vmul.f32 %v2390_v24, %v1118_v34  ;;  %v2284_v38 = vpack.c.bf16 %v2263_v27, %v2262_v28  ;;  %v1036_v35 = vpop.f32.mrf.mxu0  ;;  %v2363_v34 = vld [vmem:[%s3821_s8 + $0x1c0] sm:$0xff]  ;;  %v2397_v53 = vld [vmem:[%s3821_s8 + $0x2d0] sm:$0xff]  ;;  %v2366_v8 = vld [vmem:[%s3821_s8 + $0x1d8] sm:$0xff] }
 0x550   : > { %3067 = vst [vmem:[%s5361_s14 + $0x2b0] sm:$0xff] %v2280_v13  ;;  %v2391_v13 = vld [vmem:[%s3821_s8 + $0x2a0] sm:$0xff]  ;;  %v2266_v29 = vsub.f32 1.0, %v1036_v35  ;;  %v2398_v25 = vld [vmem:[%s3821_s8 + $0x2d8] sm:$0xff]  ;;  %v5756_v27 = vld [vmem:[%s3804_s11 + $0x8] sm:$0xff] }
 0x551   : > { %2512 = vst [vmem:[%s5564_s28 + $0x68] sm:$0xff] %v2416_v37  ;;  %v2328_v37 = vld [vmem:[%s3821_s8 + $0xa8] sm:$0xff]  ;;  %v2487_v15 = vmul.f32 %v2391_v13, %v1033_v32  ;;  %v5753_v13 = vld [vmem:[%s3804_s11] sm:$0xff]  ;;  %vm1161_vm7 = vcmp.eq.s32.totalorder %v5756_v27, 0 }
 0x552   : > { %2544 = vst [vmem:[%s5564_s28 + $0x168] sm:$0xff] %v2448_v52  ;;  %v2360_v52 = vld [vmem:[%s3821_s8 + $0x1a8] sm:$0xff]  ;;  %v2424_v7 = vmul.f32 %v2328_v37, %v1062_v41  ;;  %vm1160_vm3 = vcmp.eq.s32.totalorder %v5753_v13, 0 }
 0x553   : > { %2576 = vst [vmem:[%s5564_s28 + $0x268] sm:$0xff] %v2480_v39  ;;  %v2392_v39 = vld [vmem:[%s3821_s8 + $0x2a8] sm:$0xff]  ;;  %v1065_v60 = vpop.f32.mrf.mxu1 }
 0x554   : > { %2513 = vst [vmem:[%s5564_s28 + $0x70] sm:$0xff] %v2417_v44  ;;  %v1091_v6 = vpop.f32.mrf.mxu2  ;;  %v1120_v47 = vpop.f32.mrf.mxu3  ;;  %v2456_v44 = vmul.f32 %v2360_v52, %v1062_v41  ;;  %v2488_v16 = vmul.f32 %v2392_v39, %v1062_v41  ;;  %v2335_v41 = vld [vmem:[%s3821_s8 + $0xe0] sm:$0xff]  ;;  %v2400_v39 = vld [vmem:[%s3821_s8 + $0x2e8] sm:$0xff] }
 0x555   : > { %2545 = vst [vmem:[%s5564_s28 + $0x170] sm:$0xff] %v2449_v20  ;;  %v2361_v20 = vld [vmem:[%s3821_s8 + $0x1b0] sm:$0xff]  ;;  %v2489_v1 = vmul.f32 %v2393_v2, %v1091_v6  ;;  %v2426_v21 = vmul.f32 %v2330_v26, %v1120_v47  ;;  %v2490_v36 = vmul.f32 %v2394_v45, %v1120_v47  ;;  %v5797_v2 = vld [vmem:[%s3804_s11 + $0x38] sm:$0xff]  ;;  %v5806_v26 = vld [vmem:[%s3804_s11 + $0x40] sm:$0xff] }
 0x556   : > { %2577 = vst [vmem:[%s5564_s28 + $0x270] sm:$0xff] %v2481_v56  ;;  %v2457_v31 = vmul.f32 %v2361_v20, %v1091_v6  ;;  %v2338_v45 = vld [vmem:[%s3821_s8 + $0xf8] sm:$0xff]  ;;  %vm1167_vm4 = vcmp.eq.s32.totalorder %v5797_v2, 0 }
 0x557   : > { %3068 = vst [vmem:[%s5361_s14 + $0x2b8] sm:$0xff] %v2281_v40  ;;  %v2264_v40 = vsub.f32 1.0, %v1091_v6 }
 0x558   : > { %2514 = vst [vmem:[%s5564_s28 + $0x78] sm:$0xff] %v2418_v23  ;;  %v2265_v23 = vsub.f32 1.0, %v1120_v47 }
 0x559   : > { %2546 = vst [vmem:[%s5564_s28 + $0x178] sm:$0xff] %v2450_v51  ;;  %v2425_v51 = vmul.f32 %v2329_v14, %v1091_v6  ;;  %v2367_v6 = vld [vmem:[%s3821_s8 + $0x1e0] sm:$0xff] }
 0x55a   : > { %2578 = vst [vmem:[%s5564_s28 + $0x278] sm:$0xff] %v2482_v42  ;;  %v2362_v42 = vld [vmem:[%s3821_s8 + $0x1b8] sm:$0xff]  ;;  %v2285_v3 = vpack.c.bf16 %v2265_v23, %v2264_v40  ;;  %v5778_v14 = vld [vmem:[%s3804_s11 + $0x20] sm:$0xff]  ;;  %v5794_v40 = vld [vmem:[%s3804_s11 + $0x30] sm:$0xff] }
 0x55b   : > { %2515 = vst [vmem:[%s5564_s28 + $0x80] sm:$0xff] %v2419_v17  ;;  %v2331_v17 = vld [vmem:[%s3821_s8 + $0xc0] sm:$0xff]  ;;  %v2458_v61 = vmul.f32 %v2362_v42, %v1120_v47  ;;  %v2428_v47 = vmul.f32 %v2332_v30, %v1065_v60  ;;  %vm1164_vm1 = vcmp.eq.s32.totalorder %v5778_v14, 0  ;;  %v5844_v30 = vld [vmem:[%s3804_s11 + $0x68] sm:$0xff]  ;;  %vm1166_vm9 = vcmp.eq.s32.totalorder %v5794_v40, 0 }
 0x55c   : > { %2547 = vst [vmem:[%s5564_s28 + $0x180] sm:$0xff] %v2451_v19  ;;  %v5700_v56 = vpop.f32.mrf.mxu2  ;;  %v5704_v62 = vpop.f32.mrf.mxu3  ;;  %v2267_v19 = vsub.f32 1.0, %v1065_v60  ;;  %v2427_v50 = vmul.f32 %v2331_v17, %v1036_v35  ;;  %v5826_v17 = vld [vmem:[%s3804_s11 + $0x58] sm:$0xff] }
 0x55d   : > { %2579 = vst [vmem:[%s5564_s28 + $0x280] sm:$0xff] %v2483_v57  ;;  %v2395_v57 = vld [vmem:[%s3821_s8 + $0x2c0] sm:$0xff]  ;;  %v2268_v32 = vsub.f32 1.0, %v5700_v56  ;;  %v5766_v37 = vmul.f32 %v2397_v53, %v5700_v56  ;;  %v5788_v20 = vmul.f32 %v2398_v25, %v5704_v62  ;;  %v5902_v25 = vld [vmem:[%s3804_s11 + $0xb8] sm:$0xff] }
 0x55e   : > { %3069 = vst [vmem:[%s5361_s14 + $0x2c0] sm:$0xff] %v2282_v5  ;;  %v2364_v5 = vld [vmem:[%s3821_s8 + $0x1c8] sm:$0xff]  ;;  %v2286_v12 = vpack.c.bf16 %v2267_v19, %v2266_v29  ;;  %v5823_v29 = vld [vmem:[%s3804_s11 + $0x50] sm:$0xff] }
 0x55f   : > { %2516 = vst [vmem:[%s5564_s28 + $0x88] sm:$0xff] %v2420_v54  ;;  %v2396_v54 = vld [vmem:[%s3821_s8 + $0x2c8] sm:$0xff] }
 0x560   : > { %2548 = vst [vmem:[%s5564_s28 + $0x188] sm:$0xff] %v2452_v55  ;;  %v2365_v55 = vld [vmem:[%s3821_s8 + $0x1d0] sm:$0xff]  ;;  %v5743_v18 = vmul.f32 %v2396_v54, %v1065_v60 }
 0x561   : > { %2580 = vst [vmem:[%s5564_s28 + $0x288] sm:$0xff] %v2484_v0  ;;  %v2459_v0 = vmul.f32 %v2363_v34, %v1036_v35  ;;  %v5829_v34 = vld [vmem:[%s3804_s11 + $0x60] sm:$0xff] }
 0x562   : > { %2517 = vst [vmem:[%s5564_s28 + $0x90] sm:$0xff] %v2421_v48  ;;  %v5728_v48 = vpop.f32.mrf.mxu0 }
 0x563   : > { %2549 = vst [vmem:[%s5564_s28 + $0x190] sm:$0xff] %v2453_v58  ;;  %v2491_v58 = vmul.f32 %v2395_v57, %v1036_v35  ;;  %v2270_v52 = vsub.f32 1.0, %v5728_v48  ;;  %v5781_v35 = vld [vmem:[%s3804_s11 + $0x28] sm:$0xff]  ;;  %v5815_v42 = vmul.f32 %v2335_v41, %v5728_v48  ;;  %v5837_v19 = vmul.f32 %v2399_v63, %v5728_v48  ;;  %v2402_v57 = vld [vmem:[%s3821_s8 + $0x2f8] sm:$0xff]  ;;  %v5905_v41 = vld [vmem:[%s3804_s11 + $0xc0] sm:$0xff] }
 0x564   : > { %2581 = vst [vmem:[%s5564_s28 + $0x290] sm:$0xff] %v2485_v59  ;;  %v2269_v59 = vsub.f32 1.0, %v5704_v62  ;;  %v5738_v24 = vpop.f32.mrf.mxu2  ;;  %v5750_v28 = vpop.f32.mrf.mxu3  ;;  %vm1165_vm0 = vcmp.eq.s32.totalorder %v5781_v35, 0 }
 0x565   : > { %3070 = vst [vmem:[%s5361_s14 + $0x2c8] sm:$0xff] %v2283_v4  ;;  %v5736_v4 = vpop.f32.mrf.mxu1  ;;  %v5935_v63 = vmul.f32 %v2402_v57, %v5750_v28 }
 0x566   : > { %2518 = vst [vmem:[%s5564_s28 + $0x98] sm:$0xff] %v2422_v10  ;;  %v5741_v10 = vmul.f32 %v2364_v5, %v1065_v60  ;;  %v2271_v60 = vsub.f32 1.0, %v5736_v4  ;;  %v5800_v23 = vpack.c.bf16 %v2269_v59, %v2268_v32  ;;  %v5847_v5 = vld [vmem:[%s3804_s11 + $0x70] sm:$0xff] }
 0x567   : > { %2550 = vst [vmem:[%s5564_s28 + $0x198] sm:$0xff] %v2454_v49  ;;  %v5746_v49 = vmul.f32 %v2333_v11, %v5700_v56  ;;  %v5859_v11 = vmul.f32 %v2400_v39, %v5736_v4  ;;  %v5899_v59 = vld [vmem:[%s3804_s11 + $0xb0] sm:$0xff]  ;;  %v5998_v39 = vsel %vm1164_vm1, 1.0, %v7020_v9  ;;  %vm7273_vm1 = vcmp.eq.s32.totalorder %v5829_v34, 0 }
 0x568   : > { %2582 = vst [vmem:[%s5564_s28 + $0x298] sm:$0xff] %v2486_v43  ;;  %v2336_v43 = vld [vmem:[%s3821_s8 + $0xe8] sm:$0xff]  ;;  %v5874_v53 = vpack.c.bf16 %v2271_v60, %v2270_v52  ;;  %vm1182_vm2 = vcmp.eq.s32.totalorder %v5899_v59, 0  ;;  %v6015_v60 = vsel %vm1167_vm4, 1.0, %v7020_v9 }
 0x569   : > { %2519 = vst [vmem:[%s5564_s28 + $0xa0] sm:$0xff] %v2423_v33  ;;  %v5759_v33 = vld [vmem:[%s3804_s11 + $0x10] sm:$0xff]  ;;  %v5941_v52 = vld [vmem:[%s3804_s11 + $0xe8] sm:$0xff] }
 0x56a   : > { %2551 = vst [vmem:[%s5564_s28 + $0x1a0] sm:$0xff] %v2455_v22  ;;  %v5763_v22 = vmul.f32 %v2365_v55, %v5700_v56  ;;  %v2272_v56 = vsub.f32 1.0, %v5738_v24  ;;  %vm1162_vm8 = vcmp.eq.s32.totalorder %v5759_v33, 0  ;;  %v5862_v55 = vld [vmem:[%s3804_s11 + $0x80] sm:$0xff]  ;;  %vm1189_vm5 = vcmp.eq.s32.totalorder %v5941_v52, 0 }
 0x56b   : > { %2583 = vst [vmem:[%s5564_s28 + $0x2a0] sm:$0xff] %v2487_v15  ;;  %v5769_v15 = vmul.f32 %v2334_v46, %v5704_v62 }
 0x56c   : > { %3071 = vst [vmem:[%s5361_s14 + $0x2d0] sm:$0xff] %v2284_v38  ;;  %v2368_v38 = vld [vmem:[%s3821_s8 + $0x1e8] sm:$0xff] }
 0x56d   : > { %2520 = vst [vmem:[%s5564_s28 + $0xa8] sm:$0xff] %v2424_v7  ;;  %v5775_v7 = vld [vmem:[%s3804_s11 + $0x18] sm:$0xff]  ;;  %v5856_v54 = vmul.f32 %v2368_v38, %v5736_v4  ;;  %v5944_v38 = vld [vmem:[%s3804_s11 + $0xf0] sm:$0xff] }
 0x56e   : > { %2552 = vst [vmem:[%s5564_s28 + $0x1a8] sm:$0xff] %v2456_v44  ;;  %v5785_v44 = vmul.f32 %v2366_v8, %v5704_v62  ;;  %v2401_v62 = vld [vmem:[%s3821_s8 + $0x2f0] sm:$0xff]  ;;  %vm1163_vm10 = vcmp.eq.s32.totalorder %v5775_v7, 0  ;;  %v5880_v8 = vld [vmem:[%s3804_s11 + $0x98] sm:$0xff]  ;;  %vm1190_vm15 = vcmp.eq.s32.totalorder %v5944_v38, 0 }
 0x56f   : > { %2584 = vst [vmem:[%s5564_s28 + $0x2a8] sm:$0xff] %v2488_v16  ;;  %v2337_v16 = vld [vmem:[%s3821_s8 + $0xf0] sm:$0xff]  ;;  %v5896_v32 = vmul.f32 %v2401_v62, %v5738_v24  ;;  %v6042_v62 = vsel %vm7273_vm1, 1.0, %v7020_v9 }
 0x570   : > { %2521 = vst [vmem:[%s5564_s28 + $0xb0] sm:$0xff] %v2425_v51  ;;  %v2369_v51 = vld [vmem:[%s3821_s8 + $0x1f0] sm:$0xff]  ;;  %v5877_v46 = vmul.f32 %v2337_v16, %v5738_v24 }
 0x571   : > { %2553 = vst [vmem:[%s5564_s28 + $0x1b0] sm:$0xff] %v2457_v31  ;;  %v2273_v31 = vsub.f32 1.0, %v5750_v28 }
 0x572   : > { %2585 = vst [vmem:[%s5564_s28 + $0x2b0] sm:$0xff] %v2489_v1  ;;  %v5809_v1 = vld [vmem:[%s3804_s11 + $0x48] sm:$0xff] }
 0x573   : > { %3072 = vst [vmem:[%s5361_s14 + $0x2d8] sm:$0xff] %v2285_v3  ;;  %v5818_v3 = vmul.f32 %v2367_v6, %v5728_v48  ;;  %v5883_v48 = vld [vmem:[%s3804_s11 + $0xa0] sm:$0xff]  ;;  %v5912_v6 = vmul.f32 %v2338_v45, %v5750_v28 }
 0x574   : > { %2522 = vst [vmem:[%s5564_s28 + $0xb8] sm:$0xff] %v2426_v21  ;;  %v2370_v21 = vld [vmem:[%s3821_s8 + $0x1f8] sm:$0xff]  ;;  %vm7281_vm1 = vcmp.eq.s32.totalorder %v5883_v48, 0 }
 0x575   : > { %2554 = vst [vmem:[%s5564_s28 + $0x1b8] sm:$0xff] %v2458_v61  ;;  %v5840_v61 = vmul.f32 %v2336_v43, %v5736_v4  ;;  %v5915_v4 = vmul.f32 %v2370_v21, %v5750_v28  ;;  %v5938_v43 = vld [vmem:[%s3804_s11 + $0xe0] sm:$0xff]  ;;  %v5976_v28 = vsel %vm1160_vm3, 1.0, %v7020_v9  ;;  %vm7269_vm3 = vcmp.eq.s32.totalorder %v5806_v26, 0 }
 0x576   : > { %2586 = vst [vmem:[%s5564_s28 + $0x2b8] sm:$0xff] %v2490_v36  ;;  %v5850_v36 = vld [vmem:[%s3804_s11 + $0x78] sm:$0xff]  ;;  %vm1188_vm13 = vcmp.eq.s32.totalorder %v5938_v43, 0 }
 0x577   : > { %2523 = vst [vmem:[%s5564_s28 + $0xc0] sm:$0xff] %v2427_v50  ;;  %v5865_v50 = vld [vmem:[%s3804_s11 + $0x88] sm:$0xff]  ;;  %vm7276_vm4 = vcmp.eq.s32.totalorder %v5850_v36, 0 }
 0x578   : > { %2555 = vst [vmem:[%s5564_s28 + $0x1c0] sm:$0xff] %v2459_v0  ;;  %v5868_v0 = vld [vmem:[%s3804_s11 + $0x90] sm:$0xff] }
 0x579   : > { %7252 = vst [vmem:[#allocation31_spill] sm:$0xff] %v5809_v1 }
 0x57a   : > { %2587 = vst [vmem:[%s5564_s28 + $0x2c0] sm:$0xff] %v2491_v58  ;;  %v5886_v58 = vld [vmem:[%s3804_s11 + $0xa8] sm:$0xff] }
 0x57b   : > { %7253 = vst [vmem:[#allocation33_spill] sm:$0xff] %v5829_v34 }
 0x57c   : > { %3073 = vst [vmem:[%s5361_s14 + $0x2e0] sm:$0xff] %v2286_v12  ;;  %v5893_v12 = vmul.f32 %v2369_v51, %v5738_v24  ;;  %v5951_v24 = vld [vmem:[%s3804_s11 + $0xf8] sm:$0xff] }
 0x57d   : > { %7254 = vst [vmem:[#allocation38_spill] sm:$0xff] %v5844_v30  ;;  %vm1191_vm12 = vcmp.eq.s32.totalorder %v5951_v24, 0 }
 0x57e   : > { %2524 = vst [vmem:[%s5564_s28 + $0xc8] sm:$0xff] %v2428_v47  ;;  %v5918_v47 = vld [vmem:[%s3804_s11 + $0xc8] sm:$0xff] }
 0x57f   : > { %7255 = vst [vmem:[#allocation43_spill] sm:$0xff] %v5862_v55  ;;  %vm1185_vm11 = vcmp.eq.s32.totalorder %v5918_v47, 0 }
 0x580   : > { %7256 = vst [vmem:[#allocation37_spill] sm:$0xff] %v5865_v50 }
 0x581   : > { %2556 = vst [vmem:[%s5564_s28 + $0x1c8] sm:$0xff] %v5741_v10  ;;  %v5921_v10 = vld [vmem:[%s3804_s11 + $0xd0] sm:$0xff] }
 0x582   : > { %7257 = vst [vmem:[#allocation58_spill] sm:$0xff] %v5880_v8  ;;  %vm1186_vm6 = vcmp.eq.s32.totalorder %v5921_v10, 0 }
 0x583   : > { %7258 = vst [vmem:[#allocation24_spill] sm:$0xff] %v5883_v48 }
 0x584   : > { %7259 = vst [vmem:[#allocation27_spill] sm:$0xff] %v5886_v58 }
 0x585   : > { %2588 = vst [vmem:[%s5564_s28 + $0x2c8] sm:$0xff] %v5743_v18  ;;  %v5924_v18 = vld [vmem:[%s3804_s11 + $0xd8] sm:$0xff]  ;;  %s3123_s11 = smul.u32 768, %s3718_s18  ;;  %s2630_s18 = sshll.u32 %s5564_s28, 4  ;;  %s6785_s18 = int_to_ptr.vmem [resolvable:$true] %s2630_s18 }
 0x586   : > { %7260 = vst [vmem:[#allocation35_spill] sm:$0xff] %v5902_v25  ;;  %vm1187_vm14 = vcmp.eq.s32.totalorder %v5924_v18, 0 }
 0x587   : > { %7261 = vst [vmem:[#allocation36_spill] sm:$0xff] %v5905_v41  ;;  %s2612_s19 = scalar_lea.hbm %s6841_s6, %s3123_s11  ;;  %s2629_s23 = scalar_lea.hbm %s6842_s7, %s3123_s11 }
 0x588   : > { %2525 = vst [vmem:[%s5564_s28 + $0xd0] sm:$0xff] %v5746_v49  ;;  %v5932_v49 = vpack.c.bf16 %v2273_v31, %v2272_v56  ;;  %v6020_v56 = vsel %vm7269_vm3, 1.0, %v7020_v9  ;;  %vm7277_vm3 = vcmp.eq.s32.totalorder %v5862_v55, 0  ;;  %v6086_v55 = vsel %vm7281_vm1, 1.0, %v7020_v9  ;;  %s2615_s1 = sshll.u32 %s2612_s19, 4  ;;  %s2632_s5 = sshll.u32 %s2629_s23, 4  ;;  %s2616_s1 = int_to_ptr.hbm [resolvable:$true] %s2615_s1  ;;  %s6787_s5 = int_to_ptr.hbm [resolvable:$true] %s2632_s5 }
 0x589   : > { %7262 = vst [vmem:[#allocation56_spill] sm:$0xff] %v5918_v47  ;;  %v6064_v45 = vsel %vm7277_vm3, 1.0, %v7020_v9  ;;  %v6135_v47 = vsel %vm1189_vm5, 1.0, %v7020_v9  ;;  %vm1261_vm5 = vcmp.eq.s32.totalorder %v5781_v35, 1  ;;  %s3498_s15 = sshra.s32 %s2616_s1, 4  ;;  %s3499_s15 = int_to_ptr.hbm [resolvable:$true] %s3498_s15 }
 0x58a   : > { %7263 = vst [vmem:[#allocation26_spill] sm:$0xff] %v5921_v10  ;;  %s3500_s29 = scalar_lea.hbm %s3499_s15, 768  ;;  %p3505_p1 = scmp.lt.s32.totalorder %s3499_s15, %s6841_s6 }
 0x58b   : > { %7264 = vst [vmem:[#allocation22_spill] sm:$0xff] %v5924_v18  ;;  %v6147_v18 = vsel %vm1191_vm12, 1.0, %v7020_v9  ;;  %vm1257_vm12 = vcmp.eq.s32.totalorder %v5756_v27, 1  ;;  %p3501_p8 = scmp.ne.s32.totalorder %s3499_s15, %s3500_s29  ;;  %p3506_p3 = scmp.lt.s32.totalorder %s3504_s12, %s3500_s29 }
 0x58c   : > { %2557 = vst [vmem:[%s5564_s28 + $0x1d0] sm:$0xff] %v5763_v22  ;;  %v5981_v22 = vsel %vm1161_vm7, 1.0, %v7020_v9  ;;  %vm7270_vm7 = vcmp.eq.s32.totalorder %v5809_v1, 0 }
 0x58d   : > { %7265 = vst [vmem:[#allocation25_spill] sm:$0xff] %v5938_v43  ;;  %v6025_v16 = vsel %vm7270_vm7, 1.0, %v7020_v9  ;;  %vm7278_vm7 = vcmp.eq.s32.totalorder %v5865_v50, 0  ;;  %v1224_v43 = vpack.c.bf16 %v5981_v22, %v5976_v28  ;;  %p3502_p4 = pnand %p3501_p8, %p3735_p11  ;;  %p3507_p5 = por %p3506_p3, %p3505_p1 }
 0x58e   : > { %7266 = vst [vmem:[#allocation66_spill] sm:$0xff] %v5941_v52  ;;  %v6069_v21 = vsel %vm7278_vm7, 1.0, %v7020_v9 }
 0x58f   : > { %7267 = vst [vmem:[#allocation68_spill] sm:$0xff] %v5944_v38  ;;  %p3503_p9 = pneg %p3502_p4 }
 0x590   : > { %2589 = vst [vmem:[%s5564_s28 + $0x2d0] sm:$0xff] %v5766_v37  ;;  %v5988_v37 = vsel %vm1162_vm8, 1.0, %v7020_v9  ;;  %vm7271_vm8 = vcmp.eq.s32.totalorder %v5823_v29, 0 }
 0x591   : > { %7268 = vst [vmem:[#allocation67_spill] sm:$0xff] %v5951_v24  ;;  %v1228_v24 = vpack.c.bf16 %v6025_v16, %v6020_v56  ;;  %v7291_v56 = vld [vmem:[#allocation36_spill] sm:$0xff]  ;;  %p3508_p7 = pnand %p3507_p5, %p3503_p9 }
 0x592   : > { %3074 = vst [vmem:[%s5361_s14 + $0x2e8] sm:$0xff] %v5800_v23  ;;  %v6032_v23 = vsel %vm7271_vm8, 1.0, %v7020_v9  ;;  %vm7279_vm8 = vcmp.eq.s32.totalorder %v5868_v0, 0  ;;  %vm1280_vm3 = vcmp.eq.s32.totalorder %v7291_v56, 1  ;;  %v7292_v16 = vld [vmem:[#allocation56_spill] sm:$0xff] }
 0x593   : > { %2526 = vst [vmem:[%s5564_s28 + $0xd8] sm:$0xff] %v5769_v15  ;;  %v5993_v15 = vsel %vm1163_vm10, 1.0, %v7020_v9  ;;  %vm7272_vm10 = vcmp.eq.s32.totalorder %v5826_v17, 0  ;;  %vm1281_vm7 = vcmp.eq.s32.totalorder %v7292_v16, 1 }
 0x594   : > { %2558 = vst [vmem:[%s5564_s28 + $0x1d8] sm:$0xff] %v5785_v44  ;;  %v6003_v44 = vsel %vm1165_vm0, 1.0, %v7020_v9  ;;  %v6037_v51 = vsel %vm7272_vm10, 1.0, %v7020_v9  ;;  %vm7274_vm0 = vcmp.eq.s32.totalorder %v5844_v30, 0  ;;  %vm7280_vm10 = vcmp.eq.s32.totalorder %v5880_v8, 0 }
 0x595   : > { %2590 = vst [vmem:[%s5564_s28 + $0x2d8] sm:$0xff] %v5788_v20  ;;  %v6010_v20 = vsel %vm1166_vm9, 1.0, %v7020_v9  ;;  %v6047_v31 = vsel %vm7274_vm0, 1.0, %v7020_v9  ;;  %vm7275_vm9 = vcmp.eq.s32.totalorder %v5847_v5, 0  ;;  %v6081_v57 = vsel %vm7280_vm10, 1.0, %v7020_v9 }
 0x596   : > { %2527 = vst [vmem:[%s5564_s28 + $0xe0] sm:$0xff] %v5815_v42  ;;  %v6054_v42 = vsel %vm7275_vm9, 1.0, %v7020_v9  ;;  %vm7282_vm0 = vcmp.eq.s32.totalorder %v5886_v58, 0  ;;  %vm7283_vm9 = vcmp.eq.s32.totalorder %v5902_v25, 0  ;;  %v6113_v58 = vsel %vm1185_vm11, 1.0, %v7020_v9 }
 0x597   : > { %2559 = vst [vmem:[%s5564_s28 + $0x1e0] sm:$0xff] %v5818_v3  ;;  %v6059_v3 = vsel %vm7276_vm4, 1.0, %v7020_v9  ;;  %v6091_v50 = vsel %vm7282_vm0, 1.0, %v7020_v9  ;;  %v6103_v8 = vsel %vm7283_vm9, 1.0, %v7020_v9  ;;  %vm7284_vm4 = vcmp.eq.s32.totalorder %v5905_v41, 0 }
 0x598   : > { %2591 = vst [vmem:[%s5564_s28 + $0x2e0] sm:$0xff] %v5837_v19  ;;  %v6076_v19 = vsel %vm7279_vm8, 1.0, %v7020_v9  ;;  %v6108_v48 = vsel %vm7284_vm4, 1.0, %v7020_v9  ;;  %v6125_v25 = vsel %vm1187_vm14, 1.0, %v7020_v9  ;;  %v6130_v41 = vsel %vm1188_vm13, 1.0, %v7020_v9 }
 0x599   : > { %3075 = vst [vmem:[%s5361_s14 + $0x2f0] sm:$0xff] %v5874_v53  ;;  %v6098_v53 = vsel %vm1182_vm2, 1.0, %v7020_v9  ;;  %v1225_v52 = vpack.c.bf16 %v5993_v15, %v5988_v37  ;;  %v1227_v38 = vpack.c.bf16 %v6015_v60, %v6010_v20  ;;  %v1230_v28 = vpack.c.bf16 %v6047_v31, %v6042_v62  ;;  %v7289_v60 = vld [vmem:[#allocation27_spill] sm:$0xff]  ;;  %v7296_v62 = vld [vmem:[#allocation68_spill] sm:$0xff] }
 0x59a   : > { %2528 = vst [vmem:[%s5564_s28 + $0xe8] sm:$0xff] %v5840_v61  ;;  %v6120_v61 = vsel %vm1186_vm6, 1.0, %v7020_v9  ;;  %vm1256_vm11 = vcmp.eq.s32.totalorder %v5753_v13, 1  ;;  %vm1258_vm13 = vcmp.eq.s32.totalorder %v5759_v33, 1  ;;  %vm1259_vm14 = vcmp.eq.s32.totalorder %v5775_v7, 1  ;;  %v7297_v31 = vld [vmem:[#allocation67_spill] sm:$0xff] }
 0x59b   : > { %2560 = vst [vmem:[%s5564_s28 + $0x1e8] sm:$0xff] %v5856_v54  ;;  %v6142_v54 = vsel %vm1190_vm15, 1.0, %v7020_v9  ;;  %v1229_v9 = vpack.c.bf16 %v6037_v51, %v6032_v23  ;;  %vm1260_vm6 = vcmp.eq.s32.totalorder %v5778_v14, 1  ;;  %vm1262_vm2 = vcmp.eq.s32.totalorder %v5794_v40, 1  ;;  %v7294_v23 = vld [vmem:[#allocation25_spill] sm:$0xff]  ;;  %v7295_v51 = vld [vmem:[#allocation66_spill] sm:$0xff] }
 0x59c   : > { %2592 = vst [vmem:[%s5564_s28 + $0x2e8] sm:$0xff] %v5859_v11  ;;  %v1226_v11 = vpack.c.bf16 %v6003_v44, %v5998_v39  ;;  %vm1263_vm15 = vcmp.eq.s32.totalorder %v5797_v2, 1  ;;  %vm1282_vm8 = vcmp.eq.s32.totalorder %v5921_v10, 1  ;;  %vm1284_vm1 = vcmp.eq.s32.totalorder %v7294_v23, 1 }
 0x59d   : > { %2529 = vst [vmem:[%s5564_s28 + $0xf0] sm:$0xff] %v5877_v46  ;;  %v1231_v46 = vpack.c.bf16 %v6059_v3, %v6054_v42  ;;  %vm1285_vm0 = vcmp.eq.s32.totalorder %v7295_v51, 1  ;;  %vm1286_vm9 = vcmp.eq.s32.totalorder %v7296_v62, 1  ;;  %vm1287_vm4 = vcmp.eq.s32.totalorder %v7297_v31, 1 }
 0x59e   : > { %2561 = vst [vmem:[%s5564_s28 + $0x1f0] sm:$0xff] %v5893_v12  ;;  %v7305_v3 = vpack.c.bf16 %v6069_v21, %v6064_v45  ;;  %v7310_v21 = vpack.c.bf16 %v6081_v57, %v6076_v19  ;;  %v7315_v57 = vpack.c.bf16 %v6091_v50, %v6086_v55  ;;  %v7318_v50 = vpack.c.bf16 %v6103_v8, %v6098_v53 }
 0x59f   : > { %2593 = vst [vmem:[%s5564_s28 + $0x2f0] sm:$0xff] %v5896_v32  ;;  %v7319_v53 = vpack.c.bf16 %v6113_v58, %v6108_v48  ;;  %v7320_v51 = vpack.c.bf16 %v6125_v25, %v6120_v61 }
 0x5a0   : > { %3076 = vst [vmem:[%s5361_s14 + $0x2f8] sm:$0xff] %v5932_v49  ;;  %v7287_v49 = vld [vmem:[#allocation58_spill] sm:$0xff] }
 0x5a1   : > { %2530 = vst [vmem:[%s5564_s28 + $0xf8] sm:$0xff] %v5912_v6  ;;  %v7285_v6 = vld [vmem:[#allocation43_spill] sm:$0xff] }
 0x5a2   : > { %2562 = vst [vmem:[%s5564_s28 + $0x1f8] sm:$0xff] %v5915_v4  ;;  %v7286_v4 = vld [vmem:[#allocation37_spill] sm:$0xff] }
 0x5a3   : > { %2594 = vst [vmem:[%s5564_s28 + $0x2f8] sm:$0xff] %v5935_v63  ;;  %v7288_v63 = vld [vmem:[#allocation24_spill] sm:$0xff] }
 0x5a4   : > { %1240 = vst [vmem:[%s5361_s14] sm:$0xff] %v1224_v43  ;;  %v7290_v43 = vld [vmem:[#allocation35_spill] sm:$0xff] }
 0x5a5   : > { %1241 = vst [vmem:[%s5361_s14 + $0x8] sm:$0xff] %v1225_v52  ;;  %v7293_v52 = vld [vmem:[#allocation22_spill] sm:$0xff] }
 0x5a6   : > { %1242 = vst [vmem:[%s5361_s14 + $0x10] sm:$0xff] %v1226_v11  ;;  %vm1283_vm10 = vcmp.eq.s32.totalorder %v7293_v52, 1  ;;  %v7298_v11 = vmov 0.0  }
 0x5a7   : > { %1243 = vst [vmem:[%s5361_s14 + $0x18] sm:$0xff] %v1227_v38  ;;  %v1288_v32 = vsel %vm1256_vm11, 1.0, %v7298_v11  ;;  %v1289_v38 = vsel %vm1257_vm12, 1.0, %v7298_v11  ;;  %v1290_v20 = vsel %vm1258_vm13, 1.0, %v7298_v11  ;;  %v1292_v44 = vsel %vm1260_vm6, 1.0, %v7298_v11 }
 0x5a8   : > { %1244 = vst [vmem:[%s5361_s14 + $0x20] sm:$0xff] %v1228_v24  ;;  %v1291_v24 = vsel %vm1259_vm14, 1.0, %v7298_v11  ;;  %v1293_v39 = vsel %vm1261_vm5, 1.0, %v7298_v11  ;;  %v6260_v12 = vsel %vm1263_vm15, 1.0, %v7298_v11  ;;  %vm7299_vm11 = vcmp.eq.s32.totalorder %v5806_v26, 1 }
 0x5a9   : > { %1245 = vst [vmem:[%s5361_s14 + $0x28] sm:$0xff] %v1229_v9  ;;  %v6255_v9 = vsel %vm1262_vm2, 1.0, %v7298_v11  ;;  %v6265_v15 = vsel %vm7299_vm11, 1.0, %v7298_v11  ;;  %vm7300_vm12 = vcmp.eq.s32.totalorder %v5809_v1, 1  ;;  %vm7301_vm13 = vcmp.eq.s32.totalorder %v5823_v29, 1 }
 0x5aa   : > { %1246 = vst [vmem:[%s5361_s14 + $0x30] sm:$0xff] %v1230_v28  ;;  %v6270_v37 = vsel %vm7300_vm12, 1.0, %v7298_v11  ;;  %v6279_v28 = vsel %vm7301_vm13, 1.0, %v7298_v11  ;;  %vm7302_vm14 = vcmp.eq.s32.totalorder %v5826_v17, 1  ;;  %vm7303_vm6 = vcmp.eq.s32.totalorder %v5829_v34, 1 }
 0x5ab   : > { %1247 = vst [vmem:[%s5361_s14 + $0x38] sm:$0xff] %v1231_v46  ;;  %v6284_v22 = vsel %vm7302_vm14, 1.0, %v7298_v11  ;;  %v6289_v1 = vsel %vm7303_vm6, 1.0, %v7298_v11  ;;  %vm7304_vm5 = vcmp.eq.s32.totalorder %v5844_v30, 1  ;;  %vm7306_vm2 = vcmp.eq.s32.totalorder %v5847_v5, 1 }
 0x5ac   : > { %v6294_v42 = vsel %vm7304_vm5, 1.0, %v7298_v11  ;;  %1248 = vst [vmem:[%s5361_s14 + $0x40] sm:$0xff] %v7305_v3  ;;  %v6303_v46 = vsel %vm7306_vm2, 1.0, %v7298_v11  ;;  %vm7307_vm15 = vcmp.eq.s32.totalorder %v5850_v36, 1  ;;  %vm7308_vm11 = vcmp.eq.s32.totalorder %v7285_v6, 1 }
 0x5ad   : > { %v6308_v34 = vsel %vm7307_vm15, 1.0, %v7298_v11  ;;  %v6313_v30 = vsel %vm7308_vm11, 1.0, %v7298_v11  ;;  %vm7309_vm12 = vcmp.eq.s32.totalorder %v7286_v4, 1  ;;  %1249 = vst [vmem:[%s5361_s14 + $0x48] sm:$0xff] %v7310_v21  ;;  %vm7311_vm13 = vcmp.eq.s32.totalorder %v5868_v0, 1 }
 0x5ae   : > { %v6318_v45 = vsel %vm7309_vm12, 1.0, %v7298_v11  ;;  %v6327_v3 = vsel %vm7311_vm13, 1.0, %v7298_v11  ;;  %vm7312_vm14 = vcmp.eq.s32.totalorder %v7287_v49, 1  ;;  %vm7313_vm6 = vcmp.eq.s32.totalorder %v7288_v63, 1  ;;  %1250 = vst [vmem:[%s5361_s14 + $0x50] sm:$0xff] %v7315_v57 }
 0x5af   : > { %v6332_v6 = vsel %vm7312_vm14, 1.0, %v7298_v11  ;;  %v6337_v4 = vsel %vm7313_vm6, 1.0, %v7298_v11  ;;  %vm7314_vm5 = vcmp.eq.s32.totalorder %v7289_v60, 1  ;;  %vm7316_vm2 = vcmp.eq.s32.totalorder %v5899_v59, 1  ;;  %1251 = vst [vmem:[%s5361_s14 + $0x58] sm:$0xff] %v7318_v50 }
 0x5b0   : > { %v6342_v19 = vsel %vm7314_vm5, 1.0, %v7298_v11  ;;  %v6351_v21 = vsel %vm7316_vm2, 1.0, %v7298_v11  ;;  %vm7317_vm15 = vcmp.eq.s32.totalorder %v7290_v43, 1  ;;  %v6361_v60 = vsel %vm1280_vm3, 1.0, %v7298_v11  ;;  %1252 = vst [vmem:[%s5361_s14 + $0x60] sm:$0xff] %v7319_v53 }
 0x5b1   : > { %v6356_v63 = vsel %vm7317_vm15, 1.0, %v7298_v11  ;;  %v6366_v55 = vsel %vm1281_vm7, 1.0, %v7298_v11  ;;  %v6375_v57 = vsel %vm1282_vm8, 1.0, %v7298_v11  ;;  %v6380_v56 = vsel %vm1283_vm10, 1.0, %v7298_v11  ;;  %1253 = vst [vmem:[%s5361_s14 + $0x68] sm:$0xff] %v7320_v51  ;;  %v7336_v51 = vld [vmem:[#allocation66_spill] sm:$0xff] }
 0x5b2   : > { %v6385_v16 = vsel %vm1284_vm1, 1.0, %v7298_v11  ;;  %v6390_v8 = vsel %vm1285_vm0, 1.0, %v7298_v11  ;;  %v6399_v50 = vsel %vm1286_vm9, 1.0, %v7298_v11  ;;  %v6404_v23 = vsel %vm1287_vm4, 1.0, %v7298_v11 }
 0x5b3   : > { %v1320_v52 = vpack.c.bf16 %v1289_v38, %v1288_v32  ;;  %v1321_v10 = vpack.c.bf16 %v1291_v24, %v1290_v20  ;;  %v1322_v43 = vpack.c.bf16 %v1293_v39, %v1292_v44  ;;  %v1323_v48 = vpack.c.bf16 %v6260_v12, %v6255_v9  ;;  %v7326_v39 = vld [vmem:[#allocation43_spill] sm:$0xff]  ;;  %v7327_v44 = vld [vmem:[#allocation37_spill] sm:$0xff]  ;;  %v7328_v20 = vld [vmem:[#allocation24_spill] sm:$0xff] }
 0x5b4   : > { %v1324_v58 = vpack.c.bf16 %v6270_v37, %v6265_v15  ;;  %v1325_v53 = vpack.c.bf16 %v6284_v22, %v6279_v28  ;;  %v7321_v11 = vpack.c.bf16 %v6135_v47, %v6130_v41  ;;  %v1326_v25 = vpack.c.bf16 %v6294_v42, %v6289_v1  ;;  %v7325_v15 = vld [vmem:[#allocation38_spill] sm:$0xff]  ;;  %v7329_v32 = vld [vmem:[#allocation27_spill] sm:$0xff] }
 0x5b5   : > { %v1327_v61 = vpack.c.bf16 %v6308_v34, %v6303_v46  ;;  %v1328_v12 = vpack.c.bf16 %v6318_v45, %v6313_v30  ;;  %v1329_v37 = vpack.c.bf16 %v6332_v6, %v6327_v3  ;;  %v7322_v22 = vpack.c.bf16 %v6147_v18, %v6142_v54  ;;  %2997 = vst [vmem:[%s5361_s14 + $0x80] sm:$0xff] %v1320_v52  ;;  %v7323_v54 = vld [vmem:[#allocation31_spill] sm:$0xff]  ;;  %v7335_v52 = vld [vmem:[#allocation25_spill] sm:$0xff] }
 0x5b6   : > { %1254 = vst [vmem:[%s5361_s14 + $0x70] sm:$0xff] %v7321_v11  ;;  %v1330_v41 = vpack.c.bf16 %v6342_v19, %v6337_v4  ;;  %v1331_v1 = vpack.c.bf16 %v6356_v63, %v6351_v21  ;;  %v1332_v34 = vpack.c.bf16 %v6366_v55, %v6361_v60  ;;  %v1333_v30 = vpack.c.bf16 %v6380_v56, %v6375_v57  ;;  %v7330_v6 = vld [vmem:[#allocation35_spill] sm:$0xff]  ;;  %v7331_v4 = vld [vmem:[#allocation36_spill] sm:$0xff]  ;;  %v7333_v60 = vld [vmem:[#allocation26_spill] sm:$0xff] }
 0x5b7   : > { %1255 = vst [vmem:[%s5361_s14 + $0x78] sm:$0xff] %v7322_v22  ;;  %v1334_v47 = vpack.c.bf16 %v6390_v8, %v6385_v16  ;;  %v1335_v18 = vpack.c.bf16 %v6404_v23, %v6399_v50  ;;  %vm1353_vm3 = vcmp.eq.s32.totalorder %v5753_v13, 2  ;;  %vm1354_vm7 = vcmp.eq.s32.totalorder %v5756_v27, 2  ;;  %v7332_v63 = vld [vmem:[#allocation56_spill] sm:$0xff] }
 0x5b8   : > { %2998 = vst [vmem:[%s5361_s14 + $0x88] sm:$0xff] %v1321_v10  ;;  %vm1355_vm8 = vcmp.eq.s32.totalorder %v5759_v33, 2  ;;  %vm1356_vm10 = vcmp.eq.s32.totalorder %v5775_v7, 2  ;;  %vm1357_vm1 = vcmp.eq.s32.totalorder %v5778_v14, 2  ;;  %vm1358_vm0 = vcmp.eq.s32.totalorder %v5781_v35, 2  ;;  %v7324_v10 = vld [vmem:[#allocation33_spill] sm:$0xff] }
 0x5b9   : > { %2999 = vst [vmem:[%s5361_s14 + $0x90] sm:$0xff] %v1322_v43  ;;  %vm1359_vm9 = vcmp.eq.s32.totalorder %v5794_v40, 2  ;;  %vm1360_vm4 = vcmp.eq.s32.totalorder %v5797_v2, 2  ;;  %vm1377_vm11 = vcmp.eq.s32.totalorder %v7331_v4, 2  ;;  %vm1378_vm12 = vcmp.eq.s32.totalorder %v7332_v63, 2  ;;  %v7334_v43 = vld [vmem:[#allocation22_spill] sm:$0xff] }
 0x5ba   : > { %3000 = vst [vmem:[%s5361_s14 + $0x98] sm:$0xff] %v1323_v48  ;;  %vm1379_vm13 = vcmp.eq.s32.totalorder %v7333_v60, 2  ;;  %vm1380_vm14 = vcmp.eq.s32.totalorder %v7334_v43, 2  ;;  %vm1381_vm6 = vcmp.eq.s32.totalorder %v7335_v52, 2  ;;  %vm1382_vm5 = vcmp.eq.s32.totalorder %v7336_v51, 2 }
 0x5bb   : > { %3001 = vst [vmem:[%s5361_s14 + $0xa0] sm:$0xff] %v1324_v58  ;;  %vm1383_vm2 = vcmp.eq.s32.totalorder %v7296_v62, 2  ;;  %vm1384_vm15 = vcmp.eq.s32.totalorder %v7297_v31, 2  ;;  %v7337_v11 = vmov 0.0  }
 0x5bc   : > { %3002 = vst [vmem:[%s5361_s14 + $0xa8] sm:$0xff] %v1325_v53  ;;  %v1385_v38 = vsel %vm1353_vm3, 1.0, %v7337_v11  ;;  %v1386_v24 = vsel %vm1354_vm7, 1.0, %v7337_v11  ;;  %v1387_v9 = vsel %vm1355_vm8, 1.0, %v7337_v11  ;;  %v1388_v28 = vsel %vm1356_vm10, 1.0, %v7337_v11 }
 0x5bd   : > { %3003 = vst [vmem:[%s5361_s14 + $0xb0] sm:$0xff] %v1326_v25  ;;  %v1389_v42 = vsel %vm1357_vm1, 1.0, %v7337_v11  ;;  %v1390_v46 = vsel %vm1358_vm0, 1.0, %v7337_v11  ;;  %v1391_v45 = vsel %vm1359_vm9, 1.0, %v7337_v11  ;;  %v1392_v3 = vsel %vm1360_vm4, 1.0, %v7337_v11 }
 0x5be   : > { %3004 = vst [vmem:[%s5361_s14 + $0xb8] sm:$0xff] %v1327_v61  ;;  %vm7338_vm3 = vcmp.eq.s32.totalorder %v5806_v26, 2  ;;  %vm7339_vm7 = vcmp.eq.s32.totalorder %v7323_v54, 2  ;;  %vm7340_vm8 = vcmp.eq.s32.totalorder %v5823_v29, 2  ;;  %vm7341_vm10 = vcmp.eq.s32.totalorder %v5826_v17, 2 }
 0x5bf   : > { %3005 = vst [vmem:[%s5361_s14 + $0xc0] sm:$0xff] %v1328_v12  ;;  %v1393_v19 = vsel %vm7338_vm3, 1.0, %v7337_v11  ;;  %v1394_v21 = vsel %vm7339_vm7, 1.0, %v7337_v11  ;;  %v1395_v55 = vsel %vm7340_vm8, 1.0, %v7337_v11  ;;  %v1396_v48 = vsel %vm7341_vm10, 1.0, %v7337_v11 }
 0x5c0   : > { %3006 = vst [vmem:[%s5361_s14 + $0xc8] sm:$0xff] %v1329_v37  ;;  %vm7342_vm1 = vcmp.eq.s32.totalorder %v7324_v10, 2  ;;  %vm7343_vm0 = vcmp.eq.s32.totalorder %v7325_v15, 2  ;;  %vm7344_vm9 = vcmp.eq.s32.totalorder %v5847_v5, 2  ;;  %vm7345_vm4 = vcmp.eq.s32.totalorder %v5850_v36, 2 }
 0x5c1   : > { %3007 = vst [vmem:[%s5361_s14 + $0xd0] sm:$0xff] %v1330_v41  ;;  %v1397_v58 = vsel %vm7342_vm1, 1.0, %v7337_v11  ;;  %v1398_v53 = vsel %vm7343_vm0, 1.0, %v7337_v11  ;;  %v1399_v25 = vsel %vm7344_vm9, 1.0, %v7337_v11  ;;  %v1400_v61 = vsel %vm7345_vm4, 1.0, %v7337_v11 }
 0x5c2   : > { %3008 = vst [vmem:[%s5361_s14 + $0xd8] sm:$0xff] %v1331_v1  ;;  %vm7346_vm3 = vcmp.eq.s32.totalorder %v7326_v39, 2  ;;  %v1417_v37 = vpack.c.bf16 %v1386_v24, %v1385_v38  ;;  %vm7347_vm7 = vcmp.eq.s32.totalorder %v7327_v44, 2  ;;  %vm7348_vm8 = vcmp.eq.s32.totalorder %v5868_v0, 2 }
 0x5c3   : > { %3009 = vst [vmem:[%s5361_s14 + $0xe0] sm:$0xff] %v1332_v34  ;;  %v1401_v12 = vsel %vm7346_vm3, 1.0, %v7337_v11  ;;  %v1402_v22 = vsel %vm7347_vm7, 1.0, %v7337_v11  ;;  %v1403_v41 = vsel %vm7348_vm8, 1.0, %v7337_v11  ;;  %vm7349_vm10 = vcmp.eq.s32.totalorder %v7287_v49, 2 }
 0x5c4   : > { %3010 = vst [vmem:[%s5361_s14 + $0xe8] sm:$0xff] %v1333_v30  ;;  %v1404_v1 = vsel %vm7349_vm10, 1.0, %v7337_v11  ;;  %v1418_v34 = vpack.c.bf16 %v1388_v28, %v1387_v9  ;;  %vm7350_vm1 = vcmp.eq.s32.totalorder %v7328_v20, 2  ;;  %vm7351_vm0 = vcmp.eq.s32.totalorder %v7329_v32, 2 }
 0x5c5   : > { %3011 = vst [vmem:[%s5361_s14 + $0xf0] sm:$0xff] %v1334_v47  ;;  %v1405_v56 = vsel %vm7350_vm1, 1.0, %v7337_v11  ;;  %v1406_v57 = vsel %vm7351_vm0, 1.0, %v7337_v11  ;;  %vm7352_vm9 = vcmp.eq.s32.totalorder %v5899_v59, 2  ;;  %v1419_v38 = vpack.c.bf16 %v1390_v46, %v1389_v42 }
 0x5c6   : > { %v1407_v30 = vsel %vm7352_vm9, 1.0, %v7337_v11  ;;  %3012 = vst [vmem:[%s5361_s14 + $0xf8] sm:$0xff] %v1335_v18  ;;  %vm7353_vm4 = vcmp.eq.s32.totalorder %v7330_v6, 2  ;;  %v1409_v8 = vsel %vm1377_vm11, 1.0, %v7337_v11  ;;  %v1410_v47 = vsel %vm1378_vm12, 1.0, %v7337_v11 }
 0x5c7   : > { %v1408_v16 = vsel %vm7353_vm4, 1.0, %v7337_v11  ;;  %v1420_v24 = vpack.c.bf16 %v1392_v3, %v1391_v45  ;;  %v6582_v9 = vsel %vm1379_vm13, 1.0, %v7337_v11  ;;  %v1412_v23 = vsel %vm1380_vm14, 1.0, %v7337_v11  ;;  %3013 = vst [vmem:[%s5361_s14 + $0x100] sm:$0xff] %v1417_v37 }
 0x5c8   : > { %v6590_v50 = vsel %vm1381_vm6, 1.0, %v7337_v11  ;;  %v1421_v18 = vpack.c.bf16 %v1394_v21, %v1393_v19  ;;  %v6596_v28 = vsel %vm1382_vm5, 1.0, %v7337_v11  ;;  %v6601_v42 = vsel %vm1383_vm2, 1.0, %v7337_v11  ;;  %3014 = vst [vmem:[%s5361_s14 + $0x108] sm:$0xff] %v1418_v34  ;;  %v7365_v34 = vld [vmem:[#allocation68_spill] sm:$0xff] }
 0x5c9   : > { %v6606_v46 = vsel %vm1384_vm15, 1.0, %v7337_v11  ;;  %v1422_v45 = vpack.c.bf16 %v1396_v48, %v1395_v55  ;;  %v1423_v3 = vpack.c.bf16 %v1398_v53, %v1397_v58  ;;  %v1424_v19 = vpack.c.bf16 %v1400_v61, %v1399_v25  ;;  %3015 = vst [vmem:[%s5361_s14 + $0x110] sm:$0xff] %v1419_v38  ;;  %v7362_v25 = vld [vmem:[#allocation22_spill] sm:$0xff] }
 0x5ca   : > { %v1425_v21 = vpack.c.bf16 %v1402_v22, %v1401_v12  ;;  %v1426_v37 = vpack.c.bf16 %v1404_v1, %v1403_v41  ;;  %v1427_v51 = vpack.c.bf16 %v1406_v57, %v1405_v56  ;;  %v1428_v52 = vpack.c.bf16 %v1408_v16, %v1407_v30  ;;  %3016 = vst [vmem:[%s5361_s14 + $0x118] sm:$0xff] %v1420_v24  ;;  %v7364_v41 = vld [vmem:[#allocation66_spill] sm:$0xff]  ;;  %v7366_v57 = vld [vmem:[#allocation67_spill] sm:$0xff] }
 0x5cb   : > { %v1429_v62 = vpack.c.bf16 %v1410_v47, %v1409_v8  ;;  %v1430_v43 = vpack.c.bf16 %v1412_v23, %v6582_v9  ;;  %v1431_v31 = vpack.c.bf16 %v6596_v28, %v6590_v50  ;;  %v1432_v55 = vpack.c.bf16 %v6606_v46, %v6601_v42  ;;  %3017 = vst [vmem:[%s5361_s14 + $0x120] sm:$0xff] %v1421_v18 }
 0x5cc   : > { %3018 = vst [vmem:[%s5361_s14 + $0x128] sm:$0xff] %v1422_v45  ;;  %vm1450_vm11 = vcmp.eq.s32.totalorder %v5753_v13, 3  ;;  %vm1451_vm12 = vcmp.eq.s32.totalorder %v5756_v27, 3  ;;  %vm1452_vm13 = vcmp.eq.s32.totalorder %v5759_v33, 3  ;;  %vm1453_vm14 = vcmp.eq.s32.totalorder %v5775_v7, 3 }
 0x5cd   : > { %3019 = vst [vmem:[%s5361_s14 + $0x130] sm:$0xff] %v1423_v3  ;;  %vm1454_vm6 = vcmp.eq.s32.totalorder %v5778_v14, 3  ;;  %vm1455_vm5 = vcmp.eq.s32.totalorder %v5781_v35, 3  ;;  %vm1456_vm2 = vcmp.eq.s32.totalorder %v5794_v40, 3  ;;  %vm1457_vm15 = vcmp.eq.s32.totalorder %v5797_v2, 3 }
 0x5ce   : > { %3020 = vst [vmem:[%s5361_s14 + $0x138] sm:$0xff] %v1424_v19  ;;  %vm1466_vm3 = vcmp.eq.s32.totalorder %v7326_v39, 3  ;;  %vm1467_vm7 = vcmp.eq.s32.totalorder %v7327_v44, 3  ;;  %vm1468_vm8 = vcmp.eq.s32.totalorder %v5868_v0, 3  ;;  %vm1469_vm10 = vcmp.eq.s32.totalorder %v7287_v49, 3 }
 0x5cf   : > { %3021 = vst [vmem:[%s5361_s14 + $0x140] sm:$0xff] %v1425_v21  ;;  %vm1470_vm1 = vcmp.eq.s32.totalorder %v7328_v20, 3  ;;  %vm1471_vm0 = vcmp.eq.s32.totalorder %v7329_v32, 3  ;;  %vm1472_vm9 = vcmp.eq.s32.totalorder %v5899_v59, 3  ;;  %vm1473_vm4 = vcmp.eq.s32.totalorder %v7330_v6, 3 }
 0x5d0   : > { %3022 = vst [vmem:[%s5361_s14 + $0x148] sm:$0xff] %v1426_v37  ;;  %v1482_v48 = vsel %vm1450_vm11, 1.0, %v7337_v11  ;;  %v1483_v58 = vsel %vm1451_vm12, 1.0, %v7337_v11  ;;  %v1485_v53 = vsel %vm1453_vm14, 1.0, %v7337_v11  ;;  %v1487_v13 = vsel %vm1455_vm5, 1.0, %v7337_v11 }
 0x5d1   : > { %3023 = vst [vmem:[%s5361_s14 + $0x150] sm:$0xff] %v1427_v51  ;;  %v1484_v51 = vsel %vm1452_vm13, 1.0, %v7337_v11  ;;  %v1488_v27 = vsel %vm1456_vm2, 1.0, %v7337_v11  ;;  %v1489_v33 = vsel %vm1457_vm15, 1.0, %v7337_v11  ;;  %vm1474_vm11 = vcmp.eq.s32.totalorder %v7331_v4, 3 }
 0x5d2   : > { %3024 = vst [vmem:[%s5361_s14 + $0x158] sm:$0xff] %v1428_v52  ;;  %v1486_v52 = vsel %vm1454_vm6, 1.0, %v7337_v11  ;;  %vm1475_vm12 = vcmp.eq.s32.totalorder %v7332_v63, 3  ;;  %vm7354_vm13 = vcmp.eq.s32.totalorder %v5806_v26, 3  ;;  %vm7355_vm14 = vcmp.eq.s32.totalorder %v7323_v54, 3 }
 0x5d3   : > { %3025 = vst [vmem:[%s5361_s14 + $0x160] sm:$0xff] %v1429_v62  ;;  %v1490_v7 = vsel %vm7354_vm13, 1.0, %v7337_v11  ;;  %v1491_v14 = vsel %vm7355_vm14, 1.0, %v7337_v11  ;;  %vm7356_vm6 = vcmp.eq.s32.totalorder %v5823_v29, 3  ;;  %vm7357_vm5 = vcmp.eq.s32.totalorder %v5826_v17, 3 }
 0x5d4   : > { %3026 = vst [vmem:[%s5361_s14 + $0x168] sm:$0xff] %v1430_v43  ;;  %v1492_v35 = vsel %vm7356_vm6, 1.0, %v7337_v11  ;;  %v1493_v40 = vsel %vm7357_vm5, 1.0, %v7337_v11  ;;  %vm7358_vm2 = vcmp.eq.s32.totalorder %v7324_v10, 3  ;;  %v1514_v26 = vpack.c.bf16 %v1483_v58, %v1482_v48 }
 0x5d5   : > { %3027 = vst [vmem:[%s5361_s14 + $0x170] sm:$0xff] %v1431_v31  ;;  %v1494_v2 = vsel %vm7358_vm2, 1.0, %v7337_v11  ;;  %vm7359_vm15 = vcmp.eq.s32.totalorder %v7325_v15, 3  ;;  %v1515_v31 = vpack.c.bf16 %v1485_v53, %v1484_v51  ;;  %v1516_v54 = vpack.c.bf16 %v1487_v13, %v1486_v52 }
 0x5d6   : > { %3028 = vst [vmem:[%s5361_s14 + $0x178] sm:$0xff] %v1432_v55  ;;  %v1495_v62 = vsel %vm7359_vm15, 1.0, %v7337_v11  ;;  %v1517_v29 = vpack.c.bf16 %v1489_v33, %v1488_v27  ;;  %vm1476_vm13 = vcmp.eq.s32.totalorder %v7333_v60, 3  ;;  %vm7360_vm14 = vcmp.eq.s32.totalorder %v5847_v5, 3  ;;  %v7363_v5 = vld [vmem:[#allocation25_spill] sm:$0xff] }
 0x5d7   : > { %v1496_v17 = vsel %vm7360_vm14, 1.0, %v7337_v11  ;;  %vm7361_vm6 = vcmp.eq.s32.totalorder %v5850_v36, 3  ;;  %v1518_v43 = vpack.c.bf16 %v1491_v14, %v1490_v7  ;;  %3029 = vst [vmem:[%s5361_s14 + $0x180] sm:$0xff] %v1514_v26  ;;  %vm1477_vm5 = vcmp.eq.s32.totalorder %v7362_v25, 3 }
 0x5d8   : > { %v1497_v10 = vsel %vm7361_vm6, 1.0, %v7337_v11  ;;  %v1498_v15 = vsel %vm1466_vm3, 1.0, %v7337_v11  ;;  %v1499_v61 = vsel %vm1467_vm7, 1.0, %v7337_v11  ;;  %v1519_v12 = vpack.c.bf16 %v1493_v40, %v1492_v35  ;;  %3030 = vst [vmem:[%s5361_s14 + $0x188] sm:$0xff] %v1515_v31 }
 0x5d9   : > { %vm1478_vm2 = vcmp.eq.s32.totalorder %v7363_v5, 3  ;;  %v1500_v36 = vsel %vm1468_vm8, 1.0, %v7337_v11  ;;  %v1501_v22 = vsel %vm1469_vm10, 1.0, %v7337_v11  ;;  %v1520_v39 = vpack.c.bf16 %v1495_v62, %v1494_v2  ;;  %3031 = vst [vmem:[%s5361_s14 + $0x190] sm:$0xff] %v1516_v54 }
 0x5da   : > { %vm1479_vm3 = vcmp.eq.s32.totalorder %v7364_v41, 3  ;;  %v1502_v44 = vsel %vm1470_vm1, 1.0, %v7337_v11  ;;  %v1503_v1 = vsel %vm1471_vm0, 1.0, %v7337_v11  ;;  %v1521_v0 = vpack.c.bf16 %v1497_v10, %v1496_v17  ;;  %3032 = vst [vmem:[%s5361_s14 + $0x198] sm:$0xff] %v1517_v29 }
 0x5db   : > { %vm1480_vm7 = vcmp.eq.s32.totalorder %v7365_v34, 3  ;;  %v1504_v49 = vsel %vm1472_vm9, 1.0, %v7337_v11  ;;  %v1505_v56 = vsel %vm1473_vm4, 1.0, %v7337_v11  ;;  %v1522_v20 = vpack.c.bf16 %v1499_v61, %v1498_v15  ;;  %3033 = vst [vmem:[%s5361_s14 + $0x1a0] sm:$0xff] %v1518_v43 }
 0x5dc   : > { %vm1481_vm8 = vcmp.eq.s32.totalorder %v7366_v57, 3  ;;  %v1506_v32 = vsel %vm1474_vm11, 1.0, %v7337_v11  ;;  %v1507_v30 = vsel %vm1475_vm12, 1.0, %v7337_v11  ;;  %v1523_v59 = vpack.c.bf16 %v1501_v22, %v1500_v36  ;;  %3034 = vst [vmem:[%s5361_s14 + $0x1a8] sm:$0xff] %v1519_v12 }
 0x5dd   : > { %v1508_v6 = vsel %vm1476_vm13, 1.0, %v7337_v11  ;;  %v1509_v4 = vsel %vm1477_vm5, 1.0, %v7337_v11  ;;  %v1524_v38 = vpack.c.bf16 %v1503_v1, %v1502_v44  ;;  %3035 = vst [vmem:[%s5361_s14 + $0x1b0] sm:$0xff] %v1520_v39  ;;  %v1510_v63 = vsel %vm1478_vm2, 1.0, %v7337_v11 }
 0x5de   : > { %v1511_v16 = vsel %vm1479_vm3, 1.0, %v7337_v11  ;;  %v1525_v60 = vpack.c.bf16 %v1505_v56, %v1504_v49  ;;  %3036 = vst [vmem:[%s5361_s14 + $0x1b8] sm:$0xff] %v1521_v0  ;;  %v1512_v8 = vsel %vm1480_vm7, 1.0, %v7337_v11  ;;  %v1513_v47 = vsel %vm1481_vm8, 1.0, %v7337_v11 }
 0x5df   : > { %v1526_v24 = vpack.c.bf16 %v1507_v30, %v1506_v32  ;;  %3037 = vst [vmem:[%s5361_s14 + $0x1c0] sm:$0xff] %v1522_v20  ;;  %v1527_v9 = vpack.c.bf16 %v1509_v4, %v1508_v6  ;;  %v1528_v23 = vpack.c.bf16 %v1511_v16, %v1510_v63  ;;  %v1529_v50 = vpack.c.bf16 %v1513_v47, %v1512_v8 }
 0x5e0   : > { %3038 = vst [vmem:[%s5361_s14 + $0x1c8] sm:$0xff] %v1523_v59 }
 0x5e1   : > { %3039 = vst [vmem:[%s5361_s14 + $0x1d0] sm:$0xff] %v1524_v38 }
 0x5e2   : > { %3040 = vst [vmem:[%s5361_s14 + $0x1d8] sm:$0xff] %v1525_v60 }
 0x5e3   : > { %3041 = vst [vmem:[%s5361_s14 + $0x1e0] sm:$0xff] %v1526_v24 }
 0x5e4   : > { %3042 = vst [vmem:[%s5361_s14 + $0x1e8] sm:$0xff] %v1527_v9 }
 0x5e5   : > { %3043 = vst [vmem:[%s5361_s14 + $0x1f0] sm:$0xff] %v1528_v23 }
 0x5e6   : > { %3044 = vst [vmem:[%s5361_s14 + $0x1f8] sm:$0xff] %v1529_v50 }
 0x5e7   : > { %3511 = shalt.err (!%p3508_p7)
}
 0x5e8   : > { %s3600_s14 = smov 256   ;;  %s3601_s11 = smov 16  }
 0x5e9   : > { %3135 = dma.vmem_to_hbm [thread:$0]  (%p3735_p11), %s6778_s10, 12288, %s2616_s1, %s2596_s9, %s3600_s14, %s3600_s14, %s3601_s11  }
 0x5ea   : > { %s2601_s26 = scalar_lea.sflag [#allocation12], %s3800_s30  ;;  %s3526_s8 = sshra.s32 %s6787_s5, 4  ;;  %s3527_s8 = int_to_ptr.hbm [resolvable:$true] %s3526_s8 }
 0x5eb   : > { %s3528_s19 = scalar_lea.hbm %s3527_s8, 768  ;;  %s3532_s23 = scalar_lea.hbm %s6842_s7, 1536 }
 0x5ec   : > { %p3529_p10 = scmp.ne.s32.totalorder %s3527_s8, %s3528_s19  ;;  %p3533_p2 = scmp.lt.s32.totalorder %s3527_s8, %s6842_s7 }
 0x5ed   : > { %p3534_p6 = scmp.lt.s32.totalorder %s3532_s23, %s3528_s19 }
 0x5ee   : > { %p3530_p13 = pnand %p3529_p10, %p3735_p11 }
 0x5ef   : > { %p3535_p8 = por %p3534_p6, %p3533_p2 }
 0x5f0   : > { %p3531_p0 = pneg %p3530_p13 }
 0x5f2   : > { %p3536_p4 = pnand %p3535_p8, %p3531_p0 }
 0x5f4   : > { %3539 = shalt.err (!%p3536_p4)
}
 0x5f5   : > { %s3602_s30 = smov 512   ;;  %s3603_s10 = smov 32  }
 0x5f6   : > { %3136 = dma.vmem_to_hbm [thread:$0]  (%p3735_p11), %s6785_s18, 12288, %s6787_s5, %s2601_s26, %s3602_s30, %s3602_s30, %s3603_s10  }
 0x5f7 PF: > { %s2647_s9 = sand.u32 1, %s3578_s24   ;;  %p7368_p9 = scmp.ge.s32.totalorder %s3590_s27, 2 }
 0x5f8   : > { %s2648_s21 = scalar_lea.sflag [#allocation4], %s2647_s9 }
 0x5f9   : > { %p3154_p1 = pnand %p7368_p9, %p3739_p12 }
 0x5fb   : > { %p3155_p3 = pneg %p3154_p1 }
 0x5fd   : > { %3569 = dma.done.wait (%p3155_p3), %s2648_s21, 12288  }
 0x5fe   : > { %3571 = vsyncadd (%p3155_p3), %s2648_s21, 4294955008  ;;  %s2658_s13 = scalar_lea.sflag [#allocation12], %s2647_s9 }
 0x5ff   : > { %3573 = dma.done.wait (%p3155_p3), %s2658_s13, 12288  }
 0x600   : > { %3575 = vsyncadd (%p3155_p3), %s2658_s13, 4294955008  ;;  %s7369_s27 = sld [smem:[#allocation19_spill]]  ;;  %s7372_s24 = smov %s3582_s25 }
 0x601   : > { %s7370_s12 = sld [smem:[#allocation18_spill]] }
 0x602   : > { %s7371_s26 = sld [smem:[#allocation20_spill]] }
 0x606   : > { %p28_p11 = scmp.ge.s32.totalorder %s7369_s27, 4  }
 0x607   : > { %s7373_s25 = smov %s7370_s12 }
 0x608   :  { %30 = sbr.rel (!%p28_p11) target bundleno = 13 (0xd), region = 142 }
 0x60d   :  { %2664 = vsyncpa [#allocation3], 1 }
 0x60e   :  { %2666 = vsyncpa [#allocation3 + $0x1], 1 }
 0x60f   :  { %2667 = vsyncpa [#allocation6], 1 }
 0x610   :  { %2669 = vsyncpa [#allocation6 + $0x1], 1 }
 0x611   :  { %2670 = vsyncpa [#allocation9], 1 }
 0x612   :  { %2671 = vsyncpa [#allocation4], 1 }
 0x613   :  { %2673 = vsyncpa [#allocation4 + $0x1], 1 }
 0x614   :  { %2674 = vsyncpa [#allocation12], 1 }
 0x615   :  { %2676 = vsyncpa [#allocation12 + $0x1], 1 }

// kernel: tpu_custom_call.1
= control target key start
LH: loop header
LB: loop body
LE: loop exit
PB: predicated region body
PF: predicated region fallthrough
CT: control target
= control target key end

     0   :  { %s6399_s0 = inlined_call_operand.hbm [shape: s32[2,1,64,512], index: 0, kind: input, shape index: {}]   ;;  %s6400_s1 = inlined_call_operand.hbm [shape: s32[2,1,64,512], index: 1, kind: input, shape index: {}]   ;;  %s6401_s2 = inlined_call_operand.hbm [shape: f32[2,3,64,512], index: 2, kind: input, shape index: {}]   ;;  %s6402_s3 = inlined_call_operand.vmem [shape: f32[2,1,16,128], index: 3, kind: input, shape index: {}]   ;;  %s6403_s4 = inlined_call_operand.vmem [shape: bf16[64,16], index: 4, kind: input, shape index: {}]   ;;  %s6404_s5 = inlined_call_operand.hbm [shape: bf16[128,512], index: 5, kind: input, shape index: {}]   ;;  %s6405_s6 = inlined_call_operand.hbm [shape: bf16[2,6,64,512], index: 6, kind: output, shape index: {0}]   ;;  %s6406_s7 = inlined_call_operand.hbm [shape: f32[2,3,64,512], index: 7, kind: output, shape index: {1}]  }
   0x1   :  { %6498 = sst [smem:[#allocation41_spill]] %s6400_s1 }
   0x2   :  { %6499 = sst [smem:[#allocation42_spill]] %s6404_s5 }
   0x3   :  { %13 = vsyncpa [#allocation3], 0 }
   0x4   :  { %15 = vsyncpa [#allocation3 + $0x1], 0 }
   0x5   :  { %16 = vsyncpa [#allocation6], 0 }
   0x6   :  { %18 = vsyncpa [#allocation6 + $0x1], 0 }
   0x7   :  { %19 = vsyncpa [#allocation9], 0 }
   0x8   :  { %20 = vsyncpa [#allocation4], 0 }
   0x9   :  { %22 = vsyncpa [#allocation4 + $0x1], 0 }
   0xa   :  { %23 = vsyncpa [#allocation12], 0 }
   0xb   :  { %25 = vsyncpa [#allocation12 + $0x1], 0  ;;  %s3827_s24 = smov 0   ;;  %s3829_s25 = smov 0  }
   0xc   :  { %s3831_s26 = smov 0   ;;  %s3833_s27 = smov 0  }
   0xd LB: > { %6500 = sst [smem:[#allocation18_spill]] %s3769_s26  ;;  %s3848_s28 = sadd.s32 1, %s3773_s27   ;;  %s3773_s27 = sphi %s3833_s27, %s6692_s27   ;;  %s3769_s26 = sphi %s3831_s26, %s6694_s26   ;;  %s3765_s25 = sphi %s3829_s25, %s6696_s25   ;;  %s3761_s24 = sphi %s3827_s24, %s6695_s24  }
   0xe   : > { %6501 = sst [smem:[#allocation19_spill]] %s3848_s28  ;;  %s38_s29 = sadd.s32 1, %s3769_s26 }
   0xf   : > { %s35_s30 = ssub.s32 %s3773_s27, %s3848_s28  ;;  %p45_p0 = scmp.ne.s32.totalorder %s3769_s26, %s3765_s25 }
  0x10   : > { %p36_p1 = scmp.eq.s32.totalorder %s35_s30, 0  ;;  %p46_p2 = scmp.eq.s32.totalorder %s3773_s27, 0 }
  0x11   : > { %p3340_p4 = scmp.lt.s32.totalorder %s3773_s27, 2  ;;  %s3865_s9 = sand.u32 1, %s3769_s26  }
  0x12   : > { %s3859_s8 = scalar_select %p36_p1, %s3769_s26, %s38_s29  }
  0x13   : > { %p47_p5 = por %p46_p2, %p45_p0  ;;  %s2987_s10 = sshll.u32 %s3865_s9, 8 }
  0x14   : > { %6502 = sst [smem:[#allocation20_spill]] %s3859_s8  ;;  %s3260_s11 = sshll.u32 %s3773_s27, 8 }
  0x15   : > { %p3869_p6 = pnand %p3340_p4, %p47_p5  ;;  %s286_s13 = sand.u32 1, %s3773_s27  }
  0x16   : > { %s6504_s1 = sld [smem:[#allocation41_spill]]  ;;  %s290_s18 = scalar_lea.vmem [#allocation5], %s2987_s10 }
  0x17   : > { %s298_s19 = sshll.u32 %s290_s18, 4  ;;  %s3881_s20 = scalar_lea.sflag [#allocation6], %s286_s13  ;;  %s299_s19 = int_to_ptr.vmem [resolvable:$true] %s298_s19 }
  0x18   : > { %p3551_p8 = pneg %p3869_p6 }
  0x1c   : > { %s295_s16 = scalar_lea.hbm %s6504_s1, %s3260_s11  ;;  %s3554_s30 = scalar_lea.hbm %s6504_s1, 512 }
  0x1d   : > { %s296_s17 = sshll.u32 %s295_s16, 4  ;;  %s297_s17 = int_to_ptr.hbm [resolvable:$true] %s296_s17 }
  0x1e   : > { %s3547_s21 = sshra.s32 %s297_s17, 4  ;;  %s3548_s21 = int_to_ptr.hbm [resolvable:$true] %s3547_s21 }
  0x1f   : > { %s3549_s22 = scalar_lea.hbm %s3548_s21, 256  ;;  %p3555_p11 = scmp.lt.s32.totalorder %s3548_s21, %s6504_s1 }
  0x20   : > { %p3550_p7 = scmp.ne.s32.totalorder %s3548_s21, %s3549_s22  ;;  %p3556_p12 = scmp.lt.s32.totalorder %s3554_s30, %s3549_s22 }
  0x22   : > { %p3552_p9 = pnand %p3551_p8, %p3550_p7  ;;  %p3557_p13 = por %p3556_p12, %p3555_p11 }
  0x24   : > { %p3553_p10 = pneg %p3552_p9 }
  0x26   : > { %p3558_p1 = pnand %p3557_p13, %p3553_p10 }
  0x28   : > { %3561 = shalt.err (!%p3558_p1)
}
  0x29   : > { %s6407_s13 = smov 512   ;;  %s6409_s16 = smov 32  }
  0x2a   : > { %3328 = dma.hbm_to_vmem [thread:$0]  (!%p3869_p6), %s297_s17, 4096, %s299_s19, %s3881_s20, %s6407_s13, %s6407_s13, %s6409_s16  }
  0x2b   : > { %s3901_s18 = sadd.s32 4294967295, %s3773_s27   ;;  %s2983_s21 = sadd.s32 4294967294, %s3773_s27  }
  0x2c   : > { %p51_p2 = scmp.ne.s32.totalorder %s3765_s25, %s3761_s24  ;;  %p52_p4 = scmp.eq.s32.totalorder %s3901_s18, 0 }
  0x2d   : > { %p195_p5 = scmp.eq.s32.totalorder %s3901_s18, 1  ;;  %p201_p7 = scmp.eq.s32.totalorder %s2983_s21, 1 }
  0x2e   : > { %p3910_p9 = por %p52_p4, %p51_p2  ;;  %p2984_p10 = scmp.ge.s32.totalorder %s3773_s27, 1 }
  0x2f   : > { %p3918_p11 = por %p195_p5, %p45_p0  ;;  %p3922_p12 = por %p201_p7, %p51_p2 }
  0x30   : > { %p234_p13 = scmp.lt.s32.totalorder %s3773_s27, 3  ;;  %s6509_s5 = sld [smem:[#allocation42_spill]] }
  0x31   : > { %s6507_s19 = scalar_select %p3922_p12, 1, 0 }
  0x32   : > { %p3930_p1 = pnand %p2984_p10, %p234_p13  ;;  %s3777_s15 = smov [#allocation8]  }
  0x33   : > { %6508 = sst [smem:[#allocation21_spill]] %s6507_s19  ;;  %s250_s21 = sshll.u32 %s3777_s15, 4  ;;  %s251_s21 = int_to_ptr.vmem [resolvable:$true] %s250_s21 }
  0x34   : > { %p3318_p0 = pneg %p3930_p1  ;;  %s273_s23 = scalar_lea.hbm %s6399_s0, %s3260_s11 }
  0x35   : > { %s268_s29 = scalar_lea.vmem [#allocation2], %s2987_s10  ;;  %s3778_s8 = smov 256  }
  0x36   : > { %s248_s30 = sshll.u32 %s6509_s5, 4  ;;  %p3319_p2 = pnand %p3318_p0, %p52_p4  ;;  %s249_s30 = int_to_ptr.hbm [resolvable:$true] %s248_s30 }
  0x37   : > { %s276_s1 = sshll.u32 %s268_s29, 4  ;;  %s274_s5 = sshll.u32 %s273_s23, 4  ;;  %s275_s5 = int_to_ptr.hbm [resolvable:$true] %s274_s5  ;;  %s277_s1 = int_to_ptr.vmem [resolvable:$true] %s276_s1 }
  0x38   : > { %s3779_s26 = smov 16   ;;  %s265_s15 = scalar_lea.sflag [#allocation3], %s3865_s9 }
  0x39   : > { %3321 = dma.hbm_to_vmem [thread:$0]  (!%p3319_p2), %s249_s30, 4096, %s251_s21, [#allocation9], %s3778_s8, %s3778_s8, %s3779_s26  }
  0x3a   : > { %s3607_s28 = sshra.s32 %s275_s5, 4  ;;  %s3614_s10 = scalar_lea.hbm %s6399_s0, 512  ;;  %s3608_s28 = int_to_ptr.hbm [resolvable:$true] %s3607_s28 }
  0x3b   : > { %s3609_s19 = scalar_lea.hbm %s3608_s28, 256  ;;  %p3615_p13 = scmp.lt.s32.totalorder %s3608_s28, %s6399_s0 }
  0x3c   : > { %p3610_p5 = scmp.ne.s32.totalorder %s3608_s28, %s3609_s19  ;;  %p3616_p0 = scmp.lt.s32.totalorder %s3614_s10, %s3609_s19 }
  0x3e   : > { %p3612_p7 = pnand %p3610_p5, %p3551_p8  ;;  %p3617_p2 = por %p3616_p0, %p3615_p13 }
  0x40   : > { %p3613_p10 = pneg %p3612_p7 }
  0x42   : > { %p3618_p3 = pnand %p3617_p2, %p3613_p10 }
  0x44   : > { %3621 = shalt.err (!%p3618_p3)
}
  0x45   : > { %s6511_s26 = smov 32   ;;  %s6512_s8 = smov 512  }
  0x46   : > { %3325 = dma.hbm_to_vmem [thread:$0]  (!%p3869_p6), %s275_s5, 4096, %s277_s1, %s265_s15, %s6512_s8, %s6512_s8, %s6511_s26  }
  0x47   : > { %s3299_s30 = smul.u32 768, %s3865_s9  ;;  %s3644_s9 = scalar_lea.hbm %s6401_s2, 1536 }
  0x48   : > { %s3300_s21 = smul.u32 768, %s3773_s27 }
  0x49   : > { %s312_s28 = scalar_lea.vmem [#allocation7], %s3299_s30 }
  0x4a   : > { %s317_s11 = scalar_lea.hbm %s6401_s2, %s3300_s21  ;;  %s320_s19 = sshll.u32 %s312_s28, 4  ;;  %s321_s19 = int_to_ptr.vmem [resolvable:$true] %s320_s19 }
  0x4b   : > { %s318_s10 = sshll.u32 %s317_s11, 4  ;;  %s319_s10 = int_to_ptr.hbm [resolvable:$true] %s318_s10 }
  0x4c   : > { %s3637_s16 = sshra.s32 %s319_s10, 4  ;;  %s3638_s16 = int_to_ptr.hbm [resolvable:$true] %s3637_s16 }
  0x4d   : > { %s3639_s23 = scalar_lea.hbm %s3638_s16, 768  ;;  %p3645_p10 = scmp.lt.s32.totalorder %s3638_s16, %s6401_s2 }
  0x4e   : > { %p3640_p3 = scmp.ne.s32.totalorder %s3638_s16, %s3639_s23  ;;  %p3646_p13 = scmp.lt.s32.totalorder %s3644_s9, %s3639_s23 }
  0x50   : > { %p3642_p5 = pnand %p3640_p3, %p3551_p8  ;;  %p3647_p0 = por %p3646_p13, %p3645_p10 }
  0x52   : > { %p3643_p7 = pneg %p3642_p5 }
  0x54   : > { %p3648_p2 = pnand %p3647_p0, %p3643_p7 }
  0x56   : > { %3651 = shalt.err (!%p3648_p2)
}
  0x57   : > { %3331 = dma.hbm_to_vmem [thread:$0]  (!%p3869_p6), %s319_s10, 12288, %s321_s19, %s3881_s20, %s6512_s8, %s6512_s8, %s6511_s26  }
  0x58   : > { %340 = sbr.rel (%p3930_p1) target bundleno = 1520 (0x5f0), region = 44 }
  0x5d   : > { %s3983_s30 = sand.u32 1, %s3765_s25  }
  0x5e   : > { %s2995_s21 = sshll.u32 %s3983_s30, 8  ;;  %s343_s13 = scalar_lea.sflag [#allocation3], %s3983_s30 }
  0x5f   : > { %s3987_s11 = scalar_lea.vmem [#allocation2], %s2995_s21 }
  0x60   : > { %3740 = dma.done.wait (%p3910_p9), %s343_s13, 4096  }
  0x61   : > { %3742 = vsyncadd (%p3910_p9), %s343_s13, 4294963200  ;;  %s352_s12 = sand.u32 1, %s3901_s18   ;;  %s3994_s14 = scalar_lea.vmem [#allocation5], %s2995_s21 }
  0x62   : > { %s353_s20 = scalar_lea.sflag [#allocation6], %s352_s12 }
  0x63   : > { %3744 = dma.done.wait (%p3910_p9), %s353_s20, 16384  }
  0x64   : > { %3746 = vsyncadd (%p3910_p9), %s353_s20, 4294950912  ;;  %s4001_s26 = smul.u32 768, %s3983_s30 }
  0x66   : > { %s4004_s8 = scalar_lea.vmem [#allocation7], %s4001_s26 }
  0x67   : > { %3748 = dma.done.wait (%p52_p4), [#allocation9], 4096  }
  0x68   : > { %3750 = vsyncadd (%p52_p4), [#allocation9], 4294963200  ;;  %p423_p6 = scmp.lt.s32.totalorder %s3901_s18, 1  ;;  %v6421_v2 = vmov 0.0   ;;  %s3781_s23 = smov 1   ;;  %vm445_vm2 = vcmask 7168  }
  0x69   : > { %s3782_s1 = smov 127   ;;  %vm456_vm3 = vcmask 1039360   ;;  %vm463_vm4 = vcmask 1040384   ;;  %vm472_vm5 = vcmask 1046528   ;;  %s4616_s5 = scalar_lea.vmem [#allocation10], %s4001_s26 }
  0x6a   : > { %s424_s28 = scalar_select %p423_p6, %s3901_s18, 1 }
  0x6b   : > { %s2792_s10 = sshll.u32 %s4616_s5, 4  ;;  %s2775_s15 = scalar_lea.sflag [#allocation4], %s3983_s30  ;;  %s6342_s10 = int_to_ptr.vmem [resolvable:$true] %s2792_s10 }
  0x6c   : > { %s3262_s19 = sshll.u32 %s424_s28, 4  ;;  %s5128_s28 = scalar_lea.vmem [#allocation11], %s4001_s26 }
  0x6d   : > { %s427_s16 = scalar_lea.vmem %s6402_s3, %s3262_s19  ;;  %s3687_s20 = scalar_lea.hbm %s6405_s6, 1536 }
  0x6e   : > { %v429_v0 = vld [vmem:[%s427_s16] sm:$0xff]  ;;  %v430_v1 = vld [vmem:[%s427_s16 + $0x8] sm:$0xff] }
  0x6f   : > { %vm431_vm0 = vcmp.gt.f32.partialorder %v429_v0, 0.5  ;;  %vm432_vm1 = vcmp.gt.f32.partialorder %v430_v1, 0.5 }
  0x70   : > { %v3000_v3 = vsel %vm431_vm0, 1.0, %v6421_v2  ;;  %v3001_v4 = vsel %vm432_vm1, 1.0, %v6421_v2 }
  0x71   : > { %v3387_v5 = vpack.i.bf16 %v3001_v4, %v3000_v3 }
  0x73   : > { %3388 = vrot.lane.b32.xlu0 %v3387_v5, %s3781_s23 }
  0x7b   : > { %3393 = vrot.lane.b32.xlu0 %v3387_v5, %s3782_s1 }
  0xe5   : > { %v3389_v6 = vpop.permute.xlu0 %3388 }
  0xe6   : > { %v3391_v7 = vunpack.i.h.bf16 %v3389_v6  ;;  %v3390_v8 = vunpack.i.l.bf16 %v3389_v6 }
  0xe8   : > { %v447_v9 = vsel %vm445_vm2, 0.0, %v3391_v7  ;;  %v446_v10 = vsel %vm445_vm2, 0.0, %v3390_v8 }
  0xe9   : > { %v449_v14 = vadd.f32 %v3001_v4, %v447_v9  ;;  %v448_v15 = vadd.f32 %v3000_v3, %v446_v10 }
  0xed   : > { %v3394_v11 = vpop.permute.xlu0 %3393 }
  0xee   : > { %v3396_v12 = vunpack.i.h.bf16 %v3394_v11  ;;  %v3395_v13 = vunpack.i.l.bf16 %v3394_v11 }
  0xf0   : > { %v458_v16 = vsel %vm456_vm3, %v3396_v12, 0.0  ;;  %v457_v17 = vsel %vm456_vm3, %v3395_v13, 0.0 }
  0xf1   : > { %v459_v18 = vadd.f32 %v457_v17, %v448_v15  ;;  %v460_v19 = vadd.f32 %v458_v16, %v449_v14 }
  0xf3   : > { %v464_v20 = vrot.slane %v459_v18, 7  ;;  %v465_v21 = vrot.slane %v460_v19, 7  ;;  %v473_v22 = vrot.slane %v459_v18, 1  ;;  %v474_v23 = vrot.slane %v460_v19, 1 }
  0xf5   : > { %v466_v24 = vsel %vm463_vm4, %v464_v20, %v465_v21  ;;  %v469_v25 = vsel %vm463_vm4, 0.0, %v464_v20  ;;  %v475_v28 = vsel %vm472_vm5, %v473_v22, %v474_v23  ;;  %v478_v29 = vsel %vm472_vm5, %v474_v23, 0.0 }
  0xf6   : > { %v470_v26 = vadd.f32 %v469_v25, %v459_v18  ;;  %v471_v27 = vadd.f32 %v466_v24, %v460_v19 }
  0xf8   : > { %v479_v30 = vadd.f32 %v475_v28, %v470_v26  ;;  %v480_v31 = vadd.f32 %v478_v29, %v471_v27 }
  0xfa   : > { %vm481_vm6 = vcmp.gt.f32.partialorder %v479_v30, 4.5  ;;  %vm482_vm7 = vcmp.gt.f32.partialorder %v480_v31, 4.5 }
  0xfb   : > { %v3002_v32 = vsel %vm481_vm6, 1.0, %v6421_v2  ;;  %v3003_v33 = vsel %vm482_vm7, 1.0, %v6421_v2 }
  0xfc   : > { %v3397_v34 = vpack.i.bf16 %v3003_v33, %v3002_v32 }
  0xfe   : > { %3398 = vrot.lane.b32.xlu1 %v3397_v34, %s3781_s23 }
 0x106   : > { %3403 = vrot.lane.b32.xlu1 %v3397_v34, %s3782_s1 }
 0x170   : > { %v3399_v35 = vpop.permute.xlu1 %3398 }
 0x171   : > { %v3401_v36 = vunpack.i.h.bf16 %v3399_v35  ;;  %v3400_v37 = vunpack.i.l.bf16 %v3399_v35 }
 0x173   : > { %v496_v38 = vsel %vm445_vm2, 0.0, %v3401_v36  ;;  %v495_v39 = vsel %vm445_vm2, 0.0, %v3400_v37 }
 0x174   : > { %v498_v43 = vadd.f32 %v3003_v33, %v496_v38  ;;  %v497_v44 = vadd.f32 %v3002_v32, %v495_v39 }
 0x178   : > { %v3404_v40 = vpop.permute.xlu1 %3403 }
 0x179   : > { %v3406_v41 = vunpack.i.h.bf16 %v3404_v40  ;;  %v3405_v42 = vunpack.i.l.bf16 %v3404_v40 }
 0x17b   : > { %v506_v45 = vsel %vm456_vm3, %v3406_v41, 0.0  ;;  %v505_v46 = vsel %vm456_vm3, %v3405_v42, 0.0 }
 0x17c   : > { %v507_v47 = vadd.f32 %v505_v46, %v497_v44  ;;  %v508_v48 = vadd.f32 %v506_v45, %v498_v43 }
 0x17e   : > { %v511_v49 = vrot.slane %v507_v47, 7  ;;  %v512_v50 = vrot.slane %v508_v48, 7  ;;  %v519_v51 = vrot.slane %v507_v47, 1  ;;  %v520_v52 = vrot.slane %v508_v48, 1 }
 0x180   : > { %v513_v53 = vsel %vm463_vm4, %v511_v49, %v512_v50  ;;  %v516_v54 = vsel %vm463_vm4, 0.0, %v511_v49  ;;  %v521_v57 = vsel %vm472_vm5, %v519_v51, %v520_v52  ;;  %v524_v58 = vsel %vm472_vm5, %v520_v52, 0.0 }
 0x181   : > { %v517_v55 = vadd.f32 %v516_v54, %v507_v47  ;;  %v518_v56 = vadd.f32 %v513_v53, %v508_v48 }
 0x183   : > { %v525_v59 = vadd.f32 %v521_v57, %v517_v55  ;;  %v526_v60 = vadd.f32 %v524_v58, %v518_v56 }
 0x185   : > { %vm527_vm8 = vcmp.gt.f32.partialorder %v525_v59, 4.5  ;;  %vm528_vm9 = vcmp.gt.f32.partialorder %v526_v60, 4.5 }
 0x186   : > { %v3004_v61 = vsel %vm527_vm8, 1.0, %v6421_v2  ;;  %v3005_v62 = vsel %vm528_vm9, 1.0, %v6421_v2 }
 0x187   : > { %v3407_v63 = vpack.i.bf16 %v3005_v62, %v3004_v61 }
 0x189   : > { %3408 = vrot.lane.b32.xlu2 %v3407_v63, %s3781_s23 }
 0x191   : > { %3413 = vrot.lane.b32.xlu2 %v3407_v63, %s3782_s1 }
 0x1e3   : > { %v3409_v0 = vpop.permute.xlu2 %3408 }
 0x1e4   : > { %v3411_v1 = vunpack.i.h.bf16 %v3409_v0  ;;  %v3410_v3 = vunpack.i.l.bf16 %v3409_v0 }
 0x1e6   : > { %v542_v4 = vsel %vm445_vm2, 0.0, %v3411_v1  ;;  %v541_v5 = vsel %vm445_vm2, 0.0, %v3410_v3 }
 0x1e7   : > { %v544_v9 = vadd.f32 %v3005_v62, %v542_v4  ;;  %v543_v10 = vadd.f32 %v3004_v61, %v541_v5 }
 0x1eb   : > { %v3414_v6 = vpop.permute.xlu2 %3413 }
 0x1ec   : > { %v3416_v7 = vunpack.i.h.bf16 %v3414_v6  ;;  %v3415_v8 = vunpack.i.l.bf16 %v3414_v6 }
 0x1ee   : > { %v552_v11 = vsel %vm456_vm3, %v3416_v7, 0.0  ;;  %v551_v12 = vsel %vm456_vm3, %v3415_v8, 0.0 }
 0x1ef   : > { %v553_v13 = vadd.f32 %v551_v12, %v543_v10  ;;  %v554_v14 = vadd.f32 %v552_v11, %v544_v9 }
 0x1f1   : > { %v557_v15 = vrot.slane %v553_v13, 7  ;;  %v558_v16 = vrot.slane %v554_v14, 7  ;;  %v565_v17 = vrot.slane %v553_v13, 1  ;;  %v566_v18 = vrot.slane %v554_v14, 1 }
 0x1f3   : > { %v559_v19 = vsel %vm463_vm4, %v557_v15, %v558_v16  ;;  %v562_v20 = vsel %vm463_vm4, 0.0, %v557_v15  ;;  %v567_v23 = vsel %vm472_vm5, %v565_v17, %v566_v18  ;;  %v570_v24 = vsel %vm472_vm5, %v566_v18, 0.0 }
 0x1f4   : > { %v563_v21 = vadd.f32 %v562_v20, %v553_v13  ;;  %v564_v22 = vadd.f32 %v559_v19, %v554_v14 }
 0x1f6   : > { %v571_v25 = vadd.f32 %v567_v23, %v563_v21  ;;  %v572_v26 = vadd.f32 %v570_v24, %v564_v22 }
 0x1f8   : > { %vm573_vm10 = vcmp.gt.f32.partialorder %v571_v25, 4.5  ;;  %vm574_vm11 = vcmp.gt.f32.partialorder %v572_v26, 4.5 }
 0x1f9   : > { %v3006_v27 = vsel %vm573_vm10, 1.0, %v6421_v2  ;;  %v3007_v28 = vsel %vm574_vm11, 1.0, %v6421_v2 }
 0x1fa   : > { %v3422_v29 = vpack.i.bf16 %v3007_v28, %v3006_v27 }
 0x1fc   : > { %3423 = vrot.lane.b32.xlu1 %v3422_v29, %s3782_s1  ;;  %3418 = vrot.lane.b32.xlu0 %v3422_v29, %s3781_s23 }
 0x26e   : > { %v3424_v30 = vpop.permute.xlu1 %3423  ;;  %v3419_v31 = vpop.permute.xlu0 %3418 }
 0x26f   : > { %v3426_v32 = vunpack.i.h.bf16 %v3424_v30  ;;  %v3425_v33 = vunpack.i.l.bf16 %v3424_v30  ;;  %v3421_v34 = vunpack.i.h.bf16 %v3419_v31  ;;  %v3420_v35 = vunpack.i.l.bf16 %v3419_v31 }
 0x271   : > { %v588_v36 = vsel %vm445_vm2, 0.0, %v3421_v34  ;;  %v587_v37 = vsel %vm445_vm2, 0.0, %v3420_v35  ;;  %v598_v40 = vsel %vm456_vm3, %v3426_v32, 0.0  ;;  %v597_v41 = vsel %vm456_vm3, %v3425_v33, 0.0 }
 0x272   : > { %v590_v38 = vadd.f32 %v3007_v28, %v588_v36  ;;  %v589_v39 = vadd.f32 %v3006_v27, %v587_v37 }
 0x274   : > { %v600_v42 = vadd.f32 %v598_v40, %v590_v38  ;;  %v599_v43 = vadd.f32 %v597_v41, %v589_v39 }
 0x276   : > { %v604_v44 = vrot.slane %v600_v42, 7  ;;  %v603_v45 = vrot.slane %v599_v43, 7  ;;  %v611_v46 = vrot.slane %v599_v43, 1  ;;  %v612_v47 = vrot.slane %v600_v42, 1 }
 0x278   : > { %v605_v48 = vsel %vm463_vm4, %v603_v45, %v604_v44  ;;  %v608_v49 = vsel %vm463_vm4, 0.0, %v603_v45  ;;  %v613_v52 = vsel %vm472_vm5, %v611_v46, %v612_v47  ;;  %v616_v53 = vsel %vm472_vm5, %v612_v47, 0.0  ;;  %v4086_v47 = vld [vmem:[%s3994_s14] sm:$0xff] }
 0x279   : > { %v609_v50 = vadd.f32 %v608_v49, %v599_v43  ;;  %v610_v51 = vadd.f32 %v605_v48, %v600_v42 }
 0x27b   : > { %v617_v54 = vadd.f32 %v613_v52, %v609_v50  ;;  %v618_v55 = vadd.f32 %v616_v53, %v610_v51 }
 0x27d   : > { %vm619_vm12 = vcmp.gt.f32.partialorder %v617_v54, 4.5  ;;  %vm620_vm13 = vcmp.gt.f32.partialorder %v618_v55, 4.5  ;;  %v4103_v55 = vld [vmem:[%s3994_s14 + $0x18] sm:$0xff] }
 0x27e   : > { %v3008_v56 = vsel %vm619_vm12, 1.0, %v6421_v2  ;;  %v3009_v57 = vsel %vm620_vm13, 1.0, %v6421_v2 }
 0x27f   : > { %v3432_v58 = vpack.i.bf16 %v3009_v57, %v3008_v56 }
 0x281   : > { %3433 = vrot.lane.b32.xlu0 %v3432_v58, %s3782_s1  ;;  %3428 = vrot.lane.b32.xlu2 %v3432_v58, %s3781_s23  ;;  %v4118_v58 = vld [vmem:[%s3994_s14 + $0x30] sm:$0xff] }
 0x2db   : > { %v3429_v59 = vpop.permute.xlu2 %3428 }
 0x2dc   : > { %v3431_v60 = vunpack.i.h.bf16 %v3429_v59  ;;  %v3430_v61 = vunpack.i.l.bf16 %v3429_v59  ;;  %v4123_v59 = vld [vmem:[%s3994_s14 + $0x20] sm:$0xff] }
 0x2de   : > { %v634_v62 = vsel %vm445_vm2, 0.0, %v3431_v60  ;;  %v633_v63 = vsel %vm445_vm2, 0.0, %v3430_v61  ;;  %v4126_v60 = vld [vmem:[%s3994_s14 + $0x28] sm:$0xff] }
 0x2df   : > { %v636_v4 = vadd.f32 %v3009_v57, %v634_v62  ;;  %v635_v5 = vadd.f32 %v3008_v56, %v633_v63  ;;  %v4108_v56 = vld [vmem:[%s3994_s14 + $0x8] sm:$0xff]  ;;  %v4111_v57 = vld [vmem:[%s3994_s14 + $0x10] sm:$0xff]  ;;  %v4138_v62 = vld [vmem:[%s3994_s14 + $0x38] sm:$0xff] }
 0x2e0   : > { %v4133_v61 = vld [vmem:[%s3994_s14 + $0x48] sm:$0xff]  ;;  %v4141_v63 = vld [vmem:[%s3994_s14 + $0x40] sm:$0xff] }
 0x2f3   : > { %v3434_v0 = vpop.permute.xlu0 %3433 }
 0x2f4   : > { %v3436_v1 = vunpack.i.h.bf16 %v3434_v0  ;;  %v3435_v3 = vunpack.i.l.bf16 %v3434_v0  ;;  %v4148_v0 = vld [vmem:[%s3994_s14 + $0x60] sm:$0xff] }
 0x2f6   : > { %v644_v6 = vsel %vm456_vm3, %v3436_v1, 0.0  ;;  %v643_v7 = vsel %vm456_vm3, %v3435_v3, 0.0  ;;  %v4153_v1 = vld [vmem:[%s3994_s14 + $0x50] sm:$0xff]  ;;  %v4156_v3 = vld [vmem:[%s3994_s14 + $0x58] sm:$0xff] }
 0x2f7   : > { %v645_v8 = vadd.f32 %v643_v7, %v635_v5  ;;  %v646_v9 = vadd.f32 %v644_v6, %v636_v4  ;;  %v4163_v4 = vld [vmem:[%s3994_s14 + $0x78] sm:$0xff]  ;;  %v4168_v5 = vld [vmem:[%s3994_s14 + $0x68] sm:$0xff]  ;;  %v4171_v6 = vld [vmem:[%s3994_s14 + $0x70] sm:$0xff] }
 0x2f8   : > { %v3130_v7 = vld [vmem:[#allocation8 + $0xe0] sm:$0xf] }
 0x2f9   : > { %v649_v10 = vrot.slane %v645_v8, 7  ;;  %v650_v11 = vrot.slane %v646_v9, 7  ;;  %v657_v12 = vrot.slane %v645_v8, 1  ;;  %v658_v13 = vrot.slane %v646_v9, 1 }
 0x2fb   : > { %v651_v14 = vsel %vm463_vm4, %v649_v10, %v650_v11  ;;  %v654_v15 = vsel %vm463_vm4, 0.0, %v649_v10  ;;  %v659_v18 = vsel %vm472_vm5, %v657_v12, %v658_v13  ;;  %v662_v19 = vsel %vm472_vm5, %v658_v13, 0.0  ;;  %v3132_v11 = vld [vmem:[#allocation8 + $0xf0] sm:$0xf0]  ;;  %v3138_v12 = vld [vmem:[#allocation8 + $0xe8] sm:$0xf] }
 0x2fc   : > { %v655_v16 = vadd.f32 %v654_v15, %v645_v8  ;;  %v656_v17 = vadd.f32 %v651_v14, %v646_v9  ;;  %v3293_v8 = vld [vmem:[#allocation8 + $0xec] sm:$0xf0]  ;;  %v3291_v9 = vld [vmem:[#allocation8 + $0xe4] sm:$0xf]  ;;  %v3294_v13 = vld [vmem:[#allocation8 + $0xf4] sm:$0xf0] }
 0x2fd   : > { %v3131_v10 = vor.u32 %v3293_v8, %v3130_v7  ;;  %v3135_v14 = vor.u32 %v3291_v9, %v3132_v11  ;;  %v3139_v15 = vor.u32 %v3294_v13, %v3138_v12  ;;  %v4221_v7 = vld [vmem:[%s3994_s14 + $0xd0] sm:$0xff]  ;;  %v4228_v8 = vld [vmem:[%s3994_s14 + $0xc0] sm:$0xff] }
 0x2fe   : > { %v663_v20 = vadd.f32 %v659_v18, %v655_v16  ;;  %v664_v21 = vadd.f32 %v662_v19, %v656_v17  ;;  %v3292_v16 = vld [vmem:[#allocation8 + $0xec] sm:$0xf]  ;;  %v3140_v17 = vld [vmem:[#allocation8 + $0xf8] sm:$0xf0]  ;;  %v4178_v18 = vld [vmem:[%s3994_s14 + $0x90] sm:$0xff] }
 0x2ff   : > { %958 = vmatpush.bf16.msra.mxu0 %v3131_v10  ;;  %v3143_v19 = vor.u32 %v3292_v16, %v3140_v17  ;;  %972 = vmatpush.bf16.msra.mxu1 %v3135_v14  ;;  %v4233_v9 = vld [vmem:[%s3994_s14 + $0xe0] sm:$0xff]  ;;  %v4236_v10 = vld [vmem:[%s3994_s14 + $0xe8] sm:$0xff]  ;;  %v3281_v12 = vld [vmem:[#allocation8 + $0x8c] sm:$0xf0] }
 0x300   : > { %vm665_vm14 = vcmp.gt.f32.partialorder %v663_v20, 4.5  ;;  %vm666_vm15 = vcmp.gt.f32.partialorder %v664_v21, 4.5  ;;  %986 = vmatpush.bf16.msra.mxu2 %v3139_v15  ;;  %v4183_v20 = vld [vmem:[%s3994_s14 + $0x80] sm:$0xff]  ;;  %v4186_v21 = vld [vmem:[%s3994_s14 + $0x88] sm:$0xff]  ;;  %v3084_v15 = vld [vmem:[#allocation8 + $0x90] sm:$0xf0] }
 0x301   : > { %v3010_v22 = vsel %vm665_vm14, 1.0, %v6421_v2  ;;  %v3011_v23 = vsel %vm666_vm15, 1.0, %v6421_v2  ;;  %1000 = vmatpush.bf16.msra.mxu3 %v3143_v19  ;;  %v3082_v11 = vld [vmem:[#allocation8 + $0x80] sm:$0xf]  ;;  %v3279_v13 = vld [vmem:[#allocation8 + $0x84] sm:$0xf] }
 0x302   : > { %v3442_v24 = vpack.i.bf16 %v3011_v23, %v3010_v22  ;;  %v3083_v14 = vor.u32 %v3281_v12, %v3082_v11  ;;  %v3090_v16 = vld [vmem:[#allocation8 + $0x88] sm:$0xf]  ;;  %v3282_v17 = vld [vmem:[#allocation8 + $0x94] sm:$0xf0]  ;;  %v3087_v19 = vor.u32 %v3279_v13, %v3084_v15  ;;  %v3060_v15 = vld [vmem:[#allocation8 + $0x58] sm:$0xf0] }
 0x303   : > { %v3274_v11 = vld [vmem:[#allocation8 + $0x54] sm:$0xf0] }
 0x304   : > { %3443 = vrot.lane.b32.xlu2 %v3442_v24, %s3782_s1  ;;  %3438 = vrot.lane.b32.xlu1 %v3442_v24, %s3781_s23  ;;  %v3289_v24 = vld [vmem:[#allocation8 + $0xcc] sm:$0xf0] }
 0x30c   : > { %1640 = vrot.lane.b32.xlu2 %v4086_v47, %s3781_s23 }
 0x314   : > { %1646 = vrot.lane.b32.xlu2 %v4103_v55, %s3781_s23 }
 0x31c   : > { %1652 = vrot.lane.b32.xlu2 %v4118_v58, %s3781_s23 }
 0x324   : > { %1658 = vrot.lane.b32.xlu2 %v4133_v61, %s3781_s23 }
 0x32c   : > { %1664 = vrot.lane.b32.xlu2 %v4148_v0, %s3781_s23 }
 0x334   : > { %1670 = vrot.lane.b32.xlu2 %v4163_v4, %s3781_s23 }
 0x33c   : > { %1676 = vrot.lane.b32.xlu2 %v4178_v18, %s3781_s23 }
 0x35e   : > { %v3444_v25 = vpop.permute.xlu2 %3443 }
 0x35f   : > { %v3446_v27 = vunpack.i.h.bf16 %v3444_v25  ;;  %v3445_v28 = vunpack.i.l.bf16 %v3444_v25  ;;  %v3287_v25 = vld [vmem:[#allocation8 + $0xc4] sm:$0xf] }
 0x361   : > { %v690_v35 = vsel %vm456_vm3, %v3446_v27, 0.0  ;;  %v689_v36 = vsel %vm456_vm3, %v3445_v28, 0.0  ;;  %v3116_v27 = vld [vmem:[#allocation8 + $0xd0] sm:$0xf0]  ;;  %v3122_v28 = vld [vmem:[#allocation8 + $0xc8] sm:$0xf] }
 0x376   : > { %v3439_v26 = vpop.permute.xlu1 %3438 }
 0x377   : > { %v3441_v29 = vunpack.i.h.bf16 %v3439_v26  ;;  %v3440_v30 = vunpack.i.l.bf16 %v3439_v26 }
 0x379   : > { %v680_v31 = vsel %vm445_vm2, 0.0, %v3441_v29  ;;  %v679_v32 = vsel %vm445_vm2, 0.0, %v3440_v30  ;;  %v3290_v29 = vld [vmem:[#allocation8 + $0xd4] sm:$0xf0] }
 0x37a   : > { %v682_v33 = vadd.f32 %v3011_v23, %v680_v31  ;;  %v681_v34 = vadd.f32 %v3010_v22, %v679_v32  ;;  %v3114_v22 = vld [vmem:[#allocation8 + $0xc0] sm:$0xf]  ;;  %v4193_v23 = vld [vmem:[%s3994_s14 + $0xa8] sm:$0xff]  ;;  %v4196_v30 = vld [vmem:[%s3994_s14 + $0x98] sm:$0xff]  ;;  %v3119_v32 = vor.u32 %v3287_v25, %v3116_v27 }
 0x37b   : > { %v3115_v26 = vor.u32 %v3289_v24, %v3114_v22  ;;  %v4199_v31 = vld [vmem:[%s3994_s14 + $0xa0] sm:$0xff]  ;;  %1682 = vrot.lane.b32.xlu2 %v4193_v23, %s3781_s23  ;;  %v3091_v22 = vor.u32 %v3282_v17, %v3090_v16  ;;  %v3280_v24 = vld [vmem:[#allocation8 + $0x8c] sm:$0xf]  ;;  %v3092_v25 = vld [vmem:[#allocation8 + $0x98] sm:$0xf0] }
 0x37c   : > { %v692_v37 = vadd.f32 %v690_v35, %v682_v33  ;;  %v691_v38 = vadd.f32 %v689_v36, %v681_v34  ;;  %v3123_v33 = vor.u32 %v3290_v29, %v3122_v28  ;;  %v3288_v34 = vld [vmem:[#allocation8 + $0xcc] sm:$0xf]  ;;  %v3124_v35 = vld [vmem:[#allocation8 + $0xd8] sm:$0xf0]  ;;  %v3098_v36 = vld [vmem:[#allocation8 + $0xa0] sm:$0xf]  ;;  %973 = vmatpush.bf16.msra.mxu1 %v3119_v32  ;;  %v3095_v28 = vor.u32 %v3280_v24, %v3092_v25 }
 0x37d   : > { %959 = vmatpush.bf16.msra.mxu0 %v3115_v26  ;;  %v4243_v26 = vld [vmem:[%s3994_s14 + $0xd8] sm:$0xff]  ;;  %v3066_v29 = vld [vmem:[#allocation8 + $0x60] sm:$0xf]  ;;  %v3277_v32 = vld [vmem:[#allocation8 + $0x6c] sm:$0xf0] }
 0x37e   : > { %v696_v39 = vrot.slane %v692_v37, 7  ;;  %v695_v40 = vrot.slane %v691_v38, 7  ;;  %v703_v41 = vrot.slane %v691_v38, 1  ;;  %v704_v42 = vrot.slane %v692_v37, 1  ;;  %987 = vmatpush.bf16.msra.mxu2 %v3123_v33  ;;  %v4246_v27 = vld [vmem:[%s3994_s14 + $0xf8] sm:$0xff]  ;;  %v4253_v17 = vld [vmem:[%s3994_s14 + $0xf0] sm:$0xff] }
 0x37f   : > { %v3275_v33 = vld [vmem:[#allocation8 + $0x64] sm:$0xf]  ;;  %6513 = vst [vmem:[#allocation22_spill] sm:$0xff] %v4253_v17 }
 0x380   : > { %v697_v43 = vsel %vm463_vm4, %v695_v40, %v696_v39  ;;  %v700_v44 = vsel %vm463_vm4, 0.0, %v695_v40  ;;  %v705_v48 = vsel %vm472_vm5, %v703_v41, %v704_v42  ;;  %v708_v49 = vsel %vm472_vm5, %v704_v42, 0.0  ;;  %v3283_v39 = vld [vmem:[#allocation8 + $0xa4] sm:$0xf]  ;;  %v3100_v40 = vld [vmem:[#allocation8 + $0xb0] sm:$0xf0] }
 0x381   : > { %v701_v45 = vadd.f32 %v700_v44, %v691_v38  ;;  %v702_v46 = vadd.f32 %v697_v43, %v692_v37  ;;  %v3127_v37 = vor.u32 %v3288_v34, %v3124_v35  ;;  %v3285_v38 = vld [vmem:[#allocation8 + $0xac] sm:$0xf0]  ;;  %v3103_v42 = vor.u32 %v3283_v39, %v3100_v40  ;;  %v3106_v43 = vld [vmem:[#allocation8 + $0xa8] sm:$0xf]  ;;  %v3286_v44 = vld [vmem:[#allocation8 + $0xb4] sm:$0xf0] }
 0x382   : > { %v3099_v41 = vor.u32 %v3285_v38, %v3098_v36  ;;  %v3067_v34 = vor.u32 %v3277_v32, %v3066_v29  ;;  %v3068_v35 = vld [vmem:[#allocation8 + $0x70] sm:$0xf0]  ;;  %v3074_v36 = vld [vmem:[#allocation8 + $0x68] sm:$0xf]  ;;  %v3276_v40 = vld [vmem:[#allocation8 + $0x6c] sm:$0xf] }
 0x383   : > { %v709_v50 = vadd.f32 %v705_v48, %v701_v45  ;;  %v710_v51 = vadd.f32 %v708_v49, %v702_v46  ;;  %v3284_v45 = vld [vmem:[#allocation8 + $0xac] sm:$0xf]  ;;  %1001 = vmatpush.bf16.msra.mxu3 %v3127_v37  ;;  %v3107_v46 = vor.u32 %v3286_v44, %v3106_v43  ;;  %v3108_v48 = vld [vmem:[#allocation8 + $0xb8] sm:$0xf0]  ;;  %974 = vmatpush.bf16.msra.mxu1 %v3103_v42  ;;  %v3278_v37 = vld [vmem:[#allocation8 + $0x74] sm:$0xf0] }
 0x384   : > { %v3111_v49 = vor.u32 %v3284_v45, %v3108_v48  ;;  %960 = vmatpush.bf16.msra.mxu0 %v3099_v41  ;;  %1688 = vrot.lane.b32.xlu2 %v4228_v8, %s3781_s23  ;;  %v3071_v38 = vor.u32 %v3275_v33, %v3068_v35  ;;  %v3075_v39 = vor.u32 %v3278_v37, %v3074_v36  ;;  %v3076_v41 = vld [vmem:[#allocation8 + $0x78] sm:$0xf0]  ;;  %v3050_v43 = vld [vmem:[#allocation8 + $0x40] sm:$0xf]  ;;  %v3273_v44 = vld [vmem:[#allocation8 + $0x4c] sm:$0xf0] }
 0x385   : > { %vm711_vm0 = vcmp.gt.f32.partialorder %v709_v50, 4.5  ;;  %vm712_vm1 = vcmp.gt.f32.partialorder %v710_v51, 4.5  ;;  %988 = vmatpush.bf16.msra.mxu2 %v3107_v46  ;;  %v4208_v50 = vld [vmem:[%s3994_s14 + $0xb0] sm:$0xff]  ;;  %v4211_v51 = vld [vmem:[%s3994_s14 + $0xb8] sm:$0xff]  ;;  %v3079_v42 = vor.u32 %v3276_v40, %v3076_v41  ;;  %v3271_v45 = vld [vmem:[#allocation8 + $0x44] sm:$0xf]  ;;  %v3051_v46 = vor.u32 %v3273_v44, %v3050_v43 }
 0x386   : > { %v4093_v52 = vsel %vm711_vm0, 1.0, %v6421_v2  ;;  %v4096_v53 = vsel %vm712_vm1, 1.0, %v6421_v2  ;;  %v3052_v48 = vld [vmem:[#allocation8 + $0x50] sm:$0xf0]  ;;  %v3267_v25 = vld [vmem:[#allocation8 + $0x24] sm:$0xf] }
 0x387   : > { %v3452_v54 = vpack.i.bf16 %v4096_v53, %v4093_v52  ;;  %1002 = vmatpush.bf16.msra.mxu3 %v3111_v49  ;;  %975 = vmatpush.bf16.msra.mxu1 %v3087_v19  ;;  %v3058_v49 = vld [vmem:[#allocation8 + $0x48] sm:$0xf]  ;;  %v3055_v12 = vor.u32 %v3271_v45, %v3052_v48  ;;  %v3034_v19 = vld [vmem:[#allocation8 + $0x20] sm:$0xf]  ;;  %v3270_v33 = vld [vmem:[#allocation8 + $0x34] sm:$0xf0] }
 0x388   : > { %961 = vmatpush.bf16.msra.mxu0 %v3083_v14  ;;  %v3059_v13 = vor.u32 %v3274_v11, %v3058_v49  ;;  %v3272_v14 = vld [vmem:[#allocation8 + $0x4c] sm:$0xf]  ;;  %v3042_v29 = vld [vmem:[#allocation8 + $0x28] sm:$0xf]  ;;  %v3044_v35 = vld [vmem:[#allocation8 + $0x38] sm:$0xf0] }
 0x389   : > { %3453 = vrot.lane.b32.xlu1 %v3452_v54, %s3782_s1  ;;  %3448 = vrot.lane.b32.xlu0 %v3452_v54, %s3781_s23  ;;  %v4218_v54 = vld [vmem:[%s3994_s14 + $0xc8] sm:$0xff]  ;;  %v3063_v16 = vor.u32 %v3272_v14, %v3060_v15  ;;  %v3043_v36 = vor.u32 %v3270_v33, %v3042_v29  ;;  %v3263_v40 = vld [vmem:[#allocation8 + $0x4] sm:$0xf]  ;;  %v3266_v45 = vld [vmem:[#allocation8 + $0x14] sm:$0xf0] }
 0x38a   : > { %989 = vmatpush.bf16.msra.mxu2 %v3091_v22  ;;  %v3269_v22 = vld [vmem:[#allocation8 + $0x2c] sm:$0xf0]  ;;  %v3026_v43 = vld [vmem:[#allocation8 + $0x8] sm:$0xf]  ;;  %v3028_v49 = vld [vmem:[#allocation8 + $0x18] sm:$0xf0] }
 0x38b   : > { %1003 = vmatpush.bf16.msra.mxu3 %v3095_v28  ;;  %976 = vmatpush.bf16.msra.mxu1 %v3071_v38  ;;  %v3035_v24 = vor.u32 %v3269_v22, %v3034_v19  ;;  %v3036_v28 = vld [vmem:[#allocation8 + $0x30] sm:$0xf0]  ;;  %v3018_v38 = vld [vmem:[#allocation8] sm:$0xf]  ;;  %v3027_v48 = vor.u32 %v3266_v45, %v3026_v43 }
 0x38c   : > { %1694 = vrot.lane.b32.xlu2 %v4243_v26, %s3781_s23  ;;  %962 = vmatpush.bf16.msra.mxu0 %v3067_v34  ;;  %v3039_v32 = vor.u32 %v3267_v25, %v3036_v28  ;;  %v3268_v34 = vld [vmem:[#allocation8 + $0x2c] sm:$0xf] }
 0x38d   : > { %v3047_v37 = vor.u32 %v3268_v34, %v3044_v35 }
 0x38e   : > { %990 = vmatpush.bf16.msra.mxu2 %v3075_v39  ;;  %v3265_v39 = vld [vmem:[#allocation8 + $0xc] sm:$0xf0] }
 0x38f   : > { %1004 = vmatpush.bf16.msra.mxu3 %v3079_v42  ;;  %977 = vmatpush.bf16.msra.mxu1 %v3055_v12  ;;  %v3019_v41 = vor.u32 %v3265_v39, %v3018_v38  ;;  %v3020_v42 = vld [vmem:[#allocation8 + $0x10] sm:$0xf0]  ;;  %v1641_v12 = vpop.permute.xlu2 %1640 }
 0x390   : > { %963 = vmatpush.bf16.msra.mxu0 %v3051_v46  ;;  %v3023_v44 = vor.u32 %v3263_v40, %v3020_v42  ;;  %v3264_v46 = vld [vmem:[#allocation8 + $0xc] sm:$0xf]  ;;  %v1728_v22 = vsel %vm445_vm2, 0, %v1641_v12 }
 0x391   : > { %1642 = vrot.lane.b32.xlu0 %v4108_v56, %s3781_s23  ;;  %1644 = vrot.lane.b32.xlu1 %v4111_v57, %s3781_s23  ;;  %v3031_v11 = vor.u32 %v3264_v46, %v3028_v49  ;;  %vm1804_vm7 = vcmp.ne.s32.totalorder %v4086_v47, %v1728_v22 }
 0x392   : > { %991 = vmatpush.bf16.msra.mxu2 %v3059_v13  ;;  %v6415_v13 = vlaneseq }
 0x393   : > { %1005 = vmatpush.bf16.msra.mxu3 %v3063_v16  ;;  %978 = vmatpush.bf16.msra.mxu1 %v3039_v32 }
 0x394   : > { %1700 = vrot.lane.b32.xlu2 %v4253_v17, %s3781_s23  ;;  %964 = vmatpush.bf16.msra.mxu0 %v3035_v24  ;;  %v4258_v15 = vand.u32 127, %v6415_v13 }
 0x396   : > { %992 = vmatpush.bf16.msra.mxu2 %v3043_v36  ;;  %vm1800_vm6 = vcmp.gt.s32.totalorder %v4258_v15, 0 }
 0x397   : > { %1006 = vmatpush.bf16.msra.mxu3 %v3047_v37  ;;  %979 = vmatpush.bf16.msra.mxu1 %v3023_v44  ;;  %v1647_v14 = vpop.permute.xlu2 %1646  ;;  %vm1836_vm8 = vmand %vm1800_vm6, %vm1804_vm7 }
 0x398   : > { %965 = vmatpush.bf16.msra.mxu0 %v3019_v41 }
 0x399   : > { %1648 = vrot.lane.b32.xlu0 %v4123_v59, %s3781_s23  ;;  %1650 = vrot.lane.b32.xlu1 %v4126_v60, %s3781_s23 }
 0x39a   : > { %993 = vmatpush.bf16.msra.mxu2 %v3027_v48 }
 0x39b   : > { %1007 = vmatpush.bf16.msra.mxu3 %v3031_v11 }
 0x39f   : > { %v1653_v38 = vpop.permute.xlu2 %1652 }
 0x3a1   : > { %1654 = vrot.lane.b32.xlu0 %v4138_v62, %s3781_s23  ;;  %1656 = vrot.lane.b32.xlu1 %v4141_v63, %s3781_s23 }
 0x3a9   : > { %1660 = vrot.lane.b32.xlu0 %v4153_v1, %s3781_s23  ;;  %1662 = vrot.lane.b32.xlu1 %v4156_v3, %s3781_s23 }
 0x3b1   : > { %1666 = vrot.lane.b32.xlu0 %v4168_v5, %s3781_s23  ;;  %1668 = vrot.lane.b32.xlu1 %v4171_v6, %s3781_s23 }
 0x3b9   : > { %1672 = vrot.lane.b32.xlu0 %v4183_v20, %s3781_s23  ;;  %1674 = vrot.lane.b32.xlu1 %v4186_v21, %s3781_s23 }
 0x3c1   : > { %1678 = vrot.lane.b32.xlu0 %v4196_v30, %s3781_s23  ;;  %1680 = vrot.lane.b32.xlu1 %v4199_v31, %s3781_s23 }
 0x3c9   : > { %1684 = vrot.lane.b32.xlu0 %v4208_v50, %s3781_s23  ;;  %1686 = vrot.lane.b32.xlu1 %v4211_v51, %s3781_s23 }
 0x3d1   : > { %1690 = vrot.lane.b32.xlu0 %v4218_v54, %s3781_s23  ;;  %1692 = vrot.lane.b32.xlu1 %v4221_v7, %s3781_s23 }
 0x3d9   : > { %1696 = vrot.lane.b32.xlu0 %v4233_v9, %s3781_s23  ;;  %1698 = vrot.lane.b32.xlu1 %v4236_v10, %s3781_s23 }
 0x3e1   : > { %1702 = vrot.lane.b32.xlu0 %v4246_v27, %s3781_s23 }
 0x3fb   : > { %v3454_v16 = vpop.permute.xlu1 %3453  ;;  %v3449_v19 = vpop.permute.xlu0 %3448 }
 0x3fc   : > { %v3456_v24 = vunpack.i.h.bf16 %v3454_v16  ;;  %v3455_v25 = vunpack.i.l.bf16 %v3454_v16  ;;  %v3451_v28 = vunpack.i.h.bf16 %v3449_v19  ;;  %v3450_v29 = vunpack.i.l.bf16 %v3449_v19 }
 0x3fd   : > { %v4278_v19 = vsel %vm1836_vm8, 1.0, %v6421_v2 }
 0x3fe   : > { %v726_v32 = vsel %vm445_vm2, 0.0, %v3451_v28  ;;  %v725_v33 = vsel %vm445_vm2, 0.0, %v3450_v29  ;;  %v736_v36 = vsel %vm456_vm3, %v3456_v24, 0.0  ;;  %v735_v37 = vsel %vm456_vm3, %v3455_v25, 0.0 }
 0x3ff   : > { %v728_v34 = vadd.f32 %v4096_v53, %v726_v32  ;;  %v727_v35 = vadd.f32 %v4093_v52, %v725_v33 }
 0x401   : > { %v738_v39 = vadd.f32 %v736_v36, %v728_v34  ;;  %v737_v40 = vadd.f32 %v735_v37, %v727_v35  ;;  %v1659_v34 = vpop.permute.xlu2 %1658 }
 0x403   : > { %v742_v41 = vrot.slane %v738_v39, 7  ;;  %v750_v42 = vrot.slane %v738_v39, 1  ;;  %v741_v43 = vrot.slane %v737_v40, 7  ;;  %v749_v44 = vrot.slane %v737_v40, 1  ;;  %v1643_v45 = vpop.permute.xlu0 %1642  ;;  %v1645_v53 = vpop.permute.xlu1 %1644 }
 0x404   : > { %v1704_v52 = vsel %vm445_vm2, %v1641_v12, %v1643_v45  ;;  %v1705_v46 = vsel %vm445_vm2, %v1643_v45, %v1645_v53  ;;  %v1706_v48 = vsel %vm445_vm2, %v1645_v53, %v1647_v14 }
 0x405   : > { %v743_v49 = vsel %vm463_vm4, %v741_v43, %v742_v41  ;;  %v746_v11 = vsel %vm463_vm4, 0.0, %v741_v43  ;;  %v751_v16 = vsel %vm472_vm5, %v749_v44, %v750_v42  ;;  %vm1805_vm9 = vcmp.ne.s32.totalorder %v4108_v56, %v1704_v52 }
 0x406   : > { %v747_v22 = vadd.f32 %v746_v11, %v737_v40  ;;  %v748_v24 = vadd.f32 %v743_v49, %v738_v39  ;;  %vm1806_vm10 = vcmp.ne.s32.totalorder %v4111_v57, %v1705_v46  ;;  %v754_v12 = vsel %vm472_vm5, %v750_v42, 0.0 }
 0x407   : > { %v4284_v25 = vsel %vm1805_vm9, 1.0, %v6421_v2  ;;  %vm1807_vm11 = vcmp.ne.s32.totalorder %v4103_v55, %v1706_v48  ;;  %v4288_v14 = vsel %vm1806_vm10, 1.0, %v6421_v2 }
 0x408   : > { %v755_v28 = vadd.f32 %v751_v16, %v747_v22  ;;  %v756_v29 = vadd.f32 %v754_v12, %v748_v24  ;;  %v4291_v32 = vsel %vm1807_vm11, 1.0, %v6421_v2  ;;  %v3457_v33 = vpack.i.bf16 %v4284_v25, %v4278_v19 }
 0x409   : > { %v3462_v35 = vpack.i.bf16 %v4291_v32, %v4288_v14  ;;  %v1665_v49 = vpop.permute.xlu2 %1664 }
 0x40a   : > { %vm757_vm12 = vcmp.gt.f32.partialorder %v755_v28, 4.5  ;;  %vm758_vm13 = vcmp.gt.f32.partialorder %v756_v29, 4.5  ;;  %3458 = vrot.lane.b32.xlu1 %v3457_v33, %s3782_s1 }
 0x40b   : > { %v3014_v36 = vsel %vm757_vm12, 1.0, %v6421_v2  ;;  %v3015_v37 = vsel %vm758_vm13, 1.0, %v6421_v2  ;;  %v1649_v39 = vpop.permute.xlu0 %1648  ;;  %v1651_v40 = vpop.permute.xlu1 %1650  ;;  %3463 = vrot.lane.b32.xlu2 %v3462_v35, %s3782_s1 }
 0x40c   : > { %v763_v41 = vsub.f32 1.0, %v3014_v36  ;;  %v764_v42 = vsub.f32 1.0, %v3015_v37  ;;  %v1729_v43 = vsel %vm445_vm2, 0, %v1649_v39  ;;  %v1707_v44 = vsel %vm445_vm2, %v1649_v39, %v1651_v40 }
 0x40d   : > { %vm1808_vm14 = vcmp.ne.s32.totalorder %v4123_v59, %v1729_v43  ;;  %vm1809_vm15 = vcmp.ne.s32.totalorder %v4126_v60, %v1707_v44  ;;  %v1708_v53 = vsel %vm445_vm2, %v1651_v40, %v1653_v38  ;;  %v1731_v39 = vsel %vm445_vm2, 0, %v1665_v49 }
 0x40e   : > { %v765_v45 = vpack.c.bf16 %v764_v42, %v763_v41  ;;  %vm1840_vm0 = vmand %vm1800_vm6, %vm1808_vm14  ;;  %v4309_v52 = vsel %vm1809_vm15, 1.0, %v6421_v2  ;;  %vm1810_vm1 = vcmp.ne.s32.totalorder %v4118_v58, %v1708_v53  ;;  %vm1816_vm13 = vcmp.ne.s32.totalorder %v4148_v0, %v1731_v39 }
 0x40f   : > { %v4312_v46 = vsel %vm1840_vm0, 1.0, %v6421_v2  ;;  %v4319_v22 = vsel %vm1810_vm1, 1.0, %v6421_v2  ;;  %vm1848_vm14 = vmand %vm1800_vm6, %vm1816_vm13 }
 0x410   : > { %966 = vmatmul.bf16.vlgmr.msra.gmra.mxu0 %v765_v45  ;;  %980 = vmatmul.bf16.vlgmr.msra.gmra.mxu1 %v765_v45  ;;  %v3467_v48 = vpack.i.bf16 %v4309_v52, %v4312_v46 }
 0x411   : > { %994 = vmatmul.bf16.vlgmr.msra.gmra.mxu2 %v765_v45  ;;  %1008 = vmatmul.bf16.vlgmr.msra.gmra.mxu3 %v765_v45 }
 0x412   : > { %3468 = vrot.lane.b32.xlu0 %v3467_v48, %s3782_s1 }
 0x413   : > { %v1655_v11 = vpop.permute.xlu0 %1654  ;;  %v1657_v16 = vpop.permute.xlu1 %1656 }
 0x414   : > { %v1709_v24 = vsel %vm445_vm2, %v1653_v38, %v1655_v11  ;;  %v1730_v12 = vsel %vm445_vm2, 0, %v1657_v16  ;;  %v1710_v28 = vsel %vm445_vm2, %v1657_v16, %v1659_v34  ;;  %v1671_v38 = vpop.permute.xlu2 %1670  ;;  %v4362_v16 = vsel %vm1848_vm14, 1.0, %v6421_v2 }
 0x415   : > { %vm1811_vm7 = vcmp.ne.s32.totalorder %v4138_v62, %v1709_v24  ;;  %vm1812_vm8 = vcmp.ne.s32.totalorder %v4141_v63, %v1730_v12  ;;  %vm1813_vm9 = vcmp.ne.s32.totalorder %v4133_v61, %v1710_v28  ;;  %6514 = vst [vmem:[#allocation23_spill] sm:$0xff] %v4362_v16 }
 0x416   : > { %v4327_v29 = vsel %vm1811_vm7, 1.0, %v6421_v2  ;;  %vm1844_vm10 = vmand %vm1800_vm6, %vm1812_vm8  ;;  %v4339_v36 = vsel %vm1813_vm9, 1.0, %v6421_v2 }
 0x417   : > { %v3472_v33 = vpack.i.bf16 %v4327_v29, %v4319_v22  ;;  %v4336_v35 = vsel %vm1844_vm10, 1.0, %v6421_v2 }
 0x418   : > { %v3477_v45 = vpack.i.bf16 %v4339_v36, %v4336_v35 }
 0x419   : > { %3473 = vrot.lane.b32.xlu1 %v3472_v33, %s3782_s1 }
 0x41a   : > { %3478 = vrot.lane.b32.xlu2 %v3477_v45, %s3782_s1 }
 0x41b   : > { %v1661_v37 = vpop.permute.xlu0 %1660  ;;  %v1663_v40 = vpop.permute.xlu1 %1662 }
 0x41c   : > { %v1711_v41 = vsel %vm445_vm2, %v1659_v34, %v1661_v37  ;;  %v1712_v42 = vsel %vm445_vm2, %v1661_v37, %v1663_v40  ;;  %v1677_v53 = vpop.permute.xlu2 %1676 }
 0x41d   : > { %vm1814_vm11 = vcmp.ne.s32.totalorder %v4153_v1, %v1711_v41  ;;  %vm1815_vm12 = vcmp.ne.s32.totalorder %v4156_v3, %v1712_v42 }
 0x41e   : > { %v4347_v43 = vsel %vm1814_vm11, 1.0, %v6421_v2  ;;  %v4351_v44 = vsel %vm1815_vm12, 1.0, %v6421_v2 }
 0x41f   : > { %v3482_v34 = vpack.i.bf16 %v4351_v44, %v4347_v43 }
 0x421   : > { %3483 = vrot.lane.b32.xlu0 %v3482_v34, %s3782_s1 }
 0x423   : > { %v1667_v48 = vpop.permute.xlu0 %1666  ;;  %v1669_v11 = vpop.permute.xlu1 %1668 }
 0x424   : > { %v1713_v24 = vsel %vm445_vm2, %v1665_v49, %v1667_v48  ;;  %v1714_v12 = vsel %vm445_vm2, %v1667_v48, %v1669_v11  ;;  %v1715_v28 = vsel %vm445_vm2, %v1669_v11, %v1671_v38  ;;  %v1683_v34 = vpop.permute.xlu2 %1682 }
 0x425   : > { %vm1817_vm15 = vcmp.ne.s32.totalorder %v4168_v5, %v1713_v24  ;;  %vm1818_vm0 = vcmp.ne.s32.totalorder %v4171_v6, %v1714_v12  ;;  %vm1819_vm1 = vcmp.ne.s32.totalorder %v4163_v4, %v1715_v28 }
 0x426   : > { %v4371_v33 = vsel %vm1817_vm15, 1.0, %v6421_v2  ;;  %v4374_v37 = vsel %vm1818_vm0, 1.0, %v6421_v2  ;;  %v4377_v39 = vsel %vm1819_vm1, 1.0, %v6421_v2 }
 0x427   : > { %6515 = vst [vmem:[#allocation24_spill] sm:$0xff] %v4371_v33  ;;  %v3487_v49 = vpack.i.bf16 %v4371_v33, %v4362_v16  ;;  %v3492_v38 = vpack.i.bf16 %v4377_v39, %v4374_v37 }
 0x429   : > { %3488 = vrot.lane.b32.xlu1 %v3487_v49, %s3782_s1  ;;  %3493 = vrot.lane.b32.xlu2 %v3492_v38, %s3782_s1 }
 0x42b   : > { %v1673_v40 = vpop.permute.xlu0 %1672  ;;  %v1675_v41 = vpop.permute.xlu1 %1674 }
 0x42c   : > { %v1732_v42 = vsel %vm445_vm2, 0, %v1673_v40  ;;  %v1716_v45 = vsel %vm445_vm2, %v1673_v40, %v1675_v41  ;;  %v1717_v48 = vsel %vm445_vm2, %v1675_v41, %v1677_v53 }
 0x42d   : > { %vm1820_vm7 = vcmp.ne.s32.totalorder %v4183_v20, %v1732_v42  ;;  %vm1821_vm8 = vcmp.ne.s32.totalorder %v4186_v21, %v1716_v45  ;;  %vm1822_vm10 = vcmp.ne.s32.totalorder %v4178_v18, %v1717_v48 }
 0x42e   : > { %vm1852_vm9 = vmand %vm1800_vm6, %vm1820_vm7  ;;  %v4393_v11 = vsel %vm1821_vm8, 1.0, %v6421_v2  ;;  %v4403_v38 = vsel %vm1822_vm10, 1.0, %v6421_v2 }
 0x42f   : > { %6516 = vst [vmem:[#allocation25_spill] sm:$0xff] %v4393_v11  ;;  %v4396_v24 = vsel %vm1852_vm9, 1.0, %v6421_v2 }
 0x430   : > { %6517 = vst [vmem:[#allocation26_spill] sm:$0xff] %v4396_v24  ;;  %v3497_v12 = vpack.i.bf16 %v4393_v11, %v4396_v24 }
 0x431   : > { %6518 = vst [vmem:[#allocation27_spill] sm:$0xff] %v4403_v38 }
 0x432   : > { %3498 = vrot.lane.b32.xlu0 %v3497_v12, %s3782_s1 }
 0x433   : > { %v1679_v28 = vpop.permute.xlu0 %1678  ;;  %v1681_v49 = vpop.permute.xlu1 %1680 }
 0x434   : > { %v1718_v40 = vsel %vm445_vm2, %v1677_v53, %v1679_v28  ;;  %v1719_v41 = vsel %vm445_vm2, %v1681_v49, %v1683_v34  ;;  %v1733_v42 = vsel %vm445_vm2, 0, %v1681_v49  ;;  %v1689_v53 = vpop.permute.xlu2 %1688 }
 0x435   : > { %vm1823_vm11 = vcmp.ne.s32.totalorder %v4196_v30, %v1718_v40  ;;  %vm1824_vm12 = vcmp.ne.s32.totalorder %v4199_v31, %v1733_v42  ;;  %vm1825_vm13 = vcmp.ne.s32.totalorder %v4193_v23, %v1719_v41  ;;  %v1734_v40 = vsel %vm445_vm2, 0, %v1689_v53 }
 0x436   : > { %v4412_v45 = vsel %vm1823_vm11, 1.0, %v6421_v2  ;;  %vm1856_vm14 = vmand %vm1800_vm6, %vm1824_vm12  ;;  %v4417_v48 = vsel %vm1825_vm13, 1.0, %v6421_v2  ;;  %vm1828_vm1 = vcmp.ne.s32.totalorder %v4228_v8, %v1734_v40 }
 0x437   : > { %6519 = vst [vmem:[#allocation28_spill] sm:$0xff] %v4412_v45  ;;  %v3502_v12 = vpack.i.bf16 %v4412_v45, %v4403_v38  ;;  %v4422_v28 = vsel %vm1856_vm14, 1.0, %v6421_v2  ;;  %vm1860_vm7 = vmand %vm1800_vm6, %vm1828_vm1 }
 0x438   : > { %6520 = vst [vmem:[#allocation29_spill] sm:$0xff] %v4417_v48  ;;  %v3507_v23 = vpack.i.bf16 %v4417_v48, %v4422_v28 }
 0x439   : > { %6521 = vst [vmem:[#allocation30_spill] sm:$0xff] %v4422_v28  ;;  %3503 = vrot.lane.b32.xlu1 %v3502_v12, %s3782_s1  ;;  %v1750_v28 = vrot.slane %v4133_v61, 7 }
 0x43a   : > { %3508 = vrot.lane.b32.xlu2 %v3507_v23, %s3782_s1 }
 0x43b   : > { %v1685_v49 = vpop.permute.xlu0 %1684  ;;  %v1687_v41 = vpop.permute.xlu1 %1686 }
 0x43c   : > { %v1720_v42 = vsel %vm445_vm2, %v1683_v34, %v1685_v49  ;;  %v1721_v13 = vsel %vm445_vm2, %v1685_v49, %v1687_v41  ;;  %v1695_v23 = vpop.permute.xlu2 %1694 }
 0x43d   : > { %vm1826_vm15 = vcmp.ne.s32.totalorder %v4208_v50, %v1720_v42  ;;  %vm1827_vm0 = vcmp.ne.s32.totalorder %v4211_v51, %v1721_v13  ;;  %v4446_v13 = vsel %vm1860_vm7, 1.0, %v6421_v2 }
 0x43e   : > { %v4434_v11 = vsel %vm1826_vm15, 1.0, %v6421_v2  ;;  %v4438_v12 = vsel %vm1827_vm0, 1.0, %v6421_v2  ;;  %6524 = vst [vmem:[#allocation33_spill] sm:$0xff] %v4446_v13 }
 0x43f   : > { %6522 = vst [vmem:[#allocation31_spill] sm:$0xff] %v4434_v11  ;;  %v3512_v48 = vpack.i.bf16 %v4438_v12, %v4434_v11 }
 0x440   : > { %6523 = vst [vmem:[#allocation32_spill] sm:$0xff] %v4438_v12 }
 0x441   : > { %3513 = vrot.lane.b32.xlu0 %v3512_v48, %s3782_s1 }
 0x443   : > { %v1691_v34 = vpop.permute.xlu0 %1690  ;;  %v1693_v49 = vpop.permute.xlu1 %1692 }
 0x444   : > { %v1722_v41 = vsel %vm445_vm2, %v1689_v53, %v1691_v34  ;;  %v1723_v8 = vsel %vm445_vm2, %v1691_v34, %v1693_v49  ;;  %v1724_v40 = vsel %vm445_vm2, %v1693_v49, %v1695_v23 }
 0x445   : > { %vm1829_vm8 = vcmp.ne.s32.totalorder %v4218_v54, %v1722_v41  ;;  %vm1830_vm9 = vcmp.ne.s32.totalorder %v4221_v7, %v1723_v8  ;;  %vm1831_vm10 = vcmp.ne.s32.totalorder %v4243_v26, %v1724_v40  ;;  %v1701_v26 = vpop.permute.xlu2 %1700 }
 0x446   : > { %v4455_v42 = vsel %vm1829_vm8, 1.0, %v6421_v2  ;;  %v4458_v48 = vsel %vm1830_vm9, 1.0, %v6421_v2  ;;  %v4461_v11 = vsel %vm1831_vm10, 1.0, %v6421_v2 }
 0x447   : > { %6525 = vst [vmem:[#allocation34_spill] sm:$0xff] %v4455_v42  ;;  %v3517_v53 = vpack.i.bf16 %v4455_v42, %v4446_v13  ;;  %v3522_v23 = vpack.i.bf16 %v4461_v11, %v4458_v48 }
 0x448   : > { %6526 = vst [vmem:[#allocation35_spill] sm:$0xff] %v4458_v48  ;;  %v6429_v48 = vrot.slane %v4141_v63, 7 }
 0x449   : > { %6527 = vst [vmem:[#allocation36_spill] sm:$0xff] %v4461_v11  ;;  %3518 = vrot.lane.b32.xlu1 %v3517_v53, %s3782_s1  ;;  %3523 = vrot.lane.b32.xlu2 %v3522_v23, %s3782_s1 }
 0x44b   : > { %v1697_v34 = vpop.permute.xlu0 %1696  ;;  %v1699_v49 = vpop.permute.xlu1 %1698 }
 0x44c   : > { %v1735_v41 = vsel %vm445_vm2, 0, %v1697_v34  ;;  %v1725_v8 = vsel %vm445_vm2, %v1697_v34, %v1699_v49  ;;  %v1726_v40 = vsel %vm445_vm2, %v1699_v49, %v1701_v26 }
 0x44d   : > { %vm1832_vm11 = vcmp.ne.s32.totalorder %v4233_v9, %v1735_v41  ;;  %vm1833_vm12 = vcmp.ne.s32.totalorder %v4236_v10, %v1725_v8  ;;  %vm1834_vm14 = vcmp.ne.s32.totalorder %v4253_v17, %v1726_v40  ;;  %v1738_v41 = vrot.slane %v4111_v57, 7 }
 0x44e   : > { %vm1864_vm13 = vmand %vm1800_vm6, %vm1832_vm11  ;;  %v4477_v53 = vsel %vm1833_vm12, 1.0, %v6421_v2  ;;  %v4487_v10 = vsel %vm1834_vm14, 1.0, %v6421_v2  ;;  %v1736_v8 = vrot.slane %v4086_v47, 7  ;;  %v6532_v40 = vlaneseq }
 0x44f   : > { %6528 = vst [vmem:[#allocation37_spill] sm:$0xff] %v4477_v53  ;;  %v4480_v23 = vsel %vm1864_vm13, 1.0, %v6421_v2 }
 0x450   : > { %6529 = vst [vmem:[#allocation38_spill] sm:$0xff] %v4480_v23  ;;  %v3527_v13 = vpack.i.bf16 %v4477_v53, %v4480_v23  ;;  %v1632_v53 = vshrl.u32 %v6532_v40, 7  ;;  %v6430_v40 = vrot.slane %v4126_v60, 7 }
 0x451   : > { %6530 = vst [vmem:[#allocation39_spill] sm:$0xff] %v4487_v10 }
 0x452   : > { %3528 = vrot.lane.b32.xlu0 %v3527_v13, %s3782_s1  ;;  %v1739_v13 = vrot.slane %v4103_v55, 7 }
 0x453   : > { %v1703_v9 = vpop.permute.xlu0 %1702 }
 0x454   : > { %v1727_v15 = vsel %vm445_vm2, %v1701_v26, %v1703_v9  ;;  %v1737_v26 = vrot.slane %v4108_v56, 7  ;;  %v1744_v9 = vrot.slane %v4118_v58, 7  ;;  %vm1900_vm2 = vcmp.gt.s32.totalorder %v1632_v53, 0 }
 0x455   : > { %vm1835_vm6 = vcmp.ne.s32.totalorder %v4246_v27, %v1727_v15  ;;  %v1798_v27 = vsel %vm463_vm4, 0, %v1738_v41  ;;  %v1740_v15 = vrot.slane %v4123_v59, 7 }
 0x456   : > { %v4492_v34 = vsel %vm1835_vm6, 1.0, %v6421_v2  ;;  %v1799_v2 = vsel %vm463_vm4, 0, %v1739_v13  ;;  %vm1910_vm15 = vcmp.ne.s32.totalorder %v4111_v57, %v1798_v27  ;;  %v1745_v23 = vsel %vm463_vm4, %v1738_v41, %v1744_v9 }
 0x457   : > { %6531 = vst [vmem:[#allocation40_spill] sm:$0xff] %v4492_v34  ;;  %v3532_v49 = vpack.i.bf16 %v4492_v34, %v4487_v10  ;;  %v1796_v10 = vsel %vm463_vm4, 0, %v1736_v8  ;;  %v1797_v34 = vsel %vm463_vm4, 0, %v1737_v26  ;;  %vm1911_vm0 = vcmp.ne.s32.totalorder %v4103_v55, %v1799_v2  ;;  %vm1942_vm8 = vmand %vm1900_vm2, %vm1910_vm15 }
 0x458   : > { %v1741_v42 = vsel %vm463_vm4, %v1736_v8, %v1740_v15  ;;  %vm1908_vm1 = vcmp.ne.s32.totalorder %v4086_v47, %v1796_v10  ;;  %vm1909_vm7 = vcmp.ne.s32.totalorder %v4108_v56, %v1797_v34  ;;  %vm1943_vm9 = vmand %vm1900_vm2, %vm1911_vm0  ;;  %vm1914_vm10 = vcmp.ne.s32.totalorder %v4118_v58, %v1745_v23 }
 0x459   : > { %3533 = vrot.lane.b32.xlu1 %v3532_v49, %s3782_s1  ;;  %v1746_v49 = vrot.slane %v4138_v62, 7  ;;  %v1743_v2 = vsel %vm463_vm4, %v1737_v26, %v6430_v40  ;;  %vm1912_vm11 = vcmp.ne.s32.totalorder %v4123_v59, %v1741_v42  ;;  %vm1940_vm12 = vmand %vm1900_vm2, %vm1908_vm1  ;;  %v6432_v47 = vrot.slane %v4156_v3, 7 }
 0x45a   : > { %vm1941_vm13 = vmand %vm1900_vm2, %vm1909_vm7  ;;  %v6533_v55 = vmov 0.0   ;;  %vm1913_vm6 = vcmp.ne.s32.totalorder %v4126_v60, %v1743_v2  ;;  %v1752_v42 = vrot.slane %v4153_v1, 7 }
 0x45b   : > { %v1747_v12 = vsel %vm463_vm4, %v1739_v13, %v1746_v49  ;;  %v1974_v56 = vsel %vm1942_vm8, 1.0, %v6533_v55  ;;  %v1975_v57 = vsel %vm1943_vm9, 1.0, %v6533_v55  ;;  %v4532_v58 = vsel %vm1914_vm10, 1.0, %v6533_v55 }
 0x45c   : > { %vm1915_vm14 = vcmp.ne.s32.totalorder %v4138_v62, %v1747_v12  ;;  %v4536_v23 = vsel %vm1940_vm12, 1.0, %v6533_v55  ;;  %v4539_v59 = vsel %vm1912_vm11, 1.0, %v6533_v55  ;;  %v1749_v62 = vsel %vm463_vm4, %v1740_v15, %v6429_v48 }
 0x45d   : > { %v4545_v12 = vsel %vm1941_vm13, 1.0, %v6533_v55  ;;  %v4549_v53 = vsel %vm1915_vm14, 1.0, %v6533_v55  ;;  %v2202_v34 = vrot.slane %v1974_v56, 1  ;;  %v2205_v41 = vrot.slane %v1975_v57, 1 }
 0x45e   : > { %v1755_v13 = vsel %vm463_vm4, %v1746_v49, %v6432_v47  ;;  %v4557_v26 = vsel %vm1913_vm6, 1.0, %v6533_v55  ;;  %v2196_v27 = vrot.slane %v4536_v23, 1  ;;  %vm1916_vm2 = vcmp.ne.s32.totalorder %v4141_v63, %v1749_v62 }
 0x45f   : > { %v1758_v48 = vrot.slane %v4168_v5, 7  ;;  %v2206_v40 = vrot.slane %v4549_v53, 1  ;;  %vm1919_vm15 = vcmp.ne.s32.totalorder %v4156_v3, %v1755_v13  ;;  %v1753_v49 = vsel %vm463_vm4, %v1744_v9, %v1752_v42 }
 0x460   : > { %v6534_v47 = vrot.slane %v4171_v6, 7  ;;  %v6535_v15 = vrot.slane %v4532_v58, 1  ;;  %v2200_v17 = vrot.slane %v4557_v26, 1  ;;  %vm1918_vm0 = vcmp.ne.s32.totalorder %v4153_v1, %v1753_v49 }
 0x461   : > { %v2207_v45 = vsel %vm472_vm5, %v2205_v41, %v2206_v40  ;;  %v4587_v41 = vsel %vm1916_vm2, 1.0, %v6533_v55  ;;  %v4596_v1 = vsel %vm1919_vm15, 1.0, %v6533_v55  ;;  %v6443_v62 = vrot.slane %v4186_v21, 7 }
 0x462   : > { %v1761_v8 = vsel %vm463_vm4, %v1752_v42, %v6534_v47  ;;  %v2204_v38 = vsel %vm472_vm5, %v2202_v34, %v6535_v15  ;;  %v2327_v9 = vmax.f32 %v1975_v57, %v2207_v45  ;;  %v2199_v42 = vrot.slane %v4545_v12, 1 }
 0x463   : > { %v2326_v16 = vmax.f32 %v1974_v56, %v2204_v38  ;;  %v1764_v34 = vrot.slane %v4183_v20, 7  ;;  %v1759_v38 = vsel %vm463_vm4, %v1750_v28, %v1758_v48  ;;  %vm1922_vm1 = vcmp.ne.s32.totalorder %v4171_v6, %v1761_v8 }
 0x464   : > { %v1756_v56 = vrot.slane %v4148_v0, 7  ;;  %v4601_v57 = vsel %vm1918_vm0, 1.0, %v6533_v55  ;;  %vm1921_vm7 = vcmp.ne.s32.totalorder %v4168_v5, %v1759_v38  ;;  %v2208_v8 = vrot.slane %v4587_v41, 1 }
 0x465   : > { %v3464_v2 = vpop.permute.xlu2 %3463  ;;  %v6445_v15 = vrot.slane %v4596_v1, 1  ;;  %v4613_v49 = vsel %vm1922_vm1, 1.0, %v6533_v55  ;;  %v6538_v5 = vrot.slane %v4141_v63, 7  ;;  %v6442_v63 = vrot.slane %v4199_v31, 7 }
 0x466   : > { %v3466_v10 = vunpack.i.h.bf16 %v3464_v2  ;;  %v3465_v11 = vunpack.i.l.bf16 %v3464_v2  ;;  %v1765_v13 = vsel %vm463_vm4, %v1756_v56, %v1764_v34  ;;  %v1762_v38 = vrot.slane %v4163_v4, 7 }
 0x467   : > { %vm1924_vm9 = vcmp.ne.s32.totalorder %v4183_v20, %v1765_v13  ;;  %vm1046_vm0 = vcmask 130048  }
 0x468   : > { %v2156_v2 = vsel %vm456_vm3, %v3466_v10, 0.0  ;;  %v2102_v24 = vsel %vm456_vm3, %v3465_v11, %v3466_v10  ;;  %v4645_v20 = vsel %vm1924_vm9, 1.0, %v6533_v55 }
 0x469   : > { %v2295_v33 = vmax.f32 %v4291_v32, %v2156_v2  ;;  %v2294_v47 = vmax.f32 %v4288_v14, %v2102_v24  ;;  %v6536_v14 = vrot.slane %v4539_v59, 1  ;;  %v4628_v2 = vsel %vm1921_vm7, 1.0, %v6533_v55 }
 0x46b   : > { %v2359_v45 = vmax.f32 %v2295_v33, %v2327_v9  ;;  %v2358_v32 = vmax.f32 %v2294_v47, %v2326_v16  ;;  %v2198_v24 = vsel %vm472_vm5, %v2196_v27, %v6536_v14  ;;  %v6537_v33 = vrot.slane %v4126_v60, 7 }
 0x46c   : > { %v2324_v27 = vmax.f32 %v4536_v23, %v2198_v24  ;;  %v2212_v60 = vrot.slane %v4601_v57, 1  ;;  %v2201_v23 = vsel %vm472_vm5, %v2199_v42, %v2200_v17  ;;  %v1767_v9 = vsel %vm463_vm4, %v1758_v48, %v6443_v62 }
 0x46d   : > { %v1751_v16 = vsel %vm463_vm4, %v6537_v33, %v1750_v28  ;;  %v2389_v10 = vpack.c.bf16 %v2359_v45, %v2358_v32  ;;  %v1757_v28 = vsel %vm463_vm4, %v6538_v5, %v1756_v56  ;;  %v1770_v47 = vrot.slane %v4196_v30, 7 }
 0x46e   : > { %vm1917_vm8 = vcmp.ne.s32.totalorder %v4133_v61, %v1751_v16  ;;  %vm1920_vm10 = vcmp.ne.s32.totalorder %v4148_v0, %v1757_v28  ;;  %v1768_v14 = vrot.slane %v4178_v18, 7  ;;  %v2325_v48 = vmax.f32 %v4545_v12, %v2201_v23 }
 0x46f   : > { %3225 = vst [vmem:[%s4616_s5 + $0x208] sm:$0xff] %v2389_v10  ;;  %v4638_v42 = vsel %vm1917_vm8, 1.0, %v6533_v55  ;;  %v6444_v24 = vrot.slane %v4628_v2, 1  ;;  %v2220_v16 = vrot.slane %v4613_v49, 1  ;;  %vm1925_vm11 = vcmp.ne.s32.totalorder %v4186_v21, %v1767_v9 }
 0x470   : > { %v2210_v13 = vrot.slane %v4638_v42, 1  ;;  %v4655_v12 = vsel %vm1920_vm10, 1.0, %v6533_v55  ;;  %v1773_v5 = vsel %vm463_vm4, %v1764_v34, %v6442_v63  ;;  %v6440_v23 = vrot.slane %v4645_v20, 1 }
 0x471   : > { %v6540_v9 = vrot.slane %v4171_v6, 7  ;;  %v4680_v34 = vsel %vm1925_vm11, 1.0, %v6533_v55  ;;  %v1771_v6 = vsel %vm463_vm4, %v1762_v38, %v1770_v47  ;;  %vm1928_vm12 = vcmp.ne.s32.totalorder %v4199_v31, %v1773_v5 }
 0x472   : > { %vm1927_vm6 = vcmp.ne.s32.totalorder %v4196_v30, %v1771_v6  ;;  %v2211_v6 = vsel %vm472_vm5, %v2200_v17, %v2210_v13 }
 0x47c   : > { %v3459_v61 = vpop.permute.xlu1 %3458 }
 0x47d   : > { %v3461_v45 = vunpack.i.h.bf16 %v3459_v61  ;;  %v3460_v32 = vunpack.i.l.bf16 %v3459_v61 }
 0x47f   : > { %v2101_v56 = vsel %vm456_vm3, %v3461_v45, %v3465_v11  ;;  %v2100_v33 = vsel %vm456_vm3, %v3460_v32, %v3461_v45  ;;  %v6539_v11 = vrot.slane %v4156_v3, 7  ;;  %v6541_v45 = vrot.slane %v4532_v58, 1 }
 0x480   : > { %v2293_v10 = vmax.f32 %v4284_v25, %v2101_v56  ;;  %v2292_v0 = vmax.f32 %v4278_v19, %v2100_v33  ;;  %v1769_v25 = vsel %vm463_vm4, %v6540_v9, %v1768_v14  ;;  %v4677_v3 = vsel %vm472_vm5, %v2210_v13, %v6444_v24 }
 0x481   : > { %v1763_v28 = vsel %vm463_vm4, %v6539_v11, %v1762_v38  ;;  %v4672_v32 = vsel %vm472_vm5, %v6541_v45, %v2212_v60  ;;  %v6441_v33 = vrot.slane %v4211_v51, 7  ;;  %vm1926_vm14 = vcmp.ne.s32.totalorder %v4178_v18, %v1769_v25 }
 0x482   : > { %v2357_v19 = vmax.f32 %v2293_v10, %v2325_v48  ;;  %v2356_v61 = vmax.f32 %v2292_v0, %v2324_v27  ;;  %v2216_v27 = vrot.slane %v4655_v12, 1  ;;  %vm1923_vm13 = vcmp.ne.s32.totalorder %v4163_v4, %v1763_v28  ;;  %v4698_v4 = vpop.permute.xlu2 %3478 }
 0x483   : > { %v2330_v11 = vmax.f32 %v4532_v58, %v4672_v32  ;;  %v1776_v9 = vrot.slane %v4208_v50, 7  ;;  %v4704_v25 = vsel %vm1923_vm13, 1.0, %v6533_v55  ;;  %v6446_v58 = vrot.slane %v4221_v7, 7 }
 0x484   : > { %v2388_v48 = vpack.c.bf16 %v2357_v19, %v2356_v61  ;;  %v3469_v56 = vpop.permute.xlu0 %3468  ;;  %v4693_v38 = vsel %vm472_vm5, %v2216_v27, %v6440_v23  ;;  %v4710_v19 = vsel %vm1928_vm12, 1.0, %v6533_v55  ;;  %v4713_v30 = vsel %vm1926_vm14, 1.0, %v6533_v55 }
 0x485   : > { %v3471_v10 = vunpack.i.h.bf16 %v3469_v56  ;;  %v3470_v0 = vunpack.i.l.bf16 %v3469_v56  ;;  %v6542_v61 = vrot.slane %v4539_v59, 1  ;;  %v4729_v5 = vsel %vm463_vm4, %v1770_v47, %v6441_v33 }
 0x486   : > { %3224 = vst [vmem:[%s4616_s5 + $0x200] sm:$0xff] %v2388_v48  ;;  %v4724_v48 = vsel %vm1927_vm6, 1.0, %v6533_v55  ;;  %v1782_v56 = vrot.slane %v4218_v54, 7  ;;  %v2222_v23 = vrot.slane %v4704_v25, 1  ;;  %v4748_v33 = vsel %vm463_vm4, %v1776_v9, %v6446_v58 }
 0x487   : > { %v2209_v45 = vsel %vm472_vm5, %v6542_v61, %v2208_v8  ;;  %v2103_v32 = vsel %vm456_vm3, %v3470_v0, %v3471_v10  ;;  %v4734_v61 = vsel %vm463_vm4, %v1768_v14, %v1776_v9  ;;  %v2215_v0 = vsel %vm472_vm5, %v2206_v40, %v6445_v15  ;;  %v4755_v15 = vld [vmem:[%s3994_s14 + $0xa8] sm:$0xff] }
 0x488   : > { %v2328_v14 = vmax.f32 %v4539_v59, %v2209_v45  ;;  %v2296_v62 = vmax.f32 %v4312_v46, %v2103_v32  ;;  %v3481_v40 = vunpack.i.h.bf16 %v4698_v4  ;;  %v3480_v18 = vunpack.i.l.bf16 %v4698_v4 }
 0x489   : > { %v1774_v17 = vrot.slane %v4755_v15, 7  ;;  %v2331_v9 = vmax.f32 %v4549_v53, %v2215_v0  ;;  %v2329_v58 = vmax.f32 %v4557_v26, %v2211_v6  ;;  %v2217_v46 = vsel %vm472_vm5, %v2208_v8, %v2216_v27 }
 0x48a   : > { %vm1930_vm2 = vcmp.ne.s32.totalorder %v4208_v50, %v4734_v61  ;;  %v2221_v53 = vsel %vm472_vm5, %v2212_v60, %v2220_v16  ;;  %v2360_v27 = vmax.f32 %v2296_v62, %v2328_v14  ;;  %v6543_v60 = vrot.slane %v4596_v1, 1  ;;  %v4788_v32 = vpop.permute.xlu2 %3493 }
 0x48b   : > { %v3474_v63 = vpop.permute.xlu1 %3473  ;;  %v2230_v6 = vrot.slane %v4724_v48, 1  ;;  %v2334_v0 = vmax.f32 %v4601_v57, %v2221_v53  ;;  %v6544_v14 = vrot.slane %v4713_v30, 1  ;;  %v6547_v50 = vrot.slane %v4628_v2, 1 }
 0x48c   : > { %v3476_v24 = vunpack.i.h.bf16 %v3474_v63  ;;  %v3475_v28 = vunpack.i.l.bf16 %v3474_v63 }
 0x48d   : > { %v967_v13 = vpop.f32.mrf.mxu0  ;;  %v981_v47 = vpop.f32.mrf.mxu1  ;;  %v2231_v57 = vsel %vm472_vm5, %v2222_v23, %v2230_v6 }
 0x48e   : > { %v2157_v59 = vsel %vm456_vm3, %v3476_v24, 0.0  ;;  %v2105_v63 = vsel %vm456_vm3, %v3475_v28, %v3476_v24  ;;  %v2104_v4 = vsel %vm456_vm3, %v3471_v10, %v3475_v28  ;;  %v4781_v24 = vsel %vm463_vm4, %v1774_v17, %v1782_v56 }
 0x48f   : > { %v2299_v26 = vmax.f32 %v4327_v29, %v2157_v59  ;;  %v2298_v45 = vmax.f32 %v4319_v22, %v2105_v63  ;;  %v2297_v8 = vmax.f32 %v4309_v52, %v2104_v4  ;;  %v2332_v10 = vmax.f32 %v4587_v41, %v2217_v46 }
 0x490   : > { %v2106_v28 = vsel %vm456_vm3, %v3480_v18, %v3481_v40  ;;  %v2223_v29 = vsel %vm472_vm5, %v6543_v60, %v2222_v23  ;;  %v2229_v41 = vsel %vm472_vm5, %v2220_v16, %v6544_v14  ;;  %v3496_v18 = vunpack.i.h.bf16 %v4788_v32 }
 0x491   : > { %v2363_v22 = vmax.f32 %v2299_v26, %v2331_v9  ;;  %v2362_v52 = vmax.f32 %v2298_v45, %v2330_v11  ;;  %v2361_v62 = vmax.f32 %v2297_v8, %v2329_v58  ;;  %v3495_v46 = vunpack.i.l.bf16 %v4788_v32  ;;  %v4810_v8 = vld [vmem:[%s3994_s14 + $0xb8] sm:$0xff] }
 0x492   : > { %v2300_v11 = vmax.f32 %v4336_v35, %v2106_v28  ;;  %v2339_v26 = vmax.f32 %v4704_v25, %v2231_v57  ;;  %v2159_v45 = vsel %vm456_vm3, %v3496_v18, 0.0  ;;  %vm1931_vm15 = vcmp.ne.s32.totalorder %v4810_v8, %v4729_v5 }
 0x493   : > { %v2391_v59 = vpack.c.bf16 %v2363_v22, %v2362_v52  ;;  %v2390_v9 = vpack.c.bf16 %v2361_v62, %v2360_v27  ;;  %v3484_v58 = vpop.permute.xlu0 %3483  ;;  %v2335_v23 = vmax.f32 %v4596_v1, %v2223_v29  ;;  %v2338_v28 = vmax.f32 %v4613_v49, %v2229_v41  ;;  %v4827_v1 = vld [vmem:[%s6403_s4] sm:$0xff] }
 0x494   : > { %v4803_v63 = vpop.f32.mrf.mxu2  ;;  %v4805_v4 = vpop.f32.mrf.mxu3  ;;  %v3486_v16 = vunpack.i.h.bf16 %v3484_v58  ;;  %v3485_v53 = vunpack.i.l.bf16 %v3484_v58  ;;  %v2307_v60 = vmax.f32 %v4377_v39, %v2159_v45  ;;  %v2111_v25 = vsel %vm456_vm3, %v3495_v46, %v3496_v18 }
 0x495   : > { %v969_v35 = vpop.f32.mrf.mxu0  ;;  %v983_v27 = vpop.f32.mrf.mxu1  ;;  %3227 = vst [vmem:[%s4616_s5 + $0x218] sm:$0xff] %v2391_v59  ;;  %v2364_v49 = vmax.f32 %v2300_v11, %v2332_v10  ;;  %v2306_v41 = vmax.f32 %v4374_v37, %v2111_v25  ;;  %v4838_v10 = vsel %vm1930_vm2, 1.0, %v6533_v55  ;;  %v6545_v18 = vmax.f32 %v4638_v42, %v4677_v3  ;;  %v3541_v3 = vld [vmem:[%s3994_s14 + $0xc8] sm:$0xff] }
 0x496   : > { %v1022_v22 = vpack.c.bf16 %v969_v35, %v967_v13  ;;  %v1023_v52 = vpack.c.bf16 %v983_v27, %v981_v47  ;;  %3226 = vst [vmem:[%s4616_s5 + $0x210] sm:$0xff] %v2390_v9  ;;  %v2158_v62 = vsel %vm456_vm3, %v3486_v16, 0.0  ;;  %v2107_v14 = vsel %vm456_vm3, %v3481_v40, %v3485_v53  ;;  %v4846_v9 = vld [vmem:[%s3994_s14 + $0xc0] sm:$0xff] }
 0x497   : > { %v2303_v39 = vmax.f32 %v4351_v44, %v2158_v62  ;;  %v2108_v29 = vsel %vm456_vm3, %v3485_v53, %v3486_v16  ;;  %v2301_v13 = vmax.f32 %v4339_v36, %v2107_v14  ;;  %v2371_v40 = vmax.f32 %v2307_v60, %v2339_v26  ;;  %v3539_v44 = vld [vmem:[%s3994_s14 + $0xd0] sm:$0xff]  ;;  %v4862_v16 = vld [vmem:[%s3994_s14 + $0xe8] sm:$0xff] }
 0x498   : > { %1066 = vmatpush.bf16.msrb.mxu0 %v1022_v22  ;;  %1095 = vmatpush.bf16.msrb.mxu1 %v1023_v52  ;;  %v2302_v47 = vmax.f32 %v4347_v43, %v2108_v29  ;;  %vm1934_vm1 = vcmp.ne.s32.totalorder %v3539_v44, %v4748_v33  ;;  %v1780_v43 = vrot.slane %v4846_v9, 7  ;;  %v2370_v37 = vmax.f32 %v2306_v41, %v2338_v28  ;;  %v3543_v28 = vld [vmem:[%s3994_s14 + $0xd8] sm:$0xff]  ;;  %v6551_v29 = vld [vmem:[#allocation24_spill] sm:$0xff] }
 0x499   : > { %v2367_v36 = vmax.f32 %v2303_v39, %v2335_v23  ;;  %v2365_v59 = vmax.f32 %v2301_v13, %v6545_v18  ;;  %v6546_v58 = vrot.slane %v4680_v34, 1  ;;  %v6548_v57 = vrot.slane %v4186_v21, 7  ;;  %v6550_v39 = vld [vmem:[#allocation22_spill] sm:$0xff] }
 0x49a   : > { %v2366_v11 = vmax.f32 %v2302_v47, %v2334_v0  ;;  %vm1933_vm7 = vcmp.ne.s32.totalorder %v3541_v3, %v4781_v24  ;;  %v1790_v0 = vrot.slane %v4862_v16, 7  ;;  %v2395_v35 = vpack.c.bf16 %v2371_v40, %v2370_v37 }
 0x49b   : > { %v2227_v61 = vsel %vm472_vm5, %v6547_v50, %v6546_v58  ;;  %v1775_v42 = vsel %vm463_vm4, %v6548_v57, %v1774_v17  ;;  %3160 = vmatmul.msk.bf16.vlgmr.msrb.gmra.mxu0 %vm1046_vm0, %v4827_v1  ;;  %3164 = vmatmul.msk.bf16.vlgmr.msrb.gmra.mxu1 %vm1046_vm0, %v4827_v1  ;;  %v2392_v53 = vpack.c.bf16 %v2365_v59, %v2364_v49  ;;  %v3489_v21 = vpop.permute.xlu1 %3488  ;;  %v1786_v60 = vrot.slane %v3543_v28, 7 }
 0x49c   : > { %v997_v26 = vpop.f32.mrf.mxu2  ;;  %v1011_v45 = vpop.f32.mrf.mxu3  ;;  %v2393_v17 = vpack.c.bf16 %v2367_v36, %v2366_v11  ;;  %v3491_v27 = vunpack.i.h.bf16 %v3489_v21  ;;  %v3490_v23 = vunpack.i.l.bf16 %v3489_v21  ;;  %v2337_v52 = vmax.f32 %v4628_v2, %v2227_v61  ;;  %3231 = vst [vmem:[%s4616_s5 + $0x238] sm:$0xff] %v2395_v35  ;;  %v4917_v11 = vld [vmem:[%s3994_s14 + $0xe0] sm:$0xff]  ;;  %v3296_v35 = vld [vmem:[%s6403_s4 + $0x8] sm:$0xff] }
 0x49d   : > { %v1024_v25 = vpack.c.bf16 %v997_v26, %v4803_v63  ;;  %v1025_v22 = vpack.c.bf16 %v1011_v45, %v4805_v4  ;;  %3228 = vst [vmem:[%s4616_s5 + $0x220] sm:$0xff] %v2392_v53  ;;  %vm1929_vm8 = vcmp.ne.s32.totalorder %v4755_v15, %v1775_v42  ;;  %v6549_v62 = vrot.slane %v4199_v31, 7  ;;  %v6552_v31 = vld [vmem:[#allocation23_spill] sm:$0xff]  ;;  %v3546_v53 = vld [vmem:[%s3994_s14 + $0xf0] sm:$0xff]  ;;  %v4953_v21 = vpop.permute.xlu2 %3508 }
 0x49e   : > { %3229 = vst [vmem:[%s4616_s5 + $0x228] sm:$0xff] %v2393_v17  ;;  %v2110_v49 = vsel %vm456_vm3, %v3491_v27, %v3495_v46  ;;  %v2109_v63 = vsel %vm456_vm3, %v3490_v23, %v3491_v27  ;;  %v2236_v4 = vrot.slane %v4838_v10, 1  ;;  %v1792_v2 = vrot.slane %v6550_v39, 7 }
 0x49f   : > { %v1781_v14 = vsel %vm463_vm4, %v6549_v62, %v1780_v43  ;;  %1124 = vmatpush.bf16.msrb.mxu2 %v1024_v25  ;;  %1153 = vmatpush.bf16.msrb.mxu3 %v1025_v22  ;;  %v2305_v13 = vmax.f32 %v6551_v29, %v2110_v49  ;;  %v2304_v47 = vmax.f32 %v6552_v31, %v2109_v63  ;;  %v2232_v40 = vrot.slane %v4710_v19, 1 }
 0x4a0   : > { %v4895_v32 = vsel %vm1931_vm15, 1.0, %v6533_v55  ;;  %v4900_v46 = vsel %vm1933_vm7, 1.0, %v6533_v55  ;;  %v1791_v41 = vsel %vm463_vm4, %v1782_v56, %v1790_v0  ;;  %v6553_v36 = vrot.slane %v4211_v51, 7 }
 0x4a1   : > { %v2369_v59 = vmax.f32 %v2305_v13, %v2337_v52  ;;  %v6554_v5 = vmax.f32 %v4655_v12, %v4693_v38  ;;  %v4914_v24 = vsel %vm1934_vm1, 1.0, %v6533_v55  ;;  %v1788_v54 = vrot.slane %v4917_v11, 7 }
 0x4a2   : > { %v1787_v18 = vsel %vm463_vm4, %v6553_v36, %v1786_v60  ;;  %v4923_v51 = vsel %vm1929_vm8, 1.0, %v6533_v55  ;;  %vm1932_vm9 = vcmp.ne.s32.totalorder %v4846_v9, %v1781_v14  ;;  %3168 = vmatmul.msk.bf16.vlgmr.msrb.gmra.mxu2 %vm1046_vm0, %v4827_v1  ;;  %3172 = vmatmul.msk.bf16.vlgmr.msrb.gmra.mxu3 %vm1046_vm0, %v4827_v1  ;;  %v6555_v12 = vrot.slane %v4713_v30, 1  ;;  %v3545_v1 = vld [vmem:[%s3994_s14 + $0xf8] sm:$0xff] }
 0x4a3   : > { %v2368_v8 = vmax.f32 %v2304_v47, %v6554_v5  ;;  %v2242_v15 = vrot.slane %v4900_v46, 1  ;;  %v6556_v38 = vrot.slane %v4221_v7, 7  ;;  %v2238_v37 = vrot.slane %v4895_v32, 1 }
 0x4a4   : > { %v4935_v33 = vsel %vm472_vm5, %v6555_v12, %v2236_v4  ;;  %vm1937_vm10 = vcmp.ne.s32.totalorder %v4862_v16, %v1791_v41  ;;  %v1794_v58 = vrot.slane %v3545_v1, 7  ;;  %vm1935_vm11 = vcmp.ne.s32.totalorder %v3543_v28, %v1787_v18  ;;  %v3499_v50 = vpop.permute.xlu0 %3498 }
 0x4a5   : > { %v1793_v56 = vsel %vm463_vm4, %v6556_v38, %v1792_v2  ;;  %v2394_v44 = vpack.c.bf16 %v2369_v59, %v2368_v8  ;;  %v2234_v61 = vrot.slane %v4923_v51, 1  ;;  %v4946_v57 = vsel %vm1932_vm9, 1.0, %v6533_v55  ;;  %v6559_v2 = vld [vmem:[#allocation26_spill] sm:$0xff] }
 0x4a6   : > { %v3501_v42 = vunpack.i.h.bf16 %v3499_v50  ;;  %v3500_v7 = vunpack.i.l.bf16 %v3499_v50  ;;  %v2342_v3 = vmax.f32 %v4713_v30, %v4935_v33  ;;  %v2244_v0 = vrot.slane %v4914_v24, 1  ;;  %v6561_v33 = vld [vmem:[#allocation27_spill] sm:$0xff]  ;;  %v6563_v50 = vld [vmem:[#allocation30_spill] sm:$0xff] }
 0x4a7   : > { %3230 = vst [vmem:[%s4616_s5 + $0x230] sm:$0xff] %v2394_v44  ;;  %vm1938_vm12 = vcmp.ne.s32.totalorder %v3546_v53, %v1793_v56  ;;  %v4958_v26 = vsel %vm472_vm5, %v2234_v61, %v2242_v15  ;;  %v4963_v45 = vsel %vm1937_vm10, 1.0, %v6533_v55  ;;  %v4968_v30 = vsel %vm463_vm4, %v1780_v43, %v1788_v54  ;;  %v6560_v54 = vld [vmem:[#allocation28_spill] sm:$0xff]  ;;  %v6562_v56 = vld [vmem:[#allocation25_spill] sm:$0xff] }
 0x4a8   : > { %v4971_v17 = vsel %vm1935_vm11, 1.0, %v6533_v55  ;;  %v2240_v27 = vrot.slane %v4946_v57, 1  ;;  %v1795_v23 = vsel %vm463_vm4, %v1786_v60, %v1794_v58  ;;  %v6557_v16 = vrot.slane %v4645_v20, 1 }
 0x4a9   : > { %v2112_v43 = vsel %vm456_vm3, %v3500_v7, %v3501_v42  ;;  %v4985_v28 = vsel %vm1938_vm12, 1.0, %v6533_v55  ;;  %v2239_v25 = vsel %vm472_vm5, %v2230_v6, %v2238_v37  ;;  %v3511_v22 = vunpack.i.h.bf16 %v4953_v21 }
 0x4aa   : > { %v2233_v9 = vsel %vm472_vm5, %v6557_v16, %v2232_v40  ;;  %v3510_v52 = vunpack.i.l.bf16 %v4953_v21  ;;  %v2345_v60 = vmax.f32 %v4923_v51, %v4958_v26  ;;  %vm1936_vm4 = vcmp.ne.s32.totalorder %v4917_v11, %v4968_v30  ;;  %v6568_v11 = vld [vmem:[#allocation31_spill] sm:$0xff] }
 0x4ab   : > { %v2246_v62 = vrot.slane %v4971_v17, 1  ;;  %v6558_v14 = vrot.slane %v4680_v34, 1  ;;  %v2250_v63 = vrot.slane %v4963_v45, 1  ;;  %vm1939_vm13 = vcmp.ne.s32.totalorder %v3545_v1, %v1795_v23  ;;  %3161 = vmatmul.msk.bf16.gmra.mxu0 %vm1046_vm0, %v3296_v35  ;;  %3165 = vmatmul.msk.bf16.gmra.mxu1 %vm1046_vm0, %v3296_v35  ;;  %v3504_v6 = vpop.permute.xlu1 %3503 }
 0x4ac   : > { %v2340_v39 = vmax.f32 %v4645_v20, %v2233_v9  ;;  %v2308_v29 = vmax.f32 %v6559_v2, %v2112_v43  ;;  %v2252_v13 = vrot.slane %v4985_v28, 1  ;;  %v2343_v31 = vmax.f32 %v4724_v48, %v2239_v25 }
 0x4ad   : > { %v2235_v49 = vsel %vm472_vm5, %v6558_v14, %v2234_v61  ;;  %v3506_v47 = vunpack.i.h.bf16 %v3504_v6  ;;  %v3505_v41 = vunpack.i.l.bf16 %v3504_v6  ;;  %v2241_v18 = vsel %vm472_vm5, %v2232_v40, %v2240_v27  ;;  %v6564_v6 = vld [vmem:[#allocation36_spill] sm:$0xff] }
 0x4ae   : > { %v2341_v36 = vmax.f32 %v4680_v34, %v2235_v49  ;;  %v2115_v59 = vsel %vm456_vm3, %v3510_v52, %v3511_v22  ;;  %v2245_v20 = vsel %vm472_vm5, %v2236_v4, %v2244_v0  ;;  %v2247_v34 = vsel %vm472_vm5, %v2238_v37, %v2246_v62 }
 0x4af   : > { %v2160_v5 = vsel %vm456_vm3, %v3506_v47, 0.0  ;;  %v2114_v48 = vsel %vm456_vm3, %v3505_v41, %v3506_v47  ;;  %v2113_v8 = vsel %vm456_vm3, %v3501_v42, %v3505_v41  ;;  %v2372_v44 = vmax.f32 %v2308_v29, %v2340_v39  ;;  %v3524_v42 = vpop.permute.xlu2 %3523  ;;  %v3297_v41 = vld [vmem:[%s6403_s4 + $0x10] sm:$0xff] }
 0x4b0   : > { %v2311_v12 = vmax.f32 %v6560_v54, %v2160_v5  ;;  %v2310_v38 = vmax.f32 %v6561_v33, %v2114_v48  ;;  %v2309_v40 = vmax.f32 %v6562_v56, %v2113_v8  ;;  %v2344_v58 = vmax.f32 %v4710_v19, %v2241_v18 }
 0x4b1   : > { %v2312_v61 = vmax.f32 %v6563_v50, %v2115_v59  ;;  %v2346_v4 = vmax.f32 %v4838_v10, %v2245_v20  ;;  %v5029_v7 = vsel %vm1939_vm13, 1.0, %v6533_v55  ;;  %v2347_v19 = vmax.f32 %v4895_v32, %v2247_v34  ;;  %v6567_v59 = vld [vmem:[#allocation29_spill] sm:$0xff]  ;;  %v6569_v50 = vld [vmem:[#allocation34_spill] sm:$0xff] }
 0x4b2   : > { %v2375_v53 = vmax.f32 %v2311_v12, %v2343_v31  ;;  %v2374_v37 = vmax.f32 %v2310_v38, %v2342_v3  ;;  %v2373_v21 = vmax.f32 %v2309_v40, %v2341_v36  ;;  %v2254_v16 = vrot.slane %v5029_v7, 1  ;;  %3169 = vmatmul.msk.bf16.gmra.mxu2 %vm1046_vm0, %v3296_v35  ;;  %3173 = vmatmul.msk.bf16.gmra.mxu3 %vm1046_vm0, %v3296_v35  ;;  %v6565_v31 = vld [vmem:[#allocation35_spill] sm:$0xff]  ;;  %v6566_v36 = vld [vmem:[#allocation32_spill] sm:$0xff] }
 0x4b3   : > { %v2253_v10 = vsel %vm472_vm5, %v2244_v0, %v2252_v13  ;;  %v3526_v1 = vunpack.i.h.bf16 %v3524_v42  ;;  %v3525_v23 = vunpack.i.l.bf16 %v3524_v42  ;;  %v3514_v3 = vpop.permute.xlu0 %3513  ;;  %v2376_v0 = vmax.f32 %v2312_v61, %v2344_v58 }
 0x4b4   : > { %v2397_v9 = vpack.c.bf16 %v2375_v53, %v2374_v37  ;;  %v2396_v43 = vpack.c.bf16 %v2373_v21, %v2372_v44  ;;  %v2255_v25 = vsel %vm472_vm5, %v2246_v62, %v2254_v16  ;;  %v2350_v52 = vmax.f32 %v4914_v24, %v2253_v10  ;;  %v3298_v10 = vld [vmem:[%s6403_s4 + $0x18] sm:$0xff] }
 0x4b5   : > { %v3516_v14 = vunpack.i.h.bf16 %v3514_v3  ;;  %v3515_v35 = vunpack.i.l.bf16 %v3514_v3  ;;  %v2351_v32 = vmax.f32 %v4971_v17, %v2255_v25  ;;  %v2162_v49 = vsel %vm456_vm3, %v3526_v1, 0.0 }
 0x4b6   : > { %3233 = vst [vmem:[%s4616_s5 + $0x248] sm:$0xff] %v2397_v9  ;;  %v2319_v39 = vmax.f32 %v6564_v6, %v2162_v49  ;;  %v2120_v2 = vsel %vm456_vm3, %v3525_v23, %v3526_v1  ;;  %v5051_v29 = vsel %vm1936_vm4, 1.0, %v6533_v55  ;;  %v2251_v33 = vsel %vm472_vm5, %v2242_v15, %v2250_v63 }
 0x4b7   : > { %3232 = vst [vmem:[%s4616_s5 + $0x240] sm:$0xff] %v2396_v43  ;;  %v2161_v24 = vsel %vm456_vm3, %v3516_v14, 0.0  ;;  %v2116_v62 = vsel %vm456_vm3, %v3511_v22, %v3515_v35  ;;  %v2117_v17 = vsel %vm456_vm3, %v3515_v35, %v3516_v14  ;;  %v2318_v47 = vmax.f32 %v6565_v31, %v2120_v2  ;;  %v6571_v14 = vld [vmem:[#allocation38_spill] sm:$0xff]  ;;  %v6572_v2 = vld [vmem:[#allocation40_spill] sm:$0xff] }
 0x4b8   : > { %v2315_v18 = vmax.f32 %v6566_v36, %v2161_v24  ;;  %v2313_v20 = vmax.f32 %v6567_v59, %v2116_v62  ;;  %v2314_v30 = vmax.f32 %v6568_v11, %v2117_v17  ;;  %v2383_v5 = vmax.f32 %v2319_v39, %v2351_v32  ;;  %v6573_v24 = vld [vmem:[#allocation39_spill] sm:$0xff]  ;;  %v2518_v59 = vld [vmem:[%s4004_s8 + $0x100] sm:$0xff] }
 0x4b9   : > { %v2382_v48 = vmax.f32 %v2318_v47, %v2350_v52  ;;  %v2248_v22 = vrot.slane %v5051_v29, 1  ;;  %v2349_v44 = vmax.f32 %v4900_v46, %v2251_v33  ;;  %v2289_v9 = vsel %vm472_vm5, %v2250_v63, 0.0  ;;  %v2551_v33 = vld [vmem:[%s4004_s8 + $0x208] sm:$0xff] }
 0x4ba   : > { %v2379_v8 = vmax.f32 %v2315_v18, %v2347_v19  ;;  %v2377_v34 = vmax.f32 %v2313_v20, %v2345_v60  ;;  %v2378_v54 = vmax.f32 %v2314_v30, %v2346_v4  ;;  %v6570_v4 = vld [vmem:[#allocation33_spill] sm:$0xff]  ;;  %v2290_v43 = vsel %vm472_vm5, %v2252_v13, 0.0  ;;  %v2486_v18 = vld [vmem:[%s4004_s8] sm:$0xff] }
 0x4bb   : > { %v2401_v12 = vpack.c.bf16 %v2383_v5, %v2382_v48  ;;  %v2249_v38 = vsel %vm472_vm5, %v2240_v27, %v2248_v22  ;;  %3162 = vmatmul.msk.bf16.gmra.mxu0 %vm1046_vm0, %v3297_v41  ;;  %3166 = vmatmul.msk.bf16.gmra.mxu1 %vm1046_vm0, %v3297_v41  ;;  %v3519_v26 = vpop.permute.xlu1 %3518  ;;  %v2288_v1 = vsel %vm472_vm5, %v2248_v22, 0.0  ;;  %v2291_v3 = vsel %vm472_vm5, %v2254_v16, 0.0  ;;  %v2550_v20 = vld [vmem:[%s4004_s8 + $0x200] sm:$0xff]  ;;  %v2487_v5 = vld [vmem:[%s4004_s8 + $0x8] sm:$0xff] }
 0x4bc   : > { %v2398_v56 = vpack.c.bf16 %v2377_v34, %v2376_v0  ;;  %v2399_v51 = vpack.c.bf16 %v2379_v8, %v2378_v54  ;;  %v3521_v60 = vunpack.i.h.bf16 %v3519_v26  ;;  %v3520_v40 = vunpack.i.l.bf16 %v3519_v26  ;;  %v2519_v54 = vld [vmem:[%s4004_s8 + $0x108] sm:$0xff] }
 0x4bd   : > { %3237 = vst [vmem:[%s4616_s5 + $0x268] sm:$0xff] %v2401_v12  ;;  %v2348_v15 = vmax.f32 %v4946_v57, %v2249_v38  ;;  %v2352_v52 = vmax.f32 %v5051_v29, %v2288_v1  ;;  %v2353_v63 = vmax.f32 %v4963_v45, %v2289_v9  ;;  %v2354_v0 = vmax.f32 %v4985_v28, %v2290_v43  ;;  %v6574_v45 = vld [vmem:[#allocation37_spill] sm:$0xff] }
 0x4be   : > { %3234 = vst [vmem:[%s4616_s5 + $0x250] sm:$0xff] %v2398_v56  ;;  %v2119_v58 = vsel %vm456_vm3, %v3521_v60, %v3525_v23  ;;  %v2118_v27 = vsel %vm456_vm3, %v3520_v40, %v3521_v60  ;;  %v2355_v13 = vmax.f32 %v5029_v7, %v2291_v3  ;;  %v2490_v60 = vld [vmem:[%s4004_s8 + $0x20] sm:$0xff] }
 0x4bf   : > { %3235 = vst [vmem:[%s4616_s5 + $0x258] sm:$0xff] %v2399_v51  ;;  %v2317_v61 = vmax.f32 %v6569_v50, %v2119_v58  ;;  %v2316_v42 = vmax.f32 %v6570_v4, %v2118_v27  ;;  %v2522_v40 = vld [vmem:[%s4004_s8 + $0x120] sm:$0xff]  ;;  %v2491_v27 = vld [vmem:[%s4004_s8 + $0x28] sm:$0xff] }
 0x4c1   : > { %v2381_v53 = vmax.f32 %v2317_v61, %v2349_v44  ;;  %v2380_v37 = vmax.f32 %v2316_v42, %v2348_v15  ;;  %v2554_v44 = vld [vmem:[%s4004_s8 + $0x220] sm:$0xff] }
 0x4c2   : > { %3170 = vmatmul.msk.bf16.gmra.mxu2 %vm1046_vm0, %v3297_v41  ;;  %3174 = vmatmul.msk.bf16.gmra.mxu3 %vm1046_vm0, %v3297_v41 }
 0x4c3   : > { %v2400_v21 = vpack.c.bf16 %v2381_v53, %v2380_v37  ;;  %v2488_v37 = vld [vmem:[%s4004_s8 + $0x10] sm:$0xff] }
 0x4c4   : > { %v3529_v19 = vpop.permute.xlu0 %3528 }
 0x4c5   : > { %3236 = vst [vmem:[%s4616_s5 + $0x260] sm:$0xff] %v2400_v21  ;;  %v3531_v46 = vunpack.i.h.bf16 %v3529_v19  ;;  %v3530_v57 = vunpack.i.l.bf16 %v3529_v19  ;;  %v2520_v21 = vld [vmem:[%s4004_s8 + $0x110] sm:$0xff] }
 0x4c6   : > { %v2552_v19 = vld [vmem:[%s4004_s8 + $0x210] sm:$0xff] }
 0x4c7   : > { %v2121_v23 = vsel %vm456_vm3, %v3530_v57, %v3531_v46 }
 0x4c8   : > { %v2320_v35 = vmax.f32 %v6571_v14, %v2121_v23  ;;  %v2489_v23 = vld [vmem:[%s4004_s8 + $0x18] sm:$0xff] }
 0x4ca   : > { %v2384_v28 = vmax.f32 %v2320_v35, %v2352_v52  ;;  %v2521_v52 = vld [vmem:[%s4004_s8 + $0x118] sm:$0xff] }
 0x4cb   : > { %3163 = vmatmul.msk.bf16.gmra.mxu0 %vm1046_vm0, %v3298_v10  ;;  %3167 = vmatmul.msk.bf16.gmra.mxu1 %vm1046_vm0, %v3298_v10  ;;  %v3534_v25 = vpop.permute.xlu1 %3533  ;;  %v2553_v35 = vld [vmem:[%s4004_s8 + $0x218] sm:$0xff] }
 0x4cc   : > { %v3536_v32 = vunpack.i.h.bf16 %v3534_v25  ;;  %v3535_v49 = vunpack.i.l.bf16 %v3534_v25 }
 0x4ce   : > { %v2163_v16 = vsel %vm456_vm3, %v3536_v32, 0.0  ;;  %v2123_v6 = vsel %vm456_vm3, %v3535_v49, %v3536_v32  ;;  %v2122_v39 = vsel %vm456_vm3, %v3531_v46, %v3535_v49  ;;  %v2523_v49 = vld [vmem:[%s4004_s8 + $0x128] sm:$0xff] }
 0x4cf   : > { %v2323_v29 = vmax.f32 %v6572_v2, %v2163_v16  ;;  %v2322_v62 = vmax.f32 %v6573_v24, %v2123_v6  ;;  %v2321_v17 = vmax.f32 %v6574_v45, %v2122_v39  ;;  %v2492_v39 = vld [vmem:[%s4004_s8 + $0x30] sm:$0xff] }
 0x4d0   : > { %v2524_v2 = vld [vmem:[%s4004_s8 + $0x130] sm:$0xff] }
 0x4d1   : > { %v2387_v31 = vmax.f32 %v2323_v29, %v2355_v13  ;;  %v2386_v7 = vmax.f32 %v2322_v62, %v2354_v0  ;;  %v2385_v47 = vmax.f32 %v2321_v17, %v2353_v63  ;;  %v2555_v13 = vld [vmem:[%s4004_s8 + $0x228] sm:$0xff]  ;;  %v2556_v24 = vld [vmem:[%s4004_s8 + $0x230] sm:$0xff] }
 0x4d2   : > { %3171 = vmatmul.msk.bf16.gmra.mxu2 %vm1046_vm0, %v3298_v10  ;;  %3175 = vmatmul.msk.bf16.gmra.mxu3 %vm1046_vm0, %v3298_v10 }
 0x4d3   : > { %v2403_v41 = vpack.c.bf16 %v2387_v31, %v2386_v7  ;;  %v2402_v36 = vpack.c.bf16 %v2385_v47, %v2384_v28  ;;  %v2493_v7 = vld [vmem:[%s4004_s8 + $0x38] sm:$0xff] }
 0x4d5   : > { %3239 = vst [vmem:[%s4616_s5 + $0x278] sm:$0xff] %v2403_v41 }
 0x4d6   : > { %3238 = vst [vmem:[%s4616_s5 + $0x270] sm:$0xff] %v2402_v36  ;;  %v2525_v36 = vld [vmem:[%s4004_s8 + $0x138] sm:$0xff] }
 0x518   : > { %v1068_v11 = vpop.f32.mrf.mxu0  ;;  %v1097_v30 = vpop.f32.mrf.mxu1 }
 0x519   : > { %v2421_v48 = vsub.f32 1.0, %v1068_v11  ;;  %v2582_v22 = vmul.f32 %v2486_v18, %v1068_v11  ;;  %v2614_v8 = vmul.f32 %v2518_v59, %v1068_v11  ;;  %v2646_v34 = vmul.f32 %v2550_v20, %v1068_v11  ;;  %v2557_v18 = vld [vmem:[%s4004_s8 + $0x238] sm:$0xff]  ;;  %v2494_v11 = vld [vmem:[%s4004_s8 + $0x40] sm:$0xff] }
 0x51a   : > { %v2422_v12 = vsub.f32 1.0, %v1097_v30  ;;  %v2583_v38 = vmul.f32 %v2487_v5, %v1097_v30  ;;  %v2615_v51 = vmul.f32 %v2519_v54, %v1097_v30  ;;  %v2647_v26 = vmul.f32 %v2551_v33, %v1097_v30  ;;  %v2558_v54 = vld [vmem:[%s4004_s8 + $0x240] sm:$0xff] }
 0x51b   : > { %2678 = vst [vmem:[%s5128_s28] sm:$0xff] %v2582_v22 }
 0x51c   : > { %2710 = vst [vmem:[%s5128_s28 + $0x100] sm:$0xff] %v2614_v8  ;;  %v2453_v56 = vpack.c.bf16 %v2422_v12, %v2421_v48  ;;  %v2526_v48 = vld [vmem:[%s4004_s8 + $0x140] sm:$0xff] }
 0x51d   : > { %2742 = vst [vmem:[%s5128_s28 + $0x200] sm:$0xff] %v2646_v34 }
 0x51e   : > { %3240 = vst [vmem:[%s4616_s5 + $0x280] sm:$0xff] %v2453_v56  ;;  %v2495_v56 = vld [vmem:[%s4004_s8 + $0x48] sm:$0xff] }
 0x51f   : > { %2679 = vst [vmem:[%s5128_s28 + $0x8] sm:$0xff] %v2583_v38 }
 0x520   : > { %2711 = vst [vmem:[%s5128_s28 + $0x108] sm:$0xff] %v2615_v51  ;;  %v1070_v15 = vpop.f32.mrf.mxu0  ;;  %v1099_v58 = vpop.f32.mrf.mxu1 }
 0x521   : > { %2743 = vst [vmem:[%s5128_s28 + $0x208] sm:$0xff] %v2647_v26  ;;  %v2425_v50 = vsub.f32 1.0, %v1070_v15  ;;  %v2586_v61 = vmul.f32 %v2490_v60, %v1070_v15  ;;  %v2618_v4 = vmul.f32 %v2522_v40, %v1070_v15  ;;  %v2650_v42 = vmul.f32 %v2554_v44, %v1070_v15  ;;  %v2527_v26 = vld [vmem:[%s4004_s8 + $0x148] sm:$0xff] }
 0x522   : > { %v2426_v53 = vsub.f32 1.0, %v1099_v58  ;;  %v2587_v46 = vmul.f32 %v2491_v27, %v1099_v58  ;;  %v2619_v6 = vmul.f32 %v2523_v49, %v1099_v58  ;;  %v2651_v29 = vmul.f32 %v2555_v13, %v1099_v58  ;;  %v2559_v40 = vld [vmem:[%s4004_s8 + $0x248] sm:$0xff]  ;;  %v2496_v27 = vld [vmem:[%s4004_s8 + $0x50] sm:$0xff]  ;;  %v2562_v49 = vld [vmem:[%s4004_s8 + $0x260] sm:$0xff] }
 0x523   : > { %2682 = vst [vmem:[%s5128_s28 + $0x20] sm:$0xff] %v2586_v61  ;;  %v2528_v61 = vld [vmem:[%s4004_s8 + $0x150] sm:$0xff] }
 0x524   : > { %2714 = vst [vmem:[%s5128_s28 + $0x120] sm:$0xff] %v2618_v4  ;;  %v2455_v57 = vpack.c.bf16 %v2426_v53, %v2425_v50  ;;  %v2560_v53 = vld [vmem:[%s4004_s8 + $0x250] sm:$0xff] }
 0x525   : > { %v1126_v10 = vpop.f32.mrf.mxu2  ;;  %v1155_v1 = vpop.f32.mrf.mxu3  ;;  %2746 = vst [vmem:[%s5128_s28 + $0x220] sm:$0xff] %v2650_v42 }
 0x526   : > { %v2423_v9 = vsub.f32 1.0, %v1126_v10  ;;  %v2584_v43 = vmul.f32 %v2488_v37, %v1126_v10  ;;  %v2616_v3 = vmul.f32 %v2520_v21, %v1126_v10  ;;  %v2648_v25 = vmul.f32 %v2552_v19, %v1126_v10  ;;  %3242 = vst [vmem:[%s4616_s5 + $0x290] sm:$0xff] %v2455_v57  ;;  %v2529_v10 = vld [vmem:[%s4004_s8 + $0x158] sm:$0xff] }
 0x527   : > { %v2424_v14 = vsub.f32 1.0, %v1155_v1  ;;  %2683 = vst [vmem:[%s5128_s28 + $0x28] sm:$0xff] %v2587_v46  ;;  %v2585_v32 = vmul.f32 %v2489_v23, %v1155_v1  ;;  %v2617_v0 = vmul.f32 %v2521_v52, %v1155_v1  ;;  %v2649_v16 = vmul.f32 %v2553_v35, %v1155_v1  ;;  %v2497_v46 = vld [vmem:[%s4004_s8 + $0x58] sm:$0xff] }
 0x528   : > { %2680 = vst [vmem:[%s5128_s28 + $0x10] sm:$0xff] %v2584_v43  ;;  %v1073_v5 = vpop.f32.mrf.mxu0  ;;  %v1102_v22 = vpop.f32.mrf.mxu1  ;;  %v2561_v23 = vld [vmem:[%s4004_s8 + $0x258] sm:$0xff] }
 0x529   : > { %2712 = vst [vmem:[%s5128_s28 + $0x110] sm:$0xff] %v2616_v3  ;;  %v2454_v63 = vpack.c.bf16 %v2424_v14, %v2423_v9  ;;  %v2429_v34 = vsub.f32 1.0, %v1073_v5  ;;  %v2430_v12 = vsub.f32 1.0, %v1102_v22  ;;  %v2590_v33 = vmul.f32 %v2494_v11, %v1073_v5  ;;  %v2530_v14 = vld [vmem:[%s4004_s8 + $0x160] sm:$0xff] }
 0x52a   : > { %2744 = vst [vmem:[%s5128_s28 + $0x210] sm:$0xff] %v2648_v25  ;;  %v2622_v38 = vmul.f32 %v2526_v48, %v1073_v5  ;;  %v2654_v51 = vmul.f32 %v2558_v54, %v1073_v5  ;;  %v2591_v58 = vmul.f32 %v2495_v56, %v1102_v22  ;;  %v2623_v50 = vmul.f32 %v2527_v26, %v1102_v22  ;;  %v2498_v25 = vld [vmem:[%s4004_s8 + $0x60] sm:$0xff]  ;;  %v2565_v48 = vld [vmem:[%s4004_s8 + $0x278] sm:$0xff] }
 0x52b   : > { %3241 = vst [vmem:[%s4616_s5 + $0x288] sm:$0xff] %v2454_v63  ;;  %v2457_v60 = vpack.c.bf16 %v2430_v12, %v2429_v34  ;;  %v2655_v4 = vmul.f32 %v2559_v40, %v1102_v22  ;;  %v2534_v12 = vld [vmem:[%s4004_s8 + $0x180] sm:$0xff] }
 0x52c   : > { %2681 = vst [vmem:[%s5128_s28 + $0x18] sm:$0xff] %v2585_v32 }
 0x52d   : > { %2713 = vst [vmem:[%s5128_s28 + $0x118] sm:$0xff] %v2617_v0  ;;  %v1128_v62 = vpop.f32.mrf.mxu2  ;;  %v1157_v45 = vpop.f32.mrf.mxu3 }
 0x52e   : > { %2745 = vst [vmem:[%s5128_s28 + $0x218] sm:$0xff] %v2649_v16  ;;  %v2427_v17 = vsub.f32 1.0, %v1128_v62  ;;  %v2588_v28 = vmul.f32 %v2492_v39, %v1128_v62  ;;  %v2620_v31 = vmul.f32 %v2524_v2, %v1128_v62  ;;  %v2652_v47 = vmul.f32 %v2556_v24, %v1128_v62  ;;  %v2499_v16 = vld [vmem:[%s4004_s8 + $0x68] sm:$0xff] }
 0x52f   : > { %2715 = vst [vmem:[%s5128_s28 + $0x128] sm:$0xff] %v2619_v6  ;;  %v2428_v41 = vsub.f32 1.0, %v1157_v45  ;;  %v2589_v20 = vmul.f32 %v2493_v7, %v1157_v45  ;;  %v2621_v30 = vmul.f32 %v2525_v36, %v1157_v45  ;;  %v2653_v8 = vmul.f32 %v2557_v18, %v1157_v45  ;;  %v2531_v39 = vld [vmem:[%s4004_s8 + $0x168] sm:$0xff] }
 0x530   : > { %2747 = vst [vmem:[%s5128_s28 + $0x228] sm:$0xff] %v2651_v29  ;;  %v1075_v9 = vpop.f32.mrf.mxu0  ;;  %v1104_v43 = vpop.f32.mrf.mxu1  ;;  %v2563_v29 = vld [vmem:[%s4004_s8 + $0x268] sm:$0xff] }
 0x531   : > { %2684 = vst [vmem:[%s5128_s28 + $0x30] sm:$0xff] %v2588_v28  ;;  %v2456_v59 = vpack.c.bf16 %v2428_v41, %v2427_v17  ;;  %v2433_v32 = vsub.f32 1.0, %v1075_v9  ;;  %v2434_v63 = vsub.f32 1.0, %v1104_v43  ;;  %v2594_v0 = vmul.f32 %v2498_v25, %v1075_v9  ;;  %v2500_v17 = vld [vmem:[%s4004_s8 + $0x70] sm:$0xff]  ;;  %v2537_v25 = vld [vmem:[%s4004_s8 + $0x198] sm:$0xff] }
 0x532   : > { %2716 = vst [vmem:[%s5128_s28 + $0x130] sm:$0xff] %v2620_v31  ;;  %v2626_v13 = vmul.f32 %v2530_v14, %v1075_v9  ;;  %v2658_v6 = vmul.f32 %v2562_v49, %v1075_v9  ;;  %v2595_v45 = vmul.f32 %v2499_v16, %v1104_v43  ;;  %v2627_v28 = vmul.f32 %v2531_v39, %v1104_v43  ;;  %v2532_v31 = vld [vmem:[%s4004_s8 + $0x170] sm:$0xff]  ;;  %v2505_v9 = vld [vmem:[%s4004_s8 + $0x98] sm:$0xff]  ;;  %v2538_v16 = vld [vmem:[%s4004_s8 + $0x1a0] sm:$0xff] }
 0x533   : > { %2748 = vst [vmem:[%s5128_s28 + $0x230] sm:$0xff] %v2652_v47  ;;  %v2459_v2 = vpack.c.bf16 %v2434_v63, %v2433_v32  ;;  %v2659_v7 = vmul.f32 %v2563_v29, %v1104_v43  ;;  %v2564_v41 = vld [vmem:[%s4004_s8 + $0x270] sm:$0xff]  ;;  %v2569_v32 = vld [vmem:[%s4004_s8 + $0x298] sm:$0xff] }
 0x534   : > { %3243 = vst [vmem:[%s4616_s5 + $0x298] sm:$0xff] %v2456_v59 }
 0x535   : > { %2685 = vst [vmem:[%s5128_s28 + $0x38] sm:$0xff] %v2589_v20  ;;  %v1131_v44 = vpop.f32.mrf.mxu2  ;;  %v1160_v15 = vpop.f32.mrf.mxu3  ;;  %v2501_v20 = vld [vmem:[%s4004_s8 + $0x78] sm:$0xff] }
 0x536   : > { %2717 = vst [vmem:[%s5128_s28 + $0x138] sm:$0xff] %v2621_v30  ;;  %v2431_v42 = vsub.f32 1.0, %v1131_v44  ;;  %v2432_v37 = vsub.f32 1.0, %v1160_v15  ;;  %v2592_v21 = vmul.f32 %v2496_v27, %v1131_v44  ;;  %v2624_v19 = vmul.f32 %v2528_v61, %v1131_v44  ;;  %v2533_v30 = vld [vmem:[%s4004_s8 + $0x178] sm:$0xff] }
 0x537   : > { %2749 = vst [vmem:[%s5128_s28 + $0x238] sm:$0xff] %v2653_v8  ;;  %v2656_v57 = vmul.f32 %v2560_v53, %v1131_v44  ;;  %v2593_v3 = vmul.f32 %v2497_v46, %v1160_v15  ;;  %v2625_v52 = vmul.f32 %v2529_v10, %v1160_v15  ;;  %v2657_v35 = vmul.f32 %v2561_v23, %v1160_v15  ;;  %v2502_v8 = vld [vmem:[%s4004_s8 + $0x80] sm:$0xff]  ;;  %v2504_v53 = vld [vmem:[%s4004_s8 + $0x90] sm:$0xff] }
 0x538   : > { %2686 = vst [vmem:[%s5128_s28 + $0x40] sm:$0xff] %v2590_v33  ;;  %v2458_v1 = vpack.c.bf16 %v2432_v37, %v2431_v42  ;;  %v1078_v54 = vpop.f32.mrf.mxu0  ;;  %v1107_v33 = vpop.f32.mrf.mxu1 }
 0x539   : > { %2718 = vst [vmem:[%s5128_s28 + $0x140] sm:$0xff] %v2622_v38  ;;  %v2437_v56 = vsub.f32 1.0, %v1078_v54  ;;  %v2438_v26 = vsub.f32 1.0, %v1107_v33  ;;  %v2598_v40 = vmul.f32 %v2502_v8, %v1078_v54  ;;  %v2630_v15 = vmul.f32 %v2534_v12, %v1078_v54  ;;  %v2509_v12 = vld [vmem:[%s4004_s8 + $0xb8] sm:$0xff] }
 0x53a   : > { %2750 = vst [vmem:[%s5128_s28 + $0x240] sm:$0xff] %v2654_v51  ;;  %v2566_v51 = vld [vmem:[%s4004_s8 + $0x280] sm:$0xff] }
 0x53b   : > { %3244 = vst [vmem:[%s4616_s5 + $0x2a0] sm:$0xff] %v2457_v60  ;;  %v2662_v27 = vmul.f32 %v2566_v51, %v1078_v54  ;;  %v2461_v61 = vpack.c.bf16 %v2438_v26, %v2437_v56  ;;  %v2573_v51 = vld [vmem:[%s4004_s8 + $0x2b8] sm:$0xff] }
 0x53c   : > { %2687 = vst [vmem:[%s5128_s28 + $0x48] sm:$0xff] %v2591_v58  ;;  %v2503_v58 = vld [vmem:[%s4004_s8 + $0x88] sm:$0xff] }
 0x53d   : > { %2719 = vst [vmem:[%s5128_s28 + $0x148] sm:$0xff] %v2623_v50  ;;  %v1133_v24 = vpop.f32.mrf.mxu2  ;;  %v1162_v62 = vpop.f32.mrf.mxu3  ;;  %v2535_v50 = vld [vmem:[%s4004_s8 + $0x188] sm:$0xff]  ;;  %v2599_v42 = vmul.f32 %v2503_v58, %v1107_v33 }
 0x53e   : > { %2751 = vst [vmem:[%s5128_s28 + $0x248] sm:$0xff] %v2655_v4  ;;  %v2435_v47 = vsub.f32 1.0, %v1133_v24  ;;  %v2436_v36 = vsub.f32 1.0, %v1162_v62  ;;  %v2596_v18 = vmul.f32 %v2500_v17, %v1133_v24  ;;  %v2628_v59 = vmul.f32 %v2532_v31, %v1133_v24  ;;  %v2567_v4 = vld [vmem:[%s4004_s8 + $0x288] sm:$0xff] }
 0x53f   : > { %2688 = vst [vmem:[%s5128_s28 + $0x50] sm:$0xff] %v2592_v21  ;;  %v2660_v11 = vmul.f32 %v2564_v41, %v1133_v24  ;;  %v2597_v22 = vmul.f32 %v2501_v20, %v1162_v62  ;;  %v2629_v34 = vmul.f32 %v2533_v30, %v1162_v62  ;;  %v2661_v38 = vmul.f32 %v2565_v48, %v1162_v62  ;;  %v2536_v21 = vld [vmem:[%s4004_s8 + $0x190] sm:$0xff] }
 0x540   : > { %2720 = vst [vmem:[%s5128_s28 + $0x150] sm:$0xff] %v2624_v19  ;;  %v2460_v5 = vpack.c.bf16 %v2436_v36, %v2435_v47  ;;  %v2631_v37 = vmul.f32 %v2535_v50, %v1107_v33  ;;  %v2663_v19 = vmul.f32 %v2567_v4, %v1107_v33  ;;  %v1080_v43 = vpop.f32.mrf.mxu0  ;;  %v2508_v41 = vld [vmem:[%s4004_s8 + $0xb0] sm:$0xff]  ;;  %v2511_v50 = vld [vmem:[%s4004_s8 + $0xc8] sm:$0xff] }
 0x541   : > { %2752 = vst [vmem:[%s5128_s28 + $0x250] sm:$0xff] %v2656_v57  ;;  %v2568_v57 = vld [vmem:[%s4004_s8 + $0x290] sm:$0xff]  ;;  %v2441_v39 = vsub.f32 1.0, %v1080_v43  ;;  %v2634_v62 = vmul.f32 %v2538_v16, %v1080_v43  ;;  %v2578_v16 = vld [vmem:[%s4004_s8 + $0x2e0] sm:$0xff] }
 0x542   : > { %3245 = vst [vmem:[%s4616_s5 + $0x2a8] sm:$0xff] %v2458_v1  ;;  %v2572_v48 = vld [vmem:[%s4004_s8 + $0x2b0] sm:$0xff] }
 0x543   : > { %2689 = vst [vmem:[%s5128_s28 + $0x58] sm:$0xff] %v2593_v3 }
 0x544   : > { %2721 = vst [vmem:[%s5128_s28 + $0x158] sm:$0xff] %v2625_v52  ;;  %v1109_v52 = vpop.f32.mrf.mxu1 }
 0x545   : > { %2753 = vst [vmem:[%s5128_s28 + $0x258] sm:$0xff] %v2657_v35  ;;  %v1136_v60 = vpop.f32.mrf.mxu2  ;;  %v1165_v44 = vpop.f32.mrf.mxu3  ;;  %v2442_v29 = vsub.f32 1.0, %v1109_v52 }
 0x546   : > { %2690 = vst [vmem:[%s5128_s28 + $0x60] sm:$0xff] %v2594_v0  ;;  %v2439_v46 = vsub.f32 1.0, %v1136_v60  ;;  %v2440_v10 = vsub.f32 1.0, %v1165_v44  ;;  %v2600_v1 = vmul.f32 %v2504_v53, %v1136_v60  ;;  %v2632_v23 = vmul.f32 %v2536_v21, %v1136_v60  ;;  %v2506_v0 = vld [vmem:[%s4004_s8 + $0xa0] sm:$0xff]  ;;  %v2512_v53 = vld [vmem:[%s4004_s8 + $0xd0] sm:$0xff] }
 0x547   : > { %2722 = vst [vmem:[%s5128_s28 + $0x160] sm:$0xff] %v2626_v13  ;;  %v2664_v3 = vmul.f32 %v2568_v57, %v1136_v60  ;;  %v2601_v63 = vmul.f32 %v2505_v9, %v1165_v44  ;;  %v2633_v13 = vmul.f32 %v2537_v25, %v1165_v44  ;;  %v2602_v24 = vmul.f32 %v2506_v0, %v1080_v43  ;;  %v2513_v57 = vld [vmem:[%s4004_s8 + $0xd8] sm:$0xff] }
 0x548   : > { %2754 = vst [vmem:[%s5128_s28 + $0x260] sm:$0xff] %v2658_v6  ;;  %v2462_v35 = vpack.c.bf16 %v2440_v10, %v2439_v46  ;;  %v2665_v6 = vmul.f32 %v2569_v32, %v1165_v44  ;;  %v2463_v31 = vpack.c.bf16 %v2442_v29, %v2441_v39  ;;  %v1083_v36 = vpop.f32.mrf.mxu0  ;;  %v2542_v44 = vld [vmem:[%s4004_s8 + $0x1c0] sm:$0xff]  ;;  %v2576_v46 = vld [vmem:[%s4004_s8 + $0x2d0] sm:$0xff]  ;;  %v2545_v10 = vld [vmem:[%s4004_s8 + $0x1d8] sm:$0xff] }
 0x549   : > { %3246 = vst [vmem:[%s4616_s5 + $0x2b0] sm:$0xff] %v2459_v2  ;;  %v2570_v2 = vld [vmem:[%s4004_s8 + $0x2a0] sm:$0xff]  ;;  %v2445_v60 = vsub.f32 1.0, %v1083_v36  ;;  %v2577_v25 = vld [vmem:[%s4004_s8 + $0x2d8] sm:$0xff]  ;;  %v5320_v29 = vld [vmem:[%s3987_s11 + $0x8] sm:$0xff] }
 0x54a   : > { %2691 = vst [vmem:[%s5128_s28 + $0x68] sm:$0xff] %v2595_v45  ;;  %v2507_v45 = vld [vmem:[%s4004_s8 + $0xa8] sm:$0xff]  ;;  %v2666_v17 = vmul.f32 %v2570_v2, %v1080_v43  ;;  %v5317_v2 = vld [vmem:[%s3987_s11] sm:$0xff]  ;;  %vm1208_vm5 = vcmp.eq.s32.totalorder %v5320_v29, 0 }
 0x54b   : > { %2723 = vst [vmem:[%s5128_s28 + $0x168] sm:$0xff] %v2627_v28  ;;  %v2539_v28 = vld [vmem:[%s4004_s8 + $0x1a8] sm:$0xff]  ;;  %v2603_v47 = vmul.f32 %v2507_v45, %v1109_v52  ;;  %vm1207_vm3 = vcmp.eq.s32.totalorder %v5317_v2, 0 }
 0x54c   : > { %2755 = vst [vmem:[%s5128_s28 + $0x268] sm:$0xff] %v2659_v7  ;;  %v2571_v7 = vld [vmem:[%s4004_s8 + $0x2a8] sm:$0xff]  ;;  %v1112_v20 = vpop.f32.mrf.mxu1 }
 0x54d   : > { %2692 = vst [vmem:[%s5128_s28 + $0x70] sm:$0xff] %v2596_v18  ;;  %v1138_v14 = vpop.f32.mrf.mxu2  ;;  %v1167_v49 = vpop.f32.mrf.mxu3  ;;  %v2635_v18 = vmul.f32 %v2539_v28, %v1109_v52  ;;  %v2667_v30 = vmul.f32 %v2571_v7, %v1109_v52  ;;  %v2514_v52 = vld [vmem:[%s4004_s8 + $0xe0] sm:$0xff]  ;;  %v2579_v7 = vld [vmem:[%s4004_s8 + $0x2e8] sm:$0xff] }
 0x54e   : > { %2724 = vst [vmem:[%s5128_s28 + $0x170] sm:$0xff] %v2628_v59  ;;  %v2540_v59 = vld [vmem:[%s4004_s8 + $0x1b0] sm:$0xff]  ;;  %v2668_v33 = vmul.f32 %v2572_v48, %v1138_v14  ;;  %v2605_v26 = vmul.f32 %v2509_v12, %v1167_v49  ;;  %v2669_v4 = vmul.f32 %v2573_v51, %v1167_v49  ;;  %v5361_v48 = vld [vmem:[%s3987_s11 + $0x38] sm:$0xff]  ;;  %v5370_v12 = vld [vmem:[%s3987_s11 + $0x40] sm:$0xff] }
 0x54f   : > { %2756 = vst [vmem:[%s5128_s28 + $0x270] sm:$0xff] %v2660_v11  ;;  %v2636_v54 = vmul.f32 %v2540_v59, %v1138_v14  ;;  %v2517_v51 = vld [vmem:[%s4004_s8 + $0xf8] sm:$0xff]  ;;  %vm1214_vm1 = vcmp.eq.s32.totalorder %v5361_v48, 0 }
 0x550   : > { %3247 = vst [vmem:[%s4616_s5 + $0x2b8] sm:$0xff] %v2460_v5  ;;  %v2443_v5 = vsub.f32 1.0, %v1138_v14 }
 0x551   : > { %2693 = vst [vmem:[%s5128_s28 + $0x78] sm:$0xff] %v2597_v22  ;;  %v2444_v22 = vsub.f32 1.0, %v1167_v49 }
 0x552   : > { %2725 = vst [vmem:[%s5128_s28 + $0x178] sm:$0xff] %v2629_v34  ;;  %v2604_v34 = vmul.f32 %v2508_v41, %v1138_v14  ;;  %v2546_v14 = vld [vmem:[%s4004_s8 + $0x1e0] sm:$0xff] }
 0x553   : > { %2757 = vst [vmem:[%s5128_s28 + $0x278] sm:$0xff] %v2661_v38  ;;  %v2541_v38 = vld [vmem:[%s4004_s8 + $0x1b8] sm:$0xff]  ;;  %v2464_v56 = vpack.c.bf16 %v2444_v22, %v2443_v5  ;;  %v5342_v41 = vld [vmem:[%s3987_s11 + $0x20] sm:$0xff]  ;;  %v5358_v5 = vld [vmem:[%s3987_s11 + $0x30] sm:$0xff] }
 0x554   : > { %2694 = vst [vmem:[%s5128_s28 + $0x80] sm:$0xff] %v2598_v40  ;;  %v2510_v40 = vld [vmem:[%s4004_s8 + $0xc0] sm:$0xff]  ;;  %v2637_v58 = vmul.f32 %v2541_v38, %v1167_v49  ;;  %v2607_v49 = vmul.f32 %v2511_v50, %v1112_v20  ;;  %vm1211_vm2 = vcmp.eq.s32.totalorder %v5342_v41, 0  ;;  %v5408_v50 = vld [vmem:[%s3987_s11 + $0x68] sm:$0xff]  ;;  %vm1213_vm0 = vcmp.eq.s32.totalorder %v5358_v5, 0 }
 0x555   : > { %2726 = vst [vmem:[%s5128_s28 + $0x180] sm:$0xff] %v2630_v15  ;;  %v5264_v11 = vpop.f32.mrf.mxu2  ;;  %v5268_v8 = vpop.f32.mrf.mxu3  ;;  %v2446_v15 = vsub.f32 1.0, %v1112_v20  ;;  %v2606_v21 = vmul.f32 %v2510_v40, %v1083_v36  ;;  %v5390_v40 = vld [vmem:[%s3987_s11 + $0x58] sm:$0xff] }
 0x556   : > { %2758 = vst [vmem:[%s5128_s28 + $0x280] sm:$0xff] %v2662_v27  ;;  %v2574_v27 = vld [vmem:[%s4004_s8 + $0x2c0] sm:$0xff]  ;;  %v2447_v43 = vsub.f32 1.0, %v5264_v11  ;;  %v5330_v45 = vmul.f32 %v2576_v46, %v5264_v11  ;;  %v5352_v59 = vmul.f32 %v2577_v25, %v5268_v8  ;;  %v5466_v25 = vld [vmem:[%s3987_s11 + $0xb8] sm:$0xff] }
 0x557   : > { %3248 = vst [vmem:[%s4616_s5 + $0x2c0] sm:$0xff] %v2461_v61  ;;  %v2543_v61 = vld [vmem:[%s4004_s8 + $0x1c8] sm:$0xff]  ;;  %v2465_v9 = vpack.c.bf16 %v2446_v15, %v2445_v60  ;;  %v5387_v60 = vld [vmem:[%s3987_s11 + $0x50] sm:$0xff] }
 0x558   : > { %2695 = vst [vmem:[%s5128_s28 + $0x88] sm:$0xff] %v2599_v42  ;;  %v2575_v42 = vld [vmem:[%s4004_s8 + $0x2c8] sm:$0xff] }
 0x559   : > { %2727 = vst [vmem:[%s5128_s28 + $0x188] sm:$0xff] %v2631_v37  ;;  %v2544_v37 = vld [vmem:[%s4004_s8 + $0x1d0] sm:$0xff]  ;;  %v5307_v0 = vmul.f32 %v2575_v42, %v1112_v20 }
 0x55a   : > { %2759 = vst [vmem:[%s5128_s28 + $0x288] sm:$0xff] %v2663_v19  ;;  %v2638_v19 = vmul.f32 %v2542_v44, %v1083_v36  ;;  %v5393_v44 = vld [vmem:[%s3987_s11 + $0x60] sm:$0xff] }
 0x55b   : > { %2696 = vst [vmem:[%s5128_s28 + $0x90] sm:$0xff] %v2600_v1  ;;  %v5292_v1 = vpop.f32.mrf.mxu0 }
 0x55c   : > { %2728 = vst [vmem:[%s5128_s28 + $0x190] sm:$0xff] %v2632_v23  ;;  %v2670_v23 = vmul.f32 %v2574_v27, %v1083_v36  ;;  %v2449_v28 = vsub.f32 1.0, %v5292_v1  ;;  %v5345_v36 = vld [vmem:[%s3987_s11 + $0x28] sm:$0xff]  ;;  %v5379_v38 = vmul.f32 %v2514_v52, %v5292_v1  ;;  %v5401_v15 = vmul.f32 %v2578_v16, %v5292_v1  ;;  %v2581_v27 = vld [vmem:[%s4004_s8 + $0x2f8] sm:$0xff]  ;;  %v5469_v52 = vld [vmem:[%s3987_s11 + $0xc0] sm:$0xff] }
 0x55d   : > { %2760 = vst [vmem:[%s5128_s28 + $0x290] sm:$0xff] %v2664_v3  ;;  %v2448_v3 = vsub.f32 1.0, %v5268_v8  ;;  %v5302_v32 = vpop.f32.mrf.mxu2  ;;  %v5314_v39 = vpop.f32.mrf.mxu3  ;;  %vm1212_vm15 = vcmp.eq.s32.totalorder %v5345_v36, 0 }
 0x55e   : > { %3249 = vst [vmem:[%s4616_s5 + $0x2c8] sm:$0xff] %v2462_v35  ;;  %v5300_v35 = vpop.f32.mrf.mxu1  ;;  %v5499_v16 = vmul.f32 %v2581_v27, %v5314_v39 }
 0x55f   : > { %2697 = vst [vmem:[%s5128_s28 + $0x98] sm:$0xff] %v2601_v63  ;;  %v5305_v63 = vmul.f32 %v2543_v61, %v1112_v20  ;;  %v2450_v20 = vsub.f32 1.0, %v5300_v35  ;;  %v5364_v22 = vpack.c.bf16 %v2448_v3, %v2447_v43  ;;  %v5411_v61 = vld [vmem:[%s3987_s11 + $0x70] sm:$0xff] }
 0x560   : > { %2729 = vst [vmem:[%s5128_s28 + $0x198] sm:$0xff] %v2633_v13  ;;  %v5310_v13 = vmul.f32 %v2512_v53, %v5264_v11  ;;  %v5423_v53 = vmul.f32 %v2579_v7, %v5300_v35  ;;  %v5463_v3 = vld [vmem:[%s3987_s11 + $0xb0] sm:$0xff]  ;;  %v5562_v7 = vsel %vm1211_vm2, 1.0, %v6533_v55  ;;  %vm6596_vm2 = vcmp.eq.s32.totalorder %v5393_v44, 0 }
 0x561   : > { %2761 = vst [vmem:[%s5128_s28 + $0x298] sm:$0xff] %v2665_v6  ;;  %v2515_v6 = vld [vmem:[%s4004_s8 + $0xe8] sm:$0xff]  ;;  %v5438_v46 = vpack.c.bf16 %v2450_v20, %v2449_v28  ;;  %vm1229_vm4 = vcmp.eq.s32.totalorder %v5463_v3, 0  ;;  %v5579_v20 = vsel %vm1214_vm1, 1.0, %v6533_v55 }
 0x562   : > { %2698 = vst [vmem:[%s5128_s28 + $0xa0] sm:$0xff] %v2602_v24  ;;  %v5323_v24 = vld [vmem:[%s3987_s11 + $0x10] sm:$0xff]  ;;  %v5505_v28 = vld [vmem:[%s3987_s11 + $0xe8] sm:$0xff] }
 0x563   : > { %2730 = vst [vmem:[%s5128_s28 + $0x1a0] sm:$0xff] %v2634_v62  ;;  %v5327_v62 = vmul.f32 %v2544_v37, %v5264_v11  ;;  %v2451_v11 = vsub.f32 1.0, %v5302_v32  ;;  %vm1209_vm14 = vcmp.eq.s32.totalorder %v5323_v24, 0  ;;  %v5426_v37 = vld [vmem:[%s3987_s11 + $0x80] sm:$0xff]  ;;  %vm1236_vm12 = vcmp.eq.s32.totalorder %v5505_v28, 0 }
 0x564   : > { %2762 = vst [vmem:[%s5128_s28 + $0x2a0] sm:$0xff] %v2666_v17  ;;  %v5333_v17 = vmul.f32 %v2513_v57, %v5268_v8 }
 0x565   : > { %3250 = vst [vmem:[%s4616_s5 + $0x2d0] sm:$0xff] %v2463_v31  ;;  %v2547_v31 = vld [vmem:[%s4004_s8 + $0x1e8] sm:$0xff] }
 0x566   : > { %2699 = vst [vmem:[%s5128_s28 + $0xa8] sm:$0xff] %v2603_v47  ;;  %v5339_v47 = vld [vmem:[%s3987_s11 + $0x18] sm:$0xff]  ;;  %v5420_v42 = vmul.f32 %v2547_v31, %v5300_v35  ;;  %v5508_v31 = vld [vmem:[%s3987_s11 + $0xf0] sm:$0xff] }
 0x567   : > { %2731 = vst [vmem:[%s5128_s28 + $0x1a8] sm:$0xff] %v2635_v18  ;;  %v5349_v18 = vmul.f32 %v2545_v10, %v5268_v8  ;;  %v2580_v8 = vld [vmem:[%s4004_s8 + $0x2f0] sm:$0xff]  ;;  %vm1210_vm6 = vcmp.eq.s32.totalorder %v5339_v47, 0  ;;  %v5444_v10 = vld [vmem:[%s3987_s11 + $0x98] sm:$0xff]  ;;  %vm1237_vm13 = vcmp.eq.s32.totalorder %v5508_v31, 0 }
 0x568   : > { %2763 = vst [vmem:[%s5128_s28 + $0x2a8] sm:$0xff] %v2667_v30  ;;  %v2516_v30 = vld [vmem:[%s4004_s8 + $0xf0] sm:$0xff]  ;;  %v5460_v43 = vmul.f32 %v2580_v8, %v5302_v32  ;;  %v5606_v8 = vsel %vm6596_vm2, 1.0, %v6533_v55 }
 0x569   : > { %2700 = vst [vmem:[%s5128_s28 + $0xb0] sm:$0xff] %v2604_v34  ;;  %v2548_v34 = vld [vmem:[%s4004_s8 + $0x1f0] sm:$0xff]  ;;  %v5441_v57 = vmul.f32 %v2516_v30, %v5302_v32 }
 0x56a   : > { %2732 = vst [vmem:[%s5128_s28 + $0x1b0] sm:$0xff] %v2636_v54  ;;  %v2452_v54 = vsub.f32 1.0, %v5314_v39 }
 0x56b   : > { %2764 = vst [vmem:[%s5128_s28 + $0x2b0] sm:$0xff] %v2668_v33  ;;  %v5373_v33 = vld [vmem:[%s3987_s11 + $0x48] sm:$0xff] }
 0x56c   : > { %3251 = vst [vmem:[%s4616_s5 + $0x2d8] sm:$0xff] %v2464_v56  ;;  %v5382_v56 = vmul.f32 %v2546_v14, %v5292_v1  ;;  %v5447_v1 = vld [vmem:[%s3987_s11 + $0xa0] sm:$0xff]  ;;  %v5476_v14 = vmul.f32 %v2517_v51, %v5314_v39 }
 0x56d   : > { %2701 = vst [vmem:[%s5128_s28 + $0xb8] sm:$0xff] %v2605_v26  ;;  %v2549_v26 = vld [vmem:[%s4004_s8 + $0x1f8] sm:$0xff]  ;;  %vm6604_vm2 = vcmp.eq.s32.totalorder %v5447_v1, 0 }
 0x56e   : > { %2733 = vst [vmem:[%s5128_s28 + $0x1b8] sm:$0xff] %v2637_v58  ;;  %v5404_v58 = vmul.f32 %v2515_v6, %v5300_v35  ;;  %v5479_v35 = vmul.f32 %v2549_v26, %v5314_v39  ;;  %v5502_v6 = vld [vmem:[%s3987_s11 + $0xe0] sm:$0xff]  ;;  %v5540_v39 = vsel %vm1207_vm3, 1.0, %v6533_v55  ;;  %vm6592_vm3 = vcmp.eq.s32.totalorder %v5370_v12, 0 }
 0x56f   : > { %2765 = vst [vmem:[%s5128_s28 + $0x2b8] sm:$0xff] %v2669_v4  ;;  %v5414_v4 = vld [vmem:[%s3987_s11 + $0x78] sm:$0xff]  ;;  %vm1235_vm9 = vcmp.eq.s32.totalorder %v5502_v6, 0 }
 0x570   : > { %2702 = vst [vmem:[%s5128_s28 + $0xc0] sm:$0xff] %v2606_v21  ;;  %v5429_v21 = vld [vmem:[%s3987_s11 + $0x88] sm:$0xff]  ;;  %vm6599_vm1 = vcmp.eq.s32.totalorder %v5414_v4, 0 }
 0x571   : > { %2734 = vst [vmem:[%s5128_s28 + $0x1c0] sm:$0xff] %v2638_v19  ;;  %v5432_v19 = vld [vmem:[%s3987_s11 + $0x90] sm:$0xff] }
 0x572   : > { %6575 = vst [vmem:[#allocation22_spill] sm:$0xff] %v5373_v33 }
 0x573   : > { %2766 = vst [vmem:[%s5128_s28 + $0x2c0] sm:$0xff] %v2670_v23  ;;  %v5450_v23 = vld [vmem:[%s3987_s11 + $0xa8] sm:$0xff] }
 0x574   : > { %6576 = vst [vmem:[#allocation24_spill] sm:$0xff] %v5393_v44 }
 0x575   : > { %3252 = vst [vmem:[%s4616_s5 + $0x2e0] sm:$0xff] %v2465_v9  ;;  %v5457_v9 = vmul.f32 %v2548_v34, %v5302_v32  ;;  %v5515_v32 = vld [vmem:[%s3987_s11 + $0xf8] sm:$0xff] }
 0x576   : > { %6577 = vst [vmem:[#allocation23_spill] sm:$0xff] %v5408_v50  ;;  %vm1238_vm8 = vcmp.eq.s32.totalorder %v5515_v32, 0 }
 0x577   : > { %2703 = vst [vmem:[%s5128_s28 + $0xc8] sm:$0xff] %v2607_v49  ;;  %v5482_v49 = vld [vmem:[%s3987_s11 + $0xc8] sm:$0xff] }
 0x578   : > { %6578 = vst [vmem:[#allocation26_spill] sm:$0xff] %v5426_v37  ;;  %vm1232_vm7 = vcmp.eq.s32.totalorder %v5482_v49, 0 }
 0x579   : > { %6579 = vst [vmem:[#allocation28_spill] sm:$0xff] %v5429_v21 }
 0x57a   : > { %2735 = vst [vmem:[%s5128_s28 + $0x1c8] sm:$0xff] %v5305_v63  ;;  %v5485_v63 = vld [vmem:[%s3987_s11 + $0xd0] sm:$0xff] }
 0x57b   : > { %6580 = vst [vmem:[#allocation27_spill] sm:$0xff] %v5444_v10  ;;  %vm1233_vm11 = vcmp.eq.s32.totalorder %v5485_v63, 0 }
 0x57c   : > { %6581 = vst [vmem:[#allocation25_spill] sm:$0xff] %v5447_v1 }
 0x57d   : > { %6582 = vst [vmem:[#allocation30_spill] sm:$0xff] %v5450_v23 }
 0x57e   : > { %2767 = vst [vmem:[%s5128_s28 + $0x2c8] sm:$0xff] %v5307_v0  ;;  %v5488_v0 = vld [vmem:[%s3987_s11 + $0xd8] sm:$0xff]  ;;  %s3302_s11 = smul.u32 768, %s3901_s18  ;;  %s2809_s18 = sshll.u32 %s5128_s28, 4  ;;  %s6349_s18 = int_to_ptr.vmem [resolvable:$true] %s2809_s18 }
 0x57f   : > { %6583 = vst [vmem:[#allocation36_spill] sm:$0xff] %v5466_v25  ;;  %vm1234_vm10 = vcmp.eq.s32.totalorder %v5488_v0, 0 }
 0x580   : > { %6584 = vst [vmem:[#allocation35_spill] sm:$0xff] %v5469_v52  ;;  %s2791_s19 = scalar_lea.hbm %s6405_s6, %s3302_s11  ;;  %s2808_s23 = scalar_lea.hbm %s6406_s7, %s3302_s11 }
 0x581   : > { %2704 = vst [vmem:[%s5128_s28 + $0xd0] sm:$0xff] %v5310_v13  ;;  %v5496_v13 = vpack.c.bf16 %v2452_v54, %v2451_v11  ;;  %v5584_v11 = vsel %vm6592_vm3, 1.0, %v6533_v55  ;;  %vm6600_vm3 = vcmp.eq.s32.totalorder %v5426_v37, 0  ;;  %v5650_v37 = vsel %vm6604_vm2, 1.0, %v6533_v55  ;;  %s2794_s1 = sshll.u32 %s2791_s19, 4  ;;  %s2811_s9 = sshll.u32 %s2808_s23, 4  ;;  %s2795_s1 = int_to_ptr.hbm [resolvable:$true] %s2794_s1  ;;  %s6351_s9 = int_to_ptr.hbm [resolvable:$true] %s2811_s9 }
 0x582   : > { %6585 = vst [vmem:[#allocation32_spill] sm:$0xff] %v5482_v49  ;;  %v5628_v51 = vsel %vm6600_vm3, 1.0, %v6533_v55  ;;  %v5699_v49 = vsel %vm1236_vm12, 1.0, %v6533_v55  ;;  %vm1308_vm12 = vcmp.eq.s32.totalorder %v5345_v36, 1  ;;  %s3681_s29 = sshra.s32 %s2795_s1, 4  ;;  %s3682_s29 = int_to_ptr.hbm [resolvable:$true] %s3681_s29 }
 0x583   : > { %6586 = vst [vmem:[#allocation29_spill] sm:$0xff] %v5485_v63  ;;  %s3683_s21 = scalar_lea.hbm %s3682_s29, 768  ;;  %p3688_p1 = scmp.lt.s32.totalorder %s3682_s29, %s6405_s6 }
 0x584   : > { %6587 = vst [vmem:[#allocation31_spill] sm:$0xff] %v5488_v0  ;;  %v5711_v0 = vsel %vm1238_vm8, 1.0, %v6533_v55  ;;  %vm1304_vm8 = vcmp.eq.s32.totalorder %v5320_v29, 1  ;;  %p3684_p8 = scmp.ne.s32.totalorder %s3682_s29, %s3683_s21  ;;  %p3689_p3 = scmp.lt.s32.totalorder %s3687_s20, %s3683_s21 }
 0x585   : > { %2736 = vst [vmem:[%s5128_s28 + $0x1d0] sm:$0xff] %v5327_v62  ;;  %v5545_v62 = vsel %vm1208_vm5, 1.0, %v6533_v55  ;;  %vm6593_vm5 = vcmp.eq.s32.totalorder %v5373_v33, 0 }
 0x586   : > { %6588 = vst [vmem:[#allocation34_spill] sm:$0xff] %v5502_v6  ;;  %v5589_v30 = vsel %vm6593_vm5, 1.0, %v6533_v55  ;;  %vm6601_vm5 = vcmp.eq.s32.totalorder %v5429_v21, 0  ;;  %v1271_v6 = vpack.c.bf16 %v5545_v62, %v5540_v39  ;;  %p3685_p4 = pnand %p3684_p8, %p3918_p11  ;;  %p3690_p5 = por %p3689_p3, %p3688_p1 }
 0x587   : > { %6589 = vst [vmem:[#allocation33_spill] sm:$0xff] %v5505_v28  ;;  %v5633_v26 = vsel %vm6601_vm5, 1.0, %v6533_v55 }
 0x588   : > { %6590 = vst [vmem:[#allocation38_spill] sm:$0xff] %v5508_v31  ;;  %p3686_p9 = pneg %p3685_p4 }
 0x589   : > { %2768 = vst [vmem:[%s5128_s28 + $0x2d0] sm:$0xff] %v5330_v45  ;;  %v5552_v45 = vsel %vm1209_vm14, 1.0, %v6533_v55  ;;  %vm6594_vm14 = vcmp.eq.s32.totalorder %v5387_v60, 0 }
 0x58a   : > { %6591 = vst [vmem:[#allocation40_spill] sm:$0xff] %v5515_v32  ;;  %v1275_v32 = vpack.c.bf16 %v5589_v30, %v5584_v11  ;;  %v6614_v11 = vld [vmem:[#allocation35_spill] sm:$0xff]  ;;  %v6615_v30 = vld [vmem:[#allocation32_spill] sm:$0xff]  ;;  %p3691_p7 = pnand %p3690_p5, %p3686_p9 }
 0x58b   : > { %3253 = vst [vmem:[%s4616_s5 + $0x2e8] sm:$0xff] %v5364_v22  ;;  %v5596_v22 = vsel %vm6594_vm14, 1.0, %v6533_v55  ;;  %vm6602_vm14 = vcmp.eq.s32.totalorder %v5432_v19, 0  ;;  %vm1327_vm3 = vcmp.eq.s32.totalorder %v6614_v11, 1  ;;  %vm1328_vm5 = vcmp.eq.s32.totalorder %v6615_v30, 1 }
 0x58c   : > { %2705 = vst [vmem:[%s5128_s28 + $0xd8] sm:$0xff] %v5333_v17  ;;  %v5557_v17 = vsel %vm1210_vm6, 1.0, %v6533_v55  ;;  %vm6595_vm6 = vcmp.eq.s32.totalorder %v5390_v40, 0 }
 0x58d   : > { %2737 = vst [vmem:[%s5128_s28 + $0x1d8] sm:$0xff] %v5349_v18  ;;  %v5567_v18 = vsel %vm1212_vm15, 1.0, %v6533_v55  ;;  %v5601_v34 = vsel %vm6595_vm6, 1.0, %v6533_v55  ;;  %vm6597_vm15 = vcmp.eq.s32.totalorder %v5408_v50, 0  ;;  %vm6603_vm6 = vcmp.eq.s32.totalorder %v5444_v10, 0 }
 0x58e   : > { %2769 = vst [vmem:[%s5128_s28 + $0x2d8] sm:$0xff] %v5352_v59  ;;  %v5574_v59 = vsel %vm1213_vm0, 1.0, %v6533_v55  ;;  %v5611_v54 = vsel %vm6597_vm15, 1.0, %v6533_v55  ;;  %vm6598_vm0 = vcmp.eq.s32.totalorder %v5411_v61, 0  ;;  %v5645_v27 = vsel %vm6603_vm6, 1.0, %v6533_v55 }
 0x58f   : > { %2706 = vst [vmem:[%s5128_s28 + $0xe0] sm:$0xff] %v5379_v38  ;;  %v5618_v38 = vsel %vm6598_vm0, 1.0, %v6533_v55  ;;  %vm6605_vm15 = vcmp.eq.s32.totalorder %v5450_v23, 0  ;;  %vm6606_vm0 = vcmp.eq.s32.totalorder %v5466_v25, 0  ;;  %v5677_v23 = vsel %vm1232_vm7, 1.0, %v6533_v55 }
 0x590   : > { %2738 = vst [vmem:[%s5128_s28 + $0x1e0] sm:$0xff] %v5382_v56  ;;  %v5623_v56 = vsel %vm6599_vm1, 1.0, %v6533_v55  ;;  %v5655_v21 = vsel %vm6605_vm15, 1.0, %v6533_v55  ;;  %v5667_v10 = vsel %vm6606_vm0, 1.0, %v6533_v55  ;;  %vm6607_vm1 = vcmp.eq.s32.totalorder %v5469_v52, 0 }
 0x591   : > { %2770 = vst [vmem:[%s5128_s28 + $0x2e0] sm:$0xff] %v5401_v15  ;;  %v5640_v15 = vsel %vm6602_vm14, 1.0, %v6533_v55  ;;  %v5672_v1 = vsel %vm6607_vm1, 1.0, %v6533_v55  ;;  %v5689_v25 = vsel %vm1234_vm10, 1.0, %v6533_v55  ;;  %v5694_v52 = vsel %vm1235_vm9, 1.0, %v6533_v55 }
 0x592   : > { %3254 = vst [vmem:[%s4616_s5 + $0x2f0] sm:$0xff] %v5438_v46  ;;  %v5662_v46 = vsel %vm1229_vm4, 1.0, %v6533_v55  ;;  %v1272_v28 = vpack.c.bf16 %v5557_v17, %v5552_v45  ;;  %v1274_v31 = vpack.c.bf16 %v5579_v20, %v5574_v59  ;;  %v1277_v39 = vpack.c.bf16 %v5611_v54, %v5606_v8  ;;  %v6612_v20 = vld [vmem:[#allocation30_spill] sm:$0xff]  ;;  %v6620_v54 = vld [vmem:[#allocation40_spill] sm:$0xff] }
 0x593   : > { %2707 = vst [vmem:[%s5128_s28 + $0xe8] sm:$0xff] %v5404_v58  ;;  %v5684_v58 = vsel %vm1233_vm11, 1.0, %v6533_v55  ;;  %vm1303_vm7 = vcmp.eq.s32.totalorder %v5317_v2, 1  ;;  %vm1305_vm9 = vcmp.eq.s32.totalorder %v5323_v24, 1  ;;  %vm1306_vm10 = vcmp.eq.s32.totalorder %v5339_v47, 1  ;;  %v6619_v8 = vld [vmem:[#allocation38_spill] sm:$0xff] }
 0x594   : > { %2739 = vst [vmem:[%s5128_s28 + $0x1e8] sm:$0xff] %v5420_v42  ;;  %v5706_v42 = vsel %vm1237_vm13, 1.0, %v6533_v55  ;;  %v1276_v55 = vpack.c.bf16 %v5601_v34, %v5596_v22  ;;  %vm1307_vm11 = vcmp.eq.s32.totalorder %v5342_v41, 1  ;;  %vm1309_vm4 = vcmp.eq.s32.totalorder %v5358_v5, 1  ;;  %v6617_v22 = vld [vmem:[#allocation34_spill] sm:$0xff]  ;;  %v6618_v34 = vld [vmem:[#allocation33_spill] sm:$0xff] }
 0x595   : > { %2771 = vst [vmem:[%s5128_s28 + $0x2e8] sm:$0xff] %v5423_v53  ;;  %v1273_v53 = vpack.c.bf16 %v5567_v18, %v5562_v7  ;;  %vm1310_vm13 = vcmp.eq.s32.totalorder %v5361_v48, 1  ;;  %vm1329_vm14 = vcmp.eq.s32.totalorder %v5485_v63, 1  ;;  %vm1331_vm2 = vcmp.eq.s32.totalorder %v6617_v22, 1 }
 0x596   : > { %2708 = vst [vmem:[%s5128_s28 + $0xf0] sm:$0xff] %v5441_v57  ;;  %v1278_v57 = vpack.c.bf16 %v5623_v56, %v5618_v38  ;;  %vm1332_vm15 = vcmp.eq.s32.totalorder %v6618_v34, 1  ;;  %vm1333_vm0 = vcmp.eq.s32.totalorder %v6619_v8, 1  ;;  %vm1334_vm1 = vcmp.eq.s32.totalorder %v6620_v54, 1 }
 0x597   : > { %2740 = vst [vmem:[%s5128_s28 + $0x1f0] sm:$0xff] %v5457_v9  ;;  %v6628_v56 = vpack.c.bf16 %v5633_v26, %v5628_v51  ;;  %v6633_v26 = vpack.c.bf16 %v5645_v27, %v5640_v15  ;;  %v6638_v27 = vpack.c.bf16 %v5655_v21, %v5650_v37  ;;  %v6641_v21 = vpack.c.bf16 %v5667_v10, %v5662_v46 }
 0x598   : > { %2772 = vst [vmem:[%s5128_s28 + $0x2f0] sm:$0xff] %v5460_v43  ;;  %v6642_v46 = vpack.c.bf16 %v5677_v23, %v5672_v1  ;;  %v6643_v34 = vpack.c.bf16 %v5689_v25, %v5684_v58 }
 0x599   : > { %3255 = vst [vmem:[%s4616_s5 + $0x2f8] sm:$0xff] %v5496_v13  ;;  %v6610_v13 = vld [vmem:[#allocation27_spill] sm:$0xff] }
 0x59a   : > { %2709 = vst [vmem:[%s5128_s28 + $0xf8] sm:$0xff] %v5476_v14  ;;  %v6608_v14 = vld [vmem:[#allocation26_spill] sm:$0xff] }
 0x59b   : > { %2741 = vst [vmem:[%s5128_s28 + $0x1f8] sm:$0xff] %v5479_v35  ;;  %v6609_v35 = vld [vmem:[#allocation28_spill] sm:$0xff] }
 0x59c   : > { %2773 = vst [vmem:[%s5128_s28 + $0x2f8] sm:$0xff] %v5499_v16  ;;  %v6611_v16 = vld [vmem:[#allocation25_spill] sm:$0xff] }
 0x59d   : > { %1287 = vst [vmem:[%s4616_s5] sm:$0xff] %v1271_v6  ;;  %v6613_v6 = vld [vmem:[#allocation36_spill] sm:$0xff] }
 0x59e   : > { %1288 = vst [vmem:[%s4616_s5 + $0x8] sm:$0xff] %v1272_v28  ;;  %v6616_v28 = vld [vmem:[#allocation31_spill] sm:$0xff] }
 0x59f   : > { %1289 = vst [vmem:[%s4616_s5 + $0x10] sm:$0xff] %v1273_v53  ;;  %vm1330_vm6 = vcmp.eq.s32.totalorder %v6616_v28, 1  ;;  %v6621_v53 = vmov 0.0  }
 0x5a0   : > { %1290 = vst [vmem:[%s4616_s5 + $0x18] sm:$0xff] %v1274_v31  ;;  %v1335_v43 = vsel %vm1303_vm7, 1.0, %v6621_v53  ;;  %v1336_v31 = vsel %vm1304_vm8, 1.0, %v6621_v53  ;;  %v1337_v59 = vsel %vm1305_vm9, 1.0, %v6621_v53  ;;  %v1339_v18 = vsel %vm1307_vm11, 1.0, %v6621_v53 }
 0x5a1   : > { %1291 = vst [vmem:[%s4616_s5 + $0x20] sm:$0xff] %v1275_v32  ;;  %v1338_v32 = vsel %vm1306_vm10, 1.0, %v6621_v53  ;;  %v1340_v7 = vsel %vm1308_vm12, 1.0, %v6621_v53  ;;  %v5824_v9 = vsel %vm1310_vm13, 1.0, %v6621_v53  ;;  %vm6622_vm7 = vcmp.eq.s32.totalorder %v5370_v12, 1 }
 0x5a2   : > { %1292 = vst [vmem:[%s4616_s5 + $0x28] sm:$0xff] %v1276_v55  ;;  %v5819_v55 = vsel %vm1309_vm4, 1.0, %v6621_v53  ;;  %v5829_v17 = vsel %vm6622_vm7, 1.0, %v6621_v53  ;;  %vm6623_vm8 = vcmp.eq.s32.totalorder %v5373_v33, 1  ;;  %vm6624_vm9 = vcmp.eq.s32.totalorder %v5387_v60, 1 }
 0x5a3   : > { %1293 = vst [vmem:[%s4616_s5 + $0x30] sm:$0xff] %v1277_v39  ;;  %v5834_v45 = vsel %vm6623_vm8, 1.0, %v6621_v53  ;;  %v5843_v39 = vsel %vm6624_vm9, 1.0, %v6621_v53  ;;  %vm6625_vm10 = vcmp.eq.s32.totalorder %v5390_v40, 1  ;;  %vm6626_vm11 = vcmp.eq.s32.totalorder %v5393_v44, 1 }
 0x5a4   : > { %1294 = vst [vmem:[%s4616_s5 + $0x38] sm:$0xff] %v1278_v57  ;;  %v5848_v62 = vsel %vm6625_vm10, 1.0, %v6621_v53  ;;  %v5853_v33 = vsel %vm6626_vm11, 1.0, %v6621_v53  ;;  %vm6627_vm12 = vcmp.eq.s32.totalorder %v5408_v50, 1  ;;  %vm6629_vm4 = vcmp.eq.s32.totalorder %v5411_v61, 1 }
 0x5a5   : > { %v5858_v38 = vsel %vm6627_vm12, 1.0, %v6621_v53  ;;  %1295 = vst [vmem:[%s4616_s5 + $0x40] sm:$0xff] %v6628_v56  ;;  %v5867_v57 = vsel %vm6629_vm4, 1.0, %v6621_v53  ;;  %vm6630_vm13 = vcmp.eq.s32.totalorder %v5414_v4, 1  ;;  %vm6631_vm7 = vcmp.eq.s32.totalorder %v6608_v14, 1 }
 0x5a6   : > { %v5872_v44 = vsel %vm6630_vm13, 1.0, %v6621_v53  ;;  %v5877_v50 = vsel %vm6631_vm7, 1.0, %v6621_v53  ;;  %vm6632_vm8 = vcmp.eq.s32.totalorder %v6609_v35, 1  ;;  %1296 = vst [vmem:[%s4616_s5 + $0x48] sm:$0xff] %v6633_v26  ;;  %vm6634_vm9 = vcmp.eq.s32.totalorder %v5432_v19, 1 }
 0x5a7   : > { %v5882_v51 = vsel %vm6632_vm8, 1.0, %v6621_v53  ;;  %v5891_v56 = vsel %vm6634_vm9, 1.0, %v6621_v53  ;;  %vm6635_vm10 = vcmp.eq.s32.totalorder %v6610_v13, 1  ;;  %vm6636_vm11 = vcmp.eq.s32.totalorder %v6611_v16, 1  ;;  %1297 = vst [vmem:[%s4616_s5 + $0x50] sm:$0xff] %v6638_v27 }
 0x5a8   : > { %v5896_v14 = vsel %vm6635_vm10, 1.0, %v6621_v53  ;;  %v5901_v35 = vsel %vm6636_vm11, 1.0, %v6621_v53  ;;  %vm6637_vm12 = vcmp.eq.s32.totalorder %v6612_v20, 1  ;;  %vm6639_vm4 = vcmp.eq.s32.totalorder %v5463_v3, 1  ;;  %1298 = vst [vmem:[%s4616_s5 + $0x58] sm:$0xff] %v6641_v21 }
 0x5a9   : > { %v5906_v15 = vsel %vm6637_vm12, 1.0, %v6621_v53  ;;  %v5915_v26 = vsel %vm6639_vm4, 1.0, %v6621_v53  ;;  %vm6640_vm13 = vcmp.eq.s32.totalorder %v6613_v6, 1  ;;  %v5925_v20 = vsel %vm1327_vm3, 1.0, %v6621_v53  ;;  %1299 = vst [vmem:[%s4616_s5 + $0x60] sm:$0xff] %v6642_v46 }
 0x5aa   : > { %v5920_v16 = vsel %vm6640_vm13, 1.0, %v6621_v53  ;;  %v5930_v37 = vsel %vm1328_vm5, 1.0, %v6621_v53  ;;  %v5939_v27 = vsel %vm1329_vm14, 1.0, %v6621_v53  ;;  %v5944_v11 = vsel %vm1330_vm6, 1.0, %v6621_v53  ;;  %1300 = vst [vmem:[%s4616_s5 + $0x68] sm:$0xff] %v6643_v34  ;;  %v6659_v34 = vld [vmem:[#allocation33_spill] sm:$0xff] }
 0x5ab   : > { %v5949_v30 = vsel %vm1331_vm2, 1.0, %v6621_v53  ;;  %v5954_v10 = vsel %vm1332_vm15, 1.0, %v6621_v53  ;;  %v5963_v21 = vsel %vm1333_vm0, 1.0, %v6621_v53  ;;  %v5968_v22 = vsel %vm1334_vm1, 1.0, %v6621_v53 }
 0x5ac   : > { %v1367_v28 = vpack.c.bf16 %v1336_v31, %v1335_v43  ;;  %v1368_v63 = vpack.c.bf16 %v1338_v32, %v1337_v59  ;;  %v1369_v6 = vpack.c.bf16 %v1340_v7, %v1339_v18  ;;  %v1370_v1 = vpack.c.bf16 %v5824_v9, %v5819_v55  ;;  %v6649_v7 = vld [vmem:[#allocation26_spill] sm:$0xff]  ;;  %v6650_v18 = vld [vmem:[#allocation28_spill] sm:$0xff]  ;;  %v6651_v59 = vld [vmem:[#allocation25_spill] sm:$0xff] }
 0x5ad   : > { %v1371_v23 = vpack.c.bf16 %v5834_v45, %v5829_v17  ;;  %v1372_v46 = vpack.c.bf16 %v5848_v62, %v5843_v39  ;;  %v6644_v53 = vpack.c.bf16 %v5699_v49, %v5694_v52  ;;  %v1373_v25 = vpack.c.bf16 %v5858_v38, %v5853_v33  ;;  %v6648_v17 = vld [vmem:[#allocation23_spill] sm:$0xff]  ;;  %v6652_v43 = vld [vmem:[#allocation30_spill] sm:$0xff] }
 0x5ae   : > { %v1374_v58 = vpack.c.bf16 %v5872_v44, %v5867_v57  ;;  %v1375_v9 = vpack.c.bf16 %v5882_v51, %v5877_v50  ;;  %v1376_v45 = vpack.c.bf16 %v5896_v14, %v5891_v56  ;;  %v6645_v62 = vpack.c.bf16 %v5711_v0, %v5706_v42  ;;  %3176 = vst [vmem:[%s4616_s5 + $0x80] sm:$0xff] %v1367_v28  ;;  %v6646_v42 = vld [vmem:[#allocation22_spill] sm:$0xff]  ;;  %v6653_v14 = vld [vmem:[#allocation36_spill] sm:$0xff] }
 0x5af   : > { %1301 = vst [vmem:[%s4616_s5 + $0x70] sm:$0xff] %v6644_v53  ;;  %v1377_v52 = vpack.c.bf16 %v5906_v15, %v5901_v35  ;;  %v1378_v33 = vpack.c.bf16 %v5920_v16, %v5915_v26  ;;  %v1379_v44 = vpack.c.bf16 %v5930_v37, %v5925_v20  ;;  %v1380_v50 = vpack.c.bf16 %v5944_v11, %v5939_v27  ;;  %v6654_v35 = vld [vmem:[#allocation35_spill] sm:$0xff]  ;;  %v6655_v16 = vld [vmem:[#allocation32_spill] sm:$0xff]  ;;  %v6656_v20 = vld [vmem:[#allocation29_spill] sm:$0xff] }
 0x5b0   : > { %1302 = vst [vmem:[%s4616_s5 + $0x78] sm:$0xff] %v6645_v62  ;;  %v1381_v49 = vpack.c.bf16 %v5954_v10, %v5949_v30  ;;  %v1382_v0 = vpack.c.bf16 %v5968_v22, %v5963_v21  ;;  %vm1400_vm3 = vcmp.eq.s32.totalorder %v5317_v2, 2  ;;  %vm1401_vm5 = vcmp.eq.s32.totalorder %v5320_v29, 2  ;;  %v6658_v28 = vld [vmem:[#allocation34_spill] sm:$0xff] }
 0x5b1   : > { %3177 = vst [vmem:[%s4616_s5 + $0x88] sm:$0xff] %v1368_v63  ;;  %vm1402_vm14 = vcmp.eq.s32.totalorder %v5323_v24, 2  ;;  %vm1403_vm6 = vcmp.eq.s32.totalorder %v5339_v47, 2  ;;  %vm1404_vm2 = vcmp.eq.s32.totalorder %v5342_v41, 2  ;;  %vm1405_vm15 = vcmp.eq.s32.totalorder %v5345_v36, 2  ;;  %v6647_v63 = vld [vmem:[#allocation24_spill] sm:$0xff] }
 0x5b2   : > { %3178 = vst [vmem:[%s4616_s5 + $0x90] sm:$0xff] %v1369_v6  ;;  %vm1406_vm0 = vcmp.eq.s32.totalorder %v5358_v5, 2  ;;  %vm1407_vm1 = vcmp.eq.s32.totalorder %v5361_v48, 2  ;;  %vm1424_vm7 = vcmp.eq.s32.totalorder %v6654_v35, 2  ;;  %vm1425_vm8 = vcmp.eq.s32.totalorder %v6655_v16, 2  ;;  %v6657_v6 = vld [vmem:[#allocation31_spill] sm:$0xff] }
 0x5b3   : > { %3179 = vst [vmem:[%s4616_s5 + $0x98] sm:$0xff] %v1370_v1  ;;  %vm1426_vm9 = vcmp.eq.s32.totalorder %v6656_v20, 2  ;;  %vm1427_vm10 = vcmp.eq.s32.totalorder %v6657_v6, 2  ;;  %vm1428_vm11 = vcmp.eq.s32.totalorder %v6658_v28, 2  ;;  %vm1429_vm12 = vcmp.eq.s32.totalorder %v6659_v34, 2 }
 0x5b4   : > { %3180 = vst [vmem:[%s4616_s5 + $0xa0] sm:$0xff] %v1371_v23  ;;  %vm1430_vm4 = vcmp.eq.s32.totalorder %v6619_v8, 2  ;;  %vm1431_vm13 = vcmp.eq.s32.totalorder %v6620_v54, 2  ;;  %v6660_v53 = vmov 0.0  }
 0x5b5   : > { %3181 = vst [vmem:[%s4616_s5 + $0xa8] sm:$0xff] %v1372_v46  ;;  %v1432_v31 = vsel %vm1400_vm3, 1.0, %v6660_v53  ;;  %v1433_v32 = vsel %vm1401_vm5, 1.0, %v6660_v53  ;;  %v1434_v55 = vsel %vm1402_vm14, 1.0, %v6660_v53  ;;  %v1435_v39 = vsel %vm1403_vm6, 1.0, %v6660_v53 }
 0x5b6   : > { %3182 = vst [vmem:[%s4616_s5 + $0xb0] sm:$0xff] %v1373_v25  ;;  %v1436_v38 = vsel %vm1404_vm2, 1.0, %v6660_v53  ;;  %v1437_v57 = vsel %vm1405_vm15, 1.0, %v6660_v53  ;;  %v1438_v51 = vsel %vm1406_vm0, 1.0, %v6660_v53  ;;  %v1439_v56 = vsel %vm1407_vm1, 1.0, %v6660_v53 }
 0x5b7   : > { %3183 = vst [vmem:[%s4616_s5 + $0xb8] sm:$0xff] %v1374_v58  ;;  %vm6661_vm3 = vcmp.eq.s32.totalorder %v5370_v12, 2  ;;  %vm6662_vm5 = vcmp.eq.s32.totalorder %v6646_v42, 2  ;;  %vm6663_vm14 = vcmp.eq.s32.totalorder %v5387_v60, 2  ;;  %vm6664_vm6 = vcmp.eq.s32.totalorder %v5390_v40, 2 }
 0x5b8   : > { %3184 = vst [vmem:[%s4616_s5 + $0xc0] sm:$0xff] %v1375_v9  ;;  %v1440_v15 = vsel %vm6661_vm3, 1.0, %v6660_v53  ;;  %v1441_v26 = vsel %vm6662_vm5, 1.0, %v6660_v53  ;;  %v1442_v37 = vsel %vm6663_vm14, 1.0, %v6660_v53  ;;  %v1443_v1 = vsel %vm6664_vm6, 1.0, %v6660_v53 }
 0x5b9   : > { %3185 = vst [vmem:[%s4616_s5 + $0xc8] sm:$0xff] %v1376_v45  ;;  %vm6665_vm2 = vcmp.eq.s32.totalorder %v6647_v63, 2  ;;  %vm6666_vm15 = vcmp.eq.s32.totalorder %v6648_v17, 2  ;;  %vm6667_vm0 = vcmp.eq.s32.totalorder %v5411_v61, 2  ;;  %vm6668_vm1 = vcmp.eq.s32.totalorder %v5414_v4, 2 }
 0x5ba   : > { %3186 = vst [vmem:[%s4616_s5 + $0xd0] sm:$0xff] %v1377_v52  ;;  %v1444_v23 = vsel %vm6665_vm2, 1.0, %v6660_v53  ;;  %v1445_v46 = vsel %vm6666_vm15, 1.0, %v6660_v53  ;;  %v1446_v25 = vsel %vm6667_vm0, 1.0, %v6660_v53  ;;  %v1447_v58 = vsel %vm6668_vm1, 1.0, %v6660_v53 }
 0x5bb   : > { %3187 = vst [vmem:[%s4616_s5 + $0xd8] sm:$0xff] %v1378_v33  ;;  %vm6669_vm3 = vcmp.eq.s32.totalorder %v6649_v7, 2  ;;  %v1464_v45 = vpack.c.bf16 %v1433_v32, %v1432_v31  ;;  %vm6670_vm5 = vcmp.eq.s32.totalorder %v6650_v18, 2  ;;  %vm6671_vm14 = vcmp.eq.s32.totalorder %v5432_v19, 2 }
 0x5bc   : > { %3188 = vst [vmem:[%s4616_s5 + $0xe0] sm:$0xff] %v1379_v44  ;;  %v1448_v9 = vsel %vm6669_vm3, 1.0, %v6660_v53  ;;  %v1449_v62 = vsel %vm6670_vm5, 1.0, %v6660_v53  ;;  %v1450_v52 = vsel %vm6671_vm14, 1.0, %v6660_v53  ;;  %vm6672_vm6 = vcmp.eq.s32.totalorder %v6610_v13, 2 }
 0x5bd   : > { %3189 = vst [vmem:[%s4616_s5 + $0xe8] sm:$0xff] %v1380_v50  ;;  %v1451_v33 = vsel %vm6672_vm6, 1.0, %v6660_v53  ;;  %v1465_v44 = vpack.c.bf16 %v1435_v39, %v1434_v55  ;;  %vm6673_vm2 = vcmp.eq.s32.totalorder %v6651_v59, 2  ;;  %vm6674_vm15 = vcmp.eq.s32.totalorder %v6652_v43, 2 }
 0x5be   : > { %3190 = vst [vmem:[%s4616_s5 + $0xf0] sm:$0xff] %v1381_v49  ;;  %v1452_v11 = vsel %vm6673_vm2, 1.0, %v6660_v53  ;;  %v1453_v27 = vsel %vm6674_vm15, 1.0, %v6660_v53  ;;  %vm6675_vm0 = vcmp.eq.s32.totalorder %v5463_v3, 2  ;;  %v1466_v31 = vpack.c.bf16 %v1437_v57, %v1436_v38 }
 0x5bf   : > { %v1454_v50 = vsel %vm6675_vm0, 1.0, %v6660_v53  ;;  %3191 = vst [vmem:[%s4616_s5 + $0xf8] sm:$0xff] %v1382_v0  ;;  %vm6676_vm1 = vcmp.eq.s32.totalorder %v6653_v14, 2  ;;  %v1456_v10 = vsel %vm1424_vm7, 1.0, %v6660_v53  ;;  %v1457_v49 = vsel %vm1425_vm8, 1.0, %v6660_v53 }
 0x5c0   : > { %v1455_v30 = vsel %vm6676_vm1, 1.0, %v6660_v53  ;;  %v1467_v32 = vpack.c.bf16 %v1439_v56, %v1438_v51  ;;  %v6146_v55 = vsel %vm1426_vm9, 1.0, %v6660_v53  ;;  %v1459_v22 = vsel %vm1427_vm10, 1.0, %v6660_v53  ;;  %3192 = vst [vmem:[%s4616_s5 + $0x100] sm:$0xff] %v1464_v45 }
 0x5c1   : > { %v6154_v21 = vsel %vm1428_vm11, 1.0, %v6660_v53  ;;  %v1468_v0 = vpack.c.bf16 %v1441_v26, %v1440_v15  ;;  %v6160_v39 = vsel %vm1429_vm12, 1.0, %v6660_v53  ;;  %v6165_v38 = vsel %vm1430_vm4, 1.0, %v6660_v53  ;;  %3193 = vst [vmem:[%s4616_s5 + $0x108] sm:$0xff] %v1465_v44  ;;  %v6688_v44 = vld [vmem:[#allocation38_spill] sm:$0xff] }
 0x5c2   : > { %v6170_v57 = vsel %vm1431_vm13, 1.0, %v6660_v53  ;;  %v1469_v51 = vpack.c.bf16 %v1443_v1, %v1442_v37  ;;  %v1470_v56 = vpack.c.bf16 %v1445_v46, %v1444_v23  ;;  %v1471_v15 = vpack.c.bf16 %v1447_v58, %v1446_v25  ;;  %3194 = vst [vmem:[%s4616_s5 + $0x110] sm:$0xff] %v1466_v31  ;;  %v6685_v25 = vld [vmem:[#allocation31_spill] sm:$0xff] }
 0x5c3   : > { %v1472_v26 = vpack.c.bf16 %v1449_v62, %v1448_v9  ;;  %v1473_v45 = vpack.c.bf16 %v1451_v33, %v1450_v52  ;;  %v1474_v34 = vpack.c.bf16 %v1453_v27, %v1452_v11  ;;  %v1475_v28 = vpack.c.bf16 %v1455_v30, %v1454_v50  ;;  %3195 = vst [vmem:[%s4616_s5 + $0x118] sm:$0xff] %v1467_v32  ;;  %v6687_v52 = vld [vmem:[#allocation33_spill] sm:$0xff]  ;;  %v6689_v27 = vld [vmem:[#allocation40_spill] sm:$0xff] }
 0x5c4   : > { %v1476_v8 = vpack.c.bf16 %v1457_v49, %v1456_v10  ;;  %v1477_v6 = vpack.c.bf16 %v1459_v22, %v6146_v55  ;;  %v1478_v54 = vpack.c.bf16 %v6160_v39, %v6154_v21  ;;  %v1479_v37 = vpack.c.bf16 %v6170_v57, %v6165_v38  ;;  %3196 = vst [vmem:[%s4616_s5 + $0x120] sm:$0xff] %v1468_v0 }
 0x5c5   : > { %3197 = vst [vmem:[%s4616_s5 + $0x128] sm:$0xff] %v1469_v51  ;;  %vm1497_vm7 = vcmp.eq.s32.totalorder %v5317_v2, 3  ;;  %vm1498_vm8 = vcmp.eq.s32.totalorder %v5320_v29, 3  ;;  %vm1499_vm9 = vcmp.eq.s32.totalorder %v5323_v24, 3  ;;  %vm1500_vm10 = vcmp.eq.s32.totalorder %v5339_v47, 3 }
 0x5c6   : > { %3198 = vst [vmem:[%s4616_s5 + $0x130] sm:$0xff] %v1470_v56  ;;  %vm1501_vm11 = vcmp.eq.s32.totalorder %v5342_v41, 3  ;;  %vm1502_vm12 = vcmp.eq.s32.totalorder %v5345_v36, 3  ;;  %vm1503_vm4 = vcmp.eq.s32.totalorder %v5358_v5, 3  ;;  %vm1504_vm13 = vcmp.eq.s32.totalorder %v5361_v48, 3 }
 0x5c7   : > { %3199 = vst [vmem:[%s4616_s5 + $0x138] sm:$0xff] %v1471_v15  ;;  %vm1513_vm3 = vcmp.eq.s32.totalorder %v6649_v7, 3  ;;  %vm1514_vm5 = vcmp.eq.s32.totalorder %v6650_v18, 3  ;;  %vm1515_vm14 = vcmp.eq.s32.totalorder %v5432_v19, 3  ;;  %vm1516_vm6 = vcmp.eq.s32.totalorder %v6610_v13, 3 }
 0x5c8   : > { %3200 = vst [vmem:[%s4616_s5 + $0x140] sm:$0xff] %v1472_v26  ;;  %vm1517_vm2 = vcmp.eq.s32.totalorder %v6651_v59, 3  ;;  %vm1518_vm15 = vcmp.eq.s32.totalorder %v6652_v43, 3  ;;  %vm1519_vm0 = vcmp.eq.s32.totalorder %v5463_v3, 3  ;;  %vm1520_vm1 = vcmp.eq.s32.totalorder %v6653_v14, 3 }
 0x5c9   : > { %3201 = vst [vmem:[%s4616_s5 + $0x148] sm:$0xff] %v1473_v45  ;;  %v1529_v1 = vsel %vm1497_vm7, 1.0, %v6660_v53  ;;  %v1530_v23 = vsel %vm1498_vm8, 1.0, %v6660_v53  ;;  %v1532_v46 = vsel %vm1500_vm10, 1.0, %v6660_v53  ;;  %v1534_v2 = vsel %vm1502_vm12, 1.0, %v6660_v53 }
 0x5ca   : > { %3202 = vst [vmem:[%s4616_s5 + $0x150] sm:$0xff] %v1474_v34  ;;  %v1531_v34 = vsel %vm1499_vm9, 1.0, %v6660_v53  ;;  %v1535_v29 = vsel %vm1503_vm4, 1.0, %v6660_v53  ;;  %v1536_v24 = vsel %vm1504_vm13, 1.0, %v6660_v53  ;;  %vm1521_vm7 = vcmp.eq.s32.totalorder %v6654_v35, 3 }
 0x5cb   : > { %3203 = vst [vmem:[%s4616_s5 + $0x158] sm:$0xff] %v1475_v28  ;;  %v1533_v28 = vsel %vm1501_vm11, 1.0, %v6660_v53  ;;  %vm1522_vm8 = vcmp.eq.s32.totalorder %v6655_v16, 3  ;;  %vm6677_vm9 = vcmp.eq.s32.totalorder %v5370_v12, 3  ;;  %vm6678_vm10 = vcmp.eq.s32.totalorder %v6646_v42, 3 }
 0x5cc   : > { %3204 = vst [vmem:[%s4616_s5 + $0x160] sm:$0xff] %v1476_v8  ;;  %v1537_v47 = vsel %vm6677_vm9, 1.0, %v6660_v53  ;;  %v1538_v41 = vsel %vm6678_vm10, 1.0, %v6660_v53  ;;  %vm6679_vm11 = vcmp.eq.s32.totalorder %v5387_v60, 3  ;;  %vm6680_vm12 = vcmp.eq.s32.totalorder %v5390_v40, 3 }
 0x5cd   : > { %3205 = vst [vmem:[%s4616_s5 + $0x168] sm:$0xff] %v1477_v6  ;;  %v1539_v36 = vsel %vm6679_vm11, 1.0, %v6660_v53  ;;  %v1540_v5 = vsel %vm6680_vm12, 1.0, %v6660_v53  ;;  %vm6681_vm4 = vcmp.eq.s32.totalorder %v6647_v63, 3  ;;  %v1561_v12 = vpack.c.bf16 %v1530_v23, %v1529_v1 }
 0x5ce   : > { %3206 = vst [vmem:[%s4616_s5 + $0x170] sm:$0xff] %v1478_v54  ;;  %v1541_v48 = vsel %vm6681_vm4, 1.0, %v6660_v53  ;;  %vm6682_vm13 = vcmp.eq.s32.totalorder %v6648_v17, 3  ;;  %v1562_v54 = vpack.c.bf16 %v1532_v46, %v1531_v34  ;;  %v1563_v42 = vpack.c.bf16 %v1534_v2, %v1533_v28 }
 0x5cf   : > { %3207 = vst [vmem:[%s4616_s5 + $0x178] sm:$0xff] %v1479_v37  ;;  %v1542_v8 = vsel %vm6682_vm13, 1.0, %v6660_v53  ;;  %v1564_v60 = vpack.c.bf16 %v1536_v24, %v1535_v29  ;;  %vm1523_vm9 = vcmp.eq.s32.totalorder %v6656_v20, 3  ;;  %vm6683_vm10 = vcmp.eq.s32.totalorder %v5411_v61, 3  ;;  %v6686_v61 = vld [vmem:[#allocation34_spill] sm:$0xff] }
 0x5d0   : > { %v1543_v40 = vsel %vm6683_vm10, 1.0, %v6660_v53  ;;  %vm6684_vm11 = vcmp.eq.s32.totalorder %v5414_v4, 3  ;;  %v1565_v6 = vpack.c.bf16 %v1538_v41, %v1537_v47  ;;  %3208 = vst [vmem:[%s4616_s5 + $0x180] sm:$0xff] %v1561_v12  ;;  %vm1524_vm12 = vcmp.eq.s32.totalorder %v6685_v25, 3 }
 0x5d1   : > { %v1544_v63 = vsel %vm6684_vm11, 1.0, %v6660_v53  ;;  %v1545_v17 = vsel %vm1513_vm3, 1.0, %v6660_v53  ;;  %v1546_v58 = vsel %vm1514_vm5, 1.0, %v6660_v53  ;;  %v1566_v9 = vpack.c.bf16 %v1540_v5, %v1539_v36  ;;  %3209 = vst [vmem:[%s4616_s5 + $0x188] sm:$0xff] %v1562_v54 }
 0x5d2   : > { %vm1525_vm4 = vcmp.eq.s32.totalorder %v6686_v61, 3  ;;  %v1547_v4 = vsel %vm1515_vm14, 1.0, %v6660_v53  ;;  %v1548_v62 = vsel %vm1516_vm6, 1.0, %v6660_v53  ;;  %v1567_v7 = vpack.c.bf16 %v1542_v8, %v1541_v48  ;;  %3210 = vst [vmem:[%s4616_s5 + $0x190] sm:$0xff] %v1563_v42 }
 0x5d3   : > { %vm1526_vm3 = vcmp.eq.s32.totalorder %v6687_v52, 3  ;;  %v1549_v18 = vsel %vm1517_vm2, 1.0, %v6660_v53  ;;  %v1550_v33 = vsel %vm1518_vm15, 1.0, %v6660_v53  ;;  %v1568_v19 = vpack.c.bf16 %v1544_v63, %v1543_v40  ;;  %3211 = vst [vmem:[%s4616_s5 + $0x198] sm:$0xff] %v1564_v60 }
 0x5d4   : > { %vm1527_vm5 = vcmp.eq.s32.totalorder %v6688_v44, 3  ;;  %v1551_v13 = vsel %vm1519_vm0, 1.0, %v6660_v53  ;;  %v1552_v11 = vsel %vm1520_vm1, 1.0, %v6660_v53  ;;  %v1569_v59 = vpack.c.bf16 %v1546_v58, %v1545_v17  ;;  %3212 = vst [vmem:[%s4616_s5 + $0x1a0] sm:$0xff] %v1565_v6 }
 0x5d5   : > { %vm1528_vm14 = vcmp.eq.s32.totalorder %v6689_v27, 3  ;;  %v1553_v43 = vsel %vm1521_vm7, 1.0, %v6660_v53  ;;  %v1554_v50 = vsel %vm1522_vm8, 1.0, %v6660_v53  ;;  %v1570_v3 = vpack.c.bf16 %v1548_v62, %v1547_v4  ;;  %3213 = vst [vmem:[%s4616_s5 + $0x1a8] sm:$0xff] %v1566_v9 }
 0x5d6   : > { %v1555_v14 = vsel %vm1523_vm9, 1.0, %v6660_v53  ;;  %v1556_v35 = vsel %vm1524_vm12, 1.0, %v6660_v53  ;;  %v1571_v31 = vpack.c.bf16 %v1550_v33, %v1549_v18  ;;  %3214 = vst [vmem:[%s4616_s5 + $0x1b0] sm:$0xff] %v1567_v7  ;;  %v1557_v16 = vsel %vm1525_vm4, 1.0, %v6660_v53 }
 0x5d7   : > { %v1558_v30 = vsel %vm1526_vm3, 1.0, %v6660_v53  ;;  %v1572_v20 = vpack.c.bf16 %v1552_v11, %v1551_v13  ;;  %3215 = vst [vmem:[%s4616_s5 + $0x1b8] sm:$0xff] %v1568_v19  ;;  %v1559_v10 = vsel %vm1527_vm5, 1.0, %v6660_v53  ;;  %v1560_v49 = vsel %vm1528_vm14, 1.0, %v6660_v53 }
 0x5d8   : > { %v1573_v32 = vpack.c.bf16 %v1554_v50, %v1553_v43  ;;  %3216 = vst [vmem:[%s4616_s5 + $0x1c0] sm:$0xff] %v1569_v59  ;;  %v1574_v55 = vpack.c.bf16 %v1556_v35, %v1555_v14  ;;  %v1575_v22 = vpack.c.bf16 %v1558_v30, %v1557_v16  ;;  %v1576_v21 = vpack.c.bf16 %v1560_v49, %v1559_v10 }
 0x5d9   : > { %3217 = vst [vmem:[%s4616_s5 + $0x1c8] sm:$0xff] %v1570_v3 }
 0x5da   : > { %3218 = vst [vmem:[%s4616_s5 + $0x1d0] sm:$0xff] %v1571_v31 }
 0x5db   : > { %3219 = vst [vmem:[%s4616_s5 + $0x1d8] sm:$0xff] %v1572_v20 }
 0x5dc   : > { %3220 = vst [vmem:[%s4616_s5 + $0x1e0] sm:$0xff] %v1573_v32 }
 0x5dd   : > { %3221 = vst [vmem:[%s4616_s5 + $0x1e8] sm:$0xff] %v1574_v55 }
 0x5de   : > { %3222 = vst [vmem:[%s4616_s5 + $0x1f0] sm:$0xff] %v1575_v22 }
 0x5df   : > { %3223 = vst [vmem:[%s4616_s5 + $0x1f8] sm:$0xff] %v1576_v21 }
 0x5e0   : > { %3694 = shalt.err (!%p3691_p7)
}
 0x5e1   : > { %s3783_s5 = smov 256   ;;  %s3784_s11 = smov 16  }
 0x5e2   : > { %3314 = dma.vmem_to_hbm [thread:$0]  (%p3918_p11), %s6342_s10, 12288, %s2795_s1, %s2775_s15, %s3783_s5, %s3783_s5, %s3784_s11  }
 0x5e3   : > { %s2780_s26 = scalar_lea.sflag [#allocation12], %s3983_s30  ;;  %s3709_s8 = sshra.s32 %s6351_s9, 4  ;;  %s3710_s8 = int_to_ptr.hbm [resolvable:$true] %s3709_s8 }
 0x5e4   : > { %s3711_s19 = scalar_lea.hbm %s3710_s8, 768  ;;  %s3715_s23 = scalar_lea.hbm %s6406_s7, 1536 }
 0x5e5   : > { %p3712_p10 = scmp.ne.s32.totalorder %s3710_s8, %s3711_s19  ;;  %p3716_p2 = scmp.lt.s32.totalorder %s3710_s8, %s6406_s7 }
 0x5e6   : > { %p3717_p6 = scmp.lt.s32.totalorder %s3715_s23, %s3711_s19 }
 0x5e7   : > { %p3713_p13 = pnand %p3712_p10, %p3918_p11 }
 0x5e8   : > { %p3718_p8 = por %p3717_p6, %p3716_p2 }
 0x5e9   : > { %p3714_p0 = pneg %p3713_p13 }
 0x5eb   : > { %p3719_p4 = pnand %p3718_p8, %p3714_p0 }
 0x5ed   : > { %3722 = shalt.err (!%p3719_p4)
}
 0x5ee   : > { %s3785_s30 = smov 512   ;;  %s3786_s10 = smov 32  }
 0x5ef   : > { %3315 = dma.vmem_to_hbm [thread:$0]  (%p3918_p11), %s6349_s18, 12288, %s6351_s9, %s2780_s26, %s3785_s30, %s3785_s30, %s3786_s10  }
 0x5f0 PF: > { %s2826_s15 = sand.u32 1, %s3761_s24   ;;  %p6691_p9 = scmp.ge.s32.totalorder %s3773_s27, 2 }
 0x5f1   : > { %s2827_s13 = scalar_lea.sflag [#allocation4], %s2826_s15 }
 0x5f2   : > { %p3333_p1 = pnand %p6691_p9, %p3922_p12 }
 0x5f4   : > { %p3334_p3 = pneg %p3333_p1 }
 0x5f6   : > { %3752 = dma.done.wait (%p3334_p3), %s2827_s13, 12288  }
 0x5f7   : > { %3754 = vsyncadd (%p3334_p3), %s2827_s13, 4294955008  ;;  %s2837_s12 = scalar_lea.sflag [#allocation12], %s2826_s15 }
 0x5f8   : > { %3756 = dma.done.wait (%p3334_p3), %s2837_s12, 12288  }
 0x5f9   : > { %3758 = vsyncadd (%p3334_p3), %s2837_s12, 4294955008  ;;  %s6692_s27 = sld [smem:[#allocation19_spill]]  ;;  %s6695_s24 = smov %s3765_s25 }
 0x5fa   : > { %s6693_s20 = sld [smem:[#allocation18_spill]] }
 0x5fb   : > { %s6694_s26 = sld [smem:[#allocation20_spill]] }
 0x5ff   : > { %p28_p11 = scmp.ge.s32.totalorder %s6692_s27, 4  }
 0x600   : > { %s6696_s25 = smov %s6693_s20 }
 0x601   :  { %30 = sbr.rel (!%p28_p11) target bundleno = 13 (0xd), region = 142 }
 0x606   :  { %2843 = vsyncpa [#allocation3], 1 }
 0x607   :  { %2845 = vsyncpa [#allocation3 + $0x1], 1 }
 0x608   :  { %2846 = vsyncpa [#allocation6], 1 }
 0x609   :  { %2848 = vsyncpa [#allocation6 + $0x1], 1 }
 0x60a   :  { %2849 = vsyncpa [#allocation9], 1 }
 0x60b   :  { %2850 = vsyncpa [#allocation4], 1 }
 0x60c   :  { %2852 = vsyncpa [#allocation4 + $0x1], 1 }
 0x60d   :  { %2853 = vsyncpa [#allocation12], 1 }
 0x60e   :  { %2855 = vsyncpa [#allocation12 + $0x1], 1 }

</bundles_post_ra>
